<compile_context>
chip_gen: v7x
topology: tpu7x:2x2x1
jax: 0.10.0
libtpu: 0.0.40
codegen_flags: <defaults>
</compile_context>

<pallas_src>
import numpy as np
import jax
import jax.numpy as jnp
from jax.experimental import pallas as pl
from jax.experimental.pallas import tpu as pltpu

# ----------------------------- configuration --------------------------------
HIDDEN = 32          # hidden_channels (C)
EDGE_HIDDEN = 32     # edge_hidden_channels (E)
NUM_GRIDS = (4, 4, 4)
RBF_DIM = 16
ATTR_DIM = 16
LN_EPS = 1e-5        # PyTorch nn.LayerNorm default
LANE = 128           # TPU lane width; conv tap blocks are padded to this


# ------------------------------ fused Pallas kernel --------------------------
def fused_mix_kernel(
    # activations / edge features
    a_x_ref, m_x_ref, m_ref, rbf_h_ref, a2m_attr_ref, m2a_attr_ref,
    # dense one-hot gather / scatter operators (built from edge indices in the wrapper)
    s_edge2atom_ref,      # (Na, Ne)   scatter edges -> atoms (idx_t)
    gw_a2m_ref,           # (Ea2m, Na) weighted gather atoms -> a2m edges
    s_a2m_scatter_ref,    # (M, Ea2m)  scatter a2m edges -> mesh
    gw_m2a_ref,           # (Em2a, M)  weighted gather mesh -> m2a edges
    s_m2a_scatter_ref,    # (Na, Em2a) scatter m2a edges -> atoms
    g_idx_s_ref,          # (Ne, Na)   gather atoms -> edges (idx_s)
    g_idx_t_ref,          # (Ne, Na)   gather atoms -> edges (idx_t)
    # constant 3x3x3 zero-padded spatial shift operators (27, M, M)
    shift_ref,
    # packed parameters
    ln_g_ref, ln_b_ref,   # (5, 1, C)
    bias_ref,             # (6, 1, C)
    w_edge_ref,           # (C + RBF, E)   [W_mm ; W_rbf]
    w_atom_ref,           # (2C, C)        [W_aa ; W_ma]
    w_conv_ref,           # (C, 27*128)    tap-major, each tap padded to 128 lanes
    w_a2m_ref,            # (C + ATTR, C)  [W_x ; W_attr]
    w_m2a_ref,            # (C + ATTR, C)  [W_x ; W_attr]
    w_comb_ref,           # (2C, E)        [W_j ; W_i]
    # outputs
    a_out_ref, mx_out_ref, m_out_ref,
):
    C, R, A = HIDDEN, RBF_DIM, ATTR_DIM

    def ln(x, i):
        # nn.LayerNorm: biased variance, eps inside rsqrt
        g = ln_g_ref[i]                      # (1, C)
        b = ln_b_ref[i]                      # (1, C)
        mu = jnp.mean(x, axis=-1, keepdims=True)
        var = jnp.mean((x - mu) ** 2, axis=-1, keepdims=True)
        return (x - mu) * jax.lax.rsqrt(var + LN_EPS) * g + b

    def silu(y):
        return y * jax.nn.sigmoid(y)

    def mm(a, b):
        return jnp.dot(a, b, preferred_element_type=jnp.float32)

    # ---------------- short-range path (LN -> edge update -> scatter -> atom update) ---
    a_ln = ln(a_x_ref[...], 0)                                   # short_layernorm
    m_ln = ln(m_ref[...], 1)                                     # short_edge_layernorm
    m_new = silu(mm(m_ln, w_edge_ref[0:C, :])
                 + mm(rbf_h_ref[...], w_edge_ref[C:C + R, :])
                 + bias_ref[0])                                  # (Ne, E)
    edge_to_atom = mm(s_edge2atom_ref[...], m_new)               # scatter-add as MXU matmul
    a_new = silu(mm(a_ln, w_atom_ref[0:C, :])
                 + mm(edge_to_atom, w_atom_ref[C:2 * C, :])
                 + bias_ref[1])                                  # (Na, C)

    # ---------------- long-range path: LN + 3x3x3 conv over the grid volume -------------
    mx_ln = ln(m_x_ref[...], 2)                                  # long_layernorm (M, C)
    # single channel-mixing matmul for all 27 taps
    p = mm(mx_ln, w_conv_ref[...])                               # (M, 27*128)
    # spatial taps realised as constant one-hot shift matmuls (no padding scratch,
    # no reshapes); every slice of `p` is a 128-lane-aligned vreg-column block.
    acc = mm(shift_ref[0], p[:, 0:LANE])
    for k in range(1, 27):
        acc = acc + mm(shift_ref[k], p[:, k * LANE:(k + 1) * LANE])
    conv = acc[:, 0:C] + bias_ref[2]                             # (M, C)

    # ---------------- a2m message passing ------------------------------------------------
    a2m_xj = mm(gw_a2m_ref[...], a_new)                          # weighted gather
    a2m_msg = silu(mm(a2m_xj, w_a2m_ref[0:C, :])
                   + mm(a2m_attr_ref[...], w_a2m_ref[C:C + A, :])
                   + bias_ref[3])
    a2m_message = mm(s_a2m_scatter_ref[...], a2m_msg)            # (M, C)

    # ---------------- m2a message passing ------------------------------------------------
    m2a_xj = mm(gw_m2a_ref[...], conv)                           # weighted gather
    m2a_msg = silu(mm(m2a_xj, w_m2a_ref[0:C, :])
                   + mm(m2a_attr_ref[...], w_m2a_ref[C:C + A, :])
                   + bias_ref[4])
    m2a_message = mm(s_m2a_scatter_ref[...], m2a_msg)            # (Na, C)

    # ---------------- m2a edge combine: SiLU(Linear(cat[msg_j, msg_i])) -------------------
    msg_j = mm(g_idx_s_ref[...], m2a_message)
    msg_i = mm(g_idx_t_ref[...], m2a_message)
    edge_msg = silu(mm(msg_j, w_comb_ref[0:C, :])
                    + mm(msg_i, w_comb_ref[C:2 * C, :])
                    + bias_ref[5])                               # (Ne, E)

    # ---------------- fused LN + residual epilogues (single store per output) -------------
    a_out_ref[...] = a_new
    mx_out_ref[...] = ln(a2m_message, 3) + conv + m_x_ref[...]
    m_out_ref[...] = m_new + ln(edge_msg, 4)


# ------------------------------ wrapper ---------------------------------------
def _conv_shift_operators(B, G0, G1, G2):
    """Compile-time constant one-hot shift operators S_k (27, M, M) for the
    zero-padded 3x3x3 conv: (S_k @ x)[n] = x at spatial offset k of cell n (or 0)."""
    N = B * G0 * G1 * G2
    S = np.zeros((27, N, N), dtype=np.float32)
    for kd in range(3):
        for kh in range(3):
            for kw in range(3):
                k = kd * 9 + kh * 3 + kw
                for b in range(B):
                    for d in range(G0):
                        sd = d + kd - 1
                        if sd < 0 or sd >= G0:
                            continue
                        for h in range(G1):
                            sh = h + kh - 1
                            if sh < 0 or sh >= G1:
                                continue
                            for w in range(G2):
                                sw = w + kw - 1
                                if sw < 0 or sw >= G2:
                                    continue
                                row = ((b * G0 + d) * G1 + h) * G2 + w
                                col = ((b * G0 + sd) * G1 + sh) * G2 + sw
                                S[k, row, col] = 1.0
    return jnp.asarray(S)


def short_long_mix_forward(p, a_x, m_x, m, rbf3, cbf3, id3_ragged_idx, id_swap,
                           id3_ba, id3_ca, rbf_h, idx_s, idx_t,
                           a2m_edge_index, m2a_edge_index,
                           a2m_edge_weights, m2a_edge_weights,
                           a2m_edge_attr, m2a_edge_attr):
    # TODO(synk): short_mp/long_mp/a2m_mp/m2a_mp are constructor-injected external modules
    # in the PyTorch code; they are realised as the deterministic stand-ins above.  The
    # triplet inputs below are consumed only by the injected short_mp.
    del rbf3, cbf3, id3_ragged_idx, id_swap, id3_ba, id3_ca

    G0, G1, G2 = NUM_GRIDS
    C = HIDDEN
    num_atoms = a_x.shape[0]
    num_mesh = m_x.shape[0]
    num_edges = m.shape[0]
    B = num_mesh // (G0 * G1 * G2)
    f32 = jnp.float32

    # gather / scatter index structure as dense one-hot operators -> in-kernel MXU matmuls
    a_src, a_dst = a2m_edge_index[0], a2m_edge_index[1]
    m_src, m_dst = m2a_edge_index[0], m2a_edge_index[1]
    s_edge2atom = jax.nn.one_hot(idx_t, num_atoms, dtype=f32).T
    gw_a2m = jax.nn.one_hot(a_src, num_atoms, dtype=f32) * a2m_edge_weights[:, None]
    s_a2m = jax.nn.one_hot(a_dst, num_mesh, dtype=f32).T
    gw_m2a = jax.nn.one_hot(m_src, num_mesh, dtype=f32) * m2a_edge_weights[:, None]
    s_m2a = jax.nn.one_hot(m_dst, num_atoms, dtype=f32).T
    g_s = jax.nn.one_hot(idx_s, num_atoms, dtype=f32)
    g_t = jax.nn.one_hot(idx_t, num_atoms, dtype=f32)

    shift = _conv_shift_operators(B, G0, G1, G2)                 # constant (27, M, M)

    # parameter packing: leading index dim keeps per-row loads tile-aligned in-kernel.
    ln_g = jnp.stack([p["short_g"], p["short_edge_g"], p["long_g"],
                      p["a2m_g"], p["m2a_edge_g"]])[:, None, :]
    ln_b = jnp.stack([p["short_b"], p["short_edge_b"], p["long_b"],
                      p["a2m_b"], p["m2a_edge_b"]])[:, None, :]
    bias = jnp.stack([p["b_m"], p["b_a"], p["b_conv"],
                      p["b_a2m"], p["b_m2a"], p["b_comb"]])[:, None, :]
    w_edge = jnp.concatenate([p["W_mm"], p["W_rbf"]], axis=0)    # (C+R, E)
    w_atom = jnp.concatenate([p["W_aa"], p["W_ma"]], axis=0)     # (2C, C)
    # (tap, Cin, Cout) -> (Cin, 27*128): each tap's Cout block padded to a full lane tile.
    w_conv = jnp.pad(jnp.transpose(p["W_conv"], (1, 0, 2)),
                     ((0, 0), (0, 0), (0, LANE - C))).reshape(C, 27 * LANE)
    w_a2m = jnp.concatenate([p["W_a2m_x"], p["W_a2m_attr"]], axis=0)
    w_m2a = jnp.concatenate([p["W_m2a_x"], p["W_m2a_attr"]], axis=0)
    w_comb = jnp.concatenate([p["W_comb_j"], p["W_comb_i"]], axis=0)

    args = (a_x, m_x, m, rbf_h, a2m_edge_attr, m2a_edge_attr,
            s_edge2atom, gw_a2m, s_a2m, gw_m2a, s_m2a, g_s, g_t,
            shift, ln_g, ln_b, bias,
            w_edge, w_atom, w_conv, w_a2m, w_m2a, w_comb)

    out_shape = (jax.ShapeDtypeStruct((num_atoms, C), f32),
                 jax.ShapeDtypeStruct((num_mesh, C), f32),
                 jax.ShapeDtypeStruct((num_edges, EDGE_HIDDEN), f32))

    # Single fused invocation: everything fits in VMEM at these sizes.
    # TODO(synk): at production sizes add a ("parallel",) grid over mesh/edge rows
    # (half-size tiles for v7x's 64 MiB VMEM), cast matmul operands to bf16, and store
    # the large outputs lane-dense (point dim in lanes) instead of (N, 32).
    return pl.pallas_call(
        fused_mix_kernel,
        out_shape=out_shape,
        in_specs=[pl.BlockSpec(memory_space=pltpu.MemorySpace.VMEM) for _ in args],
        out_specs=tuple(pl.BlockSpec(memory_space=pltpu.MemorySpace.VMEM)
                        for _ in range(3)),
    )(*args)


# ------------------------------ parameters -----------------------------------
def init_params(key):
    ks = jax.random.split(key, 16)
    s = 0.1
    p = {
        "short_g": jnp.ones((HIDDEN,)), "short_b": jnp.zeros((HIDDEN,)),
        "short_edge_g": jnp.ones((EDGE_HIDDEN,)), "short_edge_b": jnp.zeros((EDGE_HIDDEN,)),
        "long_g": jnp.ones((HIDDEN,)), "long_b": jnp.zeros((HIDDEN,)),
        "a2m_g": jnp.ones((HIDDEN,)), "a2m_b": jnp.zeros((HIDDEN,)),
        "m2a_edge_g": jnp.ones((EDGE_HIDDEN,)), "m2a_edge_b": jnp.zeros((EDGE_HIDDEN,)),
        "W_mm": s * jax.random.normal(ks[0], (EDGE_HIDDEN, EDGE_HIDDEN)),
        "W_rbf": s * jax.random.normal(ks[1], (RBF_DIM, EDGE_HIDDEN)),
        "b_m": jnp.zeros((EDGE_HIDDEN,)),
        "W_aa": s * jax.random.normal(ks[2], (HIDDEN, HIDDEN)),
        "W_ma": s * jax.random.normal(ks[3], (EDGE_HIDDEN, HIDDEN)),
        "b_a": jnp.zeros((HIDDEN,)),
        "W_conv": s * jax.random.normal(ks[4], (27, HIDDEN, HIDDEN)),
        "b_conv": jnp.zeros((HIDDEN,)),
        "W_a2m_x": s * jax.random.normal(ks[5], (HIDDEN, HIDDEN)),
        "W_a2m_attr": s * jax.random.normal(ks[6], (ATTR_DIM, HIDDEN)),
        "b_a2m": jnp.zeros((HIDDEN,)),
        "W_m2a_x": s * jax.random.normal(ks[7], (HIDDEN, HIDDEN)),
        "W_m2a_attr": s * jax.random.normal(ks[8], (ATTR_DIM, HIDDEN)),
        "b_m2a": jnp.zeros((HIDDEN,)),
        "W_comb_j": s * jax.random.normal(ks[9], (HIDDEN, EDGE_HIDDEN)),
        "W_comb_i": s * jax.random.normal(ks[10], (HIDDEN, EDGE_HIDDEN)),
        "b_comb": jnp.zeros((EDGE_HIDDEN,)),
    }
    return jax.tree_util.tree_map(lambda a: a.astype(jnp.float32), p)


# ------------------------------ pure-JAX reference ----------------------------
def _reference_forward(p, a_x, m_x, m, rbf_h, idx_s, idx_t,
                       a2m_edge_index, m2a_edge_index,
                       a2m_edge_weights, m2a_edge_weights,
                       a2m_edge_attr, m2a_edge_attr):
    hp = jax.lax.Precision.HIGHEST

    def ln(x, g, b):
        mu = jnp.mean(x, axis=-1, keepdims=True)
        var = jnp.mean((x - mu) ** 2, axis=-1, keepdims=True)
        return (x - mu) * jax.lax.rsqrt(var + LN_EPS) * g + b

    def dls(x1, x2, w1, w2, b):
        y = jnp.dot(x1, w1, precision=hp) + jnp.dot(x2, w2, precision=hp) + b
        return y * jax.nn.sigmoid(y)

    G0, G1, G2 = NUM_GRIDS
    num_atoms, num_mesh = a_x.shape[0], m_x.shape[0]
    B = num_mesh // (G0 * G1 * G2)

    a_ln = ln(a_x, p["short_g"], p["short_b"])
    m_ln = ln(m, p["short_edge_g"], p["short_edge_b"])
    m_new = dls(m_ln, rbf_h, p["W_mm"], p["W_rbf"], p["b_m"])
    e2a = jnp.zeros((num_atoms, EDGE_HIDDEN), jnp.float32).at[idx_t].add(m_new)
    a_new = dls(a_ln, e2a, p["W_aa"], p["W_ma"], p["b_a"])

    mx_ln = ln(m_x, p["long_g"], p["long_b"])
    xp = jnp.pad(mx_ln.reshape(B, G0, G1, G2, HIDDEN),
                 ((0, 0), (1, 1), (1, 1), (1, 1), (0, 0)))
    conv = jnp.zeros((num_mesh, HIDDEN), jnp.float32)
    for kd in range(3):
        for kh in range(3):
            for kw in range(3):
                k = kd * 9 + kh * 3 + kw
                tap = xp[:, kd:kd + G0, kh:kh + G1, kw:kw + G2, :].reshape(-1, HIDDEN)
                conv = conv + jnp.dot(tap, p["W_conv"][k], precision=hp)
    conv = conv + p["b_conv"]

    a_src, a_dst = a2m_edge_index[0], a2m_edge_index[1]
    m_src, m_dst = m2a_edge_index[0], m2a_edge_index[1]
    a2m_msg = dls(a_new[a_src] * a2m_edge_weights[:, None], a2m_edge_attr,
                  p["W_a2m_x"], p["W_a2m_attr"], p["b_a2m"])
    a2m_message = jnp.zeros((num_mesh, HIDDEN), jnp.float32).at[a_dst].add(a2m_msg)
    m2a_msg = dls(conv[m_src] * m2a_edge_weights[:, None], m2a_edge_attr,
                  p["W_m2a_x"], p["W_m2a_attr"], p["b_m2a"])
    m2a_message = jnp.zeros((num_atoms, HIDDEN), jnp.float32).at[m_dst].add(m2a_msg)

    edge_msg = dls(m2a_message[idx_s], m2a_message[idx_t],
                   p["W_comb_j"], p["W_comb_i"], p["b_comb"])

    out_mx = ln(a2m_message, p["a2m_g"], p["a2m_b"]) + conv + m_x
    out_m = m_new + ln(edge_msg, p["m2a_edge_g"], p["m2a_edge_b"])
    return a_new, out_mx, out_m


# ------------------------------ main -------------------------------------------
if __name__ == "__main__":
    key = jax.random.PRNGKey(0)
    kk = jax.random.split(key, 20)

    B = 2
    G0, G1, G2 = NUM_GRIDS
    num_mesh = B * G0 * G1 * G2          # 128
    num_atoms = 16
    num_edges = 24                        # atom-atom edges (idx_s/idx_t, m, rbf_h)
    n_a2m = 40
    n_m2a = 40
    n_trip = 48

    a_x = jax.random.normal(kk[0], (num_atoms, HIDDEN), jnp.float32)
    m_x = jax.random.normal(kk[1], (num_mesh, HIDDEN), jnp.float32)
    m = jax.random.normal(kk[2], (num_edges, EDGE_HIDDEN), jnp.float32)
    rbf_h = jax.random.normal(kk[3], (num_edges, RBF_DIM), jnp.float32)

    # triplet-related placeholders (consumed only by the injected short_mp in PyTorch)
    rbf3 = jax.random.normal(kk[4], (num_edges, RBF_DIM), jnp.float32)
    cbf3 = jax.random.normal(kk[5], (n_trip, RBF_DIM), jnp.float32)
    id3_ragged_idx = jnp.zeros((n_trip,), jnp.int32)
    id_swap = jnp.arange(num_edges, dtype=jnp.int32)
    id3_ba = jnp.zeros((n_trip,), jnp.int32)
    id3_ca = jnp.zeros((n_trip,), jnp.int32)

    idx_s = jax.random.randint(kk[6], (num_edges,), 0, num_atoms, jnp.int32)
    idx_t = jax.random.randint(kk[7], (num_edges,), 0, num_atoms, jnp.int32)

    a2m_edge_index = jnp.stack([
        jax.random.randint(kk[8], (n_a2m,), 0, num_atoms, jnp.int32),
        jax.random.randint(kk[9], (n_a2m,), 0, num_mesh, jnp.int32)], axis=0)
    m2a_edge_index = jnp.stack([
        jax.random.randint(kk[10], (n_m2a,), 0, num_mesh, jnp.int32),
        jax.random.randint(kk[11], (n_m2a,), 0, num_atoms, jnp.int32)], axis=0)
    a2m_edge_weights = jax.random.uniform(kk[12], (n_a2m,), jnp.float32)
    m2a_edge_weights = jax.random.uniform(kk[13], (n_m2a,), jnp.float32)
    a2m_edge_attr = jax.random.normal(kk[14], (n_a2m, ATTR_DIM), jnp.float32)
    m2a_edge_attr = jax.random.normal(kk[15], (n_m2a, ATTR_DIM), jnp.float32)

    params = init_params(jax.random.PRNGKey(1))

    fwd = jax.jit(short_long_mix_forward)
    out_a_x, out_m_x, out_m = fwd(
        params, a_x, m_x, m, rbf3, cbf3, id3_ragged_idx, id_swap, id3_ba, id3_ca,
        rbf_h, idx_s, idx_t, a2m_edge_index, m2a_edge_index,
        a2m_edge_weights, m2a_edge_weights, a2m_edge_attr, m2a_edge_attr)
    jax.block_until_ready((out_a_x, out_m_x, out_m))

    assert out_a_x.shape == (num_atoms, HIDDEN)
    assert out_m_x.shape == (num_mesh, HIDDEN)
    assert out_m.shape == (num_edges, EDGE_HIDDEN)

    # correctness check against a pure-JAX reference (loose tol covers MXU f32 pass diffs)
    ref_a, ref_mx, ref_m = _reference_forward(
        params, a_x, m_x, m, rbf_h, idx_s, idx_t, a2m_edge_index, m2a_edge_index,
        a2m_edge_weights, m2a_edge_weights, a2m_edge_attr, m2a_edge_attr)
    assert jnp.allclose(out_a_x, ref_a, atol=5e-2, rtol=5e-2)
    assert jnp.allclose(out_m_x, ref_mx, atol=5e-2, rtol=5e-2)
    assert jnp.allclose(out_m, ref_m, atol=5e-2, rtol=5e-2)

    print("KERNEL_OK")
</pallas_src>

<mosaic_0001>
module attributes {stable_mosaic.version = 11 : i64} {
  func.func @fused_mix_kernel(%arg0: memref<16x32xf32, #tpu.memory_space<vmem>>, %arg1: memref<128x32xf32, #tpu.memory_space<vmem>>, %arg2: memref<24x32xf32, #tpu.memory_space<vmem>>, %arg3: memref<24x16xf32, #tpu.memory_space<vmem>>, %arg4: memref<40x16xf32, #tpu.memory_space<vmem>>, %arg5: memref<40x16xf32, #tpu.memory_space<vmem>>, %arg6: memref<16x24xf32, #tpu.memory_space<vmem>>, %arg7: memref<40x16xf32, #tpu.memory_space<vmem>>, %arg8: memref<128x40xf32, #tpu.memory_space<vmem>>, %arg9: memref<40x128xf32, #tpu.memory_space<vmem>>, %arg10: memref<16x40xf32, #tpu.memory_space<vmem>>, %arg11: memref<24x16xf32, #tpu.memory_space<vmem>>, %arg12: memref<24x16xf32, #tpu.memory_space<vmem>>, %arg13: memref<27x128x128xf32, #tpu.memory_space<vmem>>, %arg14: memref<5x1x32xf32, #tpu.memory_space<vmem>>, %arg15: memref<5x1x32xf32, #tpu.memory_space<vmem>>, %arg16: memref<6x1x32xf32, #tpu.memory_space<vmem>>, %arg17: memref<48x32xf32, #tpu.memory_space<vmem>>, %arg18: memref<64x32xf32, #tpu.memory_space<vmem>>, %arg19: memref<32x3456xf32, #tpu.memory_space<vmem>>, %arg20: memref<48x32xf32, #tpu.memory_space<vmem>>, %arg21: memref<48x32xf32, #tpu.memory_space<vmem>>, %arg22: memref<64x32xf32, #tpu.memory_space<vmem>>, %arg23: memref<16x32xf32, #tpu.memory_space<vmem>>, %arg24: memref<128x32xf32, #tpu.memory_space<vmem>>, %arg25: memref<24x32xf32, #tpu.memory_space<vmem>>) attributes {dimension_semantics = [], scalar_prefetch = 0 : i64, scratch_operands = 0 : i64, tpu.core_type = #tpu.core_type<tc>} {
    %c0 = arith.constant 0 : index
    %c0_0 = arith.constant 0 : index
    %0 = vector.load %arg0[%c0, %c0_0] : memref<16x32xf32, #tpu.memory_space<vmem>>, vector<16x32xf32>
    %c0_1 = arith.constant 0 : index
    %c0_2 = arith.constant 0 : index
    %c0_3 = arith.constant 0 : index
    %1 = vector.load %arg14[%c0_1, %c0_2, %c0_3] : memref<5x1x32xf32, #tpu.memory_space<vmem>>, vector<1x1x32xf32>
    %2 = vector.shape_cast %1 : vector<1x1x32xf32> to vector<1x32xf32>
    %c0_4 = arith.constant 0 : index
    %c0_5 = arith.constant 0 : index
    %c0_6 = arith.constant 0 : index
    %3 = vector.load %arg15[%c0_4, %c0_5, %c0_6] : memref<5x1x32xf32, #tpu.memory_space<vmem>>, vector<1x1x32xf32>
    %4 = vector.shape_cast %3 : vector<1x1x32xf32> to vector<1x32xf32>
    %cst = arith.constant dense<0.000000e+00> : vector<16xf32>
    %5 = vector.multi_reduction <add>, %0, %cst [1] : vector<16x32xf32> to vector<16xf32>
    %6 = vector.shape_cast %5 : vector<16xf32> to vector<16x1xf32>
    %cst_7 = arith.constant 3.200000e+01 : f32
    %7 = vector.broadcast %cst_7 : f32 to vector<16x1xf32>
    %8 = arith.divf %6, %7 : vector<16x1xf32>
    %9 = vector.broadcast %8 : vector<16x1xf32> to vector<16x32xf32>
    %10 = arith.subf %0, %9 : vector<16x32xf32>
    %11 = arith.mulf %10, %10 : vector<16x32xf32>
    %cst_8 = arith.constant dense<0.000000e+00> : vector<16xf32>
    %12 = vector.multi_reduction <add>, %11, %cst_8 [1] : vector<16x32xf32> to vector<16xf32>
    %13 = vector.shape_cast %12 : vector<16xf32> to vector<16x1xf32>
    %cst_9 = arith.constant 3.200000e+01 : f32
    %14 = vector.broadcast %cst_9 : f32 to vector<16x1xf32>
    %15 = arith.divf %13, %14 : vector<16x1xf32>
    %16 = vector.broadcast %8 : vector<16x1xf32> to vector<16x32xf32>
    %17 = arith.subf %0, %16 : vector<16x32xf32>
    %cst_10 = arith.constant 9.99999974E-6 : f32
    %18 = vector.broadcast %cst_10 : f32 to vector<16x1xf32>
    %19 = arith.addf %15, %18 : vector<16x1xf32>
    %20 = math.rsqrt %19 : vector<16x1xf32>
    %21 = vector.broadcast %20 : vector<16x1xf32> to vector<16x32xf32>
    %22 = arith.mulf %17, %21 : vector<16x32xf32>
    %23 = vector.broadcast %2 : vector<1x32xf32> to vector<16x32xf32>
    %24 = arith.mulf %22, %23 : vector<16x32xf32>
    %25 = vector.broadcast %4 : vector<1x32xf32> to vector<16x32xf32>
    %26 = arith.addf %24, %25 : vector<16x32xf32>
    %c0_11 = arith.constant 0 : index
    %c0_12 = arith.constant 0 : index
    %27 = vector.load %arg2[%c0_11, %c0_12] : memref<24x32xf32, #tpu.memory_space<vmem>>, vector<24x32xf32>
    %c1 = arith.constant 1 : index
    %c0_13 = arith.constant 0 : index
    %c0_14 = arith.constant 0 : index
    %28 = vector.load %arg14[%c1, %c0_13, %c0_14] : memref<5x1x32xf32, #tpu.memory_space<vmem>>, vector<1x1x32xf32>
    %29 = vector.shape_cast %28 : vector<1x1x32xf32> to vector<1x32xf32>
    %c1_15 = arith.constant 1 : index
    %c0_16 = arith.constant 0 : index
    %c0_17 = arith.constant 0 : index
    %30 = vector.load %arg15[%c1_15, %c0_16, %c0_17] : memref<5x1x32xf32, #tpu.memory_space<vmem>>, vector<1x1x32xf32>
    %31 = vector.shape_cast %30 : vector<1x1x32xf32> to vector<1x32xf32>
    %cst_18 = arith.constant dense<0.000000e+00> : vector<24xf32>
    %32 = vector.multi_reduction <add>, %27, %cst_18 [1] : vector<24x32xf32> to vector<24xf32>
    %33 = vector.shape_cast %32 : vector<24xf32> to vector<24x1xf32>
    %cst_19 = arith.constant 3.200000e+01 : f32
    %34 = vector.broadcast %cst_19 : f32 to vector<24x1xf32>
    %35 = arith.divf %33, %34 : vector<24x1xf32>
    %36 = vector.broadcast %35 : vector<24x1xf32> to vector<24x32xf32>
    %37 = arith.subf %27, %36 : vector<24x32xf32>
    %38 = arith.mulf %37, %37 : vector<24x32xf32>
    %cst_20 = arith.constant dense<0.000000e+00> : vector<24xf32>
    %39 = vector.multi_reduction <add>, %38, %cst_20 [1] : vector<24x32xf32> to vector<24xf32>
    %40 = vector.shape_cast %39 : vector<24xf32> to vector<24x1xf32>
    %cst_21 = arith.constant 3.200000e+01 : f32
    %41 = vector.broadcast %cst_21 : f32 to vector<24x1xf32>
    %42 = arith.divf %40, %41 : vector<24x1xf32>
    %43 = vector.broadcast %35 : vector<24x1xf32> to vector<24x32xf32>
    %44 = arith.subf %27, %43 : vector<24x32xf32>
    %cst_22 = arith.constant 9.99999974E-6 : f32
    %45 = vector.broadcast %cst_22 : f32 to vector<24x1xf32>
    %46 = arith.addf %42, %45 : vector<24x1xf32>
    %47 = math.rsqrt %46 : vector<24x1xf32>
    %48 = vector.broadcast %47 : vector<24x1xf32> to vector<24x32xf32>
    %49 = arith.mulf %44, %48 : vector<24x32xf32>
    %50 = vector.broadcast %29 : vector<1x32xf32> to vector<24x32xf32>
    %51 = arith.mulf %49, %50 : vector<24x32xf32>
    %52 = vector.broadcast %31 : vector<1x32xf32> to vector<24x32xf32>
    %53 = arith.addf %51, %52 : vector<24x32xf32>
    %c0_23 = arith.constant 0 : index
    %c0_24 = arith.constant 0 : index
    %54 = vector.load %arg17[%c0_23, %c0_24] : memref<48x32xf32, #tpu.memory_space<vmem>>, vector<32x32xf32>
    %cst_25 = arith.constant dense<0.000000e+00> : vector<24x32xf32>
    %55 = tpu.matmul %53, %54, %cst_25 {dimension_numbers = #tpu.dot_dimension_numbers<[1], [0], [0], [1], [0, 0, 1, 1], [], []>} : vector<24x32xf32>, vector<32x32xf32>, vector<24x32xf32> -> vector<24x32xf32>
    %c0_26 = arith.constant 0 : index
    %c0_27 = arith.constant 0 : index
    %56 = vector.load %arg3[%c0_26, %c0_27] : memref<24x16xf32, #tpu.memory_space<vmem>>, vector<24x16xf32>
    %c32 = arith.constant 32 : index
    %c0_28 = arith.constant 0 : index
    %57 = vector.load %arg17[%c32, %c0_28] : memref<48x32xf32, #tpu.memory_space<vmem>>, vector<16x32xf32>
    %cst_29 = arith.constant dense<0.000000e+00> : vector<24x32xf32>
    %58 = tpu.matmul %56, %57, %cst_29 {dimension_numbers = #tpu.dot_dimension_numbers<[1], [0], [0], [1], [0, 0, 1, 1], [], []>} : vector<24x16xf32>, vector<16x32xf32>, vector<24x32xf32> -> vector<24x32xf32>
    %59 = arith.addf %55, %58 : vector<24x32xf32>
    %c0_30 = arith.constant 0 : index
    %c0_31 = arith.constant 0 : index
    %c0_32 = arith.constant 0 : index
    %60 = vector.load %arg16[%c0_30, %c0_31, %c0_32] : memref<6x1x32xf32, #tpu.memory_space<vmem>>, vector<1x1x32xf32>
    %61 = vector.shape_cast %60 : vector<1x1x32xf32> to vector<1x32xf32>
    %62 = vector.broadcast %61 : vector<1x32xf32> to vector<24x32xf32>
    %63 = arith.addf %59, %62 : vector<24x32xf32>
    %64 = arith.negf %63 : vector<24x32xf32>
    %65 = math.exp %64 : vector<24x32xf32>
    %cst_33 = arith.constant 1.000000e+00 : f32
    %66 = vector.broadcast %cst_33 : f32 to vector<24x32xf32>
    %67 = arith.addf %66, %65 : vector<24x32xf32>
    %68 = arith.divf %66, %67 : vector<24x32xf32>
    %69 = arith.mulf %63, %68 : vector<24x32xf32>
    %c0_34 = arith.constant 0 : index
    %c0_35 = arith.constant 0 : index
    %70 = vector.load %arg6[%c0_34, %c0_35] : memref<16x24xf32, #tpu.memory_space<vmem>>, vector<16x24xf32>
    %cst_36 = arith.constant dense<0.000000e+00> : vector<16x32xf32>
    %71 = tpu.matmul %70, %69, %cst_36 {dimension_numbers = #tpu.dot_dimension_numbers<[1], [0], [0], [1], [0, 0, 1, 1], [], []>} : vector<16x24xf32>, vector<24x32xf32>, vector<16x32xf32> -> vector<16x32xf32>
    %c0_37 = arith.constant 0 : index
    %c0_38 = arith.constant 0 : index
    %72 = vector.load %arg18[%c0_37, %c0_38] : memref<64x32xf32, #tpu.memory_space<vmem>>, vector<32x32xf32>
    %cst_39 = arith.constant dense<0.000000e+00> : vector<16x32xf32>
    %73 = tpu.matmul %26, %72, %cst_39 {dimension_numbers = #tpu.dot_dimension_numbers<[1], [0], [0], [1], [0, 0, 1, 1], [], []>} : vector<16x32xf32>, vector<32x32xf32>, vector<16x32xf32> -> vector<16x32xf32>
    %c32_40 = arith.constant 32 : index
    %c0_41 = arith.constant 0 : index
    %74 = vector.load %arg18[%c32_40, %c0_41] : memref<64x32xf32, #tpu.memory_space<vmem>>, vector<32x32xf32>
    %cst_42 = arith.constant dense<0.000000e+00> : vector<16x32xf32>
    %75 = tpu.matmul %71, %74, %cst_42 {dimension_numbers = #tpu.dot_dimension_numbers<[1], [0], [0], [1], [0, 0, 1, 1], [], []>} : vector<16x32xf32>, vector<32x32xf32>, vector<16x32xf32> -> vector<16x32xf32>
    %76 = arith.addf %73, %75 : vector<16x32xf32>
    %c1_43 = arith.constant 1 : index
    %c0_44 = arith.constant 0 : index
    %c0_45 = arith.constant 0 : index
    %77 = vector.load %arg16[%c1_43, %c0_44, %c0_45] : memref<6x1x32xf32, #tpu.memory_space<vmem>>, vector<1x1x32xf32>
    %78 = vector.shape_cast %77 : vector<1x1x32xf32> to vector<1x32xf32>
    %79 = vector.broadcast %78 : vector<1x32xf32> to vector<16x32xf32>
    %80 = arith.addf %76, %79 : vector<16x32xf32>
    %81 = arith.negf %80 : vector<16x32xf32>
    %82 = math.exp %81 : vector<16x32xf32>
    %cst_46 = arith.constant 1.000000e+00 : f32
    %83 = vector.broadcast %cst_46 : f32 to vector<16x32xf32>
    %84 = arith.addf %83, %82 : vector<16x32xf32>
    %85 = arith.divf %83, %84 : vector<16x32xf32>
    %86 = arith.mulf %80, %85 : vector<16x32xf32>
    %c0_47 = arith.constant 0 : index
    %c0_48 = arith.constant 0 : index
    %87 = vector.load %arg1[%c0_47, %c0_48] : memref<128x32xf32, #tpu.memory_space<vmem>>, vector<128x32xf32>
    %c2 = arith.constant 2 : index
    %c0_49 = arith.constant 0 : index
    %c0_50 = arith.constant 0 : index
    %88 = vector.load %arg14[%c2, %c0_49, %c0_50] : memref<5x1x32xf32, #tpu.memory_space<vmem>>, vector<1x1x32xf32>
    %89 = vector.shape_cast %88 : vector<1x1x32xf32> to vector<1x32xf32>
    %c2_51 = arith.constant 2 : index
    %c0_52 = arith.constant 0 : index
    %c0_53 = arith.constant 0 : index
    %90 = vector.load %arg15[%c2_51, %c0_52, %c0_53] : memref<5x1x32xf32, #tpu.memory_space<vmem>>, vector<1x1x32xf32>
    %91 = vector.shape_cast %90 : vector<1x1x32xf32> to vector<1x32xf32>
    %cst_54 = arith.constant dense<0.000000e+00> : vector<128xf32>
    %92 = vector.multi_reduction <add>, %87, %cst_54 [1] : vector<128x32xf32> to vector<128xf32>
    %93 = vector.shape_cast %92 : vector<128xf32> to vector<128x1xf32>
    %cst_55 = arith.constant 3.200000e+01 : f32
    %94 = vector.broadcast %cst_55 : f32 to vector<128x1xf32>
    %95 = arith.divf %93, %94 : vector<128x1xf32>
    %96 = vector.broadcast %95 : vector<128x1xf32> to vector<128x32xf32>
    %97 = arith.subf %87, %96 : vector<128x32xf32>
    %98 = arith.mulf %97, %97 : vector<128x32xf32>
    %cst_56 = arith.constant dense<0.000000e+00> : vector<128xf32>
    %99 = vector.multi_reduction <add>, %98, %cst_56 [1] : vector<128x32xf32> to vector<128xf32>
    %100 = vector.shape_cast %99 : vector<128xf32> to vector<128x1xf32>
    %cst_57 = arith.constant 3.200000e+01 : f32
    %101 = vector.broadcast %cst_57 : f32 to vector<128x1xf32>
    %102 = arith.divf %100, %101 : vector<128x1xf32>
    %103 = vector.broadcast %95 : vector<128x1xf32> to vector<128x32xf32>
    %104 = arith.subf %87, %103 : vector<128x32xf32>
    %cst_58 = arith.constant 9.99999974E-6 : f32
    %105 = vector.broadcast %cst_58 : f32 to vector<128x1xf32>
    %106 = arith.addf %102, %105 : vector<128x1xf32>
    %107 = math.rsqrt %106 : vector<128x1xf32>
    %108 = vector.broadcast %107 : vector<128x1xf32> to vector<128x32xf32>
    %109 = arith.mulf %104, %108 : vector<128x32xf32>
    %110 = vector.broadcast %89 : vector<1x32xf32> to vector<128x32xf32>
    %111 = arith.mulf %109, %110 : vector<128x32xf32>
    %112 = vector.broadcast %91 : vector<1x32xf32> to vector<128x32xf32>
    %113 = arith.addf %111, %112 : vector<128x32xf32>
    %c0_59 = arith.constant 0 : index
    %c0_60 = arith.constant 0 : index
    %114 = vector.load %arg19[%c0_59, %c0_60] : memref<32x3456xf32, #tpu.memory_space<vmem>>, vector<32x3456xf32>
    %cst_61 = arith.constant dense<0.000000e+00> : vector<128x3456xf32>
    %115 = tpu.matmul %113, %114, %cst_61 {dimension_numbers = #tpu.dot_dimension_numbers<[1], [0], [0], [1], [0, 0, 1, 1], [], []>} : vector<128x32xf32>, vector<32x3456xf32>, vector<128x3456xf32> -> vector<128x3456xf32>
    %c0_62 = arith.constant 0 : index
    %c0_63 = arith.constant 0 : index
    %c0_64 = arith.constant 0 : index
    %116 = vector.load %arg13[%c0_62, %c0_63, %c0_64] : memref<27x128x128xf32, #tpu.memory_space<vmem>>, vector<1x128x128xf32>
    %117 = vector.shape_cast %116 : vector<1x128x128xf32> to vector<128x128xf32>
    %118 = vector.extract_strided_slice %115 {offsets = [0, 0], sizes = [128, 128], strides = [1, 1]} : vector<128x3456xf32> to vector<128x128xf32>
    %cst_65 = arith.constant dense<0.000000e+00> : vector<128x128xf32>
    %119 = tpu.matmul %117, %118, %cst_65 {dimension_numbers = #tpu.dot_dimension_numbers<[1], [0], [0], [1], [0, 0, 1, 1], [], []>} : vector<128x128xf32>, vector<128x128xf32>, vector<128x128xf32> -> vector<128x128xf32>
    %c1_66 = arith.constant 1 : index
    %c0_67 = arith.constant 0 : index
    %c0_68 = arith.constant 0 : index
    %120 = vector.load %arg13[%c1_66, %c0_67, %c0_68] : memref<27x128x128xf32, #tpu.memory_space<vmem>>, vector<1x128x128xf32>
    %121 = vector.shape_cast %120 : vector<1x128x128xf32> to vector<128x128xf32>
    %122 = vector.extract_strided_slice %115 {offsets = [0, 128], sizes = [128, 128], strides = [1, 1]} : vector<128x3456xf32> to vector<128x128xf32>
    %cst_69 = arith.constant dense<0.000000e+00> : vector<128x128xf32>
    %123 = tpu.matmul %121, %122, %cst_69 {dimension_numbers = #tpu.dot_dimension_numbers<[1], [0], [0], [1], [0, 0, 1, 1], [], []>} : vector<128x128xf32>, vector<128x128xf32>, vector<128x128xf32> -> vector<128x128xf32>
    %124 = arith.addf %119, %123 : vector<128x128xf32>
    %c2_70 = arith.constant 2 : index
    %c0_71 = arith.constant 0 : index
    %c0_72 = arith.constant 0 : index
    %125 = vector.load %arg13[%c2_70, %c0_71, %c0_72] : memref<27x128x128xf32, #tpu.memory_space<vmem>>, vector<1x128x128xf32>
    %126 = vector.shape_cast %125 : vector<1x128x128xf32> to vector<128x128xf32>
    %127 = vector.extract_strided_slice %115 {offsets = [0, 256], sizes = [128, 128], strides = [1, 1]} : vector<128x3456xf32> to vector<128x128xf32>
    %cst_73 = arith.constant dense<0.000000e+00> : vector<128x128xf32>
    %128 = tpu.matmul %126, %127, %cst_73 {dimension_numbers = #tpu.dot_dimension_numbers<[1], [0], [0], [1], [0, 0, 1, 1], [], []>} : vector<128x128xf32>, vector<128x128xf32>, vector<128x128xf32> -> vector<128x128xf32>
    %129 = arith.addf %124, %128 : vector<128x128xf32>
    %c3 = arith.constant 3 : index
    %c0_74 = arith.constant 0 : index
    %c0_75 = arith.constant 0 : index
    %130 = vector.load %arg13[%c3, %c0_74, %c0_75] : memref<27x128x128xf32, #tpu.memory_space<vmem>>, vector<1x128x128xf32>
    %131 = vector.shape_cast %130 : vector<1x128x128xf32> to vector<128x128xf32>
    %132 = vector.extract_strided_slice %115 {offsets = [0, 384], sizes = [128, 128], strides = [1, 1]} : vector<128x3456xf32> to vector<128x128xf32>
    %cst_76 = arith.constant dense<0.000000e+00> : vector<128x128xf32>
    %133 = tpu.matmul %131, %132, %cst_76 {dimension_numbers = #tpu.dot_dimension_numbers<[1], [0], [0], [1], [0, 0, 1, 1], [], []>} : vector<128x128xf32>, vector<128x128xf32>, vector<128x128xf32> -> vector<128x128xf32>
    %134 = arith.addf %129, %133 : vector<128x128xf32>
    %c4 = arith.constant 4 : index
    %c0_77 = arith.constant 0 : index
    %c0_78 = arith.constant 0 : index
    %135 = vector.load %arg13[%c4, %c0_77, %c0_78] : memref<27x128x128xf32, #tpu.memory_space<vmem>>, vector<1x128x128xf32>
    %136 = vector.shape_cast %135 : vector<1x128x128xf32> to vector<128x128xf32>
    %137 = vector.extract_strided_slice %115 {offsets = [0, 512], sizes = [128, 128], strides = [1, 1]} : vector<128x3456xf32> to vector<128x128xf32>
    %cst_79 = arith.constant dense<0.000000e+00> : vector<128x128xf32>
    %138 = tpu.matmul %136, %137, %cst_79 {dimension_numbers = #tpu.dot_dimension_numbers<[1], [0], [0], [1], [0, 0, 1, 1], [], []>} : vector<128x128xf32>, vector<128x128xf32>, vector<128x128xf32> -> vector<128x128xf32>
    %139 = arith.addf %134, %138 : vector<128x128xf32>
    %c5 = arith.constant 5 : index
    %c0_80 = arith.constant 0 : index
    %c0_81 = arith.constant 0 : index
    %140 = vector.load %arg13[%c5, %c0_80, %c0_81] : memref<27x128x128xf32, #tpu.memory_space<vmem>>, vector<1x128x128xf32>
    %141 = vector.shape_cast %140 : vector<1x128x128xf32> to vector<128x128xf32>
    %142 = vector.extract_strided_slice %115 {offsets = [0, 640], sizes = [128, 128], strides = [1, 1]} : vector<128x3456xf32> to vector<128x128xf32>
    %cst_82 = arith.constant dense<0.000000e+00> : vector<128x128xf32>
    %143 = tpu.matmul %141, %142, %cst_82 {dimension_numbers = #tpu.dot_dimension_numbers<[1], [0], [0], [1], [0, 0, 1, 1], [], []>} : vector<128x128xf32>, vector<128x128xf32>, vector<128x128xf32> -> vector<128x128xf32>
    %144 = arith.addf %139, %143 : vector<128x128xf32>
    %c6 = arith.constant 6 : index
    %c0_83 = arith.constant 0 : index
    %c0_84 = arith.constant 0 : index
    %145 = vector.load %arg13[%c6, %c0_83, %c0_84] : memref<27x128x128xf32, #tpu.memory_space<vmem>>, vector<1x128x128xf32>
    %146 = vector.shape_cast %145 : vector<1x128x128xf32> to vector<128x128xf32>
    %147 = vector.extract_strided_slice %115 {offsets = [0, 768], sizes = [128, 128], strides = [1, 1]} : vector<128x3456xf32> to vector<128x128xf32>
    %cst_85 = arith.constant dense<0.000000e+00> : vector<128x128xf32>
    %148 = tpu.matmul %146, %147, %cst_85 {dimension_numbers = #tpu.dot_dimension_numbers<[1], [0], [0], [1], [0, 0, 1, 1], [], []>} : vector<128x128xf32>, vector<128x128xf32>, vector<128x128xf32> -> vector<128x128xf32>
    %149 = arith.addf %144, %148 : vector<128x128xf32>
    %c7 = arith.constant 7 : index
    %c0_86 = arith.constant 0 : index
    %c0_87 = arith.constant 0 : index
    %150 = vector.load %arg13[%c7, %c0_86, %c0_87] : memref<27x128x128xf32, #tpu.memory_space<vmem>>, vector<1x128x128xf32>
    %151 = vector.shape_cast %150 : vector<1x128x128xf32> to vector<128x128xf32>
    %152 = vector.extract_strided_slice %115 {offsets = [0, 896], sizes = [128, 128], strides = [1, 1]} : vector<128x3456xf32> to vector<128x128xf32>
    %cst_88 = arith.constant dense<0.000000e+00> : vector<128x128xf32>
    %153 = tpu.matmul %151, %152, %cst_88 {dimension_numbers = #tpu.dot_dimension_numbers<[1], [0], [0], [1], [0, 0, 1, 1], [], []>} : vector<128x128xf32>, vector<128x128xf32>, vector<128x128xf32> -> vector<128x128xf32>
    %154 = arith.addf %149, %153 : vector<128x128xf32>
    %c8 = arith.constant 8 : index
    %c0_89 = arith.constant 0 : index
    %c0_90 = arith.constant 0 : index
    %155 = vector.load %arg13[%c8, %c0_89, %c0_90] : memref<27x128x128xf32, #tpu.memory_space<vmem>>, vector<1x128x128xf32>
    %156 = vector.shape_cast %155 : vector<1x128x128xf32> to vector<128x128xf32>
    %157 = vector.extract_strided_slice %115 {offsets = [0, 1024], sizes = [128, 128], strides = [1, 1]} : vector<128x3456xf32> to vector<128x128xf32>
    %cst_91 = arith.constant dense<0.000000e+00> : vector<128x128xf32>
    %158 = tpu.matmul %156, %157, %cst_91 {dimension_numbers = #tpu.dot_dimension_numbers<[1], [0], [0], [1], [0, 0, 1, 1], [], []>} : vector<128x128xf32>, vector<128x128xf32>, vector<128x128xf32> -> vector<128x128xf32>
    %159 = arith.addf %154, %158 : vector<128x128xf32>
    %c9 = arith.constant 9 : index
    %c0_92 = arith.constant 0 : index
    %c0_93 = arith.constant 0 : index
    %160 = vector.load %arg13[%c9, %c0_92, %c0_93] : memref<27x128x128xf32, #tpu.memory_space<vmem>>, vector<1x128x128xf32>
    %161 = vector.shape_cast %160 : vector<1x128x128xf32> to vector<128x128xf32>
    %162 = vector.extract_strided_slice %115 {offsets = [0, 1152], sizes = [128, 128], strides = [1, 1]} : vector<128x3456xf32> to vector<128x128xf32>
    %cst_94 = arith.constant dense<0.000000e+00> : vector<128x128xf32>
    %163 = tpu.matmul %161, %162, %cst_94 {dimension_numbers = #tpu.dot_dimension_numbers<[1], [0], [0], [1], [0, 0, 1, 1], [], []>} : vector<128x128xf32>, vector<128x128xf32>, vector<128x128xf32> -> vector<128x128xf32>
    %164 = arith.addf %159, %163 : vector<128x128xf32>
    %c10 = arith.constant 10 : index
    %c0_95 = arith.constant 0 : index
    %c0_96 = arith.constant 0 : index
    %165 = vector.load %arg13[%c10, %c0_95, %c0_96] : memref<27x128x128xf32, #tpu.memory_space<vmem>>, vector<1x128x128xf32>
    %166 = vector.shape_cast %165 : vector<1x128x128xf32> to vector<128x128xf32>
    %167 = vector.extract_strided_slice %115 {offsets = [0, 1280], sizes = [128, 128], strides = [1, 1]} : vector<128x3456xf32> to vector<128x128xf32>
    %cst_97 = arith.constant dense<0.000000e+00> : vector<128x128xf32>
    %168 = tpu.matmul %166, %167, %cst_97 {dimension_numbers = #tpu.dot_dimension_numbers<[1], [0], [0], [1], [0, 0, 1, 1], [], []>} : vector<128x128xf32>, vector<128x128xf32>, vector<128x128xf32> -> vector<128x128xf32>
    %169 = arith.addf %164, %168 : vector<128x128xf32>
    %c11 = arith.constant 11 : index
    %c0_98 = arith.constant 0 : index
    %c0_99 = arith.constant 0 : index
    %170 = vector.load %arg13[%c11, %c0_98, %c0_99] : memref<27x128x128xf32, #tpu.memory_space<vmem>>, vector<1x128x128xf32>
    %171 = vector.shape_cast %170 : vector<1x128x128xf32> to vector<128x128xf32>
    %172 = vector.extract_strided_slice %115 {offsets = [0, 1408], sizes = [128, 128], strides = [1, 1]} : vector<128x3456xf32> to vector<128x128xf32>
    %cst_100 = arith.constant dense<0.000000e+00> : vector<128x128xf32>
    %173 = tpu.matmul %171, %172, %cst_100 {dimension_numbers = #tpu.dot_dimension_numbers<[1], [0], [0], [1], [0, 0, 1, 1], [], []>} : vector<128x128xf32>, vector<128x128xf32>, vector<128x128xf32> -> vector<128x128xf32>
    %174 = arith.addf %169, %173 : vector<128x128xf32>
    %c12 = arith.constant 12 : index
    %c0_101 = arith.constant 0 : index
    %c0_102 = arith.constant 0 : index
    %175 = vector.load %arg13[%c12, %c0_101, %c0_102] : memref<27x128x128xf32, #tpu.memory_space<vmem>>, vector<1x128x128xf32>
    %176 = vector.shape_cast %175 : vector<1x128x128xf32> to vector<128x128xf32>
    %177 = vector.extract_strided_slice %115 {offsets = [0, 1536], sizes = [128, 128], strides = [1, 1]} : vector<128x3456xf32> to vector<128x128xf32>
    %cst_103 = arith.constant dense<0.000000e+00> : vector<128x128xf32>
    %178 = tpu.matmul %176, %177, %cst_103 {dimension_numbers = #tpu.dot_dimension_numbers<[1], [0], [0], [1], [0, 0, 1, 1], [], []>} : vector<128x128xf32>, vector<128x128xf32>, vector<128x128xf32> -> vector<128x128xf32>
    %179 = arith.addf %174, %178 : vector<128x128xf32>
    %c13 = arith.constant 13 : index
    %c0_104 = arith.constant 0 : index
    %c0_105 = arith.constant 0 : index
    %180 = vector.load %arg13[%c13, %c0_104, %c0_105] : memref<27x128x128xf32, #tpu.memory_space<vmem>>, vector<1x128x128xf32>
    %181 = vector.shape_cast %180 : vector<1x128x128xf32> to vector<128x128xf32>
    %182 = vector.extract_strided_slice %115 {offsets = [0, 1664], sizes = [128, 128], strides = [1, 1]} : vector<128x3456xf32> to vector<128x128xf32>
    %cst_106 = arith.constant dense<0.000000e+00> : vector<128x128xf32>
    %183 = tpu.matmul %181, %182, %cst_106 {dimension_numbers = #tpu.dot_dimension_numbers<[1], [0], [0], [1], [0, 0, 1, 1], [], []>} : vector<128x128xf32>, vector<128x128xf32>, vector<128x128xf32> -> vector<128x128xf32>
    %184 = arith.addf %179, %183 : vector<128x128xf32>
    %c14 = arith.constant 14 : index
    %c0_107 = arith.constant 0 : index
    %c0_108 = arith.constant 0 : index
    %185 = vector.load %arg13[%c14, %c0_107, %c0_108] : memref<27x128x128xf32, #tpu.memory_space<vmem>>, vector<1x128x128xf32>
    %186 = vector.shape_cast %185 : vector<1x128x128xf32> to vector<128x128xf32>
    %187 = vector.extract_strided_slice %115 {offsets = [0, 1792], sizes = [128, 128], strides = [1, 1]} : vector<128x3456xf32> to vector<128x128xf32>
    %cst_109 = arith.constant dense<0.000000e+00> : vector<128x128xf32>
    %188 = tpu.matmul %186, %187, %cst_109 {dimension_numbers = #tpu.dot_dimension_numbers<[1], [0], [0], [1], [0, 0, 1, 1], [], []>} : vector<128x128xf32>, vector<128x128xf32>, vector<128x128xf32> -> vector<128x128xf32>
    %189 = arith.addf %184, %188 : vector<128x128xf32>
    %c15 = arith.constant 15 : index
    %c0_110 = arith.constant 0 : index
    %c0_111 = arith.constant 0 : index
    %190 = vector.load %arg13[%c15, %c0_110, %c0_111] : memref<27x128x128xf32, #tpu.memory_space<vmem>>, vector<1x128x128xf32>
    %191 = vector.shape_cast %190 : vector<1x128x128xf32> to vector<128x128xf32>
    %192 = vector.extract_strided_slice %115 {offsets = [0, 1920], sizes = [128, 128], strides = [1, 1]} : vector<128x3456xf32> to vector<128x128xf32>
    %cst_112 = arith.constant dense<0.000000e+00> : vector<128x128xf32>
    %193 = tpu.matmul %191, %192, %cst_112 {dimension_numbers = #tpu.dot_dimension_numbers<[1], [0], [0], [1], [0, 0, 1, 1], [], []>} : vector<128x128xf32>, vector<128x128xf32>, vector<128x128xf32> -> vector<128x128xf32>
    %194 = arith.addf %189, %193 : vector<128x128xf32>
    %c16 = arith.constant 16 : index
    %c0_113 = arith.constant 0 : index
    %c0_114 = arith.constant 0 : index
    %195 = vector.load %arg13[%c16, %c0_113, %c0_114] : memref<27x128x128xf32, #tpu.memory_space<vmem>>, vector<1x128x128xf32>
    %196 = vector.shape_cast %195 : vector<1x128x128xf32> to vector<128x128xf32>
    %197 = vector.extract_strided_slice %115 {offsets = [0, 2048], sizes = [128, 128], strides = [1, 1]} : vector<128x3456xf32> to vector<128x128xf32>
    %cst_115 = arith.constant dense<0.000000e+00> : vector<128x128xf32>
    %198 = tpu.matmul %196, %197, %cst_115 {dimension_numbers = #tpu.dot_dimension_numbers<[1], [0], [0], [1], [0, 0, 1, 1], [], []>} : vector<128x128xf32>, vector<128x128xf32>, vector<128x128xf32> -> vector<128x128xf32>
    %199 = arith.addf %194, %198 : vector<128x128xf32>
    %c17 = arith.constant 17 : index
    %c0_116 = arith.constant 0 : index
    %c0_117 = arith.constant 0 : index
    %200 = vector.load %arg13[%c17, %c0_116, %c0_117] : memref<27x128x128xf32, #tpu.memory_space<vmem>>, vector<1x128x128xf32>
    %201 = vector.shape_cast %200 : vector<1x128x128xf32> to vector<128x128xf32>
    %202 = vector.extract_strided_slice %115 {offsets = [0, 2176], sizes = [128, 128], strides = [1, 1]} : vector<128x3456xf32> to vector<128x128xf32>
    %cst_118 = arith.constant dense<0.000000e+00> : vector<128x128xf32>
    %203 = tpu.matmul %201, %202, %cst_118 {dimension_numbers = #tpu.dot_dimension_numbers<[1], [0], [0], [1], [0, 0, 1, 1], [], []>} : vector<128x128xf32>, vector<128x128xf32>, vector<128x128xf32> -> vector<128x128xf32>
    %204 = arith.addf %199, %203 : vector<128x128xf32>
    %c18 = arith.constant 18 : index
    %c0_119 = arith.constant 0 : index
    %c0_120 = arith.constant 0 : index
    %205 = vector.load %arg13[%c18, %c0_119, %c0_120] : memref<27x128x128xf32, #tpu.memory_space<vmem>>, vector<1x128x128xf32>
    %206 = vector.shape_cast %205 : vector<1x128x128xf32> to vector<128x128xf32>
    %207 = vector.extract_strided_slice %115 {offsets = [0, 2304], sizes = [128, 128], strides = [1, 1]} : vector<128x3456xf32> to vector<128x128xf32>
    %cst_121 = arith.constant dense<0.000000e+00> : vector<128x128xf32>
    %208 = tpu.matmul %206, %207, %cst_121 {dimension_numbers = #tpu.dot_dimension_numbers<[1], [0], [0], [1], [0, 0, 1, 1], [], []>} : vector<128x128xf32>, vector<128x128xf32>, vector<128x128xf32> -> vector<128x128xf32>
    %209 = arith.addf %204, %208 : vector<128x128xf32>
    %c19 = arith.constant 19 : index
    %c0_122 = arith.constant 0 : index
    %c0_123 = arith.constant 0 : index
    %210 = vector.load %arg13[%c19, %c0_122, %c0_123] : memref<27x128x128xf32, #tpu.memory_space<vmem>>, vector<1x128x128xf32>
    %211 = vector.shape_cast %210 : vector<1x128x128xf32> to vector<128x128xf32>
    %212 = vector.extract_strided_slice %115 {offsets = [0, 2432], sizes = [128, 128], strides = [1, 1]} : vector<128x3456xf32> to vector<128x128xf32>
    %cst_124 = arith.constant dense<0.000000e+00> : vector<128x128xf32>
    %213 = tpu.matmul %211, %212, %cst_124 {dimension_numbers = #tpu.dot_dimension_numbers<[1], [0], [0], [1], [0, 0, 1, 1], [], []>} : vector<128x128xf32>, vector<128x128xf32>, vector<128x128xf32> -> vector<128x128xf32>
    %214 = arith.addf %209, %213 : vector<128x128xf32>
    %c20 = arith.constant 20 : index
    %c0_125 = arith.constant 0 : index
    %c0_126 = arith.constant 0 : index
    %215 = vector.load %arg13[%c20, %c0_125, %c0_126] : memref<27x128x128xf32, #tpu.memory_space<vmem>>, vector<1x128x128xf32>
    %216 = vector.shape_cast %215 : vector<1x128x128xf32> to vector<128x128xf32>
    %217 = vector.extract_strided_slice %115 {offsets = [0, 2560], sizes = [128, 128], strides = [1, 1]} : vector<128x3456xf32> to vector<128x128xf32>
    %cst_127 = arith.constant dense<0.000000e+00> : vector<128x128xf32>
    %218 = tpu.matmul %216, %217, %cst_127 {dimension_numbers = #tpu.dot_dimension_numbers<[1], [0], [0], [1], [0, 0, 1, 1], [], []>} : vector<128x128xf32>, vector<128x128xf32>, vector<128x128xf32> -> vector<128x128xf32>
    %219 = arith.addf %214, %218 : vector<128x128xf32>
    %c21 = arith.constant 21 : index
    %c0_128 = arith.constant 0 : index
    %c0_129 = arith.constant 0 : index
    %220 = vector.load %arg13[%c21, %c0_128, %c0_129] : memref<27x128x128xf32, #tpu.memory_space<vmem>>, vector<1x128x128xf32>
    %221 = vector.shape_cast %220 : vector<1x128x128xf32> to vector<128x128xf32>
    %222 = vector.extract_strided_slice %115 {offsets = [0, 2688], sizes = [128, 128], strides = [1, 1]} : vector<128x3456xf32> to vector<128x128xf32>
    %cst_130 = arith.constant dense<0.000000e+00> : vector<128x128xf32>
    %223 = tpu.matmul %221, %222, %cst_130 {dimension_numbers = #tpu.dot_dimension_numbers<[1], [0], [0], [1], [0, 0, 1, 1], [], []>} : vector<128x128xf32>, vector<128x128xf32>, vector<128x128xf32> -> vector<128x128xf32>
    %224 = arith.addf %219, %223 : vector<128x128xf32>
    %c22 = arith.constant 22 : index
    %c0_131 = arith.constant 0 : index
    %c0_132 = arith.constant 0 : index
    %225 = vector.load %arg13[%c22, %c0_131, %c0_132] : memref<27x128x128xf32, #tpu.memory_space<vmem>>, vector<1x128x128xf32>
    %226 = vector.shape_cast %225 : vector<1x128x128xf32> to vector<128x128xf32>
    %227 = vector.extract_strided_slice %115 {offsets = [0, 2816], sizes = [128, 128], strides = [1, 1]} : vector<128x3456xf32> to vector<128x128xf32>
    %cst_133 = arith.constant dense<0.000000e+00> : vector<128x128xf32>
    %228 = tpu.matmul %226, %227, %cst_133 {dimension_numbers = #tpu.dot_dimension_numbers<[1], [0], [0], [1], [0, 0, 1, 1], [], []>} : vector<128x128xf32>, vector<128x128xf32>, vector<128x128xf32> -> vector<128x128xf32>
    %229 = arith.addf %224, %228 : vector<128x128xf32>
    %c23 = arith.constant 23 : index
    %c0_134 = arith.constant 0 : index
    %c0_135 = arith.constant 0 : index
    %230 = vector.load %arg13[%c23, %c0_134, %c0_135] : memref<27x128x128xf32, #tpu.memory_space<vmem>>, vector<1x128x128xf32>
    %231 = vector.shape_cast %230 : vector<1x128x128xf32> to vector<128x128xf32>
    %232 = vector.extract_strided_slice %115 {offsets = [0, 2944], sizes = [128, 128], strides = [1, 1]} : vector<128x3456xf32> to vector<128x128xf32>
    %cst_136 = arith.constant dense<0.000000e+00> : vector<128x128xf32>
    %233 = tpu.matmul %231, %232, %cst_136 {dimension_numbers = #tpu.dot_dimension_numbers<[1], [0], [0], [1], [0, 0, 1, 1], [], []>} : vector<128x128xf32>, vector<128x128xf32>, vector<128x128xf32> -> vector<128x128xf32>
    %234 = arith.addf %229, %233 : vector<128x128xf32>
    %c24 = arith.constant 24 : index
    %c0_137 = arith.constant 0 : index
    %c0_138 = arith.constant 0 : index
    %235 = vector.load %arg13[%c24, %c0_137, %c0_138] : memref<27x128x128xf32, #tpu.memory_space<vmem>>, vector<1x128x128xf32>
    %236 = vector.shape_cast %235 : vector<1x128x128xf32> to vector<128x128xf32>
    %237 = vector.extract_strided_slice %115 {offsets = [0, 3072], sizes = [128, 128], strides = [1, 1]} : vector<128x3456xf32> to vector<128x128xf32>
    %cst_139 = arith.constant dense<0.000000e+00> : vector<128x128xf32>
    %238 = tpu.matmul %236, %237, %cst_139 {dimension_numbers = #tpu.dot_dimension_numbers<[1], [0], [0], [1], [0, 0, 1, 1], [], []>} : vector<128x128xf32>, vector<128x128xf32>, vector<128x128xf32> -> vector<128x128xf32>
    %239 = arith.addf %234, %238 : vector<128x128xf32>
    %c25 = arith.constant 25 : index
    %c0_140 = arith.constant 0 : index
    %c0_141 = arith.constant 0 : index
    %240 = vector.load %arg13[%c25, %c0_140, %c0_141] : memref<27x128x128xf32, #tpu.memory_space<vmem>>, vector<1x128x128xf32>
    %241 = vector.shape_cast %240 : vector<1x128x128xf32> to vector<128x128xf32>
    %242 = vector.extract_strided_slice %115 {offsets = [0, 3200], sizes = [128, 128], strides = [1, 1]} : vector<128x3456xf32> to vector<128x128xf32>
    %cst_142 = arith.constant dense<0.000000e+00> : vector<128x128xf32>
    %243 = tpu.matmul %241, %242, %cst_142 {dimension_numbers = #tpu.dot_dimension_numbers<[1], [0], [0], [1], [0, 0, 1, 1], [], []>} : vector<128x128xf32>, vector<128x128xf32>, vector<128x128xf32> -> vector<128x128xf32>
    %244 = arith.addf %239, %243 : vector<128x128xf32>
    %c26 = arith.constant 26 : index
    %c0_143 = arith.constant 0 : index
    %c0_144 = arith.constant 0 : index
    %245 = vector.load %arg13[%c26, %c0_143, %c0_144] : memref<27x128x128xf32, #tpu.memory_space<vmem>>, vector<1x128x128xf32>
    %246 = vector.shape_cast %245 : vector<1x128x128xf32> to vector<128x128xf32>
    %247 = vector.extract_strided_slice %115 {offsets = [0, 3328], sizes = [128, 128], strides = [1, 1]} : vector<128x3456xf32> to vector<128x128xf32>
    %cst_145 = arith.constant dense<0.000000e+00> : vector<128x128xf32>
    %248 = tpu.matmul %246, %247, %cst_145 {dimension_numbers = #tpu.dot_dimension_numbers<[1], [0], [0], [1], [0, 0, 1, 1], [], []>} : vector<128x128xf32>, vector<128x128xf32>, vector<128x128xf32> -> vector<128x128xf32>
    %249 = arith.addf %244, %248 : vector<128x128xf32>
    %250 = vector.extract_strided_slice %249 {offsets = [0, 0], sizes = [128, 32], strides = [1, 1]} : vector<128x128xf32> to vector<128x32xf32>
    %c2_146 = arith.constant 2 : index
    %c0_147 = arith.constant 0 : index
    %c0_148 = arith.constant 0 : index
    %251 = vector.load %arg16[%c2_146, %c0_147, %c0_148] : memref<6x1x32xf32, #tpu.memory_space<vmem>>, vector<1x1x32xf32>
    %252 = vector.shape_cast %251 : vector<1x1x32xf32> to vector<1x32xf32>
    %253 = vector.broadcast %252 : vector<1x32xf32> to vector<128x32xf32>
    %254 = arith.addf %250, %253 : vector<128x32xf32>
    %c0_149 = arith.constant 0 : index
    %c0_150 = arith.constant 0 : index
    %255 = vector.load %arg7[%c0_149, %c0_150] : memref<40x16xf32, #tpu.memory_space<vmem>>, vector<40x16xf32>
    %cst_151 = arith.constant dense<0.000000e+00> : vector<40x32xf32>
    %256 = tpu.matmul %255, %86, %cst_151 {dimension_numbers = #tpu.dot_dimension_numbers<[1], [0], [0], [1], [0, 0, 1, 1], [], []>} : vector<40x16xf32>, vector<16x32xf32>, vector<40x32xf32> -> vector<40x32xf32>
    %c0_152 = arith.constant 0 : index
    %c0_153 = arith.constant 0 : index
    %257 = vector.load %arg20[%c0_152, %c0_153] : memref<48x32xf32, #tpu.memory_space<vmem>>, vector<32x32xf32>
    %cst_154 = arith.constant dense<0.000000e+00> : vector<40x32xf32>
    %258 = tpu.matmul %256, %257, %cst_154 {dimension_numbers = #tpu.dot_dimension_numbers<[1], [0], [0], [1], [0, 0, 1, 1], [], []>} : vector<40x32xf32>, vector<32x32xf32>, vector<40x32xf32> -> vector<40x32xf32>
    %c0_155 = arith.constant 0 : index
    %c0_156 = arith.constant 0 : index
    %259 = vector.load %arg4[%c0_155, %c0_156] : memref<40x16xf32, #tpu.memory_space<vmem>>, vector<40x16xf32>
    %c32_157 = arith.constant 32 : index
    %c0_158 = arith.constant 0 : index
    %260 = vector.load %arg20[%c32_157, %c0_158] : memref<48x32xf32, #tpu.memory_space<vmem>>, vector<16x32xf32>
    %cst_159 = arith.constant dense<0.000000e+00> : vector<40x32xf32>
    %261 = tpu.matmul %259, %260, %cst_159 {dimension_numbers = #tpu.dot_dimension_numbers<[1], [0], [0], [1], [0, 0, 1, 1], [], []>} : vector<40x16xf32>, vector<16x32xf32>, vector<40x32xf32> -> vector<40x32xf32>
    %262 = arith.addf %258, %261 : vector<40x32xf32>
    %c3_160 = arith.constant 3 : index
    %c0_161 = arith.constant 0 : index
    %c0_162 = arith.constant 0 : index
    %263 = vector.load %arg16[%c3_160, %c0_161, %c0_162] : memref<6x1x32xf32, #tpu.memory_space<vmem>>, vector<1x1x32xf32>
    %264 = vector.shape_cast %263 : vector<1x1x32xf32> to vector<1x32xf32>
    %265 = vector.broadcast %264 : vector<1x32xf32> to vector<40x32xf32>
    %266 = arith.addf %262, %265 : vector<40x32xf32>
    %267 = arith.negf %266 : vector<40x32xf32>
    %268 = math.exp %267 : vector<40x32xf32>
    %cst_163 = arith.constant 1.000000e+00 : f32
    %269 = vector.broadcast %cst_163 : f32 to vector<40x32xf32>
    %270 = arith.addf %269, %268 : vector<40x32xf32>
    %271 = arith.divf %269, %270 : vector<40x32xf32>
    %272 = arith.mulf %266, %271 : vector<40x32xf32>
    %c0_164 = arith.constant 0 : index
    %c0_165 = arith.constant 0 : index
    %273 = vector.load %arg8[%c0_164, %c0_165] : memref<128x40xf32, #tpu.memory_space<vmem>>, vector<128x40xf32>
    %cst_166 = arith.constant dense<0.000000e+00> : vector<128x32xf32>
    %274 = tpu.matmul %273, %272, %cst_166 {dimension_numbers = #tpu.dot_dimension_numbers<[1], [0], [0], [1], [0, 0, 1, 1], [], []>} : vector<128x40xf32>, vector<40x32xf32>, vector<128x32xf32> -> vector<128x32xf32>
    %c0_167 = arith.constant 0 : index
    %c0_168 = arith.constant 0 : index
    %275 = vector.load %arg9[%c0_167, %c0_168] : memref<40x128xf32, #tpu.memory_space<vmem>>, vector<40x128xf32>
    %cst_169 = arith.constant dense<0.000000e+00> : vector<40x32xf32>
    %276 = tpu.matmul %275, %254, %cst_169 {dimension_numbers = #tpu.dot_dimension_numbers<[1], [0], [0], [1], [0, 0, 1, 1], [], []>} : vector<40x128xf32>, vector<128x32xf32>, vector<40x32xf32> -> vector<40x32xf32>
    %c0_170 = arith.constant 0 : index
    %c0_171 = arith.constant 0 : index
    %277 = vector.load %arg21[%c0_170, %c0_171] : memref<48x32xf32, #tpu.memory_space<vmem>>, vector<32x32xf32>
    %cst_172 = arith.constant dense<0.000000e+00> : vector<40x32xf32>
    %278 = tpu.matmul %276, %277, %cst_172 {dimension_numbers = #tpu.dot_dimension_numbers<[1], [0], [0], [1], [0, 0, 1, 1], [], []>} : vector<40x32xf32>, vector<32x32xf32>, vector<40x32xf32> -> vector<40x32xf32>
    %c0_173 = arith.constant 0 : index
    %c0_174 = arith.constant 0 : index
    %279 = vector.load %arg5[%c0_173, %c0_174] : memref<40x16xf32, #tpu.memory_space<vmem>>, vector<40x16xf32>
    %c32_175 = arith.constant 32 : index
    %c0_176 = arith.constant 0 : index
    %280 = vector.load %arg21[%c32_175, %c0_176] : memref<48x32xf32, #tpu.memory_space<vmem>>, vector<16x32xf32>
    %cst_177 = arith.constant dense<0.000000e+00> : vector<40x32xf32>
    %281 = tpu.matmul %279, %280, %cst_177 {dimension_numbers = #tpu.dot_dimension_numbers<[1], [0], [0], [1], [0, 0, 1, 1], [], []>} : vector<40x16xf32>, vector<16x32xf32>, vector<40x32xf32> -> vector<40x32xf32>
    %282 = arith.addf %278, %281 : vector<40x32xf32>
    %c4_178 = arith.constant 4 : index
    %c0_179 = arith.constant 0 : index
    %c0_180 = arith.constant 0 : index
    %283 = vector.load %arg16[%c4_178, %c0_179, %c0_180] : memref<6x1x32xf32, #tpu.memory_space<vmem>>, vector<1x1x32xf32>
    %284 = vector.shape_cast %283 : vector<1x1x32xf32> to vector<1x32xf32>
    %285 = vector.broadcast %284 : vector<1x32xf32> to vector<40x32xf32>
    %286 = arith.addf %282, %285 : vector<40x32xf32>
    %287 = arith.negf %286 : vector<40x32xf32>
    %288 = math.exp %287 : vector<40x32xf32>
    %cst_181 = arith.constant 1.000000e+00 : f32
    %289 = vector.broadcast %cst_181 : f32 to vector<40x32xf32>
    %290 = arith.addf %289, %288 : vector<40x32xf32>
    %291 = arith.divf %289, %290 : vector<40x32xf32>
    %292 = arith.mulf %286, %291 : vector<40x32xf32>
    %c0_182 = arith.constant 0 : index
    %c0_183 = arith.constant 0 : index
    %293 = vector.load %arg10[%c0_182, %c0_183] : memref<16x40xf32, #tpu.memory_space<vmem>>, vector<16x40xf32>
    %cst_184 = arith.constant dense<0.000000e+00> : vector<16x32xf32>
    %294 = tpu.matmul %293, %292, %cst_184 {dimension_numbers = #tpu.dot_dimension_numbers<[1], [0], [0], [1], [0, 0, 1, 1], [], []>} : vector<16x40xf32>, vector<40x32xf32>, vector<16x32xf32> -> vector<16x32xf32>
    %c0_185 = arith.constant 0 : index
    %c0_186 = arith.constant 0 : index
    %295 = vector.load %arg11[%c0_185, %c0_186] : memref<24x16xf32, #tpu.memory_space<vmem>>, vector<24x16xf32>
    %cst_187 = arith.constant dense<0.000000e+00> : vector<24x32xf32>
    %296 = tpu.matmul %295, %294, %cst_187 {dimension_numbers = #tpu.dot_dimension_numbers<[1], [0], [0], [1], [0, 0, 1, 1], [], []>} : vector<24x16xf32>, vector<16x32xf32>, vector<24x32xf32> -> vector<24x32xf32>
    %c0_188 = arith.constant 0 : index
    %c0_189 = arith.constant 0 : index
    %297 = vector.load %arg12[%c0_188, %c0_189] : memref<24x16xf32, #tpu.memory_space<vmem>>, vector<24x16xf32>
    %cst_190 = arith.constant dense<0.000000e+00> : vector<24x32xf32>
    %298 = tpu.matmul %297, %294, %cst_190 {dimension_numbers = #tpu.dot_dimension_numbers<[1], [0], [0], [1], [0, 0, 1, 1], [], []>} : vector<24x16xf32>, vector<16x32xf32>, vector<24x32xf32> -> vector<24x32xf32>
    %c0_191 = arith.constant 0 : index
    %c0_192 = arith.constant 0 : index
    %299 = vector.load %arg22[%c0_191, %c0_192] : memref<64x32xf32, #tpu.memory_space<vmem>>, vector<32x32xf32>
    %cst_193 = arith.constant dense<0.000000e+00> : vector<24x32xf32>
    %300 = tpu.matmul %296, %299, %cst_193 {dimension_numbers = #tpu.dot_dimension_numbers<[1], [0], [0], [1], [0, 0, 1, 1], [], []>} : vector<24x32xf32>, vector<32x32xf32>, vector<24x32xf32> -> vector<24x32xf32>
    %c32_194 = arith.constant 32 : index
    %c0_195 = arith.constant 0 : index
    %301 = vector.load %arg22[%c32_194, %c0_195] : memref<64x32xf32, #tpu.memory_space<vmem>>, vector<32x32xf32>
    %cst_196 = arith.constant dense<0.000000e+00> : vector<24x32xf32>
    %302 = tpu.matmul %298, %301, %cst_196 {dimension_numbers = #tpu.dot_dimension_numbers<[1], [0], [0], [1], [0, 0, 1, 1], [], []>} : vector<24x32xf32>, vector<32x32xf32>, vector<24x32xf32> -> vector<24x32xf32>
    %303 = arith.addf %300, %302 : vector<24x32xf32>
    %c5_197 = arith.constant 5 : index
    %c0_198 = arith.constant 0 : index
    %c0_199 = arith.constant 0 : index
    %304 = vector.load %arg16[%c5_197, %c0_198, %c0_199] : memref<6x1x32xf32, #tpu.memory_space<vmem>>, vector<1x1x32xf32>
    %305 = vector.shape_cast %304 : vector<1x1x32xf32> to vector<1x32xf32>
    %306 = vector.broadcast %305 : vector<1x32xf32> to vector<24x32xf32>
    %307 = arith.addf %303, %306 : vector<24x32xf32>
    %308 = arith.negf %307 : vector<24x32xf32>
    %309 = math.exp %308 : vector<24x32xf32>
    %cst_200 = arith.constant 1.000000e+00 : f32
    %310 = vector.broadcast %cst_200 : f32 to vector<24x32xf32>
    %311 = arith.addf %310, %309 : vector<24x32xf32>
    %312 = arith.divf %310, %311 : vector<24x32xf32>
    %313 = arith.mulf %307, %312 : vector<24x32xf32>
    %c0_201 = arith.constant 0 : index
    %c0_202 = arith.constant 0 : index
    %314 = vector.load %arg23[%c0_201, %c0_202] : memref<16x32xf32, #tpu.memory_space<vmem>>, vector<16x32xf32>
    tpu.vector_store %arg23[%c0_201, %c0_202], %86 {strides = array<i32>} : memref<16x32xf32, #tpu.memory_space<vmem>>, vector<16x32xf32>,
    %c3_203 = arith.constant 3 : index
    %c0_204 = arith.constant 0 : index
    %c0_205 = arith.constant 0 : index
    %315 = vector.load %arg14[%c3_203, %c0_204, %c0_205] : memref<5x1x32xf32, #tpu.memory_space<vmem>>, vector<1x1x32xf32>
    %316 = vector.shape_cast %315 : vector<1x1x32xf32> to vector<1x32xf32>
    %c3_206 = arith.constant 3 : index
    %c0_207 = arith.constant 0 : index
    %c0_208 = arith.constant 0 : index
    %317 = vector.load %arg15[%c3_206, %c0_207, %c0_208] : memref<5x1x32xf32, #tpu.memory_space<vmem>>, vector<1x1x32xf32>
    %318 = vector.shape_cast %317 : vector<1x1x32xf32> to vector<1x32xf32>
    %cst_209 = arith.constant dense<0.000000e+00> : vector<128xf32>
    %319 = vector.multi_reduction <add>, %274, %cst_209 [1] : vector<128x32xf32> to vector<128xf32>
    %320 = vector.shape_cast %319 : vector<128xf32> to vector<128x1xf32>
    %cst_210 = arith.constant 3.200000e+01 : f32
    %321 = vector.broadcast %cst_210 : f32 to vector<128x1xf32>
    %322 = arith.divf %320, %321 : vector<128x1xf32>
    %323 = vector.broadcast %322 : vector<128x1xf32> to vector<128x32xf32>
    %324 = arith.subf %274, %323 : vector<128x32xf32>
    %325 = arith.mulf %324, %324 : vector<128x32xf32>
    %cst_211 = arith.constant dense<0.000000e+00> : vector<128xf32>
    %326 = vector.multi_reduction <add>, %325, %cst_211 [1] : vector<128x32xf32> to vector<128xf32>
    %327 = vector.shape_cast %326 : vector<128xf32> to vector<128x1xf32>
    %cst_212 = arith.constant 3.200000e+01 : f32
    %328 = vector.broadcast %cst_212 : f32 to vector<128x1xf32>
    %329 = arith.divf %327, %328 : vector<128x1xf32>
    %330 = vector.broadcast %322 : vector<128x1xf32> to vector<128x32xf32>
    %331 = arith.subf %274, %330 : vector<128x32xf32>
    %cst_213 = arith.constant 9.99999974E-6 : f32
    %332 = vector.broadcast %cst_213 : f32 to vector<128x1xf32>
    %333 = arith.addf %329, %332 : vector<128x1xf32>
    %334 = math.rsqrt %333 : vector<128x1xf32>
    %335 = vector.broadcast %334 : vector<128x1xf32> to vector<128x32xf32>
    %336 = arith.mulf %331, %335 : vector<128x32xf32>
    %337 = vector.broadcast %316 : vector<1x32xf32> to vector<128x32xf32>
    %338 = arith.mulf %336, %337 : vector<128x32xf32>
    %339 = vector.broadcast %318 : vector<1x32xf32> to vector<128x32xf32>
    %340 = arith.addf %338, %339 : vector<128x32xf32>
    %341 = arith.addf %340, %254 : vector<128x32xf32>
    %c0_214 = arith.constant 0 : index
    %c0_215 = arith.constant 0 : index
    %342 = vector.load %arg1[%c0_214, %c0_215] : memref<128x32xf32, #tpu.memory_space<vmem>>, vector<128x32xf32>
    %343 = arith.addf %341, %342 : vector<128x32xf32>
    %c0_216 = arith.constant 0 : index
    %c0_217 = arith.constant 0 : index
    %344 = vector.load %arg24[%c0_216, %c0_217] : memref<128x32xf32, #tpu.memory_space<vmem>>, vector<128x32xf32>
    tpu.vector_store %arg24[%c0_216, %c0_217], %343 {strides = array<i32>} : memref<128x32xf32, #tpu.memory_space<vmem>>, vector<128x32xf32>,
    %c4_218 = arith.constant 4 : index
    %c0_219 = arith.constant 0 : index
    %c0_220 = arith.constant 0 : index
    %345 = vector.load %arg14[%c4_218, %c0_219, %c0_220] : memref<5x1x32xf32, #tpu.memory_space<vmem>>, vector<1x1x32xf32>
    %346 = vector.shape_cast %345 : vector<1x1x32xf32> to vector<1x32xf32>
    %c4_221 = arith.constant 4 : index
    %c0_222 = arith.constant 0 : index
    %c0_223 = arith.constant 0 : index
    %347 = vector.load %arg15[%c4_221, %c0_222, %c0_223] : memref<5x1x32xf32, #tpu.memory_space<vmem>>, vector<1x1x32xf32>
    %348 = vector.shape_cast %347 : vector<1x1x32xf32> to vector<1x32xf32>
    %cst_224 = arith.constant dense<0.000000e+00> : vector<24xf32>
    %349 = vector.multi_reduction <add>, %313, %cst_224 [1] : vector<24x32xf32> to vector<24xf32>
    %350 = vector.shape_cast %349 : vector<24xf32> to vector<24x1xf32>
    %cst_225 = arith.constant 3.200000e+01 : f32
    %351 = vector.broadcast %cst_225 : f32 to vector<24x1xf32>
    %352 = arith.divf %350, %351 : vector<24x1xf32>
    %353 = vector.broadcast %352 : vector<24x1xf32> to vector<24x32xf32>
    %354 = arith.subf %313, %353 : vector<24x32xf32>
    %355 = arith.mulf %354, %354 : vector<24x32xf32>
    %cst_226 = arith.constant dense<0.000000e+00> : vector<24xf32>
    %356 = vector.multi_reduction <add>, %355, %cst_226 [1] : vector<24x32xf32> to vector<24xf32>
    %357 = vector.shape_cast %356 : vector<24xf32> to vector<24x1xf32>
    %cst_227 = arith.constant 3.200000e+01 : f32
    %358 = vector.broadcast %cst_227 : f32 to vector<24x1xf32>
    %359 = arith.divf %357, %358 : vector<24x1xf32>
    %360 = vector.broadcast %352 : vector<24x1xf32> to vector<24x32xf32>
    %361 = arith.subf %313, %360 : vector<24x32xf32>
    %cst_228 = arith.constant 9.99999974E-6 : f32
    %362 = vector.broadcast %cst_228 : f32 to vector<24x1xf32>
    %363 = arith.addf %359, %362 : vector<24x1xf32>
    %364 = math.rsqrt %363 : vector<24x1xf32>
    %365 = vector.broadcast %364 : vector<24x1xf32> to vector<24x32xf32>
    %366 = arith.mulf %361, %365 : vector<24x32xf32>
    %367 = vector.broadcast %346 : vector<1x32xf32> to vector<24x32xf32>
    %368 = arith.mulf %366, %367 : vector<24x32xf32>
    %369 = vector.broadcast %348 : vector<1x32xf32> to vector<24x32xf32>
    %370 = arith.addf %368, %369 : vector<24x32xf32>
    %371 = arith.addf %69, %370 : vector<24x32xf32>
    %c0_229 = arith.constant 0 : index
    %c0_230 = arith.constant 0 : index
    %372 = vector.load %arg25[%c0_229, %c0_230] : memref<24x32xf32, #tpu.memory_space<vmem>>, vector<24x32xf32>
    tpu.vector_store %arg25[%c0_229, %c0_230], %371 {strides = array<i32>} : memref<24x32xf32, #tpu.memory_space<vmem>>, vector<24x32xf32>,
    return
  }
}

</mosaic_0001>

<bundles_post_ra>
// kernel: short_long_mix_forward.1
= control target key start
LH: loop header
LB: loop body
LE: loop exit
PB: predicated region body
PF: predicated region fallthrough
CT: control target
= control target key end

     0   :  { %s20010_s0 = inlined_call_operand.vmem [shape: f32[16,32], index: 0, kind: input, shape index: {}]   ;;  %s20011_s1 = inlined_call_operand.vmem [shape: f32[128,32], index: 1, kind: input, shape index: {}]   ;;  %s20012_s2 = inlined_call_operand.vmem [shape: f32[24,32], index: 2, kind: input, shape index: {}]   ;;  %s20013_s3 = inlined_call_operand.vmem [shape: f32[24,16], index: 3, kind: input, shape index: {}]   ;;  %s20014_s4 = inlined_call_operand.vmem [shape: f32[40,16], index: 4, kind: input, shape index: {}]   ;;  %s20015_s5 = inlined_call_operand.vmem [shape: f32[40,16], index: 5, kind: input, shape index: {}]   ;;  %s20016_s6 = inlined_call_operand.vmem [shape: f32[16,24], index: 6, kind: input, shape index: {}]   ;;  %s20017_s7 = inlined_call_operand.vmem [shape: f32[40,16], index: 7, kind: input, shape index: {}]   ;;  %s20018_s8 = inlined_call_operand.vmem [shape: f32[128,40], index: 8, kind: input, shape index: {}]   ;;  %s20019_s9 = inlined_call_operand.vmem [shape: f32[40,128], index: 9, kind: input, shape index: {}]   ;;  %s20020_s10 = inlined_call_operand.vmem [shape: f32[16,40], index: 10, kind: input, shape index: {}]   ;;  %s20021_s11 = inlined_call_operand.vmem [shape: f32[24,16], index: 11, kind: input, shape index: {}]   ;;  %s20022_s12 = inlined_call_operand.vmem [shape: f32[24,16], index: 12, kind: input, shape index: {}]   ;;  %s20023_s13 = inlined_call_operand.vmem [shape: f32[27,128,128], index: 13, kind: input, shape index: {}]   ;;  %s20024_s14 = inlined_call_operand.vmem [shape: f32[5,1,32], index: 14, kind: input, shape index: {}]   ;;  %s20025_s15 = inlined_call_operand.vmem [shape: f32[5,1,32], index: 15, kind: input, shape index: {}]   ;;  %s20026_s16 = inlined_call_operand.vmem [shape: f32[6,1,32], index: 16, kind: input, shape index: {}]   ;;  %s20027_s17 = inlined_call_operand.vmem [shape: f32[48,32], index: 17, kind: input, shape index: {}]   ;;  %s20028_s18 = inlined_call_operand.vmem [shape: f32[64,32], index: 18, kind: input, shape index: {}]   ;;  %s20029_s19 = inlined_call_operand.vmem [shape: f32[32,3456], index: 19, kind: input, shape index: {}]   ;;  %s20030_s20 = inlined_call_operand.vmem [shape: f32[48,32], index: 20, kind: input, shape index: {}]   ;;  %s20031_s21 = inlined_call_operand.vmem [shape: f32[48,32], index: 21, kind: input, shape index: {}]   ;;  %s20032_s22 = inlined_call_operand.vmem [shape: f32[64,32], index: 22, kind: input, shape index: {}]   ;;  %s20033_s23 = inlined_call_operand.hbm [shape: f32[16,32], index: 23, kind: output, shape index: {0}]   ;;  %s20034_s24 = inlined_call_operand.vmem [shape: f32[128,32], index: 24, kind: output, shape index: {1}]   ;;  %s20035_s25 = inlined_call_operand.hbm [shape: f32[24,32], index: 25, kind: output, shape index: {2}]  }
   0x1   :  { %20064 = sst [smem:[#allocation24_spill]] %s20010_s0 }
   0x2   :  { %20065 = sst [smem:[#allocation25_spill]] %s20011_s1 }
   0x3   :  { %20066 = sst [smem:[#allocation26_spill]] %s20012_s2 }
   0x4   :  { %20067 = sst [smem:[#allocation27_spill]] %s20013_s3 }
   0x5   :  { %20068 = sst [smem:[#allocation28_spill]] %s20014_s4 }
   0x6   :  { %20069 = sst [smem:[#allocation29_spill]] %s20015_s5 }
   0x7   :  { %20070 = sst [smem:[#allocation30_spill]] %s20016_s6 }
   0x8   :  { %20071 = sst [smem:[#allocation31_spill]] %s20017_s7 }
   0x9   :  { %20072 = sst [smem:[#allocation32_spill]] %s20018_s8 }
   0xa   :  { %20073 = sst [smem:[#allocation33_spill]] %s20019_s9 }
   0xb   :  { %31 = vsyncpa [#allocation3], 0  ;;  %vm83_vm0 = vcmask 261120   ;;  %s20074_s6 = sld [smem:[#allocation26_spill]] }
  0x11   :  { %v127_v0 = vld [vmem:[%s20074_s6] sm:$0xff]  ;;  %v129_v1 = vld [vmem:[%s20074_s6 + $0x10] sm:$0xff]  ;;  %v128_v2 = vld [vmem:[%s20074_s6 + $0x8] sm:$0xff] }
  0x12   :  { %v134_v3 = vsel %vm83_vm0, %v127_v0, 0.0  ;;  %v140_v4 = vsel %vm83_vm0, %v129_v1, 0.0 }
  0x13   :  { %32 = vsyncpa [#allocation5], 0  ;;  %135 = vadd.xlane.f32.xlu0 %v134_v3  ;;  %141 = vadd.xlane.f32.xlu1 %v140_v4  ;;  %v137_v5 = vsel %vm83_vm0, %v128_v2, 0.0  ;;  %s20075_s27 = sld [smem:[#allocation25_spill]]  ;;  %v191_v47 = vld [vmem:[%s20027_s17] sm:$0xff]  ;;  %v192_v48 = vld [vmem:[%s20027_s17 + $0x8] sm:$0xff] }
  0x14   :  { %v13659_v49 = vpack.c.bf16 %v192_v48, %v191_v47  ;;  %v20046_v53 = vmov 0.0|0.0   ;;  %v198_v54 = vld [vmem:[%s20027_s17 + $0x20] sm:$0xff]  ;;  %v199_v55 = vld [vmem:[%s20027_s17 + $0x28] sm:$0xff]  ;;  %v193_v58 = vld [vmem:[%s20027_s17 + $0x10] sm:$0xff]  ;;  %vm15365_vm1 = vmmov 0   ;;  %v15366_v63 = vmov 0.0  }
  0x15   :  { %13658 = vmatprep.subr.bf16.mxu1 %v20046_v53  ;;  %13655 = vmatprep.subr.bf16.mxu0 %v20046_v53  ;;  %v13656_v57 = vpack.c.bf16 %v199_v55, %v198_v54  ;;  %v194_v59 = vld [vmem:[%s20027_s17 + $0x18] sm:$0xff]  ;;  %s20076_s28 = sld [smem:[#allocation27_spill]]  ;;  %vm200_vm2 = vcmask 130048   ;;  %s20077_s1 = sld [smem:[#allocation24_spill]]  ;;  %vm412_vm3 = vcmask 195584   ;;  %vm8546_vm4 = vcmask 326656  }
  0x16   :  { %13660 = vmatpush3.bf16.msra.mxu1 %v13659_v49  ;;  %v13662_v60 = vpack.c.bf16 %v194_v59, %v193_v58  ;;  %11797 = vmatprep.mubr.msk.f32.mxu0 %vm15365_vm1, %v15366_v63  ;;  %s20078_s9 = sld [smem:[#allocation30_spill]]  ;;  %s20097_s17 = sld [smem:[#allocation31_spill]] }
  0x17   :  { %138 = vadd.xlane.f32.xlu0 %v137_v5  ;;  %13661 = vmatprep.subr.bf16.mxu1 %v20046_v53  ;;  %s20098_s8 = sld [smem:[#allocation28_spill]]  ;;  %s20113_s7 = sld [smem:[#allocation33_spill]] }
  0x18   :  { %13657 = vmatpush3.bf16.msra.mxu0 %v13656_v57  ;;  %11814 = vmatprep.mubr.msk.f32.mxu1 %vm15365_vm1, %v15366_v63  ;;  %s20114_s2 = sld [smem:[#allocation29_spill]] }
  0x19   :  { %v15530_v20 = vld [vmem:[%s20075_s27 + $0x8] sm:$0xff]  ;;  %v15535_v21 = vld [vmem:[%s20075_s27] sm:$0xff]  ;;  %v15545_v25 = vld [vmem:[%s20075_s27 + $0x18] sm:$0xff] }
  0x1a   :  { %v711_v23 = vsel %vm83_vm0, %v15530_v20, 0.0  ;;  %v708_v24 = vsel %vm83_vm0, %v15535_v21, 0.0  ;;  %v15550_v26 = vld [vmem:[%s20075_s27 + $0x10] sm:$0xff]  ;;  %v717_v27 = vsel %vm83_vm0, %v15545_v25, 0.0  ;;  %v15559_v29 = vld [vmem:[%s20075_s27 + $0x28] sm:$0xff]  ;;  %v15564_v30 = vld [vmem:[%s20075_s27 + $0x20] sm:$0xff]  ;;  %13663 = vmatpush3.bf16.msra.mxu1 %v13662_v60 }
  0x1b   :  { %v714_v28 = vsel %vm83_vm0, %v15550_v26, 0.0  ;;  %v723_v31 = vsel %vm83_vm0, %v15559_v29, 0.0  ;;  %v720_v32 = vsel %vm83_vm0, %v15564_v30, 0.0  ;;  %v15573_v33 = vld [vmem:[%s20075_s27 + $0x38] sm:$0xff]  ;;  %v15578_v34 = vld [vmem:[%s20075_s27 + $0x30] sm:$0xff]  ;;  %v15587_v37 = vld [vmem:[%s20075_s27 + $0x48] sm:$0xff] }
  0x1c   :  { %v729_v35 = vsel %vm83_vm0, %v15573_v33, 0.0  ;;  %v726_v36 = vsel %vm83_vm0, %v15578_v34, 0.0  ;;  %v15592_v38 = vld [vmem:[%s20075_s27 + $0x40] sm:$0xff]  ;;  %v735_v39 = vsel %vm83_vm0, %v15587_v37, 0.0  ;;  %v15601_v41 = vld [vmem:[%s20075_s27 + $0x58] sm:$0xff]  ;;  %v15606_v42 = vld [vmem:[%s20075_s27 + $0x50] sm:$0xff] }
  0x1d   :  { %v732_v40 = vsel %vm83_vm0, %v15592_v38, 0.0  ;;  %v741_v43 = vsel %vm83_vm0, %v15601_v41, 0.0  ;;  %v738_v44 = vsel %vm83_vm0, %v15606_v42, 0.0  ;;  %v15615_v45 = vld [vmem:[%s20075_s27 + $0x68] sm:$0xff]  ;;  %v15620_v46 = vld [vmem:[%s20075_s27 + $0x60] sm:$0xff]  ;;  %v15635_v52 = vld [vmem:[%s20075_s27 + $0x78] sm:$0xff] }
  0x1e   :  { %v747_v50 = vsel %vm83_vm0, %v15615_v45, 0.0  ;;  %v744_v51 = vsel %vm83_vm0, %v15620_v46, 0.0  ;;  %v15648_v56 = vld [vmem:[%s20075_s27 + $0x70] sm:$0xff]  ;;  %v753_v61 = vsel %vm83_vm0, %v15635_v52, 0.0 }
  0x1f   :  { %v750_v62 = vsel %vm83_vm0, %v15648_v56, 0.0 }
  0xa0   :  { %v136_v6 = vpop.xlane.xlu0 %135  ;;  %v142_v7 = vpop.xlane.xlu1 %141 }
  0xa1   :  { %v143_v8 = vmul.f32 0.03125, %v136_v6  ;;  %v145_v9 = vmul.f32 0.03125, %v142_v7 }
  0xa3   :  { %v15513_v10 = vsub.f32 %v127_v0, %v143_v8  ;;  %v15515_v11 = vsub.f32 %v129_v1, %v145_v9  ;;  %v195_v0 = vld [vmem:[%s20076_s28] sm:$0xff]  ;;  %v196_v1 = vld [vmem:[%s20076_s28 + $0x8] sm:$0xff] }
  0xa4   :  { %v139_v12 = vpop.xlane.xlu0 %138  ;;  %11798 = vmatmul.mubr.msk.f32.vlgmr.msra.gmra.mrb[0].mxu0 %vm200_vm2, %v195_v0 }
  0xa5   :  { %v144_v13 = vmul.f32 0.03125, %v139_v12  ;;  %v149_v14 = vmul.f32 %v15513_v10, %v15513_v10  ;;  %v151_v15 = vmul.f32 %v15515_v11, %v15515_v11  ;;  %11800 = vmatprep.mubr.msk.f32.mxu0 %vm15365_vm1, %v15366_v63 }
  0xa7   :  { %v15521_v16 = vsub.f32 %v128_v2, %v144_v13  ;;  %v152_v17 = vsel %vm83_vm0, %v149_v14, 0.0  ;;  %v158_v18 = vsel %vm83_vm0, %v151_v15, 0.0  ;;  %v197_v2 = vld [vmem:[%s20076_s28 + $0x10] sm:$0xff] }
  0xa8   :  { %153 = vadd.xlane.f32.xlu1 %v152_v17  ;;  %11801 = vmatmul.mubr.msk.f32.gmra.mrb[2].mxu0 %vm200_vm2, %v196_v1 }
  0xa9   :  { %v150_v19 = vmul.f32 %v15521_v16, %v15521_v16  ;;  %11803 = vmatprep.mubr.msk.f32.mxu0 %vm15365_vm1, %v15366_v63 }
  0xab   :  { %v155_v22 = vsel %vm83_vm0, %v150_v19, 0.0 }
  0xac   :  { %159 = vadd.xlane.f32.xlu1 %v158_v18  ;;  %156 = vadd.xlane.f32.xlu0 %v155_v22 }
  0xad   :  { %11804 = vmatmul.mubr.msk.f32.gmra.mrb[4].mxu0 %vm200_vm2, %v197_v2 }
  0xb0   :  { %712 = vadd.xlane.f32.xlu1 %v711_v23  ;;  %709 = vadd.xlane.f32.xlu0 %v708_v24 }
  0xb4   :  { %718 = vadd.xlane.f32.xlu1 %v717_v27  ;;  %715 = vadd.xlane.f32.xlu0 %v714_v28 }
  0xb8   :  { %724 = vadd.xlane.f32.xlu1 %v723_v31  ;;  %721 = vadd.xlane.f32.xlu0 %v720_v32 }
  0xbc   :  { %730 = vadd.xlane.f32.xlu1 %v729_v35  ;;  %727 = vadd.xlane.f32.xlu0 %v726_v36 }
  0xc0   :  { %736 = vadd.xlane.f32.xlu1 %v735_v39  ;;  %733 = vadd.xlane.f32.xlu0 %v732_v40  ;;  %v10018_v40 = vld [vmem:[%s20024_s14 + $0x1] ss:$0 sm:$0xff] }
  0xc4   :  { %742 = vadd.xlane.f32.xlu1 %v741_v43  ;;  %739 = vadd.xlane.f32.xlu0 %v738_v44 }
  0xc8   :  { %748 = vadd.xlane.f32.xlu1 %v747_v50  ;;  %745 = vadd.xlane.f32.xlu0 %v744_v51  ;;  %v10019_v50 = vld [vmem:[%s20025_s15 + $0x1] ss:$0 sm:$0xff] }
  0xcc   :  { %754 = vadd.xlane.f32.xlu1 %v753_v61  ;;  %751 = vadd.xlane.f32.xlu0 %v750_v62 }
 0x135   :  { %v154_v3 = vpop.xlane.xlu1 %153 }
 0x136   :  { %v161_v4 = vmul.f32 0.03125, %v154_v3 }
 0x138   :  { %v164_v5 = vadd.f32 1e-05, %v161_v4 }
 0x139   :  { %v160_v6 = vpop.xlane.xlu1 %159  ;;  %v157_v7 = vpop.xlane.xlu0 %156 }
 0x13a   :  { %15164 = vrsqrt.f32 %v164_v5  ;;  %v163_v8 = vmul.f32 0.03125, %v160_v6  ;;  %v162_v9 = vmul.f32 0.03125, %v157_v7 }
 0x13c   :  { %v166_v12 = vadd.f32 1e-05, %v163_v8  ;;  %v165_v13 = vadd.f32 1e-05, %v162_v9 }
 0x13d   :  { %v713_v14 = vpop.xlane.xlu1 %712  ;;  %v710_v15 = vpop.xlane.xlu0 %709 }
 0x13e   :  { %15166 = vrsqrt.f32 %v166_v12  ;;  %v757_v17 = vmul.f32 0.03125, %v713_v14  ;;  %v756_v18 = vmul.f32 0.03125, %v710_v15 }
 0x13f   :  { %15168 = vrsqrt.f32 %v165_v13 }
 0x140   :  { %v15682_v19 = vsub.f32 %v15530_v20, %v757_v17  ;;  %v15685_v22 = vsub.f32 %v15535_v21, %v756_v18 }
 0x141   :  { %v719_v23 = vpop.xlane.xlu1 %718  ;;  %v716_v24 = vpop.xlane.xlu0 %715 }
 0x142   :  { %v759_v27 = vmul.f32 0.03125, %v719_v23  ;;  %v758_v28 = vmul.f32 0.03125, %v716_v24  ;;  %v789_v31 = vmul.f32 %v15682_v19, %v15682_v19  ;;  %v788_v32 = vmul.f32 %v15685_v22, %v15685_v22 }
 0x144   :  { %v15165_v35 = vpop.eup %15164  ;;  %v15692_v36 = vsub.f32 %v15545_v25, %v759_v27  ;;  %v15695_v20 = vsub.f32 %v15550_v26, %v758_v28  ;;  %v807_v21 = vsel %vm83_vm0, %v789_v31, 0.0  ;;  %v804_v39 = vsel %vm83_vm0, %v788_v32, 0.0 }
 0x145   :  { %808 = vadd.xlane.f32.xlu1 %v807_v21  ;;  %v725_v43 = vpop.xlane.xlu1 %724  ;;  %805 = vadd.xlane.f32.xlu0 %v804_v39  ;;  %v722_v44 = vpop.xlane.xlu0 %721  ;;  %v170_v47 = vmul.f32 %v15165_v35, %v15513_v10 }
 0x146   :  { %v761_v48 = vmul.f32 0.03125, %v725_v43  ;;  %v760_v25 = vmul.f32 0.03125, %v722_v44  ;;  %v791_v26 = vmul.f32 %v15692_v36, %v15692_v36  ;;  %v790_v49 = vmul.f32 %v15695_v20, %v15695_v20 }
 0x147   :  { %v179_v51 = vmul.f32 %v10018_v40, %v170_v47 }
 0x148   :  { %v15167_v54 = vpop.eup %15166  ;;  %v15711_v55 = vsub.f32 %v15559_v29, %v761_v48  ;;  %v15714_v57 = vsub.f32 %v15564_v30, %v760_v25  ;;  %v813_v10 = vsel %vm83_vm0, %v791_v26, 0.0  ;;  %v810_v58 = vsel %vm83_vm0, %v790_v49, 0.0 }
 0x149   :  { %v15169_v59 = vpop.eup %15168  ;;  %814 = vadd.xlane.f32.xlu1 %v813_v10  ;;  %v731_v60 = vpop.xlane.xlu1 %730  ;;  %811 = vadd.xlane.f32.xlu0 %v810_v58  ;;  %v188_v62 = vadd.f32 %v10019_v50, %v179_v51  ;;  %v172_v3 = vmul.f32 %v15167_v54, %v15515_v11 }
 0x14a   :  { %v728_v61 = vpop.xlane.xlu0 %727  ;;  %v763_v0 = vmul.f32 0.03125, %v731_v60  ;;  %v793_v2 = vmul.f32 %v15711_v55, %v15711_v55  ;;  %v792_v29 = vmul.f32 %v15714_v57, %v15714_v57  ;;  %v171_v30 = vmul.f32 %v15169_v59, %v15521_v16 }
 0x14b   :  { %v762_v1 = vmul.f32 0.03125, %v728_v61  ;;  %11815 = vmatmul.mubr.msk.f32.vlgmr.msra.gmra.mrb[0].mxu1 %vm83_vm0, %v188_v62  ;;  %v181_v14 = vmul.f32 %v10018_v40, %v172_v3 }
 0x14c   :  { %v15726_v4 = vsub.f32 %v15573_v33, %v763_v0  ;;  %v819_v6 = vsel %vm83_vm0, %v793_v2, 0.0  ;;  %v816_v7 = vsel %vm83_vm0, %v792_v29, 0.0  ;;  %11817 = vmatprep.mubr.msk.f32.mxu1 %vm15365_vm1, %v15366_v63  ;;  %v180_v16 = vmul.f32 %v10018_v40, %v171_v30  ;;  %v79_v29 = vld [vmem:[%s20077_s1] sm:$0xff] }
 0x14d   :  { %v15729_v5 = vsub.f32 %v15578_v34, %v762_v1  ;;  %820 = vadd.xlane.f32.xlu1 %v819_v6  ;;  %v737_v8 = vpop.xlane.xlu1 %736  ;;  %817 = vadd.xlane.f32.xlu0 %v816_v7  ;;  %v190_v32 = vadd.f32 %v10019_v50, %v181_v14  ;;  %v84_v3 = vsel %vm83_vm0, %v79_v29, 0.0 }
 0x14e   :  { %v734_v9 = vpop.xlane.xlu0 %733  ;;  %v765_v12 = vmul.f32 0.03125, %v737_v8  ;;  %v795_v33 = vmul.f32 %v15726_v4, %v15726_v4  ;;  %v189_v13 = vadd.f32 %v10019_v50, %v180_v16 }
 0x14f   :  { %v764_v11 = vmul.f32 0.03125, %v734_v9  ;;  %v794_v34 = vmul.f32 %v15729_v5, %v15729_v5 }
 0x150   :  { %v15740_v15 = vsub.f32 %v15587_v37, %v765_v12  ;;  %v825_v18 = vsel %vm83_vm0, %v795_v33, 0.0  ;;  %11818 = vmatmul.mubr.msk.f32.gmra.mrb[2].mxu1 %vm83_vm0, %v189_v13 }
 0x151   :  { %v15743_v17 = vsub.f32 %v15592_v38, %v764_v11  ;;  %v822_v23 = vsel %vm83_vm0, %v794_v34, 0.0  ;;  %826 = vadd.xlane.f32.xlu1 %v825_v18  ;;  %v743_v24 = vpop.xlane.xlu1 %742  ;;  %11820 = vmatprep.mubr.msk.f32.mxu1 %vm15365_vm1, %v15366_v63  ;;  %v410_v11 = vld [vmem:[%s20078_s9] sm:$0xff] }
 0x152   :  { %v740_v27 = vpop.xlane.xlu0 %739  ;;  %v767_v28 = vmul.f32 0.03125, %v743_v24  ;;  %823 = vadd.xlane.f32.xlu0 %v822_v23  ;;  %v797_v37 = vmul.f32 %v15740_v15, %v15740_v15  ;;  %11829 = vmatprep.mubr.msk.f32.mxu0 %vm412_vm3, %v410_v11 }
 0x153   :  { %v766_v31 = vmul.f32 0.03125, %v740_v27  ;;  %v796_v38 = vmul.f32 %v15743_v17, %v15743_v17 }
 0x154   :  { %v15755_v35 = vsub.f32 %v15601_v41, %v767_v28  ;;  %v831_v39 = vsel %vm83_vm0, %v797_v37, 0.0  ;;  %11821 = vmatmul.mubr.msk.f32.gmra.mrb[4].mxu1 %vm83_vm0, %v190_v32 }
 0x155   :  { %v15758_v21 = vsub.f32 %v15606_v42, %v766_v31  ;;  %v828_v40 = vsel %vm83_vm0, %v796_v38, 0.0  ;;  %832 = vadd.xlane.f32.xlu1 %v831_v39  ;;  %v749_v43 = vpop.xlane.xlu1 %748 }
 0x156   :  { %v746_v44 = vpop.xlane.xlu0 %745  ;;  %v769_v47 = vmul.f32 0.03125, %v749_v43  ;;  %829 = vadd.xlane.f32.xlu0 %v828_v40  ;;  %v799_v25 = vmul.f32 %v15755_v35, %v15755_v35 }
 0x157   :  { %v768_v48 = vmul.f32 0.03125, %v746_v44  ;;  %v798_v41 = vmul.f32 %v15758_v21, %v15758_v21 }
 0x158   :  { %v15768_v42 = vsub.f32 %v15615_v45, %v769_v47  ;;  %v837_v49 = vsel %vm83_vm0, %v799_v25, 0.0 }
 0x159   :  { %v15771_v26 = vsub.f32 %v15620_v46, %v768_v48  ;;  %v834_v50 = vsel %vm83_vm0, %v798_v41, 0.0  ;;  %838 = vadd.xlane.f32.xlu1 %v837_v49  ;;  %v755_v51 = vpop.xlane.xlu1 %754 }
 0x15a   :  { %v752_v54 = vpop.xlane.xlu0 %751  ;;  %v771_v10 = vmul.f32 0.03125, %v755_v51  ;;  %835 = vadd.xlane.f32.xlu0 %v834_v50  ;;  %v801_v59 = vmul.f32 %v15768_v42, %v15768_v42 }
 0x15b   :  { %v770_v58 = vmul.f32 0.03125, %v752_v54  ;;  %v800_v45 = vmul.f32 %v15771_v26, %v15771_v26 }
 0x15c   :  { %v15780_v60 = vsub.f32 %v15635_v52, %v771_v10  ;;  %v843_v61 = vsel %vm83_vm0, %v801_v59, 0.0  ;;  %v80_v52 = vld [vmem:[%s20077_s1 + $0x8] sm:$0xff]  ;;  %v10026_v59 = vld [vmem:[%s20026_s16] ss:$0 sm:$0xff] }
 0x15d   :  { %v15783_v46 = vsub.f32 %v15648_v56, %v770_v58  ;;  %v840_v62 = vsel %vm83_vm0, %v800_v45, 0.0  ;;  %844 = vadd.xlane.f32.xlu1 %v843_v61  ;;  %v87_v30 = vsel %vm83_vm0, %v80_v52, 0.0 }
 0x15e   :  { %841 = vadd.xlane.f32.xlu0 %v840_v62  ;;  %v803_v0 = vmul.f32 %v15780_v60, %v15780_v60 }
 0x15f   :  { %v802_v1 = vmul.f32 %v15783_v46, %v15783_v46 }
 0x160   :  { %v849_v2 = vsel %vm83_vm0, %v803_v0, 0.0 }
 0x161   :  { %v846_v56 = vsel %vm83_vm0, %v802_v1, 0.0  ;;  %850 = vadd.xlane.f32.xlu1 %v849_v2 }
 0x162   :  { %847 = vadd.xlane.f32.xlu0 %v846_v56 }
 0x165   :  { %88 = vadd.xlane.f32.xlu1 %v87_v30 }
 0x166   :  { %85 = vadd.xlane.f32.xlu0 %v84_v3 }
 0x177   :  { %v276_v6 = vpop.f32.mrb[0].mxu0 }
 0x178   :  { %v11799_v7 = vpop.f32.mrb[1].mxu0 }
 0x17b   :  { %v281_v8 = vpop.f32.mrb[2].mxu0 }
 0x17c   :  { %v11802_v9 = vpop.f32.mrb[3].mxu0 }
 0x180   :  { %v286_v16 = vpop.f32.mrb[4].mxu0 }
 0x181   :  { %v11805_v12 = vpop.f32.mrb[5].mxu0 }
 0x1d2   :  { %v809_v33 = vpop.xlane.xlu1 %808  ;;  %v806_v34 = vpop.xlane.xlu0 %805 }
 0x1d6   :  { %v815_v13 = vpop.xlane.xlu1 %814  ;;  %v812_v14 = vpop.xlane.xlu0 %811 }
 0x1da   :  { %v15805_v18 = vpop.xlane.xlu1 %820  ;;  %v15807_v23 = vpop.xlane.xlu0 %817 }
 0x1de   :  { %v15809_v24 = vpop.xlane.xlu1 %826 }
 0x1df   :  { %v15811_v27 = vpop.xlane.xlu0 %823 }
 0x1e2   :  { %v15813_v28 = vpop.xlane.xlu1 %832 }
 0x1e3   :  { %v15815_v31 = vpop.xlane.xlu0 %829 }
 0x1e6   :  { %v15817_v37 = vpop.xlane.xlu1 %838 }
 0x1e7   :  { %v15819_v38 = vpop.xlane.xlu0 %835 }
 0x1ea   :  { %v15821_v32 = vpop.xlane.xlu1 %844 }
 0x1eb   :  { %v15823_v39 = vpop.xlane.xlu0 %841 }
 0x1ee   :  { %v15825_v40 = vpop.xlane.xlu1 %850 }
 0x1ef   :  { %v15827_v43 = vpop.xlane.xlu0 %847 }
 0x1f2   :  { %v89_v44 = vpop.xlane.xlu1 %88 }
 0x1f3   :  { %v92_v47 = vmul.f32 0.03125, %v89_v44  ;;  %v86_v48 = vpop.xlane.xlu0 %85 }
 0x1f4   :  { %v91_v25 = vmul.f32 0.03125, %v86_v48 }
 0x1f5   :  { %v15829_v41 = vsub.f32 %v80_v52, %v92_v47 }
 0x1f6   :  { %v15831_v49 = vsub.f32 %v79_v29, %v91_v25 }
 0x1f7   :  { %v96_v50 = vmul.f32 %v15829_v41, %v15829_v41 }
 0x1f8   :  { %v95_v51 = vmul.f32 %v15831_v49, %v15831_v49 }
 0x1f9   :  { %v100_v54 = vsel %vm83_vm0, %v96_v50, 0.0  ;;  %v853_v50 = vmul.f32 0.03125, %v809_v33 }
 0x1fa   :  { %101 = vadd.xlane.f32.xlu1 %v100_v54  ;;  %v97_v10 = vsel %vm83_vm0, %v95_v51, 0.0 }
 0x1fb   :  { %98 = vadd.xlane.f32.xlu0 %v97_v10  ;;  %v869_v54 = vadd.f32 1e-05, %v853_v50  ;;  %v990_v50 = vld [vmem:[%s20029_s19 + $0xf0] sm:$0xff] }
 0x21e   :  { %v365_v58 = vpop.f32.mrb[0].mxu1 }
 0x21f   :  { %v366_v45 = vadd.f32 %v365_v58, %v276_v6  ;;  %v11816_v61 = vpop.f32.mrb[1].mxu1  ;;  %v852_v6 = vmul.f32 0.03125, %v806_v34 }
 0x221   :  { %v386_v62 = vadd.f32 %v10026_v59, %v366_v45 }
 0x223   :  { %v10027_v0 = vmul.f32 -1.442695, %v386_v62  ;;  %v370_v1 = vpop.f32.mrb[2].mxu1 }
 0x224   :  { %v371_v52 = vadd.f32 %v370_v1, %v281_v8  ;;  %v11819_v2 = vpop.f32.mrb[3].mxu1  ;;  %v868_v8 = vadd.f32 1e-05, %v852_v6  ;;  %v1014_v6 = vld [vmem:[%s20029_s19 + $0x1b0] sm:$0xff] }
 0x225   :  { %15170 = vpow2.f32 %v10027_v0  ;;  %v960_v2 = vld [vmem:[%s20029_s19] sm:$0xff] }
 0x226   :  { %v387_v56 = vadd.f32 %v10026_v59, %v371_v52  ;;  %v856_v52 = vmul.f32 0.03125, %v15807_v23 }
 0x227   :  { %v375_v29 = vpop.f32.mrb[4].mxu1 }
 0x228   :  { %v10028_v30 = vmul.f32 -1.442695, %v387_v56  ;;  %v376_v3 = vadd.f32 %v375_v29, %v286_v16  ;;  %v11822_v7 = vpop.f32.mrb[5].mxu1  ;;  %v854_v16 = vmul.f32 0.03125, %v812_v14  ;;  %v961_v14 = vld [vmem:[%s20029_s19 + $0x8] sm:$0xff]  ;;  %v1015_v29 = vld [vmem:[%s20029_s19 + $0x1b8] sm:$0xff] }
 0x229   :  { %v857_v7 = vmul.f32 0.03125, %v15805_v18  ;;  %v15884_v18 = vld [vmem:[%s20024_s14 + $0x2] ss:$0 sm:$0xff] }
 0x22a   :  { %15172 = vpow2.f32 %v10028_v30  ;;  %v388_v9 = vadd.f32 %v10026_v59, %v376_v3  ;;  %v855_v59 = vmul.f32 0.03125, %v815_v13  ;;  %v870_v45 = vadd.f32 1e-05, %v854_v16  ;;  %v988_v13 = vld [vmem:[%s20029_s19 + $0xe0] sm:$0xff]  ;;  %v1042_v30 = vld [vmem:[%s20029_s19 + $0x290] sm:$0xff] }
 0x22b   :  { %v13684_v3 = vpack.c.bf16 %v988_v13, %v961_v14 }
 0x22c   :  { %v10029_v12 = vmul.f32 -1.442695, %v388_v9  ;;  %v871_v33 = vadd.f32 1e-05, %v855_v59  ;;  %v962_v59 = vld [vmem:[%s20029_s19 + $0x10] sm:$0xff] }
 0x22e   :  { %15174 = vpow2.f32 %v10029_v12  ;;  %v411_v12 = vld [vmem:[%s20078_s9 + $0x8] sm:$0xff] }
 0x22f   :  { %v15171_v11 = vpop.eup %15170 }
 0x230   :  { %v398_v44 = vadd.f32 1.0, %v15171_v11 }
 0x232   :  { %15176 = vrcp.f32 %v398_v44 }
 0x234   :  { %v15173_v47 = vpop.eup %15172 }
 0x235   :  { %v399_v48 = vadd.f32 1.0, %v15173_v47  ;;  %v13688_v47 = vpack.c.bf16 %v1042_v30, %v1015_v29  ;;  %v1016_v29 = vld [vmem:[%s20029_s19 + $0x1c0] sm:$0xff] }
 0x237   :  { %15178 = vrcp.f32 %v399_v48  ;;  %v1041_v48 = vld [vmem:[%s20029_s19 + $0x288] sm:$0xff] }
 0x238   :  { %v15175_v25 = vpop.eup %15174 }
 0x239   :  { %v400_v51 = vadd.f32 1.0, %v15175_v25 }
 0x23b   :  { %15180 = vrcp.f32 %v400_v51  ;;  %v858_v51 = vmul.f32 0.03125, %v15811_v27  ;;  %v15907_v27 = vld [vmem:[%s20025_s15 + $0x2] ss:$0 sm:$0xff] }
 0x23c   :  { %15182 = vrsqrt.f32 %v868_v8  ;;  %v15177_v10 = vpop.eup %15176  ;;  %v873_v8 = vadd.f32 1e-05, %v857_v7  ;;  %v992_v7 = vld [vmem:[%s20029_s19 + $0x100] sm:$0xff] }
 0x23d   :  { %15184 = vrsqrt.f32 %v869_v54  ;;  %v15842_v61 = vmul.f32 %v15177_v10, %v386_v62  ;;  %v13690_v54 = vpack.c.bf16 %v1041_v48, %v1014_v6 }
 0x23e   :  { %15186 = vrsqrt.f32 %v870_v45  ;;  %v989_v45 = vld [vmem:[%s20029_s19 + $0xe8] sm:$0xff] }
 0x23f   :  { %20079 = vst [vmem:[#allocation8_spill] sm:$0xff] %v15842_v61  ;;  %15188 = vrsqrt.f32 %v871_v33  ;;  %v859_v33 = vmul.f32 0.03125, %v15809_v24  ;;  %v13694_v14 = vpack.c.bf16 %v989_v45, %v962_v59  ;;  %v1043_v24 = vld [vmem:[%s20029_s19 + $0x298] sm:$0xff] }
 0x241   :  { %v15179_v58 = vpop.eup %15178 }
 0x242   :  { %v15844_v0 = vmul.f32 %v15179_v58, %v387_v56  ;;  %v987_v56 = vld [vmem:[%s20029_s19 + $0xd8] sm:$0xff] }
 0x243   :  { %v13686_v11 = vpack.c.bf16 %v987_v56, %v960_v2 }
 0x244   :  { %20080 = vst [vmem:[#allocation9_spill] sm:$0xff] %v15844_v0  ;;  %v13664_v34 = vpack.c.bf16 %v15844_v0, %v15842_v61 }
 0x245   :  { %v15181_v1 = vpop.eup %15180 }
 0x246   :  { %13665 = vmatprep.subr.bf16.mxu0 %v13664_v34  ;;  %v15855_v62 = vmul.f32 %v15181_v1, %v388_v9  ;;  %v15183_v23 = vpop.eup %15182  ;;  %v872_v9 = vadd.f32 1e-05, %v856_v52  ;;  %v1044_v1 = vld [vmem:[%s20029_s19 + $0x2a0] sm:$0xff]  ;;  %v874_v52 = vadd.f32 1e-05, %v858_v51 }
 0x247   :  { %13667 = vmatpush3.bf16.msra.mxu0 %v13664_v34  ;;  %v900_v44 = vmul.f32 %v15183_v23, %v15685_v22  ;;  %v15185_v25 = vpop.eup %15184  ;;  %v963_v22 = vld [vmem:[%s20029_s19 + $0x18] sm:$0xff] }
 0x248   :  { %20081 = vst [vmem:[#allocation10_spill] sm:$0xff] %v15855_v62  ;;  %11827 = vmatprep.subr.mxu0 %v15855_v62  ;;  %15190 = vrsqrt.f32 %v872_v9  ;;  %v901_v16 = vmul.f32 %v15185_v25, %v15682_v19  ;;  %v13692_v58 = vpack.c.bf16 %v990_v50, %v963_v22  ;;  %v15187_v34 = vpop.eup %15186  ;;  %v1017_v19 = vld [vmem:[%s20029_s19 + $0x1c8] sm:$0xff]  ;;  %v860_v9 = vmul.f32 0.03125, %v15815_v31 }
 0x249   :  { %v922_v10 = vmul.f32 %v15884_v18, %v900_v44  ;;  %15192 = vrsqrt.f32 %v873_v8  ;;  %v902_v56 = vmul.f32 %v15187_v34, %v15695_v20  ;;  %v13696_v23 = vpack.c.bf16 %v1044_v1, %v1017_v19  ;;  %v15189_v30 = vpop.eup %15188 }
 0x24a   :  { %v923_v13 = vmul.f32 %v15884_v18, %v901_v16  ;;  %v875_v20 = vadd.f32 1e-05, %v859_v33  ;;  %15194 = vrsqrt.f32 %v874_v52  ;;  %v903_v44 = vmul.f32 %v15189_v30, %v15692_v36 }
 0x24b   :  { %11828 = vmatpush3.msra.mxu0 %v15855_v62  ;;  %v15918_v2 = vadd.f32 %v15907_v27, %v922_v10  ;;  %v861_v31 = vmul.f32 0.03125, %v15813_v28  ;;  %v876_v25 = vadd.f32 1e-05, %v860_v9  ;;  %v862_v28 = vmul.f32 0.03125, %v15819_v38 }
 0x24c   :  { %11830 = vmatmul.mubr.msk.f32.vlgmr.msra.gmra.mrb[6].mxu0 %vm412_vm3, %v411_v12  ;;  %13685 = vmatprep.subr.bf16.mxu0 %v13684_v3  ;;  %v965_v3 = vld [vmem:[%s20029_s19 + $0x28] sm:$0xff]  ;;  %v13698_v12 = vpack.c.bf16 %v1043_v24, %v1016_v29  ;;  %15196 = vrsqrt.f32 %v875_v20  ;;  %v925_v22 = vmul.f32 %v15884_v18, %v903_v44  ;;  %v864_v1 = vmul.f32 0.03125, %v15823_v39 }
 0x24d   :  { %13687 = vmatpush1.bf16.msra.mxu0 %v13686_v11  ;;  %1180 = vmatprep.mubr.f32.mxu0 %v15366_v63  ;;  %v15938_v11 = vadd.f32 %v15907_v27, %v923_v13  ;;  %v13700_v6 = vpack.c.bf16 %v992_v7, %v965_v3  ;;  %v877_v51 = vadd.f32 1e-05, %v861_v31  ;;  %15198 = vrsqrt.f32 %v876_v25 }
 0x24e   :  { %13689 = vmatprep.subr.bf16.mxu0 %v13688_v47  ;;  %v924_v47 = vmul.f32 %v15884_v18, %v902_v56  ;;  %v878_v59 = vadd.f32 1e-05, %v862_v28  ;;  %v880_v13 = vadd.f32 1e-05, %v864_v1  ;;  %v866_v24 = vmul.f32 0.03125, %v15827_v43  ;;  %v1018_v1 = vld [vmem:[%s20029_s19 + $0x1d0] sm:$0xff] }
 0x24f   :  { %15200 = vrsqrt.f32 %v877_v51 }
 0x250   :  { %v15948_v50 = vadd.f32 %v15907_v27, %v924_v47  ;;  %15202 = vrsqrt.f32 %v878_v59  ;;  %v882_v20 = vadd.f32 1e-05, %v866_v24  ;;  %v501_v24 = vld [vmem:[%s20028_s18 + $0x38] sm:$0xff] }
 0x251   :  { %13691 = vmatpush1.bf16.msra.mxu0 %v13690_v54  ;;  %v15956_v54 = vadd.f32 %v15907_v27, %v925_v22 }
 0x252   :  { %13693 = vmatprep.subr.bf16.mxu0 %v13692_v58  ;;  %v15191_v48 = vpop.eup %15190 }
 0x253   :  { %v904_v36 = vmul.f32 %v15191_v48, %v15714_v57  ;;  %v15193_v8 = vpop.eup %15192  ;;  %v863_v57 = vmul.f32 0.03125, %v15817_v37 }
 0x254   :  { %10044 = vmatmul.mubr.msk.f32.vlgmr.msra.gmra.mrb[8].mxu0 %vm83_vm0, %v15918_v2  ;;  %v905_v16 = vmul.f32 %v15193_v8, %v15711_v55  ;;  %v15195_v58 = vpop.eup %15194 }
 0x255   :  { %1186 = vmatprep.mubr.f32.mxu0 %v15366_v63  ;;  %13695 = vmatpush1.bf16.msra.mxu0 %v13694_v14  ;;  %v926_v10 = vmul.f32 %v15884_v18, %v904_v36  ;;  %v906_v34 = vmul.f32 %v15195_v58, %v15729_v5  ;;  %v879_v19 = vadd.f32 1e-05, %v863_v57  ;;  %v865_v5 = vmul.f32 0.03125, %v15821_v32 }
 0x256   :  { %13697 = vmatprep.subr.bf16.mxu0 %v13696_v23  ;;  %v927_v38 = vmul.f32 %v15884_v18, %v905_v16  ;;  %v15197_v55 = vpop.eup %15196 }
 0x257   :  { %v15966_v45 = vadd.f32 %v15907_v27, %v926_v10  ;;  %v907_v33 = vmul.f32 %v15197_v55, %v15726_v4  ;;  %v928_v52 = vmul.f32 %v15884_v18, %v906_v34  ;;  %v15199_v14 = vpop.eup %15198  ;;  %15204 = vrsqrt.f32 %v879_v19  ;;  %v991_v34 = vld [vmem:[%s20029_s19 + $0xf8] sm:$0xff]  ;;  %v1046_v55 = vld [vmem:[%s20029_s19 + $0x2b0] sm:$0xff] }
 0x258   :  { %10045 = vmatmul.mubr.msk.f32.gmra.mrb[10].mxu0 %vm83_vm0, %v15938_v11  ;;  %v15974_v37 = vadd.f32 %v15907_v27, %v927_v38  ;;  %v908_v23 = vmul.f32 %v15199_v14, %v15743_v17  ;;  %v881_v29 = vadd.f32 1e-05, %v865_v5  ;;  %15206 = vrsqrt.f32 %v880_v13  ;;  %v994_v14 = vld [vmem:[%s20029_s19 + $0x110] sm:$0xff] }
 0x259   :  { %1192 = vmatprep.mubr.f32.mxu0 %v15366_v63  ;;  %13699 = vmatpush1.bf16.msra.mxu0 %v13698_v12  ;;  %v929_v39 = vmul.f32 %v15884_v18, %v907_v33  ;;  %v15984_v56 = vadd.f32 %v15907_v27, %v928_v52  ;;  %v15201_v4 = vpop.eup %15200  ;;  %v867_v17 = vmul.f32 0.03125, %v15825_v40  ;;  %v1045_v33 = vld [vmem:[%s20029_s19 + $0x2a8] sm:$0xff]  ;;  %v967_v52 = vld [vmem:[%s20029_s19 + $0x38] sm:$0xff] }
 0x25a   :  { %13701 = vmatprep.subr.bf16.mxu0 %v13700_v6  ;;  %v909_v30 = vmul.f32 %v15201_v4, %v15740_v15  ;;  %v930_v3 = vmul.f32 %v15884_v18, %v908_v23  ;;  %v15203_v7 = vpop.eup %15202  ;;  %15208 = vrsqrt.f32 %v881_v29  ;;  %v13706_v5 = vpack.c.bf16 %v1045_v33, %v1018_v1  ;;  %v499_v23 = vld [vmem:[%s20028_s18 + $0x28] sm:$0xff]  ;;  %v500_v29 = vld [vmem:[%s20028_s18 + $0x30] sm:$0xff]  ;;  %v971_v1 = vld [vmem:[%s20029_s19 + $0x58] sm:$0xff] }
 0x25b   :  { %v15992_v32 = vadd.f32 %v15907_v27, %v929_v39  ;;  %v910_v12 = vmul.f32 %v15203_v7, %v15758_v21  ;;  %v883_v44 = vadd.f32 1e-05, %v867_v17  ;;  %15210 = vrsqrt.f32 %v882_v20  ;;  %v498_v39 = vld [vmem:[%s20028_s18 + $0x20] sm:$0xff]  ;;  %v495_v7 = vld [vmem:[%s20028_s18 + $0x8] sm:$0xff]  ;;  %v966_v20 = vld [vmem:[%s20029_s19 + $0x30] sm:$0xff] }
 0x25c   :  { %10046 = vmatmul.mubr.msk.f32.gmra.mrb[12].mxu0 %vm83_vm0, %v15948_v50  ;;  %v931_v43 = vmul.f32 %v15884_v18, %v909_v30  ;;  %v16002_v9 = vadd.f32 %v15907_v27, %v930_v3  ;;  %v13708_v13 = vpack.c.bf16 %v994_v14, %v967_v52  ;;  %v13668_v4 = vpack.c.bf16 %v499_v23, %v498_v39  ;;  %v494_v3 = vld [vmem:[%s20028_s18] sm:$0xff]  ;;  %v998_v33 = vld [vmem:[%s20029_s19 + $0x130] sm:$0xff] }
 0x25d   :  { %1198 = vmatprep.mubr.f32.mxu0 %v15366_v63  ;;  %v932_v6 = vmul.f32 %v15884_v18, %v910_v12  ;;  %15212 = vrsqrt.f32 %v883_v44  ;;  %v13672_v30 = vpack.c.bf16 %v501_v24, %v500_v29  ;;  %v16112_v17 = vpack.c.bf16 %v495_v7, %v494_v3  ;;  %v1021_v12 = vld [vmem:[%s20029_s19 + $0x1e8] sm:$0xff]  ;;  %v10014_v39 = vld [vmem:[%s20024_s14] ss:$0 sm:$0xff]  ;;  %v496_v29 = vld [vmem:[%s20028_s18 + $0x10] sm:$0xff] }
 0x25e   :  { %v16009_v40 = vadd.f32 %v15907_v27, %v931_v43  ;;  %13669 = vmatprep.subr.bf16.mxu1 %v13668_v4  ;;  %v993_v43 = vld [vmem:[%s20029_s19 + $0x108] sm:$0xff]  ;;  %v10015_v24 = vld [vmem:[%s20025_s15] ss:$0 sm:$0xff] }
 0x25f   :  { %v16018_v31 = vadd.f32 %v15907_v27, %v932_v6  ;;  %13671 = vmatpush3.bf16.msra.mxu1 %v13668_v4  ;;  %v13710_v44 = vpack.c.bf16 %v993_v43, %v966_v20  ;;  %v1020_v6 = vld [vmem:[%s20029_s19 + $0x1e0] sm:$0xff] }
 0x260   :  { %10047 = vmatmul.mubr.msk.f32.gmra.mrb[14].mxu0 %vm83_vm0, %v15956_v54  ;;  %13673 = vmatprep.subr.bf16.mxu1 %v13672_v30 }
 0x261   :  { %1204 = vmatprep.mubr.f32.mxu0 %v15366_v63  ;;  %v15205_v15 = vpop.eup %15204 }
 0x262   :  { %v911_v47 = vmul.f32 %v15205_v15, %v15755_v35  ;;  %v15207_v48 = vpop.eup %15206  ;;  %v1048_v15 = vld [vmem:[%s20029_s19 + $0x2c0] sm:$0xff] }
 0x263   :  { %v912_v25 = vmul.f32 %v15207_v48, %v15771_v26  ;;  %13675 = vmatpush3.bf16.msra.mxu1 %v13672_v30  ;;  %v1047_v48 = vld [vmem:[%s20029_s19 + $0x2b8] sm:$0xff] }
 0x264   :  { %10048 = vmatmul.mubr.msk.f32.gmra.mrb[16].mxu0 %vm83_vm0, %v15966_v45  ;;  %v933_v21 = vmul.f32 %v15884_v18, %v911_v47  ;;  %v15209_v22 = vpop.eup %15208  ;;  %13677 = vmatprep.subr.bf16.mxu1 %v16112_v17  ;;  %v13712_v47 = vpack.c.bf16 %v1048_v15, %v1021_v12  ;;  %v983_v12 = vld [vmem:[%s20029_s19 + $0xb8] sm:$0xff]  ;;  %v1010_v15 = vld [vmem:[%s20029_s19 + $0x190] sm:$0xff] }
 0x265   :  { %1210 = vmatprep.mubr.f32.mxu0 %v15366_v63  ;;  %v913_v36 = vmul.f32 %v15209_v22, %v15768_v42  ;;  %v934_v8 = vmul.f32 %v15884_v18, %v912_v25  ;;  %v15211_v51 = vpop.eup %15210  ;;  %v996_v25 = vld [vmem:[%s20029_s19 + $0x120] sm:$0xff]  ;;  %v13714_v22 = vpack.c.bf16 %v1047_v48, %v1020_v6  ;;  %v1009_v6 = vld [vmem:[%s20029_s19 + $0x188] sm:$0xff] }
 0x266   :  { %v16025_v35 = vadd.f32 %v15907_v27, %v933_v21  ;;  %v914_v16 = vmul.f32 %v15211_v51, %v15783_v46  ;;  %v969_v21 = vld [vmem:[%s20029_s19 + $0x48] sm:$0xff]  ;;  %v1064_v48 = vld [vmem:[%s20029_s19 + $0x340] sm:$0xff] }
 0x267   :  { %v935_v26 = vmul.f32 %v15884_v18, %v913_v36  ;;  %v16034_v28 = vadd.f32 %v15907_v27, %v934_v8  ;;  %v15213_v10 = vpop.eup %15212  ;;  %v13716_v36 = vpack.c.bf16 %v996_v25, %v969_v21 }
 0x268   :  { %10049 = vmatmul.mubr.msk.f32.gmra.mrb[18].mxu0 %vm83_vm0, %v15974_v37  ;;  %v915_v58 = vmul.f32 %v15213_v10, %v15780_v60  ;;  %v936_v57 = vmul.f32 %v15884_v18, %v914_v16  ;;  %v964_v60 = vld [vmem:[%s20029_s19 + $0x20] sm:$0xff] }
 0x269   :  { %1216 = vmatprep.mubr.f32.mxu0 %v15366_v63  ;;  %v16041_v42 = vadd.f32 %v15907_v27, %v935_v26 }
 0x26a   :  { %v937_v46 = vmul.f32 %v15884_v18, %v915_v58  ;;  %v16050_v59 = vadd.f32 %v15907_v27, %v936_v57  ;;  %v1019_v18 = vld [vmem:[%s20029_s19 + $0x1d8] sm:$0xff]  ;;  %v968_v58 = vld [vmem:[%s20029_s19 + $0x40] sm:$0xff] }
 0x26b   :  { %v13704_v19 = vpack.c.bf16 %v1046_v55, %v1019_v18  ;;  %v995_v57 = vld [vmem:[%s20029_s19 + $0x118] sm:$0xff] }
 0x26c   :  { %10050 = vmatmul.mubr.msk.f32.gmra.mrb[20].mxu0 %vm83_vm0, %v15984_v56  ;;  %v16056_v38 = vadd.f32 %v15907_v27, %v937_v46  ;;  %v13702_v27 = vpack.c.bf16 %v991_v34, %v964_v60  ;;  %v1023_v60 = vld [vmem:[%s20029_s19 + $0x1f8] sm:$0xff]  ;;  %v1050_v34 = vld [vmem:[%s20029_s19 + $0x2d0] sm:$0xff]  ;;  %v13718_v18 = vpack.c.bf16 %v995_v57, %v968_v58 }
 0x26d   :  { %1222 = vmatprep.mubr.f32.mxu0 %v15366_v63  ;;  %v13720_v55 = vpack.c.bf16 %v1050_v34, %v1023_v60 }
 0x270   :  { %10051 = vmatmul.mubr.msk.f32.gmra.mrb[22].mxu0 %vm83_vm0, %v15992_v32 }
 0x271   :  { %1228 = vmatprep.mubr.f32.mxu0 %v15366_v63 }
 0x274   :  { %10052 = vmatmul.mubr.msk.f32.gmra.mrb[24].mxu0 %vm83_vm0, %v16002_v9 }
 0x275   :  { %1234 = vmatprep.mubr.f32.mxu0 %v15366_v63 }
 0x278   :  { %10053 = vmatmul.mubr.msk.f32.gmra.mrb[26].mxu0 %vm83_vm0, %v16009_v40 }
 0x279   :  { %1240 = vmatprep.mubr.f32.mxu0 %v15366_v63 }
 0x27c   :  { %10054 = vmatmul.mubr.msk.f32.gmra.mrb[28].mxu0 %vm83_vm0, %v16018_v31 }
 0x27d   :  { %1246 = vmatprep.mubr.f32.mxu0 %v15366_v63 }
 0x280   :  { %10055 = vmatmul.mubr.msk.f32.gmra.mrb[30].mxu0 %vm83_vm0, %v16025_v35 }
 0x281   :  { %1252 = vmatprep.mubr.f32.mxu0 %v15366_v63 }
 0x284   :  { %10056 = vmatmul.mubr.msk.f32.gmra.mrb[32].mxu0 %vm83_vm0, %v16034_v28 }
 0x285   :  { %1258 = vmatprep.mubr.f32.mxu0 %v15366_v63 }
 0x287   :  { %v102_v26 = vpop.xlane.xlu1 %101 }
 0x288   :  { %10057 = vmatmul.mubr.msk.f32.gmra.mrb[34].mxu0 %vm83_vm0, %v16041_v42  ;;  %v99_v8 = vpop.xlane.xlu0 %98  ;;  %v104_v10 = vmul.f32 0.03125, %v102_v26  ;;  %v1063_v26 = vld [vmem:[%s20029_s19 + $0x338] sm:$0xff] }
 0x289   :  { %1264 = vmatprep.mubr.f32.mxu0 %v15366_v63  ;;  %v103_v51 = vmul.f32 0.03125, %v99_v8 }
 0x28a   :  { %v106_v46 = vadd.f32 1e-05, %v104_v10  ;;  %v1013_v10 = vld [vmem:[%s20029_s19 + $0x1a8] sm:$0xff] }
 0x28b   :  { %v105_v16 = vadd.f32 1e-05, %v103_v51  ;;  %v1036_v51 = vld [vmem:[%s20029_s19 + $0x260] sm:$0xff] }
 0x28c   :  { %10058 = vmatmul.mubr.msk.f32.gmra.mrb[36].mxu0 %vm83_vm0, %v16050_v59  ;;  %v13778_v57 = vpack.c.bf16 %v1063_v26, %v1036_v51 }
 0x28d   :  { %1270 = vmatprep.mubr.f32.mxu0 %v15366_v63  ;;  %15214 = vrsqrt.f32 %v105_v16  ;;  %v986_v16 = vld [vmem:[%s20029_s19 + $0xd0] sm:$0xff] }
 0x28e   :  { %15216 = vrsqrt.f32 %v106_v46  ;;  %v13788_v34 = vpack.c.bf16 %v1013_v10, %v986_v16  ;;  %v1024_v16 = vld [vmem:[%s20029_s19 + $0x200] sm:$0xff]  ;;  %v1051_v10 = vld [vmem:[%s20029_s19 + $0x2d8] sm:$0xff] }
 0x290   :  { %10059 = vmatmul.mubr.msk.f32.gmra.mrb[38].mxu0 %vm83_vm0, %v16056_v38 }
 0x291   :  { %1341 = vmatprep.mubr.f32.mxu0 %v15366_v63 }
 0x294   :  { %10060 = vmatmul.mubr.msk.f32.vlgmr.msra.gmra.mrb[40].mxu0 %vm83_vm0, %v15918_v2 }
 0x295   :  { %1347 = vmatprep.mubr.f32.mxu0 %v15366_v63  ;;  %13703 = vmatpush1.bf16.msra.mxu0 %v13702_v27  ;;  %v1022_v27 = vld [vmem:[%s20029_s19 + $0x1f0] sm:$0xff] }
 0x296   :  { %13705 = vmatprep.subr.bf16.mxu0 %v13704_v19  ;;  %v1049_v19 = vld [vmem:[%s20029_s19 + $0x2c8] sm:$0xff] }
 0x297   :  { %v13722_v52 = vpack.c.bf16 %v1049_v19, %v1022_v27  ;;  %v15215_v14 = vpop.eup %15214  ;;  %v1067_v27 = vld [vmem:[%s20029_s19 + $0x358] sm:$0xff] }
 0x298   :  { %10061 = vmatmul.mubr.msk.f32.gmra.mrb[42].mxu0 %vm83_vm0, %v15938_v11  ;;  %v15217_v23 = vpop.eup %15216 }
 0x299   :  { %1353 = vmatprep.mubr.f32.mxu0 %v15366_v63  ;;  %13707 = vmatpush1.bf16.msra.mxu0 %v13706_v5  ;;  %v13724_v5 = vpack.c.bf16 %v998_v33, %v971_v1  ;;  %v110_v3 = vmul.f32 %v15217_v23, %v15829_v41 }
 0x29a   :  { %13709 = vmatprep.subr.bf16.mxu0 %v13708_v13  ;;  %v109_v13 = vmul.f32 %v15215_v14, %v15831_v49  ;;  %v497_v49 = vld [vmem:[%s20028_s18 + $0x18] sm:$0xff]  ;;  %s20105_s18 = sld [smem:[#allocation32_spill]] }
 0x29b   :  { %v13680_v20 = vpack.c.bf16 %v497_v49, %v496_v29  ;;  %v118_v41 = vmul.f32 %v10014_v39, %v110_v3 }
 0x29c   :  { %10062 = vmatmul.mubr.msk.f32.gmra.mrb[44].mxu0 %vm83_vm0, %v15948_v50  ;;  %v117_v4 = vmul.f32 %v10014_v39, %v109_v13 }
 0x29d   :  { %1359 = vmatprep.mubr.f32.mxu0 %v15366_v63 }
 0x29e   :  { %v125_v43 = vadd.f32 %v10015_v24, %v117_v4 }
 0x2a0   :  { %10063 = vmatmul.mubr.msk.f32.gmra.mrb[46].mxu0 %vm83_vm0, %v15956_v54 }
 0x2a1   :  { %1365 = vmatprep.mubr.f32.mxu0 %v15366_v63 }
 0x2a4   :  { %10064 = vmatmul.mubr.msk.f32.gmra.mrb[48].mxu0 %vm83_vm0, %v15966_v45 }
 0x2a5   :  { %1371 = vmatprep.mubr.f32.mxu0 %v15366_v63 }
 0x2a8   :  { %10065 = vmatmul.mubr.msk.f32.gmra.mrb[50].mxu0 %vm83_vm0, %v15974_v37 }
 0x2a9   :  { %1377 = vmatprep.mubr.f32.mxu0 %v15366_v63 }
 0x2ac   :  { %10066 = vmatmul.mubr.msk.f32.gmra.mrb[52].mxu0 %vm83_vm0, %v15984_v56 }
 0x2ad   :  { %1383 = vmatprep.mubr.f32.mxu0 %v15366_v63 }
 0x2b0   :  { %10067 = vmatmul.mubr.msk.f32.gmra.mrb[54].mxu0 %vm83_vm0, %v15992_v32 }
 0x2b1   :  { %1389 = vmatprep.mubr.f32.mxu0 %v15366_v63 }
 0x2b4   :  { %10068 = vmatmul.mubr.msk.f32.gmra.mrb[56].mxu0 %vm83_vm0, %v16002_v9 }
 0x2b5   :  { %1395 = vmatprep.mubr.f32.mxu0 %v15366_v63 }
 0x2b8   :  { %10069 = vmatmul.mubr.msk.f32.gmra.mrb[58].mxu0 %vm83_vm0, %v16009_v40 }
 0x2b9   :  { %1401 = vmatprep.mubr.f32.mxu0 %v15366_v63 }
 0x2bc   :  { %10070 = vmatmul.mubr.msk.f32.gmra.mrb[60].mxu0 %vm83_vm0, %v16018_v31 }
 0x2bd   :  { %1407 = vmatprep.mubr.f32.mxu0 %v15366_v63 }
 0x2c0   :  { %10071 = vmatmul.mubr.msk.f32.gmra.mrb[62].mxu0 %vm83_vm0, %v16025_v35 }
 0x2c1   :  { %1413 = vmatprep.mubr.f32.mxu0 %v15366_v63 }
 0x2c4   :  { %10072 = vmatmul.mubr.msk.f32.gmra.mrb[64].mxu0 %vm83_vm0, %v16034_v28 }
 0x2c5   :  { %1419 = vmatprep.mubr.f32.mxu0 %v15366_v63 }
 0x2c8   :  { %10073 = vmatmul.mubr.msk.f32.gmra.mrb[66].mxu0 %vm83_vm0, %v16041_v42 }
 0x2c9   :  { %1425 = vmatprep.mubr.f32.mxu0 %v15366_v63 }
 0x2cc   :  { %10074 = vmatmul.mubr.msk.f32.gmra.mrb[68].mxu0 %vm83_vm0, %v16050_v59 }
 0x2cd   :  { %1431 = vmatprep.mubr.f32.mxu0 %v15366_v63 }
 0x2d0   :  { %10075 = vmatmul.mubr.msk.f32.gmra.mrb[70].mxu0 %vm83_vm0, %v16056_v38 }
 0x2d1   :  { %1502 = vmatprep.mubr.f32.mxu0 %v15366_v63 }
 0x2d4   :  { %10076 = vmatmul.mubr.msk.f32.vlgmr.msra.gmra.mrb[72].mxu0 %vm83_vm0, %v15918_v2 }
 0x2d5   :  { %1508 = vmatprep.mubr.f32.mxu0 %v15366_v63  ;;  %13711 = vmatpush1.bf16.msra.mxu0 %v13710_v44  ;;  %v13772_v44 = vpack.c.bf16 %v1010_v15, %v983_v12 }
 0x2d6   :  { %13713 = vmatprep.subr.bf16.mxu0 %v13712_v47  ;;  %v982_v47 = vld [vmem:[%s20029_s19 + $0xb0] sm:$0xff] }
 0x2d7   :  { %v13774_v25 = vpack.c.bf16 %v1009_v6, %v982_v47 }
 0x2d8   :  { %10077 = vmatmul.mubr.msk.f32.gmra.mrb[74].mxu0 %vm83_vm0, %v15938_v11 }
 0x2d9   :  { %1514 = vmatprep.mubr.f32.mxu0 %v15366_v63  ;;  %13715 = vmatpush1.bf16.msra.mxu0 %v13714_v22  ;;  %v126_v22 = vadd.f32 %v10015_v24, %v118_v41 }
 0x2da   :  { %13717 = vmatprep.subr.bf16.mxu0 %v13716_v36 }
 0x2dc   :  { %10078 = vmatmul.mubr.msk.f32.gmra.mrb[76].mxu0 %vm83_vm0, %v15948_v50 }
 0x2dd   :  { %1520 = vmatprep.mubr.f32.mxu0 %v15366_v63 }
 0x2e0   :  { %10079 = vmatmul.mubr.msk.f32.gmra.mrb[78].mxu0 %vm83_vm0, %v15956_v54 }
 0x2e1   :  { %1526 = vmatprep.mubr.f32.mxu0 %v15366_v63 }
 0x2e4   :  { %10080 = vmatmul.mubr.msk.f32.gmra.mrb[80].mxu0 %vm83_vm0, %v15966_v45 }
 0x2e5   :  { %1532 = vmatprep.mubr.f32.mxu0 %v15366_v63 }
 0x2e8   :  { %10081 = vmatmul.mubr.msk.f32.gmra.mrb[82].mxu0 %vm83_vm0, %v15974_v37 }
 0x2e9   :  { %1538 = vmatprep.mubr.f32.mxu0 %v15366_v63 }
 0x2ec   :  { %10082 = vmatmul.mubr.msk.f32.gmra.mrb[84].mxu0 %vm83_vm0, %v15984_v56 }
 0x2ed   :  { %1544 = vmatprep.mubr.f32.mxu0 %v15366_v63 }
 0x2f0   :  { %10083 = vmatmul.mubr.msk.f32.gmra.mrb[86].mxu0 %vm83_vm0, %v15992_v32 }
 0x2f1   :  { %1550 = vmatprep.mubr.f32.mxu0 %v15366_v63 }
 0x2f4   :  { %10084 = vmatmul.mubr.msk.f32.gmra.mrb[88].mxu0 %vm83_vm0, %v16002_v9 }
 0x2f5   :  { %1556 = vmatprep.mubr.f32.mxu0 %v15366_v63 }
 0x2f8   :  { %10085 = vmatmul.mubr.msk.f32.gmra.mrb[90].mxu0 %vm83_vm0, %v16009_v40 }
 0x2f9   :  { %1562 = vmatprep.mubr.f32.mxu0 %v15366_v63 }
 0x2fc   :  { %10086 = vmatmul.mubr.msk.f32.gmra.mrb[92].mxu0 %vm83_vm0, %v16018_v31 }
 0x2fd   :  { %1568 = vmatprep.mubr.f32.mxu0 %v15366_v63 }
 0x300   :  { %10087 = vmatmul.mubr.msk.f32.gmra.mrb[94].mxu0 %vm83_vm0, %v16025_v35 }
 0x301   :  { %1574 = vmatprep.mubr.f32.mxu0 %v15366_v63 }
 0x304   :  { %10088 = vmatmul.mubr.msk.f32.gmra.mrb[96].mxu0 %vm83_vm0, %v16034_v28 }
 0x305   :  { %1580 = vmatprep.mubr.f32.mxu0 %v15366_v63 }
 0x308   :  { %10089 = vmatmul.mubr.msk.f32.gmra.mrb[98].mxu0 %vm83_vm0, %v16041_v42 }
 0x309   :  { %1586 = vmatprep.mubr.f32.mxu0 %v15366_v63 }
 0x30c   :  { %10090 = vmatmul.mubr.msk.f32.gmra.mrb[100].mxu0 %vm83_vm0, %v16050_v59 }
 0x30d   :  { %1592 = vmatprep.mubr.f32.mxu0 %v15366_v63 }
 0x310   :  { %10091 = vmatmul.mubr.msk.f32.gmra.mrb[102].mxu0 %vm83_vm0, %v16056_v38 }
 0x311   :  { %1663 = vmatprep.mubr.f32.mxu0 %v15366_v63 }
 0x314   :  { %10092 = vmatmul.mubr.msk.f32.vlgmr.msra.gmra.mrb[104].mxu0 %vm83_vm0, %v15918_v2 }
 0x315   :  { %1669 = vmatprep.mubr.f32.mxu0 %v15366_v63  ;;  %13719 = vmatpush1.bf16.msra.mxu0 %v13718_v18 }
 0x316   :  { %13721 = vmatprep.subr.bf16.mxu0 %v13720_v55  ;;  %v1040_v55 = vld [vmem:[%s20029_s19 + $0x280] sm:$0xff] }
 0x317   :  { %v13792_v33 = vpack.c.bf16 %v1067_v27, %v1040_v55 }
 0x318   :  { %10093 = vmatmul.mubr.msk.f32.gmra.mrb[106].mxu0 %vm83_vm0, %v15938_v11 }
 0x319   :  { %1675 = vmatprep.mubr.f32.mxu0 %v15366_v63  ;;  %13723 = vmatpush1.bf16.msra.mxu0 %v13722_v52 }
 0x31a   :  { %13725 = vmatprep.subr.bf16.mxu0 %v13724_v5 }
 0x31c   :  { %10094 = vmatmul.mubr.msk.f32.gmra.mrb[108].mxu0 %vm83_vm0, %v15948_v50 }
 0x31d   :  { %1681 = vmatprep.mubr.f32.mxu0 %v15366_v63 }
 0x31f   :  { %v11831_v30 = vpop.f32.mrb[6].mxu0 }
 0x320   :  { %v485_v7 = vpop.f32.mrb[7].mxu0  ;;  %10095 = vmatmul.mubr.msk.f32.gmra.mrb[110].mxu0 %vm83_vm0, %v15956_v54 }
 0x321   :  { %11840 = vmatprep.mubr.msk.f32.mxu1 %vm83_vm0, %v485_v7  ;;  %1687 = vmatprep.mubr.f32.mxu0 %v15366_v63 }
 0x322   :  { %11841 = vmatmul.mubr.msk.f32.vlgmr.msra.gmra.mrb[6].mxu1 %vm83_vm0, %v11831_v30 }
 0x323   :  { %13679 = vmatpush3.bf16.msra.mxu1 %v16112_v17  ;;  %11851 = vmatprep.mubr.msk.f32.mxu1 %vm83_vm0, %v125_v43  ;;  %v1037_v17 = vld [vmem:[%s20029_s19 + $0x268] sm:$0xff] }
 0x324   :  { %10096 = vmatmul.mubr.msk.f32.gmra.mrb[112].mxu0 %vm83_vm0, %v15966_v45  ;;  %13681 = vmatprep.subr.bf16.mxu1 %v13680_v20  ;;  %v13776_v8 = vpack.c.bf16 %v1064_v48, %v1037_v17  ;;  %v970_v48 = vld [vmem:[%s20029_s19 + $0x50] sm:$0xff] }
 0x325   :  { %1693 = vmatprep.mubr.f32.mxu0 %v15366_v63 }
 0x327   :  { %13683 = vmatpush3.bf16.msra.mxu1 %v13680_v20  ;;  %v1182_v21 = vpop.f32.mrb[8].mxu0 }
 0x328   :  { %v1184_v36 = vpop.f32.mrb[9].mxu0  ;;  %10097 = vmatmul.mubr.msk.f32.gmra.mrb[114].mxu0 %vm83_vm0, %v15974_v37  ;;  %13773 = vmatprep.subr.bf16.mxu1 %v13772_v44 }
 0x329   :  { %1699 = vmatprep.mubr.f32.mxu0 %v15366_v63 }
 0x32a   :  { %11852 = vmatmul.mubr.msk.f32.vlgmr.msra.gmra.mrb[6].mxu1 %vm83_vm0, %v126_v22  ;;  %v1025_v22 = vld [vmem:[%s20029_s19 + $0x208] sm:$0xff] }
 0x32b   :  { %13775 = vmatpush1.bf16.msra.mxu1 %v13774_v25  ;;  %v1188_v58 = vpop.f32.mrb[10].mxu0  ;;  %2951 = vmatprep.mubr.f32.mxu1 %v15366_v63 }
 0x32c   :  { %v16318_v46 = vpack.c.bf16 %v1188_v58, %v1182_v21  ;;  %v1190_v60 = vpop.f32.mrb[11].mxu0  ;;  %10098 = vmatmul.mubr.msk.f32.gmra.mrb[116].mxu0 %vm83_vm0, %v15984_v56  ;;  %13777 = vmatprep.subr.bf16.mxu1 %v13776_v8  ;;  %v997_v21 = vld [vmem:[%s20029_s19 + $0x128] sm:$0xff] }
 0x32d   :  { %v16322_v18 = vpack.c.bf16 %v1190_v60, %v1184_v36  ;;  %1705 = vmatprep.mubr.f32.mxu0 %v15366_v63  ;;  %v1052_v36 = vld [vmem:[%s20029_s19 + $0x2e0] sm:$0xff]  ;;  %v13726_v51 = vpack.c.bf16 %v997_v21, %v970_v48 }
 0x32e   :  { %v13728_v26 = vpack.c.bf16 %v1052_v36, %v1025_v22  ;;  %v1000_v60 = vld [vmem:[%s20029_s19 + $0x140] sm:$0xff] }
 0x32f   :  { %13779 = vmatpush1.bf16.msra.mxu1 %v13778_v57  ;;  %v1194_v19 = vpop.f32.mrb[12].mxu0  ;;  %v973_v57 = vld [vmem:[%s20029_s19 + $0x68] sm:$0xff] }
 0x330   :  { %v1196_v1 = vpop.f32.mrb[13].mxu0  ;;  %10099 = vmatmul.mubr.msk.f32.gmra.mrb[118].mxu0 %vm83_vm0, %v15992_v32  ;;  %13789 = vmatprep.subr.bf16.mxu1 %v13788_v34 }
 0x331   :  { %1711 = vmatprep.mubr.f32.mxu0 %v15366_v63 }
 0x332   :  { %10220 = vmatmul.mubr.msk.f32.vlgmr.msra.gmra.mrb[8].mxu1 %vm83_vm0, %v15918_v2 }
 0x333   :  { %13791 = vmatpush3.bf16.msra.mxu1 %v13788_v34  ;;  %v1200_v52 = vpop.f32.mrb[14].mxu0  ;;  %2957 = vmatprep.mubr.f32.mxu1 %v15366_v63 }
 0x334   :  { %v16337_v14 = vpack.c.bf16 %v1200_v52, %v1194_v19  ;;  %v1202_v5 = vpop.f32.mrb[15].mxu0  ;;  %10100 = vmatmul.mubr.msk.f32.gmra.mrb[120].mxu0 %vm83_vm0, %v16002_v9  ;;  %13793 = vmatprep.subr.bf16.mxu1 %v13792_v33  ;;  %v13730_v19 = vpack.c.bf16 %v1051_v10, %v1024_v16 }
 0x335   :  { %v16341_v13 = vpack.c.bf16 %v1202_v5, %v1196_v1  ;;  %1717 = vmatprep.mubr.f32.mxu0 %v15366_v63  ;;  %v13732_v1 = vpack.c.bf16 %v1000_v60, %v973_v57 }
 0x336   :  { %10221 = vmatmul.mubr.msk.f32.gmra.mrb[10].mxu1 %vm83_vm0, %v15938_v11 }
 0x337   :  { %13795 = vmatpush3.bf16.msra.mxu1 %v13792_v33  ;;  %v1206_v39 = vpop.f32.mrb[16].mxu0  ;;  %2963 = vmatprep.mubr.f32.mxu1 %v15366_v63 }
 0x338   :  { %13797 = vmatprep.subr.bf16.mxu1 %v16322_v18  ;;  %v1208_v23 = vpop.f32.mrb[17].mxu0  ;;  %10101 = vmatmul.mubr.msk.f32.gmra.mrb[122].mxu0 %vm83_vm0, %v16009_v40 }
 0x339   :  { %1723 = vmatprep.mubr.f32.mxu0 %v15366_v63 }
 0x33a   :  { %10222 = vmatmul.mubr.msk.f32.gmra.mrb[12].mxu1 %vm83_vm0, %v15948_v50 }
 0x33b   :  { %v1212_v4 = vpop.f32.mrb[18].mxu0  ;;  %2969 = vmatprep.mubr.f32.mxu1 %v15366_v63 }
 0x33c   :  { %v16354_v29 = vpack.c.bf16 %v1212_v4, %v1206_v39  ;;  %v1214_v49 = vpop.f32.mrb[19].mxu0  ;;  %10102 = vmatmul.mubr.msk.f32.gmra.mrb[124].mxu0 %vm83_vm0, %v16018_v31 }
 0x33d   :  { %v16358_v24 = vpack.c.bf16 %v1214_v49, %v1208_v23  ;;  %1729 = vmatprep.mubr.f32.mxu0 %v15366_v63 }
 0x33e   :  { %10223 = vmatmul.mubr.msk.f32.gmra.mrb[14].mxu1 %vm83_vm0, %v15956_v54 }
 0x33f   :  { %v1218_v30 = vpop.f32.mrb[20].mxu0  ;;  %2975 = vmatprep.mubr.f32.mxu1 %v15366_v63 }
 0x340   :  { %v1220_v3 = vpop.f32.mrb[21].mxu0  ;;  %10103 = vmatmul.mubr.msk.f32.gmra.mrb[126].mxu0 %vm83_vm0, %v16025_v35 }
 0x341   :  { %1735 = vmatprep.mubr.f32.mxu0 %v15366_v63 }
 0x342   :  { %10224 = vmatmul.mubr.msk.f32.gmra.mrb[16].mxu1 %vm83_vm0, %v15966_v45 }
 0x343   :  { %v1224_v7 = vpop.f32.mrb[22].mxu0  ;;  %2981 = vmatprep.mubr.f32.mxu1 %v15366_v63 }
 0x344   :  { %v16370_v20 = vpack.c.bf16 %v1224_v7, %v1218_v30  ;;  %v1226_v43 = vpop.f32.mrb[23].mxu0  ;;  %10104 = vmatmul.mubr.msk.f32.gmra.mrb[128].mxu0 %vm83_vm0, %v16034_v28 }
 0x345   :  { %v16374_v12 = vpack.c.bf16 %v1226_v43, %v1220_v3  ;;  %1741 = vmatprep.mubr.f32.mxu0 %v15366_v63 }
 0x346   :  { %10225 = vmatmul.mubr.msk.f32.gmra.mrb[18].mxu1 %vm83_vm0, %v15974_v37 }
 0x347   :  { %v1230_v15 = vpop.f32.mrb[24].mxu0  ;;  %2987 = vmatprep.mubr.f32.mxu1 %v15366_v63 }
 0x348   :  { %v1232_v41 = vpop.f32.mrb[25].mxu0  ;;  %10105 = vmatmul.mubr.msk.f32.gmra.mrb[130].mxu0 %vm83_vm0, %v16041_v42 }
 0x349   :  { %1747 = vmatprep.mubr.f32.mxu0 %v15366_v63 }
 0x34a   :  { %10226 = vmatmul.mubr.msk.f32.gmra.mrb[20].mxu1 %vm83_vm0, %v15984_v56 }
 0x34b   :  { %v1236_v44 = vpop.f32.mrb[26].mxu0  ;;  %2993 = vmatprep.mubr.f32.mxu1 %v15366_v63 }
 0x34c   :  { %v16386_v47 = vpack.c.bf16 %v1236_v44, %v1230_v15  ;;  %v1238_v6 = vpop.f32.mrb[27].mxu0  ;;  %10106 = vmatmul.mubr.msk.f32.gmra.mrb[132].mxu0 %vm83_vm0, %v16050_v59 }
 0x34d   :  { %v16390_v17 = vpack.c.bf16 %v1238_v6, %v1232_v41  ;;  %1753 = vmatprep.mubr.f32.mxu0 %v15366_v63 }
 0x34e   :  { %10227 = vmatmul.mubr.msk.f32.gmra.mrb[22].mxu1 %vm83_vm0, %v15992_v32 }
 0x34f   :  { %v1242_v25 = vpop.f32.mrb[28].mxu0  ;;  %2999 = vmatprep.mubr.f32.mxu1 %v15366_v63 }
 0x350   :  { %v1244_v8 = vpop.f32.mrb[29].mxu0  ;;  %10107 = vmatmul.mubr.msk.f32.gmra.mrb[134].mxu0 %vm83_vm0, %v16056_v38 }
 0x351   :  { %1824 = vmatprep.mubr.f32.mxu0 %v15366_v63 }
 0x352   :  { %10228 = vmatmul.mubr.msk.f32.gmra.mrb[24].mxu1 %vm83_vm0, %v16002_v9 }
 0x353   :  { %v1248_v58 = vpop.f32.mrb[30].mxu0  ;;  %3005 = vmatprep.mubr.f32.mxu1 %v15366_v63 }
 0x354   :  { %v16426_v34 = vpack.c.bf16 %v1248_v58, %v1242_v25  ;;  %v1250_v55 = vpop.f32.mrb[31].mxu0  ;;  %10108 = vmatmul.mubr.msk.f32.vlgmr.msra.gmra.mrb[136].mxu0 %vm83_vm0, %v15918_v2 }
 0x355   :  { %v16430_v27 = vpack.c.bf16 %v1250_v55, %v1244_v8  ;;  %1830 = vmatprep.mubr.f32.mxu0 %v15366_v63  ;;  %13727 = vmatpush1.bf16.msra.mxu0 %v13726_v51 }
 0x356   :  { %10229 = vmatmul.mubr.msk.f32.gmra.mrb[26].mxu1 %vm83_vm0, %v16009_v40  ;;  %13729 = vmatprep.subr.bf16.mxu0 %v13728_v26 }
 0x357   :  { %v1254_v33 = vpop.f32.mrb[32].mxu0  ;;  %3011 = vmatprep.mubr.f32.mxu1 %v15366_v63 }
 0x358   :  { %v1256_v52 = vpop.f32.mrb[33].mxu0  ;;  %10109 = vmatmul.mubr.msk.f32.gmra.mrb[138].mxu0 %vm83_vm0, %v15938_v11 }
 0x359   :  { %1836 = vmatprep.mubr.f32.mxu0 %v15366_v63  ;;  %13731 = vmatpush1.bf16.msra.mxu0 %v13730_v19 }
 0x35a   :  { %10230 = vmatmul.mubr.msk.f32.gmra.mrb[28].mxu1 %vm83_vm0, %v16018_v31  ;;  %13733 = vmatprep.subr.bf16.mxu0 %v13732_v1 }
 0x35b   :  { %v1260_v5 = vpop.f32.mrb[34].mxu0  ;;  %3017 = vmatprep.mubr.f32.mxu1 %v15366_v63 }
 0x35c   :  { %v16442_v39 = vpack.c.bf16 %v1260_v5, %v1254_v33  ;;  %v1262_v23 = vpop.f32.mrb[35].mxu0  ;;  %10110 = vmatmul.mubr.msk.f32.gmra.mrb[140].mxu0 %vm83_vm0, %v15948_v50 }
 0x35d   :  { %v16446_v4 = vpack.c.bf16 %v1262_v23, %v1256_v52  ;;  %1842 = vmatprep.mubr.f32.mxu0 %v15366_v63 }
 0x35e   :  { %10231 = vmatmul.mubr.msk.f32.gmra.mrb[30].mxu1 %vm83_vm0, %v16025_v35 }
 0x35f   :  { %v1266_v49 = vpop.f32.mrb[36].mxu0  ;;  %3023 = vmatprep.mubr.f32.mxu1 %v15366_v63 }
 0x360   :  { %v1268_v30 = vpop.f32.mrb[37].mxu0  ;;  %10111 = vmatmul.mubr.msk.f32.gmra.mrb[142].mxu0 %vm83_vm0, %v15956_v54 }
 0x361   :  { %1848 = vmatprep.mubr.f32.mxu0 %v15366_v63 }
 0x362   :  { %10232 = vmatmul.mubr.msk.f32.gmra.mrb[32].mxu1 %vm83_vm0, %v16034_v28 }
 0x363   :  { %v1272_v3 = vpop.f32.mrb[38].mxu0  ;;  %3029 = vmatprep.mubr.f32.mxu1 %v15366_v63 }
 0x364   :  { %v16458_v7 = vpack.c.bf16 %v1272_v3, %v1266_v49  ;;  %v1274_v43 = vpop.f32.mrb[39].mxu0  ;;  %10112 = vmatmul.mubr.msk.f32.gmra.mrb[144].mxu0 %vm83_vm0, %v15966_v45  ;;  %v10268_v49 = vld [vmem:[%s20023_s13 + $0x80] sm:$0xff]  ;;  %v999_v3 = vld [vmem:[%s20029_s19 + $0x138] sm:$0xff] }
 0x365   :  { %v16462_v15 = vpack.c.bf16 %v1274_v43, %v1268_v30  ;;  %1854 = vmatprep.mubr.f32.mxu0 %v15366_v63 }
 0x366   :  { %10233 = vmatmul.mubr.msk.f32.gmra.mrb[34].mxu1 %vm83_vm0, %v16041_v42 }
 0x367   :  { %v1343_v41 = vpop.f32.mrb[40].mxu0  ;;  %3035 = vmatprep.mubr.f32.mxu1 %v15366_v63 }
 0x368   :  { %v1345_v44 = vpop.f32.mrb[41].mxu0  ;;  %10113 = vmatmul.mubr.msk.f32.gmra.mrb[146].mxu0 %vm83_vm0, %v15974_v37 }
 0x369   :  { %1860 = vmatprep.mubr.f32.mxu0 %v15366_v63 }
 0x36a   :  { %10234 = vmatmul.mubr.msk.f32.gmra.mrb[36].mxu1 %vm83_vm0, %v16050_v59 }
 0x36b   :  { %v1349_v6 = vpop.f32.mrb[42].mxu0  ;;  %3041 = vmatprep.mubr.f32.mxu1 %v15366_v63 }
 0x36c   :  { %v16474_v48 = vpack.c.bf16 %v1349_v6, %v1343_v41  ;;  %v1351_v21 = vpop.f32.mrb[43].mxu0  ;;  %10114 = vmatmul.mubr.msk.f32.gmra.mrb[148].mxu0 %vm83_vm0, %v15984_v56  ;;  %v10269_v41 = vld [vmem:[%s20023_s13 + $0x88] sm:$0xff]  ;;  %v1054_v6 = vld [vmem:[%s20029_s19 + $0x2f0] sm:$0xff] }
 0x36d   :  { %v16478_v25 = vpack.c.bf16 %v1351_v21, %v1345_v44  ;;  %1866 = vmatprep.mubr.f32.mxu0 %v15366_v63  ;;  %v1027_v44 = vld [vmem:[%s20029_s19 + $0x218] sm:$0xff] }
 0x36e   :  { %10235 = vmatmul.mubr.msk.f32.gmra.mrb[38].mxu1 %vm83_vm0, %v16056_v38 }
 0x36f   :  { %11862 = vmatprep.mubr.msk.f32.mxu1 %vm83_vm0, %v15918_v2  ;;  %v1355_v22 = vpop.f32.mrb[44].mxu0 }
 0x370   :  { %v1357_v36 = vpop.f32.mrb[45].mxu0  ;;  %10115 = vmatmul.mubr.msk.f32.gmra.mrb[150].mxu0 %vm83_vm0, %v15992_v32 }
 0x371   :  { %1872 = vmatprep.mubr.f32.mxu0 %v15366_v63 }
 0x372   :  { %11863 = vmatmul.mubr.msk.f32.vlgmr.msra.gmra.mrb[40].mxu1 %vm83_vm0, %v15938_v11 }
 0x373   :  { %13799 = vmatpush3.bf16.msra.mxu1 %v16322_v18  ;;  %11865 = vmatprep.mubr.msk.f32.mxu1 %vm83_vm0, %v15948_v50  ;;  %v1361_v8 = vpop.f32.mrb[46].mxu0 }
 0x374   :  { %13801 = vmatprep.subr.bf16.mxu1 %v16341_v13  ;;  %v16494_v51 = vpack.c.bf16 %v1361_v8, %v1355_v22  ;;  %v1363_v26 = vpop.f32.mrb[47].mxu0  ;;  %10116 = vmatmul.mubr.msk.f32.gmra.mrb[152].mxu0 %vm83_vm0, %v16002_v9  ;;  %v1026_v8 = vld [vmem:[%s20029_s19 + $0x210] sm:$0xff] }
 0x375   :  { %v16498_v16 = vpack.c.bf16 %v1363_v26, %v1357_v36  ;;  %1878 = vmatprep.mubr.f32.mxu0 %v15366_v63  ;;  %v13736_v36 = vpack.c.bf16 %v1054_v6, %v1027_v44  ;;  %v1053_v26 = vld [vmem:[%s20029_s19 + $0x2e8] sm:$0xff] }
 0x376   :  { %11866 = vmatmul.mubr.msk.f32.gmra.mrb[42].mxu1 %vm83_vm0, %v15956_v54  ;;  %v10277_v6 = vld [vmem:[%s20023_s13 + $0xc8] sm:$0xff] }
 0x377   :  { %13803 = vmatpush3.bf16.msra.mxu1 %v16341_v13  ;;  %11868 = vmatprep.mubr.msk.f32.mxu1 %vm83_vm0, %v15966_v45  ;;  %v1367_v18 = vpop.f32.mrb[48].mxu0 }
 0x378   :  { %13805 = vmatprep.subr.bf16.mxu1 %v16358_v24  ;;  %v1369_v10 = vpop.f32.mrb[49].mxu0  ;;  %10117 = vmatmul.mubr.msk.f32.gmra.mrb[154].mxu0 %vm83_vm0, %v16009_v40 }
 0x379   :  { %1884 = vmatprep.mubr.f32.mxu0 %v15366_v63 }
 0x37a   :  { %11869 = vmatmul.mubr.msk.f32.gmra.mrb[44].mxu1 %vm83_vm0, %v15974_v37 }
 0x37b   :  { %13807 = vmatpush3.bf16.msra.mxu1 %v16358_v24  ;;  %11871 = vmatprep.mubr.msk.f32.mxu1 %vm83_vm0, %v15984_v56  ;;  %v1373_v13 = vpop.f32.mrb[50].mxu0 }
 0x37c   :  { %13809 = vmatprep.subr.bf16.mxu1 %v16374_v12  ;;  %v16516_v58 = vpack.c.bf16 %v1373_v13, %v1367_v18  ;;  %v1375_v57 = vpop.f32.mrb[51].mxu0  ;;  %10118 = vmatmul.mubr.msk.f32.gmra.mrb[156].mxu0 %vm83_vm0, %v16018_v31  ;;  %v975_v13 = vld [vmem:[%s20029_s19 + $0x78] sm:$0xff] }
 0x37d   :  { %v16520_v60 = vpack.c.bf16 %v1375_v57, %v1369_v10  ;;  %1890 = vmatprep.mubr.f32.mxu0 %v15366_v63  ;;  %v10271_v10 = vld [vmem:[%s20023_s13 + $0x98] sm:$0xff]  ;;  %v1002_v57 = vld [vmem:[%s20029_s19 + $0x150] sm:$0xff] }
 0x37e   :  { %11872 = vmatmul.mubr.msk.f32.gmra.mrb[46].mxu1 %vm83_vm0, %v15992_v32 }
 0x37f   :  { %13811 = vmatpush3.bf16.msra.mxu1 %v16374_v12  ;;  %11874 = vmatprep.mubr.msk.f32.mxu1 %vm83_vm0, %v16002_v9  ;;  %v1379_v24 = vpop.f32.mrb[52].mxu0 }
 0x380   :  { %13813 = vmatprep.subr.bf16.mxu1 %v16390_v17  ;;  %v1381_v55 = vpop.f32.mrb[53].mxu0  ;;  %10119 = vmatmul.mubr.msk.f32.gmra.mrb[158].mxu0 %vm83_vm0, %v16025_v35 }
 0x381   :  { %1896 = vmatprep.mubr.f32.mxu0 %v15366_v63 }
 0x382   :  { %11875 = vmatmul.mubr.msk.f32.gmra.mrb[48].mxu1 %vm83_vm0, %v16009_v40 }
 0x383   :  { %13815 = vmatpush3.bf16.msra.mxu1 %v16390_v17  ;;  %11877 = vmatprep.mubr.msk.f32.mxu1 %vm83_vm0, %v16018_v31  ;;  %v1385_v12 = vpop.f32.mrb[54].mxu0 }
 0x384   :  { %13817 = vmatprep.subr.bf16.mxu1 %v16430_v27  ;;  %v16538_v19 = vpack.c.bf16 %v1385_v12, %v1379_v24  ;;  %v1387_v1 = vpop.f32.mrb[55].mxu0  ;;  %10120 = vmatmul.mubr.msk.f32.gmra.mrb[160].mxu0 %vm83_vm0, %v16034_v28 }
 0x385   :  { %v16542_v33 = vpack.c.bf16 %v1387_v1, %v1381_v55  ;;  %1902 = vmatprep.mubr.f32.mxu0 %v15366_v63  ;;  %v13738_v1 = vpack.c.bf16 %v1053_v26, %v1026_v8  ;;  %v10280_v26 = vld [vmem:[%s20023_s13 + $0xe0] sm:$0xff] }
 0x386   :  { %11878 = vmatmul.mubr.msk.f32.gmra.mrb[50].mxu1 %vm83_vm0, %v16025_v35 }
 0x387   :  { %13819 = vmatpush3.bf16.msra.mxu1 %v16430_v27  ;;  %11880 = vmatprep.mubr.msk.f32.mxu1 %vm83_vm0, %v16034_v28  ;;  %v1391_v17 = vpop.f32.mrb[56].mxu0 }
 0x388   :  { %13821 = vmatprep.subr.bf16.mxu1 %v16446_v4  ;;  %v1393_v52 = vpop.f32.mrb[57].mxu0  ;;  %10121 = vmatmul.mubr.msk.f32.gmra.mrb[162].mxu0 %vm83_vm0, %v16041_v42 }
 0x389   :  { %1908 = vmatprep.mubr.f32.mxu0 %v15366_v63 }
 0x38a   :  { %11881 = vmatmul.mubr.msk.f32.gmra.mrb[52].mxu1 %vm83_vm0, %v16041_v42 }
 0x38b   :  { %13823 = vmatpush3.bf16.msra.mxu1 %v16446_v4  ;;  %11883 = vmatprep.mubr.msk.f32.mxu1 %vm83_vm0, %v16050_v59  ;;  %v1397_v27 = vpop.f32.mrb[58].mxu0  ;;  %v972_v4 = vld [vmem:[%s20029_s19 + $0x60] sm:$0xff] }
 0x38c   :  { %13825 = vmatprep.subr.bf16.mxu1 %v16462_v15  ;;  %v16560_v5 = vpack.c.bf16 %v1397_v27, %v1391_v17  ;;  %v1399_v23 = vpop.f32.mrb[59].mxu0  ;;  %10122 = vmatmul.mubr.msk.f32.gmra.mrb[164].mxu0 %vm83_vm0, %v16050_v59  ;;  %v13734_v22 = vpack.c.bf16 %v999_v3, %v972_v4  ;;  %v13740_v17 = vpack.c.bf16 %v1002_v57, %v975_v13  ;;  %v10273_v27 = vld [vmem:[%s20023_s13 + $0xa8] sm:$0xff]  ;;  %v10275_v4 = vld [vmem:[%s20023_s13 + $0xb8] sm:$0xff]  ;;  %v10282_v57 = vld [vmem:[%s20023_s13 + $0xf0] sm:$0xff] }
 0x38d   :  { %v16567_v30 = vpack.c.bf16 %v1399_v23, %v1393_v52  ;;  %1914 = vmatprep.mubr.f32.mxu0 %v15366_v63 }
 0x38e   :  { %11884 = vmatmul.mubr.msk.f32.gmra.mrb[54].mxu1 %vm83_vm0, %v16056_v38 }
 0x38f   :  { %13827 = vmatpush3.bf16.msra.mxu1 %v16462_v15  ;;  %v1403_v43 = vpop.f32.mrb[60].mxu0  ;;  %11918 = vmatprep.mubr.f32.mxu1 %v10268_v49  ;;  %v10270_v15 = vld [vmem:[%s20023_s13 + $0x90] sm:$0xff] }
 0x390   :  { %13829 = vmatprep.subr.bf16.mxu1 %v16318_v46  ;;  %v1405_v21 = vpop.f32.mrb[61].mxu0  ;;  %10123 = vmatmul.mubr.msk.f32.gmra.mrb[166].mxu0 %vm83_vm0, %v16056_v38  ;;  %v10274_v49 = vld [vmem:[%s20023_s13 + $0xb0] sm:$0xff] }
 0x391   :  { %1985 = vmatprep.mubr.f32.mxu0 %v15366_v63 }
 0x392   :  { %11919 = vmatmul.mubr.f32.vlgmr.msra.gmra.mrb[56].mxu1 %v10269_v41  ;;  %v10276_v41 = vld [vmem:[%s20023_s13 + $0xc0] sm:$0xff] }
 0x393   :  { %13831 = vmatpush3.bf16.msra.mxu1 %v16318_v46  ;;  %v1409_v18 = vpop.f32.mrb[62].mxu0  ;;  %11921 = vmatprep.mubr.f32.mxu1 %v10270_v15  ;;  %v10272_v46 = vld [vmem:[%s20023_s13 + $0xa0] sm:$0xff]  ;;  %v10278_v15 = vld [vmem:[%s20023_s13 + $0xd0] sm:$0xff] }
 0x394   :  { %13833 = vmatprep.subr.bf16.mxu1 %v16337_v14  ;;  %v16612_v24 = vpack.c.bf16 %v1409_v18, %v1403_v43  ;;  %v1411_v55 = vpop.f32.mrb[63].mxu0  ;;  %10124 = vmatmul.mubr.msk.f32.vlgmr.msra.gmra.mrb[168].mxu0 %vm83_vm0, %v15918_v2 }
 0x395   :  { %v16619_v12 = vpack.c.bf16 %v1411_v55, %v1405_v21  ;;  %1991 = vmatprep.mubr.f32.mxu0 %v15366_v63  ;;  %13735 = vmatpush1.bf16.msra.mxu0 %v13734_v22  ;;  %v10279_v22 = vld [vmem:[%s20023_s13 + $0xd8] sm:$0xff] }
 0x396   :  { %11922 = vmatmul.mubr.f32.gmra.mrb[58].mxu1 %v10271_v10  ;;  %13737 = vmatprep.subr.bf16.mxu0 %v13736_v36  ;;  %v10281_v10 = vld [vmem:[%s20023_s13 + $0xe8] sm:$0xff]  ;;  %v10283_v55 = vld [vmem:[%s20023_s13 + $0xf8] sm:$0xff] }
 0x397   :  { %13835 = vmatpush3.bf16.msra.mxu1 %v16337_v14  ;;  %v1415_v52 = vpop.f32.mrb[64].mxu0  ;;  %11924 = vmatprep.mubr.f32.mxu1 %v10272_v46 }
 0x398   :  { %13837 = vmatprep.subr.bf16.mxu1 %v16354_v29  ;;  %v1417_v23 = vpop.f32.mrb[65].mxu0  ;;  %10125 = vmatmul.mubr.msk.f32.gmra.mrb[170].mxu0 %vm83_vm0, %v15938_v11 }
 0x399   :  { %1997 = vmatprep.mubr.f32.mxu0 %v15366_v63  ;;  %13739 = vmatpush1.bf16.msra.mxu0 %v13738_v1 }
 0x39a   :  { %11925 = vmatmul.mubr.f32.gmra.mrb[60].mxu1 %v10273_v27  ;;  %13741 = vmatprep.subr.bf16.mxu0 %v13740_v17  ;;  %v3354_v17 = vld [vmem:[%s20023_s13] sm:$0xff]  ;;  %v3355_v27 = vld [vmem:[%s20023_s13 + $0x8] sm:$0xff] }
 0x39b   :  { %13839 = vmatpush3.bf16.msra.mxu1 %v16354_v29  ;;  %v1421_v14 = vpop.f32.mrb[66].mxu0  ;;  %11927 = vmatprep.mubr.f32.mxu1 %v10274_v49  ;;  %v3356_v49 = vld [vmem:[%s20023_s13 + $0x10] sm:$0xff] }
 0x39c   :  { %13841 = vmatprep.subr.bf16.mxu1 %v16370_v20  ;;  %v16638_v3 = vpack.c.bf16 %v1421_v14, %v1415_v52  ;;  %v1423_v43 = vpop.f32.mrb[67].mxu0  ;;  %10126 = vmatmul.mubr.msk.f32.gmra.mrb[172].mxu0 %vm83_vm0, %v15948_v50  ;;  %v3357_v14 = vld [vmem:[%s20023_s13 + $0x18] sm:$0xff] }
 0x39d   :  { %v16645_v44 = vpack.c.bf16 %v1423_v43, %v1417_v23  ;;  %2003 = vmatprep.mubr.f32.mxu0 %v15366_v63 }
 0x39e   :  { %11928 = vmatmul.mubr.f32.gmra.mrb[62].mxu1 %v10275_v4 }
 0x39f   :  { %13843 = vmatpush3.bf16.msra.mxu1 %v16370_v20  ;;  %v1427_v29 = vpop.f32.mrb[68].mxu0  ;;  %11930 = vmatprep.mubr.f32.mxu1 %v10276_v41  ;;  %v3358_v41 = vld [vmem:[%s20023_s13 + $0x20] sm:$0xff] }
 0x3a0   :  { %13845 = vmatprep.subr.bf16.mxu1 %v16386_v47  ;;  %v1429_v21 = vpop.f32.mrb[69].mxu0  ;;  %10127 = vmatmul.mubr.msk.f32.gmra.mrb[174].mxu0 %vm83_vm0, %v15956_v54 }
 0x3a1   :  { %2009 = vmatprep.mubr.f32.mxu0 %v15366_v63 }
 0x3a2   :  { %11931 = vmatmul.mubr.f32.gmra.mrb[64].mxu1 %v10277_v6  ;;  %v3359_v6 = vld [vmem:[%s20023_s13 + $0x28] sm:$0xff] }
 0x3a3   :  { %13847 = vmatpush3.bf16.msra.mxu1 %v16386_v47  ;;  %v1433_v20 = vpop.f32.mrb[70].mxu0  ;;  %11933 = vmatprep.mubr.f32.mxu1 %v10278_v15  ;;  %v3360_v15 = vld [vmem:[%s20023_s13 + $0x30] sm:$0xff] }
 0x3a4   :  { %13849 = vmatprep.subr.bf16.mxu1 %v16426_v34  ;;  %v16664_v36 = vpack.c.bf16 %v1433_v20, %v1427_v29  ;;  %v1435_v8 = vpop.f32.mrb[71].mxu0  ;;  %10128 = vmatmul.mubr.msk.f32.gmra.mrb[176].mxu0 %vm83_vm0, %v15966_v45  ;;  %v3361_v20 = vld [vmem:[%s20023_s13 + $0x38] sm:$0xff] }
 0x3a5   :  { %v16671_v18 = vpack.c.bf16 %v1435_v8, %v1429_v21  ;;  %2015 = vmatprep.mubr.f32.mxu0 %v15366_v63 }
 0x3a6   :  { %11934 = vmatmul.mubr.f32.gmra.mrb[66].mxu1 %v10279_v22 }
 0x3a7   :  { %13851 = vmatpush3.bf16.msra.mxu1 %v16426_v34  ;;  %v1504_v47 = vpop.f32.mrb[72].mxu0  ;;  %11936 = vmatprep.mubr.f32.mxu1 %v10280_v26  ;;  %v3362_v26 = vld [vmem:[%s20023_s13 + $0x40] sm:$0xff] }
 0x3a8   :  { %13853 = vmatprep.subr.bf16.mxu1 %v16442_v39  ;;  %v1506_v13 = vpop.f32.mrb[73].mxu0  ;;  %10129 = vmatmul.mubr.msk.f32.gmra.mrb[178].mxu0 %vm83_vm0, %v15974_v37 }
 0x3a9   :  { %2021 = vmatprep.mubr.f32.mxu0 %v15366_v63 }
 0x3aa   :  { %11937 = vmatmul.mubr.f32.gmra.mrb[68].mxu1 %v10281_v10  ;;  %v3363_v10 = vld [vmem:[%s20023_s13 + $0x48] sm:$0xff] }
 0x3ab   :  { %13855 = vmatpush3.bf16.msra.mxu1 %v16442_v39  ;;  %v1510_v34 = vpop.f32.mrb[74].mxu0  ;;  %11939 = vmatprep.mubr.f32.mxu1 %v10282_v57  ;;  %v3364_v57 = vld [vmem:[%s20023_s13 + $0x50] sm:$0xff] }
 0x3ac   :  { %13857 = vmatprep.subr.bf16.mxu1 %v16458_v7  ;;  %v16690_v46 = vpack.c.bf16 %v1510_v34, %v1504_v47  ;;  %v1512_v1 = vpop.f32.mrb[75].mxu0  ;;  %10130 = vmatmul.mubr.msk.f32.gmra.mrb[180].mxu0 %vm83_vm0, %v15984_v56  ;;  %v3365_v34 = vld [vmem:[%s20023_s13 + $0x58] sm:$0xff] }
 0x3ad   :  { %v16697_v52 = vpack.c.bf16 %v1512_v1, %v1506_v13  ;;  %2027 = vmatprep.mubr.f32.mxu0 %v15366_v63 }
 0x3ae   :  { %11940 = vmatmul.mubr.f32.gmra.mrb[70].mxu1 %v10283_v55 }
 0x3af   :  { %13859 = vmatpush3.bf16.msra.mxu1 %v16458_v7  ;;  %v1516_v39 = vpop.f32.mrb[76].mxu0  ;;  %11974 = vmatprep.mubr.f32.mxu1 %v3354_v17  ;;  %v3366_v17 = vld [vmem:[%s20023_s13 + $0x60] sm:$0xff] }
 0x3b0   :  { %13861 = vmatprep.subr.bf16.mxu1 %v16474_v48  ;;  %v1518_v23 = vpop.f32.mrb[77].mxu0  ;;  %10131 = vmatmul.mubr.msk.f32.gmra.mrb[182].mxu0 %vm83_vm0, %v15992_v32 }
 0x3b1   :  { %2033 = vmatprep.mubr.f32.mxu0 %v15366_v63 }
 0x3b2   :  { %11975 = vmatmul.mubr.f32.vlgmr.msra.gmra.mrb[56].mxu1 %v3355_v27  ;;  %v3367_v27 = vld [vmem:[%s20023_s13 + $0x68] sm:$0xff] }
 0x3b3   :  { %13863 = vmatpush3.bf16.msra.mxu1 %v16474_v48  ;;  %v1522_v7 = vpop.f32.mrb[78].mxu0  ;;  %11977 = vmatprep.mubr.f32.mxu1 %v3356_v49  ;;  %v3368_v49 = vld [vmem:[%s20023_s13 + $0x70] sm:$0xff] }
 0x3b4   :  { %13865 = vmatprep.subr.bf16.mxu1 %v16494_v51  ;;  %v16716_v4 = vpack.c.bf16 %v1522_v7, %v1516_v39  ;;  %v1524_v43 = vpop.f32.mrb[79].mxu0  ;;  %10132 = vmatmul.mubr.msk.f32.gmra.mrb[184].mxu0 %vm83_vm0, %v16002_v9  ;;  %v3369_v7 = vld [vmem:[%s20023_s13 + $0x78] sm:$0xff] }
 0x3b5   :  { %v16723_v29 = vpack.c.bf16 %v1524_v43, %v1518_v23  ;;  %2039 = vmatprep.mubr.f32.mxu0 %v15366_v63 }
 0x3b6   :  { %11978 = vmatmul.mubr.f32.gmra.mrb[58].mxu1 %v3357_v14 }
 0x3b7   :  { %13867 = vmatpush3.bf16.msra.mxu1 %v16494_v51  ;;  %v1528_v48 = vpop.f32.mrb[80].mxu0  ;;  %11980 = vmatprep.mubr.f32.mxu1 %v3358_v41  ;;  %v10284_v41 = vld [vmem:[%s20023_s13 + $0x100] sm:$0xff] }
 0x3b8   :  { %13869 = vmatprep.subr.bf16.mxu1 %v16516_v58  ;;  %v1530_v21 = vpop.f32.mrb[81].mxu0  ;;  %10133 = vmatmul.mubr.msk.f32.gmra.mrb[186].mxu0 %vm83_vm0, %v16009_v40 }
 0x3b9   :  { %2045 = vmatprep.mubr.f32.mxu0 %v15366_v63 }
 0x3ba   :  { %11981 = vmatmul.mubr.f32.gmra.mrb[60].mxu1 %v3359_v6  ;;  %v1001_v6 = vld [vmem:[%s20029_s19 + $0x148] sm:$0xff] }
 0x3bb   :  { %13871 = vmatpush3.bf16.msra.mxu1 %v16516_v58  ;;  %v1534_v51 = vpop.f32.mrb[82].mxu0  ;;  %11983 = vmatprep.mubr.f32.mxu1 %v3360_v15  ;;  %v10285_v15 = vld [vmem:[%s20023_s13 + $0x108] sm:$0xff] }
 0x3bc   :  { %13873 = vmatprep.subr.bf16.mxu1 %v16538_v19  ;;  %v16742_v22 = vpack.c.bf16 %v1534_v51, %v1528_v48  ;;  %v1536_v8 = vpop.f32.mrb[83].mxu0  ;;  %10134 = vmatmul.mubr.msk.f32.gmra.mrb[188].mxu0 %vm83_vm0, %v16018_v31  ;;  %v1029_v51 = vld [vmem:[%s20029_s19 + $0x228] sm:$0xff] }
 0x3bd   :  { %v16749_v47 = vpack.c.bf16 %v1536_v8, %v1530_v21  ;;  %2051 = vmatprep.mubr.f32.mxu0 %v15366_v63 }
 0x3be   :  { %11984 = vmatmul.mubr.f32.gmra.mrb[62].mxu1 %v3361_v20  ;;  %v1056_v20 = vld [vmem:[%s20029_s19 + $0x300] sm:$0xff] }
 0x3bf   :  { %13875 = vmatpush3.bf16.msra.mxu1 %v16538_v19  ;;  %v1540_v58 = vpop.f32.mrb[84].mxu0  ;;  %11986 = vmatprep.mubr.f32.mxu1 %v3362_v26 }
 0x3c0   :  { %13877 = vmatprep.subr.bf16.mxu1 %v16560_v5  ;;  %v1542_v13 = vpop.f32.mrb[85].mxu0  ;;  %10135 = vmatmul.mubr.msk.f32.gmra.mrb[190].mxu0 %vm83_vm0, %v16025_v35 }
 0x3c1   :  { %2057 = vmatprep.mubr.f32.mxu0 %v15366_v63 }
 0x3c2   :  { %11987 = vmatmul.mubr.f32.gmra.mrb[64].mxu1 %v3363_v10  ;;  %v1028_v10 = vld [vmem:[%s20029_s19 + $0x220] sm:$0xff] }
 0x3c3   :  { %13879 = vmatpush3.bf16.msra.mxu1 %v16560_v5  ;;  %v1546_v19 = vpop.f32.mrb[86].mxu0  ;;  %11989 = vmatprep.mubr.f32.mxu1 %v3364_v57 }
 0x3c4   :  { %13881 = vmatprep.subr.bf16.mxu1 %v16612_v24  ;;  %v16768_v55 = vpack.c.bf16 %v1546_v19, %v1540_v58  ;;  %v1548_v1 = vpop.f32.mrb[87].mxu0  ;;  %10136 = vmatmul.mubr.msk.f32.gmra.mrb[192].mxu0 %vm83_vm0, %v16034_v28  ;;  %v13744_v58 = vpack.c.bf16 %v1056_v20, %v1029_v51  ;;  %v10287_v19 = vld [vmem:[%s20023_s13 + $0x118] sm:$0xff]  ;;  %v10293_v20 = vld [vmem:[%s20023_s13 + $0x148] sm:$0xff] }
 0x3c5   :  { %v16775_v39 = vpack.c.bf16 %v1548_v1, %v1542_v13  ;;  %2063 = vmatprep.mubr.f32.mxu0 %v15366_v63  ;;  %v1055_v13 = vld [vmem:[%s20029_s19 + $0x2f8] sm:$0xff]  ;;  %v1004_v1 = vld [vmem:[%s20029_s19 + $0x160] sm:$0xff] }
 0x3c6   :  { %11990 = vmatmul.mubr.f32.gmra.mrb[66].mxu1 %v3365_v34  ;;  %v977_v34 = vld [vmem:[%s20029_s19 + $0x88] sm:$0xff] }
 0x3c7   :  { %13883 = vmatpush3.bf16.msra.mxu1 %v16612_v24  ;;  %v1552_v5 = vpop.f32.mrb[88].mxu0  ;;  %11992 = vmatprep.mubr.f32.mxu1 %v3366_v17 }
 0x3c8   :  { %13885 = vmatprep.subr.bf16.mxu1 %v16638_v3  ;;  %v1554_v23 = vpop.f32.mrb[89].mxu0  ;;  %10137 = vmatmul.mubr.msk.f32.gmra.mrb[194].mxu0 %vm83_vm0, %v16041_v42 }
 0x3c9   :  { %2069 = vmatprep.mubr.f32.mxu0 %v15366_v63 }
 0x3ca   :  { %11993 = vmatmul.mubr.f32.gmra.mrb[68].mxu1 %v3367_v27 }
 0x3cb   :  { %13887 = vmatpush3.bf16.msra.mxu1 %v16638_v3  ;;  %v1558_v24 = vpop.f32.mrb[90].mxu0  ;;  %11995 = vmatprep.mubr.f32.mxu1 %v3368_v49  ;;  %v974_v3 = vld [vmem:[%s20029_s19 + $0x70] sm:$0xff]  ;;  %v13748_v49 = vpack.c.bf16 %v1004_v1, %v977_v34 }
 0x3cc   :  { %13889 = vmatprep.subr.bf16.mxu1 %v16664_v36  ;;  %v16794_v14 = vpack.c.bf16 %v1558_v24, %v1552_v5  ;;  %v1560_v43 = vpop.f32.mrb[91].mxu0  ;;  %10138 = vmatmul.mubr.msk.f32.gmra.mrb[196].mxu0 %vm83_vm0, %v16050_v59  ;;  %v13742_v26 = vpack.c.bf16 %v1001_v6, %v974_v3  ;;  %v10291_v3 = vld [vmem:[%s20023_s13 + $0x138] sm:$0xff]  ;;  %v10298_v1 = vld [vmem:[%s20023_s13 + $0x170] sm:$0xff] }
 0x3cd   :  { %v16801_v48 = vpack.c.bf16 %v1560_v43, %v1554_v23  ;;  %2075 = vmatprep.mubr.f32.mxu0 %v15366_v63  ;;  %v13746_v23 = vpack.c.bf16 %v1055_v13, %v1028_v10  ;;  %v10296_v13 = vld [vmem:[%s20023_s13 + $0x160] sm:$0xff] }
 0x3ce   :  { %11996 = vmatmul.mubr.f32.gmra.mrb[70].mxu1 %v3369_v7  ;;  %v10289_v7 = vld [vmem:[%s20023_s13 + $0x128] sm:$0xff] }
 0x3cf   :  { %13891 = vmatpush3.bf16.msra.mxu1 %v16664_v36  ;;  %v1564_v21 = vpop.f32.mrb[92].mxu0  ;;  %12030 = vmatprep.mubr.f32.mxu1 %v10284_v41  ;;  %v10286_v36 = vld [vmem:[%s20023_s13 + $0x110] sm:$0xff] }
 0x3d0   :  { %13893 = vmatprep.subr.bf16.mxu1 %v16478_v25  ;;  %v1566_v8 = vpop.f32.mrb[93].mxu0  ;;  %10139 = vmatmul.mubr.msk.f32.gmra.mrb[198].mxu0 %vm83_vm0, %v16056_v38  ;;  %v10290_v41 = vld [vmem:[%s20023_s13 + $0x130] sm:$0xff] }
 0x3d1   :  { %2146 = vmatprep.mubr.f32.mxu0 %v15366_v63 }
 0x3d2   :  { %12031 = vmatmul.mubr.f32.vlgmr.msra.gmra.mrb[56].mxu1 %v10285_v15  ;;  %v10292_v15 = vld [vmem:[%s20023_s13 + $0x140] sm:$0xff] }
 0x3d3   :  { %13895 = vmatpush3.bf16.msra.mxu1 %v16478_v25  ;;  %v1570_v57 = vpop.f32.mrb[94].mxu0  ;;  %12033 = vmatprep.mubr.f32.mxu1 %v10286_v36  ;;  %v10288_v25 = vld [vmem:[%s20023_s13 + $0x120] sm:$0xff]  ;;  %v10294_v36 = vld [vmem:[%s20023_s13 + $0x150] sm:$0xff] }
 0x3d4   :  { %13897 = vmatprep.subr.bf16.mxu1 %v16498_v16  ;;  %v16844_v17 = vpack.c.bf16 %v1570_v57, %v1564_v21  ;;  %v1572_v5 = vpop.f32.mrb[95].mxu0  ;;  %10140 = vmatmul.mubr.msk.f32.vlgmr.msra.gmra.mrb[200].mxu0 %vm83_vm0, %v15918_v2 }
 0x3d5   :  { %v16851_v27 = vpack.c.bf16 %v1572_v5, %v1566_v8  ;;  %2152 = vmatprep.mubr.f32.mxu0 %v15366_v63  ;;  %13743 = vmatpush1.bf16.msra.mxu0 %v13742_v26  ;;  %v10295_v26 = vld [vmem:[%s20023_s13 + $0x158] sm:$0xff] }
 0x3d6   :  { %12034 = vmatmul.mubr.f32.gmra.mrb[58].mxu1 %v10287_v19  ;;  %13745 = vmatprep.subr.bf16.mxu0 %v13744_v58  ;;  %v10297_v19 = vld [vmem:[%s20023_s13 + $0x168] sm:$0xff]  ;;  %v10299_v5 = vld [vmem:[%s20023_s13 + $0x178] sm:$0xff] }
 0x3d7   :  { %13899 = vmatpush3.bf16.msra.mxu1 %v16498_v16  ;;  %v1576_v24 = vpop.f32.mrb[96].mxu0  ;;  %12036 = vmatprep.mubr.f32.mxu1 %v10288_v25 }
 0x3d8   :  { %13901 = vmatprep.subr.bf16.mxu1 %v16520_v60  ;;  %v1578_v43 = vpop.f32.mrb[97].mxu0  ;;  %10141 = vmatmul.mubr.msk.f32.gmra.mrb[202].mxu0 %vm83_vm0, %v15938_v11 }
 0x3d9   :  { %2158 = vmatprep.mubr.f32.mxu0 %v15366_v63  ;;  %13747 = vmatpush1.bf16.msra.mxu0 %v13746_v23 }
 0x3da   :  { %12037 = vmatmul.mubr.f32.gmra.mrb[60].mxu1 %v10289_v7  ;;  %13749 = vmatprep.subr.bf16.mxu0 %v13748_v49  ;;  %v10300_v49 = vld [vmem:[%s20023_s13 + $0x180] sm:$0xff]  ;;  %v10301_v7 = vld [vmem:[%s20023_s13 + $0x188] sm:$0xff] }
 0x3db   :  { %13903 = vmatpush3.bf16.msra.mxu1 %v16520_v60  ;;  %v1582_v16 = vpop.f32.mrb[98].mxu0  ;;  %12039 = vmatprep.mubr.f32.mxu1 %v10290_v41  ;;  %v10302_v41 = vld [vmem:[%s20023_s13 + $0x190] sm:$0xff] }
 0x3dc   :  { %13905 = vmatprep.subr.bf16.mxu1 %v16542_v33  ;;  %v16870_v6 = vpack.c.bf16 %v1582_v16, %v1576_v24  ;;  %v1584_v21 = vpop.f32.mrb[99].mxu0  ;;  %10142 = vmatmul.mubr.msk.f32.gmra.mrb[204].mxu0 %vm83_vm0, %v15948_v50  ;;  %v10303_v16 = vld [vmem:[%s20023_s13 + $0x198] sm:$0xff] }
 0x3dd   :  { %v16877_v51 = vpack.c.bf16 %v1584_v21, %v1578_v43  ;;  %2164 = vmatprep.mubr.f32.mxu0 %v15366_v63 }
 0x3de   :  { %12040 = vmatmul.mubr.f32.gmra.mrb[62].mxu1 %v10291_v3 }
 0x3df   :  { %13907 = vmatpush3.bf16.msra.mxu1 %v16542_v33  ;;  %v1588_v60 = vpop.f32.mrb[100].mxu0  ;;  %12042 = vmatprep.mubr.f32.mxu1 %v10292_v15  ;;  %v10304_v15 = vld [vmem:[%s20023_s13 + $0x1a0] sm:$0xff] }
 0x3e0   :  { %13909 = vmatprep.subr.bf16.mxu1 %v16567_v30  ;;  %v1590_v8 = vpop.f32.mrb[101].mxu0  ;;  %10143 = vmatmul.mubr.msk.f32.gmra.mrb[206].mxu0 %vm83_vm0, %v15956_v54 }
 0x3e1   :  { %2170 = vmatprep.mubr.f32.mxu0 %v15366_v63 }
 0x3e2   :  { %12043 = vmatmul.mubr.f32.gmra.mrb[64].mxu1 %v10293_v20  ;;  %v10305_v20 = vld [vmem:[%s20023_s13 + $0x1a8] sm:$0xff] }
 0x3e3   :  { %13911 = vmatpush3.bf16.msra.mxu1 %v16567_v30  ;;  %v1594_v33 = vpop.f32.mrb[102].mxu0  ;;  %12045 = vmatprep.mubr.f32.mxu1 %v10294_v36  ;;  %v10306_v36 = vld [vmem:[%s20023_s13 + $0x1b0] sm:$0xff] }
 0x3e4   :  { %13913 = vmatprep.subr.bf16.mxu1 %v16619_v12  ;;  %v16896_v58 = vpack.c.bf16 %v1594_v33, %v1588_v60  ;;  %v1596_v10 = vpop.f32.mrb[103].mxu0  ;;  %10144 = vmatmul.mubr.msk.f32.gmra.mrb[208].mxu0 %vm83_vm0, %v15966_v45  ;;  %v10037_v33 = vld [vmem:[%s20026_s16 + $0x1] ss:$0 sm:$0xff] }
 0x3e5   :  { %v16903_v57 = vpack.c.bf16 %v1596_v10, %v1590_v8  ;;  %2176 = vmatprep.mubr.f32.mxu0 %v15366_v63 }
 0x3e6   :  { %12046 = vmatmul.mubr.f32.gmra.mrb[66].mxu1 %v10295_v26  ;;  %v10307_v26 = vld [vmem:[%s20023_s13 + $0x1b8] sm:$0xff] }
 0x3e7   :  { %13915 = vmatpush3.bf16.msra.mxu1 %v16619_v12  ;;  %v1665_v30 = vpop.f32.mrb[104].mxu0  ;;  %12048 = vmatprep.mubr.f32.mxu1 %v10296_v13 }
 0x3e8   :  { %13917 = vmatprep.subr.bf16.mxu1 %v16645_v44  ;;  %v1667_v34 = vpop.f32.mrb[105].mxu0  ;;  %10145 = vmatmul.mubr.msk.f32.gmra.mrb[210].mxu0 %vm83_vm0, %v15974_v37 }
 0x3e9   :  { %2182 = vmatprep.mubr.f32.mxu0 %v15366_v63 }
 0x3ea   :  { %12049 = vmatmul.mubr.f32.gmra.mrb[68].mxu1 %v10297_v19 }
 0x3eb   :  { %13919 = vmatpush3.bf16.msra.mxu1 %v16645_v44  ;;  %v1671_v12 = vpop.f32.mrb[106].mxu0  ;;  %12051 = vmatprep.mubr.f32.mxu1 %v10298_v1 }
 0x3ec   :  { %13921 = vmatprep.subr.bf16.mxu1 %v16671_v18  ;;  %v16922_v25 = vpack.c.bf16 %v1671_v12, %v1665_v30  ;;  %v1673_v23 = vpop.f32.mrb[107].mxu0  ;;  %10146 = vmatmul.mubr.msk.f32.gmra.mrb[212].mxu0 %vm83_vm0, %v15984_v56 }
 0x3ed   :  { %v16929_v24 = vpack.c.bf16 %v1673_v23, %v1667_v34  ;;  %2188 = vmatprep.mubr.f32.mxu0 %v15366_v63  ;;  %v10309_v23 = vld [vmem:[%s20023_s13 + $0x1c8] sm:$0xff] }
 0x3ee   :  { %12052 = vmatmul.mubr.f32.gmra.mrb[70].mxu1 %v10299_v5 }
 0x3ef   :  { %13923 = vmatpush3.bf16.msra.mxu1 %v16671_v18  ;;  %v1677_v44 = vpop.f32.mrb[108].mxu0  ;;  %12086 = vmatprep.mubr.f32.mxu1 %v10300_v49 }
 0x3f0   :  { %13925 = vmatprep.subr.bf16.mxu1 %v16690_v46  ;;  %v1679_v43 = vpop.f32.mrb[109].mxu0  ;;  %10147 = vmatmul.mubr.msk.f32.gmra.mrb[214].mxu0 %vm83_vm0, %v15992_v32 }
 0x3f1   :  { %2194 = vmatprep.mubr.f32.mxu0 %v15366_v63 }
 0x3f2   :  { %12087 = vmatmul.mubr.f32.vlgmr.msra.gmra.mrb[56].mxu1 %v10301_v7 }
 0x3f3   :  { %13927 = vmatpush3.bf16.msra.mxu1 %v16690_v46  ;;  %v1683_v18 = vpop.f32.mrb[110].mxu0  ;;  %12089 = vmatprep.mubr.f32.mxu1 %v10302_v41  ;;  %v10311_v41 = vld [vmem:[%s20023_s13 + $0x1d8] sm:$0xff] }
 0x3f4   :  { %13929 = vmatprep.subr.bf16.mxu1 %v16716_v4  ;;  %v16948_v3 = vpack.c.bf16 %v1683_v18, %v1677_v44  ;;  %v1685_v21 = vpop.f32.mrb[111].mxu0  ;;  %10148 = vmatmul.mubr.msk.f32.gmra.mrb[216].mxu0 %vm83_vm0, %v16002_v9 }
 0x3f5   :  { %v16955_v60 = vpack.c.bf16 %v1685_v21, %v1679_v43  ;;  %2200 = vmatprep.mubr.f32.mxu0 %v15366_v63  ;;  %v10312_v21 = vld [vmem:[%s20023_s13 + $0x1e0] sm:$0xff] }
 0x3f6   :  { %12090 = vmatmul.mubr.f32.gmra.mrb[58].mxu1 %v10303_v16 }
 0x3f7   :  { %13931 = vmatpush3.bf16.msra.mxu1 %v16716_v4  ;;  %v1689_v46 = vpop.f32.mrb[112].mxu0  ;;  %12092 = vmatprep.mubr.f32.mxu1 %v10304_v15 }
 0x3f8   :  { %13933 = vmatprep.subr.bf16.mxu1 %v16742_v22  ;;  %v1691_v8 = vpop.f32.mrb[113].mxu0  ;;  %10149 = vmatmul.mubr.msk.f32.gmra.mrb[218].mxu0 %vm83_vm0, %v16009_v40 }
 0x3f9   :  { %2206 = vmatprep.mubr.f32.mxu0 %v15366_v63 }
 0x3fa   :  { %12093 = vmatmul.mubr.f32.gmra.mrb[60].mxu1 %v10305_v20 }
 0x3fb   :  { %13935 = vmatpush3.bf16.msra.mxu1 %v16742_v22  ;;  %v1695_v4 = vpop.f32.mrb[114].mxu0  ;;  %12095 = vmatprep.mubr.f32.mxu1 %v10306_v36  ;;  %v10308_v22 = vld [vmem:[%s20023_s13 + $0x1c0] sm:$0xff] }
 0x3fc   :  { %13937 = vmatprep.subr.bf16.mxu1 %v16768_v55  ;;  %v16977_v10 = vpack.c.bf16 %v1695_v4, %v1689_v46  ;;  %v1697_v13 = vpop.f32.mrb[115].mxu0  ;;  %10150 = vmatmul.mubr.msk.f32.gmra.mrb[220].mxu0 %vm83_vm0, %v16018_v31  ;;  %v10314_v4 = vld [vmem:[%s20023_s13 + $0x1f0] sm:$0xff] }
 0x3fd   :  { %v16984_v30 = vpack.c.bf16 %v1697_v13, %v1691_v8  ;;  %v11853_v19 = vpop.f32.mrb[6].mxu1  ;;  %2212 = vmatprep.mubr.f32.mxu0 %v15366_v63  ;;  %v10313_v8 = vld [vmem:[%s20023_s13 + $0x1e8] sm:$0xff] }
 0x3fe   :  { %v16987_v34 = vadd.f32 %v11853_v19, %v10037_v33  ;;  %12096 = vmatmul.mubr.f32.gmra.mrb[62].mxu1 %v10307_v26  ;;  %v655_v1 = vpop.f32.mrb[7].mxu1  ;;  %v10315_v19 = vld [vmem:[%s20023_s13 + $0x1f8] sm:$0xff] }
 0x3ff   :  { %13939 = vmatpush3.bf16.msra.mxu1 %v16768_v55  ;;  %v16990_v12 = vadd.f32 %v10037_v33, %v655_v1  ;;  %v1701_v5 = vpop.f32.mrb[116].mxu0  ;;  %12098 = vmatprep.mubr.f32.mxu1 %v10308_v22  ;;  %v10310_v55 = vld [vmem:[%s20023_s13 + $0x1d0] sm:$0xff] }
 0x400   :  { %v10039_v49 = vmul.f32 -1.442695, %v16987_v34  ;;  %13941 = vmatprep.subr.bf16.mxu1 %v16794_v14  ;;  %v1703_v44 = vpop.f32.mrb[117].mxu0  ;;  %10151 = vmatmul.mubr.msk.f32.gmra.mrb[222].mxu0 %vm83_vm0, %v16025_v35 }
 0x401   :  { %v10038_v7 = vmul.f32 -1.442695, %v16990_v12  ;;  %2218 = vmatprep.mubr.f32.mxu0 %v15366_v63 }
 0x402   :  { %15218 = vpow2.f32 %v10039_v49  ;;  %12099 = vmatmul.mubr.f32.gmra.mrb[64].mxu1 %v10309_v23  ;;  %v10316_v49 = vld [vmem:[%s20023_s13 + $0x200] sm:$0xff] }
 0x403   :  { %15220 = vpow2.f32 %v10038_v7  ;;  %13943 = vmatpush3.bf16.msra.mxu1 %v16794_v14  ;;  %v1707_v43 = vpop.f32.mrb[118].mxu0  ;;  %12101 = vmatprep.mubr.f32.mxu1 %v10310_v55 }
 0x404   :  { %13945 = vmatprep.subr.bf16.mxu1 %v16844_v17  ;;  %v17009_v18 = vpack.c.bf16 %v1707_v43, %v1701_v5  ;;  %v1709_v16 = vpop.f32.mrb[119].mxu0  ;;  %10152 = vmatmul.mubr.msk.f32.gmra.mrb[224].mxu0 %vm83_vm0, %v16034_v28 }
 0x405   :  { %v17016_v15 = vpack.c.bf16 %v1709_v16, %v1703_v44  ;;  %v2953_v14 = vpop.f32.mrb[8].mxu1  ;;  %2224 = vmatprep.mubr.f32.mxu0 %v15366_v63  ;;  %v976_v16 = vld [vmem:[%s20029_s19 + $0x80] sm:$0xff] }
 0x406   :  { %v2955_v46 = vpop.f32.mrb[9].mxu1  ;;  %12102 = vmatmul.mubr.f32.gmra.mrb[66].mxu1 %v10311_v41 }
 0x407   :  { %13947 = vmatpush3.bf16.msra.mxu1 %v16844_v17  ;;  %v1713_v20 = vpop.f32.mrb[120].mxu0  ;;  %12104 = vmatprep.mubr.f32.mxu1 %v10312_v21  ;;  %v1003_v21 = vld [vmem:[%s20029_s19 + $0x158] sm:$0xff] }
 0x408   :  { %13949 = vmatprep.subr.bf16.mxu1 %v16870_v6  ;;  %v1715_v36 = vpop.f32.mrb[121].mxu0  ;;  %10153 = vmatmul.mubr.msk.f32.gmra.mrb[226].mxu0 %vm83_vm0, %v16041_v42 }
 0x409   :  { %v2959_v33 = vpop.f32.mrb[10].mxu1  ;;  %2230 = vmatprep.mubr.f32.mxu0 %v15366_v63 }
 0x40a   :  { %v17030_v17 = vpack.c.bf16 %v2959_v33, %v2953_v14  ;;  %v2961_v26 = vpop.f32.mrb[11].mxu1  ;;  %12105 = vmatmul.mubr.f32.gmra.mrb[68].mxu1 %v10313_v8  ;;  %v1058_v8 = vld [vmem:[%s20029_s19 + $0x310] sm:$0xff]  ;;  %v13750_v33 = vpack.c.bf16 %v1003_v21, %v976_v16 }
 0x40b   :  { %v17032_v13 = vpack.c.bf16 %v2961_v26, %v2955_v46  ;;  %13951 = vmatpush3.bf16.msra.mxu1 %v16870_v6  ;;  %v1719_v22 = vpop.f32.mrb[122].mxu0  ;;  %12107 = vmatprep.mubr.f32.mxu1 %v10314_v4  ;;  %v10317_v46 = vld [vmem:[%s20023_s13 + $0x208] sm:$0xff] }
 0x40c   :  { %v15219_v1 = vpop.eup %15218  ;;  %13953 = vmatprep.subr.bf16.mxu1 %v16896_v58  ;;  %v17039_v5 = vpack.c.bf16 %v1719_v22, %v1713_v20  ;;  %v1721_v23 = vpop.f32.mrb[123].mxu0  ;;  %10154 = vmatmul.mubr.msk.f32.gmra.mrb[228].mxu0 %vm83_vm0, %v16050_v59  ;;  %v1031_v20 = vld [vmem:[%s20029_s19 + $0x238] sm:$0xff] }
 0x40d   :  { %v15221_v6 = vpop.eup %15220  ;;  %v681_v44 = vadd.f32 1.0, %v15219_v1  ;;  %v17046_v55 = vpack.c.bf16 %v1721_v23, %v1715_v36  ;;  %v2965_v7 = vpop.f32.mrb[12].mxu1  ;;  %2236 = vmatprep.mubr.f32.mxu0 %v15366_v63  ;;  %v1030_v1 = vld [vmem:[%s20029_s19 + $0x230] sm:$0xff]  ;;  %v1057_v23 = vld [vmem:[%s20029_s19 + $0x308] sm:$0xff] }
 0x40e   :  { %v680_v43 = vadd.f32 1.0, %v15221_v6  ;;  %v2967_v41 = vpop.f32.mrb[13].mxu1  ;;  %12108 = vmatmul.mubr.f32.gmra.mrb[70].mxu1 %v10315_v19  ;;  %v13752_v19 = vpack.c.bf16 %v1058_v8, %v1031_v20  ;;  %v13754_v20 = vpack.c.bf16 %v1057_v23, %v1030_v1 }
 0x40f   :  { %15222 = vrcp.f32 %v681_v44  ;;  %13955 = vmatpush3.bf16.msra.mxu1 %v16896_v58  ;;  %v1725_v14 = vpop.f32.mrb[124].mxu0  ;;  %12142 = vmatprep.mubr.f32.mxu1 %v10316_v49  ;;  %v10318_v58 = vld [vmem:[%s20023_s13 + $0x210] sm:$0xff]  ;;  %v10319_v44 = vld [vmem:[%s20023_s13 + $0x218] sm:$0xff] }
 0x410   :  { %15224 = vrcp.f32 %v680_v43  ;;  %13957 = vmatprep.subr.bf16.mxu1 %v16697_v52  ;;  %v1727_v36 = vpop.f32.mrb[125].mxu0  ;;  %10155 = vmatmul.mubr.msk.f32.gmra.mrb[230].mxu0 %vm83_vm0, %v16056_v38  ;;  %v1006_v43 = vld [vmem:[%s20029_s19 + $0x170] sm:$0xff] }
 0x411   :  { %v2971_v4 = vpop.f32.mrb[14].mxu1  ;;  %2307 = vmatprep.mubr.f32.mxu0 %v15366_v63 }
 0x412   :  { %v17072_v26 = vpack.c.bf16 %v2971_v4, %v2965_v7  ;;  %v2973_v22 = vpop.f32.mrb[15].mxu1  ;;  %12143 = vmatmul.mubr.f32.vlgmr.msra.gmra.mrb[56].mxu1 %v10317_v46  ;;  %v979_v7 = vld [vmem:[%s20029_s19 + $0x98] sm:$0xff]  ;;  %v10321_v4 = vld [vmem:[%s20023_s13 + $0x228] sm:$0xff] }
 0x413   :  { %v17080_v49 = vpack.c.bf16 %v2973_v22, %v2967_v41  ;;  %13959 = vmatpush3.bf16.msra.mxu1 %v16697_v52  ;;  %v1731_v6 = vpop.f32.mrb[126].mxu0  ;;  %12145 = vmatprep.mubr.f32.mxu1 %v10318_v58  ;;  %v10320_v52 = vld [vmem:[%s20023_s13 + $0x220] sm:$0xff] }
 0x414   :  { %13961 = vmatprep.subr.bf16.mxu1 %v16723_v29  ;;  %v17093_v41 = vpack.c.bf16 %v1731_v6, %v1725_v14  ;;  %v1733_v16 = vpop.f32.mrb[127].mxu0  ;;  %10156 = vmatmul.mubr.msk.f32.vlgmr.msra.gmra.mrb[232].mxu0 %vm83_vm0, %v15918_v2  ;;  %v13756_v14 = vpack.c.bf16 %v1006_v43, %v979_v7 }
 0x415   :  { %v17100_v21 = vpack.c.bf16 %v1733_v16, %v1727_v36  ;;  %v2977_v46 = vpop.f32.mrb[16].mxu1  ;;  %2313 = vmatprep.mubr.f32.mxu0 %v15366_v63  ;;  %13751 = vmatpush1.bf16.msra.mxu0 %v13750_v33  ;;  %v10322_v33 = vld [vmem:[%s20023_s13 + $0x230] sm:$0xff]  ;;  %v10323_v16 = vld [vmem:[%s20023_s13 + $0x238] sm:$0xff] }
 0x416   :  { %v2979_v8 = vpop.f32.mrb[17].mxu1  ;;  %12146 = vmatmul.mubr.f32.gmra.mrb[58].mxu1 %v10319_v44  ;;  %13753 = vmatprep.subr.bf16.mxu0 %v13752_v19 }
 0x417   :  { %13963 = vmatpush3.bf16.msra.mxu1 %v16723_v29  ;;  %v1737_v58 = vpop.f32.mrb[128].mxu0  ;;  %12148 = vmatprep.mubr.f32.mxu1 %v10320_v52 }
 0x418   :  { %13965 = vmatprep.subr.bf16.mxu1 %v16749_v47  ;;  %v1739_v36 = vpop.f32.mrb[129].mxu0  ;;  %10157 = vmatmul.mubr.msk.f32.gmra.mrb[234].mxu0 %vm83_vm0, %v15938_v11 }
 0x419   :  { %v15223_v22 = vpop.eup %15222  ;;  %v2983_v19 = vpop.f32.mrb[18].mxu1  ;;  %2319 = vmatprep.mubr.f32.mxu0 %v15366_v63  ;;  %13755 = vmatpush1.bf16.msra.mxu0 %v13754_v20 }
 0x41a   :  { %v15225_v29 = vpop.eup %15224  ;;  %v17115_v1 = vmul.f32 %v15223_v22, %v16987_v34  ;;  %v17117_v23 = vpack.c.bf16 %v2983_v19, %v2977_v46  ;;  %v2985_v6 = vpop.f32.mrb[19].mxu1  ;;  %12149 = vmatmul.mubr.f32.gmra.mrb[60].mxu1 %v10321_v4  ;;  %13757 = vmatprep.subr.bf16.mxu0 %v13756_v14 }
 0x41b   :  { %v17120_v44 = vmul.f32 %v15225_v29, %v16990_v12  ;;  %v17122_v7 = vpack.c.bf16 %v2985_v6, %v2979_v8  ;;  %13967 = vmatpush3.bf16.msra.mxu1 %v16749_v47  ;;  %v1743_v43 = vpop.f32.mrb[130].mxu0  ;;  %12151 = vmatprep.mubr.f32.mxu1 %v10322_v33  ;;  %v10324_v47 = vld [vmem:[%s20023_s13 + $0x240] sm:$0xff]  ;;  %v10327_v6 = vld [vmem:[%s20023_s13 + $0x258] sm:$0xff] }
 0x41c   :  { %9590 = vst.msk [vmem:[#allocation2 + $0x8] sm:$0xff] %vm83_vm0, %v17115_v1  ;;  %13969 = vmatprep.subr.bf16.mxu1 %v16775_v39  ;;  %v17131_v34 = vpack.c.bf16 %v1743_v43, %v1737_v58  ;;  %v1745_v52 = vpop.f32.mrb[131].mxu0  ;;  %10158 = vmatmul.mubr.msk.f32.gmra.mrb[236].mxu0 %vm83_vm0, %v15948_v50  ;;  %v10325_v58 = vld [vmem:[%s20023_s13 + $0x248] sm:$0xff] }
 0x41d   :  { %20082 = vst [vmem:[#allocation11_spill] sm:$0xff] %v17122_v7  ;;  %9589 = vst.msk [vmem:[#allocation2] sm:$0xff] %vm83_vm0, %v17120_v44  ;;  %v17142_v46 = vpack.c.bf16 %v1745_v52, %v1739_v36  ;;  %v2989_v20 = vpop.f32.mrb[20].mxu1  ;;  %2325 = vmatprep.mubr.f32.mxu0 %v15366_v63  ;;  %v10326_v36 = vld [vmem:[%s20023_s13 + $0x250] sm:$0xff]  ;;  %v10328_v52 = vld [vmem:[%s20023_s13 + $0x260] sm:$0xff] }
 0x41e   :  { %v2991_v8 = vpop.f32.mrb[21].mxu1  ;;  %12152 = vmatmul.mubr.f32.gmra.mrb[62].mxu1 %v10323_v16 }
 0x41f   :  { %13971 = vmatpush3.bf16.msra.mxu1 %v16775_v39  ;;  %v1749_v14 = vpop.f32.mrb[132].mxu0  ;;  %12154 = vmatprep.mubr.f32.mxu1 %v10324_v47 }
 0x420   :  { %13973 = vmatprep.subr.bf16.mxu1 %v16801_v48  ;;  %v1751_v4 = vpop.f32.mrb[133].mxu0  ;;  %10159 = vmatmul.mubr.msk.f32.gmra.mrb[238].mxu0 %vm83_vm0, %v15956_v54 }
 0x421   :  { %v2995_v33 = vpop.f32.mrb[22].mxu1  ;;  %2331 = vmatprep.mubr.f32.mxu0 %v15366_v63 }
 0x422   :  { %v17156_v39 = vpack.c.bf16 %v2995_v33, %v2989_v20  ;;  %v2997_v22 = vpop.f32.mrb[23].mxu1  ;;  %12155 = vmatmul.mubr.f32.gmra.mrb[64].mxu1 %v10325_v58 }
 0x423   :  { %v17158_v19 = vpack.c.bf16 %v2997_v22, %v2991_v8  ;;  %13975 = vmatpush3.bf16.msra.mxu1 %v16801_v48  ;;  %v1755_v29 = vpop.f32.mrb[134].mxu0  ;;  %12157 = vmatprep.mubr.f32.mxu1 %v10326_v36 }
 0x424   :  { %13977 = vmatprep.subr.bf16.mxu1 %v16851_v27  ;;  %v17165_v43 = vpack.c.bf16 %v1755_v29, %v1749_v14  ;;  %v1757_v16 = vpop.f32.mrb[135].mxu0  ;;  %10160 = vmatmul.mubr.msk.f32.gmra.mrb[240].mxu0 %vm83_vm0, %v15966_v45  ;;  %v10329_v14 = vld [vmem:[%s20023_s13 + $0x268] sm:$0xff] }
 0x425   :  { %20083 = vst [vmem:[#allocation12_spill] sm:$0xff] %v17158_v19  ;;  %v17172_v47 = vpack.c.bf16 %v1757_v16, %v1751_v4  ;;  %v3001_v48 = vpop.f32.mrb[24].mxu1  ;;  %2337 = vmatprep.mubr.f32.mxu0 %v15366_v63  ;;  %v10330_v4 = vld [vmem:[%s20023_s13 + $0x270] sm:$0xff] }
 0x426   :  { %v3003_v20 = vpop.f32.mrb[25].mxu1  ;;  %12158 = vmatmul.mubr.f32.gmra.mrb[66].mxu1 %v10327_v6  ;;  %v10331_v6 = vld [vmem:[%s20023_s13 + $0x278] sm:$0xff] }
 0x427   :  { %13979 = vmatpush3.bf16.msra.mxu1 %v16851_v27  ;;  %v1826_v8 = vpop.f32.mrb[136].mxu0  ;;  %12160 = vmatprep.mubr.f32.mxu1 %v10328_v52 }
 0x428   :  { %13981 = vmatprep.subr.bf16.mxu1 %v16877_v51  ;;  %v1828_v58 = vpop.f32.mrb[137].mxu0  ;;  %10161 = vmatmul.mubr.msk.f32.gmra.mrb[242].mxu0 %vm83_vm0, %v15974_v37 }
 0x429   :  { %v3007_v36 = vpop.f32.mrb[26].mxu1  ;;  %2343 = vmatprep.mubr.f32.mxu0 %v15366_v63 }
 0x42a   :  { %v17186_v27 = vpack.c.bf16 %v3007_v36, %v3001_v48  ;;  %v3009_v33 = vpop.f32.mrb[27].mxu1  ;;  %12161 = vmatmul.mubr.f32.gmra.mrb[68].mxu1 %v10329_v14  ;;  %v10332_v48 = vld [vmem:[%s20023_s13 + $0x280] sm:$0xff] }
 0x42b   :  { %v17188_v22 = vpack.c.bf16 %v3009_v33, %v3003_v20  ;;  %13983 = vmatpush3.bf16.msra.mxu1 %v16877_v51  ;;  %v1832_v29 = vpop.f32.mrb[138].mxu0  ;;  %12163 = vmatprep.mubr.f32.mxu1 %v10330_v4 }
 0x42c   :  { %13985 = vmatprep.subr.bf16.mxu1 %v16903_v57  ;;  %v17195_v16 = vpack.c.bf16 %v1832_v29, %v1826_v8  ;;  %v1834_v52 = vpop.f32.mrb[139].mxu0  ;;  %10162 = vmatmul.mubr.msk.f32.gmra.mrb[244].mxu0 %vm83_vm0, %v15984_v56  ;;  %v10333_v8 = vld [vmem:[%s20023_s13 + $0x288] sm:$0xff] }
 0x42d   :  { %20084 = vst [vmem:[#allocation13_spill] sm:$0xff] %v17188_v22  ;;  %v17202_v20 = vpack.c.bf16 %v1834_v52, %v1828_v58  ;;  %v3013_v51 = vpop.f32.mrb[28].mxu1  ;;  %2349 = vmatprep.mubr.f32.mxu0 %v15366_v63  ;;  %v10334_v58 = vld [vmem:[%s20023_s13 + $0x290] sm:$0xff] }
 0x42e   :  { %v3015_v14 = vpop.f32.mrb[29].mxu1  ;;  %12164 = vmatmul.mubr.f32.gmra.mrb[70].mxu1 %v10331_v6 }
 0x42f   :  { %13987 = vmatpush3.bf16.msra.mxu1 %v16903_v57  ;;  %v1838_v4 = vpop.f32.mrb[140].mxu0  ;;  %12198 = vmatprep.mubr.f32.mxu1 %v10332_v48  ;;  %v10335_v48 = vld [vmem:[%s20023_s13 + $0x298] sm:$0xff] }
 0x430   :  { %13989 = vmatprep.subr.bf16.mxu1 %v16922_v25  ;;  %v1840_v36 = vpop.f32.mrb[141].mxu0  ;;  %10163 = vmatmul.mubr.msk.f32.gmra.mrb[246].mxu0 %vm83_vm0, %v15992_v32 }
 0x431   :  { %v3019_v33 = vpop.f32.mrb[30].mxu1  ;;  %2355 = vmatprep.mubr.f32.mxu0 %v15366_v63 }
 0x432   :  { %v17216_v57 = vpack.c.bf16 %v3019_v33, %v3013_v51  ;;  %v3021_v29 = vpop.f32.mrb[31].mxu1  ;;  %12199 = vmatmul.mubr.f32.vlgmr.msra.gmra.mrb[56].mxu1 %v10333_v8  ;;  %v10336_v51 = vld [vmem:[%s20023_s13 + $0x2a0] sm:$0xff] }
 0x433   :  { %v17218_v6 = vpack.c.bf16 %v3021_v29, %v3015_v14  ;;  %13991 = vmatpush3.bf16.msra.mxu1 %v16922_v25  ;;  %v1844_v52 = vpop.f32.mrb[142].mxu0  ;;  %12201 = vmatprep.mubr.f32.mxu1 %v10334_v58 }
 0x434   :  { %13993 = vmatprep.subr.bf16.mxu1 %v16948_v3  ;;  %v17225_v12 = vpack.c.bf16 %v1844_v52, %v1838_v4  ;;  %v1846_v53 = vpop.f32.mrb[143].mxu0  ;;  %10164 = vmatmul.mubr.msk.f32.gmra.mrb[248].mxu0 %vm83_vm0, %v16002_v9  ;;  %v10337_v4 = vld [vmem:[%s20023_s13 + $0x2a8] sm:$0xff] }
 0x435   :  { %20085 = vst [vmem:[#allocation14_spill] sm:$0xff] %v17218_v6  ;;  %v17232_v14 = vpack.c.bf16 %v1846_v53, %v1840_v36  ;;  %v3025_v25 = vpop.f32.mrb[32].mxu1  ;;  %2361 = vmatprep.mubr.f32.mxu0 %v15366_v63  ;;  %v10338_v53 = vld [vmem:[%s20023_s13 + $0x2b0] sm:$0xff]  ;;  %v1059_v6 = vld [vmem:[%s20029_s19 + $0x318] sm:$0xff] }
 0x436   :  { %v3027_v8 = vpop.f32.mrb[33].mxu1  ;;  %12202 = vmatmul.mubr.f32.gmra.mrb[58].mxu1 %v10335_v48 }
 0x437   :  { %13995 = vmatpush3.bf16.msra.mxu1 %v16948_v3  ;;  %v1850_v58 = vpop.f32.mrb[144].mxu0  ;;  %12204 = vmatprep.mubr.f32.mxu1 %v10336_v51  ;;  %v10339_v51 = vld [vmem:[%s20023_s13 + $0x2b8] sm:$0xff] }
 0x438   :  { %13997 = vmatprep.subr.bf16.mxu1 %v16977_v10  ;;  %v1852_v33 = vpop.f32.mrb[145].mxu0  ;;  %10165 = vmatmul.mubr.msk.f32.gmra.mrb[250].mxu0 %vm83_vm0, %v16009_v40 }
 0x439   :  { %v3031_v36 = vpop.f32.mrb[34].mxu1  ;;  %2367 = vmatprep.mubr.f32.mxu0 %v15366_v63 }
 0x43a   :  { %v17246_v3 = vpack.c.bf16 %v3031_v36, %v3025_v25  ;;  %v3033_v29 = vpop.f32.mrb[35].mxu1  ;;  %12205 = vmatmul.mubr.f32.gmra.mrb[60].mxu1 %v10337_v4  ;;  %v10340_v25 = vld [vmem:[%s20023_s13 + $0x2c0] sm:$0xff] }
 0x43b   :  { %v17248_v52 = vpack.c.bf16 %v3033_v29, %v3027_v8  ;;  %13999 = vmatpush3.bf16.msra.mxu1 %v16977_v10  ;;  %v1856_v48 = vpop.f32.mrb[146].mxu0  ;;  %12207 = vmatprep.mubr.f32.mxu1 %v10338_v53 }
 0x43c   :  { %14001 = vmatprep.subr.bf16.mxu1 %v17009_v18  ;;  %v17255_v62 = vpack.c.bf16 %v1856_v48, %v1850_v58  ;;  %v1858_v0 = vpop.f32.mrb[147].mxu0  ;;  %10166 = vmatmul.mubr.msk.f32.gmra.mrb[252].mxu0 %vm83_vm0, %v16018_v31  ;;  %v10341_v58 = vld [vmem:[%s20023_s13 + $0x2c8] sm:$0xff] }
 0x43d   :  { %20086 = vst [vmem:[#allocation15_spill] sm:$0xff] %v17248_v52  ;;  %v17262_v8 = vpack.c.bf16 %v1858_v0, %v1852_v33  ;;  %v3037_v10 = vpop.f32.mrb[36].mxu1  ;;  %2373 = vmatprep.mubr.f32.mxu0 %v15366_v63  ;;  %v10342_v0 = vld [vmem:[%s20023_s13 + $0x2d0] sm:$0xff] }
 0x43e   :  { %v3039_v4 = vpop.f32.mrb[37].mxu1  ;;  %12208 = vmatmul.mubr.f32.gmra.mrb[62].mxu1 %v10339_v51 }
 0x43f   :  { %14003 = vmatpush3.bf16.msra.mxu1 %v17009_v18  ;;  %v1862_v53 = vpop.f32.mrb[148].mxu0  ;;  %12210 = vmatprep.mubr.f32.mxu1 %v10340_v25  ;;  %v10343_v25 = vld [vmem:[%s20023_s13 + $0x2d8] sm:$0xff] }
 0x440   :  { %14005 = vmatprep.subr.bf16.mxu1 %v17039_v5  ;;  %v1864_v36 = vpop.f32.mrb[149].mxu0  ;;  %10167 = vmatmul.mubr.msk.f32.gmra.mrb[254].mxu0 %vm83_vm0, %v16025_v35 }
 0x441   :  { %v3043_v33 = vpop.f32.mrb[38].mxu1  ;;  %2379 = vmatprep.mubr.f32.mxu0 %v15366_v63 }
 0x442   :  { %v17276_v18 = vpack.c.bf16 %v3043_v33, %v3037_v10  ;;  %v3045_v29 = vpop.f32.mrb[39].mxu1  ;;  %12211 = vmatmul.mubr.f32.gmra.mrb[64].mxu1 %v10341_v58  ;;  %v10344_v10 = vld [vmem:[%s20023_s13 + $0x2e0] sm:$0xff]  ;;  %v10345_v33 = vld [vmem:[%s20023_s13 + $0x2e8] sm:$0xff] }
 0x443   :  { %v17278_v48 = vpack.c.bf16 %v3045_v29, %v3039_v4  ;;  %14007 = vmatpush3.bf16.msra.mxu1 %v17039_v5  ;;  %v1868_v51 = vpop.f32.mrb[150].mxu0  ;;  %12213 = vmatprep.mubr.f32.mxu1 %v10342_v0 }
 0x444   :  { %14009 = vmatprep.subr.bf16.mxu1 %v17093_v41  ;;  %v17285_v61 = vpack.c.bf16 %v1868_v51, %v1862_v53  ;;  %v1870_v52 = vpop.f32.mrb[151].mxu0  ;;  %10168 = vmatmul.mubr.msk.f32.gmra.mrb[0].mxu0 %vm83_vm0, %v16034_v28 }
 0x445   :  { %20087 = vst [vmem:[#allocation16_spill] sm:$0xff] %v17278_v48  ;;  %v17292_v4 = vpack.c.bf16 %v1870_v52, %v1864_v36  ;;  %v11864_v5 = vpop.f32.mrb[40].mxu1  ;;  %2385 = vmatprep.mubr.f32.mxu0 %v15366_v63  ;;  %v10346_v52 = vld [vmem:[%s20023_s13 + $0x2f0] sm:$0xff]  ;;  %v1032_v48 = vld [vmem:[%s20029_s19 + $0x240] sm:$0xff] }
 0x446   :  { %v3275_v58 = vpop.f32.mrb[41].mxu1  ;;  %12214 = vmatmul.mubr.f32.gmra.mrb[66].mxu1 %v10343_v25 }
 0x447   :  { %v17295_v0 = vpack.c.bf16 %v11864_v5, %v3275_v58  ;;  %14011 = vmatpush3.bf16.msra.mxu1 %v17093_v41  ;;  %v1874_v53 = vpop.f32.mrb[152].mxu0  ;;  %12216 = vmatprep.mubr.f32.mxu1 %v10344_v10  ;;  %v10347_v10 = vld [vmem:[%s20023_s13 + $0x2f8] sm:$0xff] }
 0x448   :  { %14013 = vmatprep.subr.bf16.mxu1 %v17131_v34  ;;  %v1876_v29 = vpop.f32.mrb[153].mxu0  ;;  %10169 = vmatmul.mubr.msk.f32.gmra.mrb[2].mxu0 %vm83_vm0, %v16041_v42 }
 0x449   :  { %20088 = vst [vmem:[#allocation17_spill] sm:$0xff] %v17295_v0  ;;  %v11867_v36 = vpop.f32.mrb[42].mxu1  ;;  %2391 = vmatprep.mubr.f32.mxu0 %v15366_v63 }
 0x44a   :  { %v3285_v41 = vpop.f32.mrb[43].mxu1  ;;  %12217 = vmatmul.mubr.f32.gmra.mrb[68].mxu1 %v10345_v33  ;;  %v10348_v33 = vld [vmem:[%s20023_s13 + $0x300] sm:$0xff] }
 0x44b   :  { %v17308_v51 = vpack.c.bf16 %v11867_v36, %v3285_v41  ;;  %14015 = vmatpush3.bf16.msra.mxu1 %v17131_v34  ;;  %v1880_v25 = vpop.f32.mrb[154].mxu0  ;;  %12219 = vmatprep.mubr.f32.mxu1 %v10346_v52  ;;  %v1005_v41 = vld [vmem:[%s20029_s19 + $0x168] sm:$0xff] }
 0x44c   :  { %14017 = vmatprep.subr.bf16.mxu1 %v17165_v43  ;;  %v17315_v5 = vpack.c.bf16 %v1880_v25, %v1874_v53  ;;  %v1882_v58 = vpop.f32.mrb[155].mxu0  ;;  %10170 = vmatmul.mubr.msk.f32.gmra.mrb[4].mxu0 %vm83_vm0, %v16050_v59  ;;  %v978_v53 = vld [vmem:[%s20029_s19 + $0x90] sm:$0xff] }
 0x44d   :  { %20089 = vst [vmem:[#allocation18_spill] sm:$0xff] %v17308_v51  ;;  %v17322_v36 = vpack.c.bf16 %v1882_v58, %v1876_v29  ;;  %v11870_v34 = vpop.f32.mrb[44].mxu1  ;;  %2397 = vmatprep.mubr.f32.mxu0 %v15366_v63  ;;  %v10349_v29 = vld [vmem:[%s20023_s13 + $0x308] sm:$0xff]  ;;  %v1060_v58 = vld [vmem:[%s20029_s19 + $0x320] sm:$0xff] }
 0x44e   :  { %v3295_v52 = vpop.f32.mrb[45].mxu1  ;;  %12220 = vmatmul.mubr.f32.gmra.mrb[70].mxu1 %v10347_v10  ;;  %v1033_v10 = vld [vmem:[%s20029_s19 + $0x248] sm:$0xff] }
 0x44f   :  { %v17331_v25 = vpack.c.bf16 %v11870_v34, %v3295_v52  ;;  %14019 = vmatpush3.bf16.msra.mxu1 %v17165_v43  ;;  %v1886_v51 = vpop.f32.mrb[156].mxu0  ;;  %12254 = vmatprep.mubr.f32.mxu1 %v10348_v33  ;;  %v10350_v43 = vld [vmem:[%s20023_s13 + $0x310] sm:$0xff]  ;;  %v13758_v52 = vpack.c.bf16 %v1005_v41, %v978_v53  ;;  %v13760_v0 = vpack.c.bf16 %v1060_v58, %v1033_v10  ;;  %v10351_v53 = vld [vmem:[%s20023_s13 + $0x318] sm:$0xff]  ;;  %v981_v41 = vld [vmem:[%s20029_s19 + $0xa8] sm:$0xff] }
 0x450   :  { %14021 = vmatprep.subr.bf16.mxu1 %v16929_v24  ;;  %v1888_v34 = vpop.f32.mrb[157].mxu0  ;;  %10171 = vmatmul.mubr.msk.f32.gmra.mrb[6].mxu0 %vm83_vm0, %v16056_v38 }
 0x451   :  { %20090 = vst [vmem:[#allocation19_spill] sm:$0xff] %v17331_v25  ;;  %v11873_v33 = vpop.f32.mrb[46].mxu1  ;;  %2468 = vmatprep.mubr.f32.mxu0 %v15366_v63 }
 0x452   :  { %v3305_v25 = vpop.f32.mrb[47].mxu1  ;;  %12255 = vmatmul.mubr.f32.vlgmr.msra.gmra.mrb[56].mxu1 %v10349_v29  ;;  %v1008_v29 = vld [vmem:[%s20029_s19 + $0x180] sm:$0xff] }
 0x453   :  { %v17356_v22 = vpack.c.bf16 %v11873_v33, %v3305_v25  ;;  %14023 = vmatpush3.bf16.msra.mxu1 %v16929_v24  ;;  %v1892_v19 = vpop.f32.mrb[158].mxu0  ;;  %12257 = vmatprep.mubr.f32.mxu1 %v10350_v43  ;;  %v10352_v24 = vld [vmem:[%s20023_s13 + $0x320] sm:$0xff]  ;;  %v13762_v33 = vpack.c.bf16 %v1059_v6, %v1032_v48  ;;  %v10354_v6 = vld [vmem:[%s20023_s13 + $0x330] sm:$0xff] }
 0x454   :  { %14025 = vmatprep.subr.bf16.mxu1 %v16955_v60  ;;  %v17369_v25 = vpack.c.bf16 %v1892_v19, %v1886_v51  ;;  %v1894_v10 = vpop.f32.mrb[159].mxu0  ;;  %10172 = vmatmul.mubr.msk.f32.vlgmr.msra.gmra.mrb[8].mxu0 %vm83_vm0, %v15918_v2  ;;  %v13764_v19 = vpack.c.bf16 %v1008_v29, %v981_v41  ;;  %v10356_v29 = vld [vmem:[%s20023_s13 + $0x340] sm:$0xff] }
 0x455   :  { %20091 = vst [vmem:[#allocation20_spill] sm:$0xff] %v17356_v22  ;;  %v17376_v58 = vpack.c.bf16 %v1894_v10, %v1888_v34  ;;  %v11876_v43 = vpop.f32.mrb[48].mxu1  ;;  %2474 = vmatprep.mubr.f32.mxu0 %v15366_v63  ;;  %13759 = vmatpush1.bf16.msra.mxu0 %v13758_v52  ;;  %v10353_v34 = vld [vmem:[%s20023_s13 + $0x328] sm:$0xff]  ;;  %v10355_v52 = vld [vmem:[%s20023_s13 + $0x338] sm:$0xff] }
 0x456   :  { %v3315_v22 = vpop.f32.mrb[49].mxu1  ;;  %12258 = vmatmul.mubr.f32.gmra.mrb[58].mxu1 %v10351_v53  ;;  %13761 = vmatprep.subr.bf16.mxu0 %v13760_v0 }
 0x457   :  { %v17379_v51 = vpack.c.bf16 %v11876_v43, %v3315_v22  ;;  %14027 = vmatpush3.bf16.msra.mxu1 %v16955_v60  ;;  %v1898_v7 = vpop.f32.mrb[160].mxu0  ;;  %12260 = vmatprep.mubr.f32.mxu1 %v10352_v24 }
 0x458   :  { %14029 = vmatprep.subr.bf16.mxu1 %v16984_v30  ;;  %v1900_v10 = vpop.f32.mrb[161].mxu0  ;;  %10173 = vmatmul.mubr.msk.f32.gmra.mrb[10].mxu0 %vm83_vm0, %v15938_v11 }
 0x459   :  { %v11879_v22 = vpop.f32.mrb[50].mxu1  ;;  %2480 = vmatprep.mubr.f32.mxu0 %v15366_v63  ;;  %13763 = vmatpush1.bf16.msra.mxu0 %v13762_v33 }
 0x45a   :  { %v3325_v60 = vpop.f32.mrb[51].mxu1  ;;  %12261 = vmatmul.mubr.f32.gmra.mrb[60].mxu1 %v10353_v34  ;;  %13765 = vmatprep.subr.bf16.mxu0 %v13764_v19  ;;  %v10357_v19 = vld [vmem:[%s20023_s13 + $0x348] sm:$0xff] }
 0x45b   :  { %v17392_v48 = vpack.c.bf16 %v11879_v22, %v3325_v60  ;;  %14031 = vmatpush3.bf16.msra.mxu1 %v16984_v30  ;;  %v1904_v0 = vpop.f32.mrb[162].mxu0  ;;  %12263 = vmatprep.mubr.f32.mxu1 %v10354_v6 }
 0x45c   :  { %14033 = vmatprep.subr.bf16.mxu1 %v17016_v15  ;;  %v17399_v53 = vpack.c.bf16 %v1904_v0, %v1898_v7  ;;  %v1906_v41 = vpop.f32.mrb[163].mxu0  ;;  %10174 = vmatmul.mubr.msk.f32.gmra.mrb[12].mxu0 %vm83_vm0, %v15948_v50  ;;  %v10359_v0 = vld [vmem:[%s20023_s13 + $0x358] sm:$0xff] }
 0x45d   :  { %20092 = vst [vmem:[#allocation21_spill] sm:$0xff] %v17392_v48  ;;  %v17406_v24 = vpack.c.bf16 %v1906_v41, %v1900_v10  ;;  %v11882_v30 = vpop.f32.mrb[52].mxu1  ;;  %2486 = vmatprep.mubr.f32.mxu0 %v15366_v63  ;;  %v10358_v10 = vld [vmem:[%s20023_s13 + $0x350] sm:$0xff] }
 0x45e   :  { %v3335_v43 = vpop.f32.mrb[53].mxu1  ;;  %12264 = vmatmul.mubr.f32.gmra.mrb[62].mxu1 %v10355_v52 }
 0x45f   :  { %v17409_v33 = vpack.c.bf16 %v11882_v30, %v3335_v43  ;;  %14035 = vmatpush3.bf16.msra.mxu1 %v17016_v15  ;;  %v1910_v7 = vpop.f32.mrb[164].mxu0  ;;  %12266 = vmatprep.mubr.f32.mxu1 %v10356_v29  ;;  %v10360_v29 = vld [vmem:[%s20023_s13 + $0x360] sm:$0xff]  ;;  %v10361_v43 = vld [vmem:[%s20023_s13 + $0x368] sm:$0xff] }
 0x460   :  { %14037 = vmatprep.subr.bf16.mxu1 %v17046_v55  ;;  %v1912_v34 = vpop.f32.mrb[165].mxu0  ;;  %10175 = vmatmul.mubr.msk.f32.gmra.mrb[14].mxu0 %vm83_vm0, %v15956_v54 }
 0x461   :  { %20093 = vst [vmem:[#allocation22_spill] sm:$0xff] %v17409_v33  ;;  %v11885_v6 = vpop.f32.mrb[54].mxu1  ;;  %2492 = vmatprep.mubr.f32.mxu0 %v15366_v63 }
 0x462   :  { %v3345_v15 = vpop.f32.mrb[55].mxu1  ;;  %12267 = vmatmul.mubr.f32.gmra.mrb[64].mxu1 %v10357_v19  ;;  %v10362_v19 = vld [vmem:[%s20023_s13 + $0x370] sm:$0xff] }
 0x463   :  { %v17422_v22 = vpack.c.bf16 %v11885_v6, %v3345_v15  ;;  %14039 = vmatpush3.bf16.msra.mxu1 %v17046_v55  ;;  %v1916_v60 = vpop.f32.mrb[166].mxu0  ;;  %12269 = vmatprep.mubr.f32.mxu1 %v10358_v10  ;;  %v10364_v15 = vld [vmem:[%s20023_s13 + $0x380] sm:$0xff] }
 0x464   :  { %14041 = vmatprep.subr.bf16.mxu1 %v17100_v21  ;;  %v17429_v52 = vpack.c.bf16 %v1916_v60, %v1910_v7  ;;  %v1918_v41 = vpop.f32.mrb[167].mxu0  ;;  %10176 = vmatmul.mubr.msk.f32.gmra.mrb[16].mxu0 %vm83_vm0, %v15966_v45 }
 0x465   :  { %20094 = vst [vmem:[#allocation23_spill] sm:$0xff] %v17422_v22  ;;  %v17436_v30 = vpack.c.bf16 %v1918_v41, %v1912_v34  ;;  %2498 = vmatprep.mubr.f32.mxu0 %v15366_v63  ;;  %v10363_v34 = vld [vmem:[%s20023_s13 + $0x378] sm:$0xff] }
 0x466   :  { %12270 = vmatmul.mubr.f32.gmra.mrb[66].mxu1 %v10359_v0  ;;  %v10365_v0 = vld [vmem:[%s20023_s13 + $0x388] sm:$0xff]  ;;  %v10383_v22 = vld [vmem:[%s20023_s13 + $0x418] sm:$0xff] }
 0x467   :  { %14043 = vmatpush3.bf16.msra.mxu1 %v17100_v21  ;;  %v1987_v55 = vpop.f32.mrb[168].mxu0  ;;  %12272 = vmatprep.mubr.f32.mxu1 %v10360_v29  ;;  %v10366_v29 = vld [vmem:[%s20023_s13 + $0x390] sm:$0xff] }
 0x468   :  { %14045 = vmatprep.subr.bf16.mxu1 %v17142_v46  ;;  %v1989_v7 = vpop.f32.mrb[169].mxu0  ;;  %10177 = vmatmul.mubr.msk.f32.gmra.mrb[18].mxu0 %vm83_vm0, %v15974_v37 }
 0x469   :  { %2504 = vmatprep.mubr.f32.mxu0 %v15366_v63 }
 0x46a   :  { %12273 = vmatmul.mubr.f32.gmra.mrb[68].mxu1 %v10361_v43 }
 0x46b   :  { %14047 = vmatpush3.bf16.msra.mxu1 %v17142_v46  ;;  %v1993_v21 = vpop.f32.mrb[170].mxu0  ;;  %12275 = vmatprep.mubr.f32.mxu1 %v10362_v19  ;;  %v10368_v19 = vld [vmem:[%s20023_s13 + $0x3a0] sm:$0xff] }
 0x46c   :  { %14049 = vmatprep.subr.bf16.mxu1 %v17172_v47  ;;  %v17455_v10 = vpack.c.bf16 %v1993_v21, %v1987_v55  ;;  %v1995_v6 = vpop.f32.mrb[171].mxu0  ;;  %10178 = vmatmul.mubr.msk.f32.gmra.mrb[20].mxu0 %vm83_vm0, %v15984_v56  ;;  %v10367_v55 = vld [vmem:[%s20023_s13 + $0x398] sm:$0xff] }
 0x46d   :  { %v17462_v60 = vpack.c.bf16 %v1995_v6, %v1989_v7  ;;  %2510 = vmatprep.mubr.f32.mxu0 %v15366_v63 }
 0x46e   :  { %12276 = vmatmul.mubr.f32.gmra.mrb[70].mxu1 %v10363_v34  ;;  %v10369_v34 = vld [vmem:[%s20023_s13 + $0x3a8] sm:$0xff] }
 0x46f   :  { %14051 = vmatpush3.bf16.msra.mxu1 %v17172_v47  ;;  %v1999_v46 = vpop.f32.mrb[172].mxu0  ;;  %12310 = vmatprep.mubr.f32.mxu1 %v10364_v15  ;;  %v10370_v15 = vld [vmem:[%s20023_s13 + $0x3b0] sm:$0xff] }
 0x470   :  { %14053 = vmatprep.subr.bf16.mxu1 %v17195_v16  ;;  %v2001_v41 = vpop.f32.mrb[173].mxu0  ;;  %10179 = vmatmul.mubr.msk.f32.gmra.mrb[22].mxu0 %vm83_vm0, %v15992_v32 }
 0x471   :  { %2516 = vmatprep.mubr.f32.mxu0 %v15366_v63 }
 0x472   :  { %12311 = vmatmul.mubr.f32.vlgmr.msra.gmra.mrb[56].mxu1 %v10365_v0 }
 0x473   :  { %14055 = vmatpush3.bf16.msra.mxu1 %v17195_v16  ;;  %v2005_v47 = vpop.f32.mrb[174].mxu0  ;;  %12313 = vmatprep.mubr.f32.mxu1 %v10366_v29  ;;  %v10372_v29 = vld [vmem:[%s20023_s13 + $0x3c0] sm:$0xff] }
 0x474   :  { %14057 = vmatprep.subr.bf16.mxu1 %v17225_v12  ;;  %v17481_v43 = vpack.c.bf16 %v2005_v47, %v1999_v46  ;;  %v2007_v7 = vpop.f32.mrb[175].mxu0  ;;  %10180 = vmatmul.mubr.msk.f32.gmra.mrb[24].mxu0 %vm83_vm0, %v16002_v9  ;;  %v10371_v46 = vld [vmem:[%s20023_s13 + $0x3b8] sm:$0xff] }
 0x475   :  { %v17488_v21 = vpack.c.bf16 %v2007_v7, %v2001_v41  ;;  %2522 = vmatprep.mubr.f32.mxu0 %v15366_v63 }
 0x476   :  { %12314 = vmatmul.mubr.f32.gmra.mrb[58].mxu1 %v10367_v55  ;;  %v10373_v55 = vld [vmem:[%s20023_s13 + $0x3c8] sm:$0xff] }
 0x477   :  { %14059 = vmatpush3.bf16.msra.mxu1 %v17225_v12  ;;  %v2011_v16 = vpop.f32.mrb[176].mxu0  ;;  %12316 = vmatprep.mubr.f32.mxu1 %v10368_v19  ;;  %v10374_v19 = vld [vmem:[%s20023_s13 + $0x3d0] sm:$0xff] }
 0x478   :  { %14061 = vmatprep.subr.bf16.mxu1 %v17255_v62  ;;  %v2013_v6 = vpop.f32.mrb[177].mxu0  ;;  %10181 = vmatmul.mubr.msk.f32.gmra.mrb[26].mxu0 %vm83_vm0, %v16009_v40 }
 0x479   :  { %2528 = vmatprep.mubr.f32.mxu0 %v15366_v63 }
 0x47a   :  { %12317 = vmatmul.mubr.f32.gmra.mrb[60].mxu1 %v10369_v34 }
 0x47b   :  { %14063 = vmatpush3.bf16.msra.mxu1 %v17255_v62  ;;  %v2017_v12 = vpop.f32.mrb[178].mxu0  ;;  %12319 = vmatprep.mubr.f32.mxu1 %v10370_v15  ;;  %v10376_v15 = vld [vmem:[%s20023_s13 + $0x3e0] sm:$0xff] }
 0x47c   :  { %14065 = vmatprep.subr.bf16.mxu1 %v17285_v61  ;;  %v17507_v0 = vpack.c.bf16 %v2017_v12, %v2011_v16  ;;  %v2019_v41 = vpop.f32.mrb[179].mxu0  ;;  %10182 = vmatmul.mubr.msk.f32.gmra.mrb[28].mxu0 %vm83_vm0, %v16018_v31  ;;  %v10375_v16 = vld [vmem:[%s20023_s13 + $0x3d8] sm:$0xff] }
 0x47d   :  { %v17514_v47 = vpack.c.bf16 %v2019_v41, %v2013_v6  ;;  %2534 = vmatprep.mubr.f32.mxu0 %v15366_v63 }
 0x47e   :  { %12320 = vmatmul.mubr.f32.gmra.mrb[62].mxu1 %v10371_v46  ;;  %v10377_v46 = vld [vmem:[%s20023_s13 + $0x3e8] sm:$0xff] }
 0x47f   :  { %14067 = vmatpush3.bf16.msra.mxu1 %v17285_v61  ;;  %v2023_v62 = vpop.f32.mrb[180].mxu0  ;;  %12322 = vmatprep.mubr.f32.mxu1 %v10372_v29  ;;  %v10378_v29 = vld [vmem:[%s20023_s13 + $0x3f0] sm:$0xff] }
 0x480   :  { %14069 = vmatprep.subr.bf16.mxu1 %v17315_v5  ;;  %v2025_v7 = vpop.f32.mrb[181].mxu0  ;;  %10183 = vmatmul.mubr.msk.f32.gmra.mrb[30].mxu0 %vm83_vm0, %v16025_v35 }
 0x481   :  { %2540 = vmatprep.mubr.f32.mxu0 %v15366_v63 }
 0x482   :  { %12323 = vmatmul.mubr.f32.gmra.mrb[64].mxu1 %v10373_v55 }
 0x483   :  { %14071 = vmatpush3.bf16.msra.mxu1 %v17315_v5  ;;  %v2029_v61 = vpop.f32.mrb[182].mxu0  ;;  %12325 = vmatprep.mubr.f32.mxu1 %v10374_v19  ;;  %v10380_v19 = vld [vmem:[%s20023_s13 + $0x400] sm:$0xff] }
 0x484   :  { %14073 = vmatprep.subr.bf16.mxu1 %v17369_v25  ;;  %v17533_v34 = vpack.c.bf16 %v2029_v61, %v2023_v62  ;;  %v2031_v6 = vpop.f32.mrb[183].mxu0  ;;  %10184 = vmatmul.mubr.msk.f32.gmra.mrb[32].mxu0 %vm83_vm0, %v16034_v28  ;;  %v10379_v62 = vld [vmem:[%s20023_s13 + $0x3f8] sm:$0xff] }
 0x485   :  { %v17540_v12 = vpack.c.bf16 %v2031_v6, %v2025_v7  ;;  %2546 = vmatprep.mubr.f32.mxu0 %v15366_v63 }
 0x486   :  { %12326 = vmatmul.mubr.f32.gmra.mrb[66].mxu1 %v10375_v16  ;;  %v1007_v16 = vld [vmem:[%s20029_s19 + $0x178] sm:$0xff] }
 0x487   :  { %14075 = vmatpush3.bf16.msra.mxu1 %v17369_v25  ;;  %v2035_v5 = vpop.f32.mrb[184].mxu0  ;;  %12328 = vmatprep.mubr.f32.mxu1 %v10376_v15  ;;  %v10381_v15 = vld [vmem:[%s20023_s13 + $0x408] sm:$0xff] }
 0x488   :  { %14077 = vmatprep.subr.bf16.mxu1 %v17399_v53  ;;  %v2037_v41 = vpop.f32.mrb[185].mxu0  ;;  %10185 = vmatmul.mubr.msk.f32.gmra.mrb[34].mxu0 %vm83_vm0, %v16041_v42 }
 0x489   :  { %2552 = vmatprep.mubr.f32.mxu0 %v15366_v63 }
 0x48a   :  { %12329 = vmatmul.mubr.f32.gmra.mrb[68].mxu1 %v10377_v46  ;;  %v1062_v46 = vld [vmem:[%s20029_s19 + $0x330] sm:$0xff] }
 0x48b   :  { %14079 = vmatpush3.bf16.msra.mxu1 %v17399_v53  ;;  %v2041_v25 = vpop.f32.mrb[186].mxu0  ;;  %12331 = vmatprep.mubr.f32.mxu1 %v10378_v29  ;;  %v980_v53 = vld [vmem:[%s20029_s19 + $0xa0] sm:$0xff] }
 0x48c   :  { %14081 = vmatprep.subr.bf16.mxu1 %v17429_v52  ;;  %v17559_v55 = vpack.c.bf16 %v2041_v25, %v2035_v5  ;;  %v2043_v7 = vpop.f32.mrb[187].mxu0  ;;  %10186 = vmatmul.mubr.msk.f32.gmra.mrb[36].mxu0 %vm83_vm0, %v16050_v59  ;;  %v1035_v5 = vld [vmem:[%s20029_s19 + $0x258] sm:$0xff]  ;;  %v13766_v29 = vpack.c.bf16 %v1007_v16, %v980_v53  ;;  %v985_v53 = vld [vmem:[%s20029_s19 + $0xc8] sm:$0xff]  ;;  %v1012_v16 = vld [vmem:[%s20029_s19 + $0x1a0] sm:$0xff] }
 0x48d   :  { %v17566_v61 = vpack.c.bf16 %v2043_v7, %v2037_v41  ;;  %2558 = vmatprep.mubr.f32.mxu0 %v15366_v63  ;;  %v13768_v25 = vpack.c.bf16 %v1062_v46, %v1035_v5  ;;  %v1061_v7 = vld [vmem:[%s20029_s19 + $0x328] sm:$0xff]  ;;  %v13780_v33 = vpack.c.bf16 %v1012_v16, %v985_v53  ;;  %v10391_v16 = vld [vmem:[%s20023_s13 + $0x458] sm:$0xff] }
 0x48e   :  { %12332 = vmatmul.mubr.f32.gmra.mrb[70].mxu1 %v10379_v62  ;;  %v1034_v62 = vld [vmem:[%s20029_s19 + $0x250] sm:$0xff] }
 0x48f   :  { %14083 = vmatpush3.bf16.msra.mxu1 %v17429_v52  ;;  %v2047_v6 = vpop.f32.mrb[188].mxu0  ;;  %12366 = vmatprep.mubr.f32.mxu1 %v10380_v19  ;;  %v10382_v52 = vld [vmem:[%s20023_s13 + $0x410] sm:$0xff] }
 0x490   :  { %14085 = vmatprep.subr.bf16.mxu1 %v17202_v20  ;;  %v2049_v41 = vpop.f32.mrb[189].mxu0  ;;  %10187 = vmatmul.mubr.msk.f32.gmra.mrb[38].mxu0 %vm83_vm0, %v16056_v38 }
 0x491   :  { %2629 = vmatprep.mubr.f32.mxu0 %v15366_v63 }
 0x492   :  { %12367 = vmatmul.mubr.f32.vlgmr.msra.gmra.mrb[56].mxu1 %v10381_v15 }
 0x493   :  { %14087 = vmatpush3.bf16.msra.mxu1 %v17202_v20  ;;  %v2053_v19 = vpop.f32.mrb[190].mxu0  ;;  %12369 = vmatprep.mubr.f32.mxu1 %v10382_v52  ;;  %v10384_v20 = vld [vmem:[%s20023_s13 + $0x420] sm:$0xff]  ;;  %v13770_v52 = vpack.c.bf16 %v1061_v7, %v1034_v62  ;;  %v10389_v7 = vld [vmem:[%s20023_s13 + $0x448] sm:$0xff] }
 0x494   :  { %14089 = vmatprep.subr.bf16.mxu1 %v17232_v14  ;;  %v17609_v15 = vpack.c.bf16 %v2053_v19, %v2047_v6  ;;  %v2055_v5 = vpop.f32.mrb[191].mxu0  ;;  %10188 = vmatmul.mubr.msk.f32.vlgmr.msra.gmra.mrb[40].mxu0 %vm83_vm0, %v15918_v2  ;;  %v10385_v19 = vld [vmem:[%s20023_s13 + $0x428] sm:$0xff] }
 0x495   :  { %v17616_v46 = vpack.c.bf16 %v2055_v5, %v2049_v41  ;;  %2635 = vmatprep.mubr.f32.mxu0 %v15366_v63  ;;  %13767 = vmatpush1.bf16.msra.mxu0 %v13766_v29  ;;  %v10387_v41 = vld [vmem:[%s20023_s13 + $0x438] sm:$0xff] }
 0x496   :  { %12370 = vmatmul.mubr.f32.gmra.mrb[58].mxu1 %v10383_v22  ;;  %13769 = vmatprep.subr.bf16.mxu0 %v13768_v25  ;;  %v10386_v22 = vld [vmem:[%s20023_s13 + $0x430] sm:$0xff] }
 0x497   :  { %14091 = vmatpush3.bf16.msra.mxu1 %v17232_v14  ;;  %v2059_v6 = vpop.f32.mrb[192].mxu0  ;;  %12372 = vmatprep.mubr.f32.mxu1 %v10384_v20 }
 0x498   :  { %14093 = vmatprep.subr.bf16.mxu1 %v17262_v8  ;;  %v2061_v48 = vpop.f32.mrb[193].mxu0  ;;  %10189 = vmatmul.mubr.msk.f32.gmra.mrb[42].mxu0 %vm83_vm0, %v15938_v11 }
 0x499   :  { %2641 = vmatprep.mubr.f32.mxu0 %v15366_v63  ;;  %13771 = vmatpush1.bf16.msra.mxu0 %v13770_v52  ;;  %v10392_v52 = vld [vmem:[%s20023_s13 + $0x460] sm:$0xff] }
 0x49a   :  { %12373 = vmatmul.mubr.f32.gmra.mrb[60].mxu1 %v10385_v19  ;;  %13781 = vmatprep.subr.bf16.mxu0 %v13780_v33  ;;  %v10388_v33 = vld [vmem:[%s20023_s13 + $0x440] sm:$0xff]  ;;  %v10393_v19 = vld [vmem:[%s20023_s13 + $0x468] sm:$0xff] }
 0x49b   :  { %14095 = vmatpush3.bf16.msra.mxu1 %v17262_v8  ;;  %v2065_v14 = vpop.f32.mrb[194].mxu0  ;;  %12375 = vmatprep.mubr.f32.mxu1 %v10386_v22 }
 0x49c   :  { %14097 = vmatprep.subr.bf16.mxu1 %v17292_v4  ;;  %v17635_v29 = vpack.c.bf16 %v2065_v14, %v2059_v6  ;;  %v2067_v25 = vpop.f32.mrb[195].mxu0  ;;  %10190 = vmatmul.mubr.msk.f32.gmra.mrb[44].mxu0 %vm83_vm0, %v15948_v50  ;;  %v10394_v14 = vld [vmem:[%s20023_s13 + $0x470] sm:$0xff] }
 0x49d   :  { %v17642_v62 = vpack.c.bf16 %v2067_v25, %v2061_v48  ;;  %2647 = vmatprep.mubr.f32.mxu0 %v15366_v63  ;;  %v10390_v48 = vld [vmem:[%s20023_s13 + $0x450] sm:$0xff] }
 0x49e   :  { %12376 = vmatmul.mubr.f32.gmra.mrb[62].mxu1 %v10387_v41  ;;  %v10395_v41 = vld [vmem:[%s20023_s13 + $0x478] sm:$0xff] }
 0x49f   :  { %14099 = vmatpush3.bf16.msra.mxu1 %v17292_v4  ;;  %v2071_v8 = vpop.f32.mrb[196].mxu0  ;;  %12378 = vmatprep.mubr.f32.mxu1 %v10388_v33 }
 0x4a0   :  { %14101 = vmatprep.subr.bf16.mxu1 %v17322_v36  ;;  %v2073_v53 = vpop.f32.mrb[197].mxu0  ;;  %10191 = vmatmul.mubr.msk.f32.gmra.mrb[46].mxu0 %vm83_vm0, %v15956_v54 }
 0x4a1   :  { %2653 = vmatprep.mubr.f32.mxu0 %v15366_v63 }
 0x4a2   :  { %12379 = vmatmul.mubr.f32.gmra.mrb[64].mxu1 %v10389_v7 }
 0x4a3   :  { %14103 = vmatpush3.bf16.msra.mxu1 %v17322_v36  ;;  %v2077_v4 = vpop.f32.mrb[198].mxu0  ;;  %12381 = vmatprep.mubr.f32.mxu1 %v10390_v48 }
 0x4a4   :  { %14105 = vmatprep.subr.bf16.mxu1 %v17376_v58  ;;  %v17661_v5 = vpack.c.bf16 %v2077_v4, %v2071_v8  ;;  %v2079_v20 = vpop.f32.mrb[199].mxu0  ;;  %10192 = vmatmul.mubr.msk.f32.gmra.mrb[48].mxu0 %vm83_vm0, %v15966_v45  ;;  %v10396_v8 = vld [vmem:[%s20023_s13 + $0x480] sm:$0xff]  ;;  %v10398_v4 = vld [vmem:[%s20023_s13 + $0x490] sm:$0xff] }
 0x4a5   :  { %v17668_v6 = vpack.c.bf16 %v2079_v20, %v2073_v53  ;;  %2659 = vmatprep.mubr.f32.mxu0 %v15366_v63  ;;  %v10397_v53 = vld [vmem:[%s20023_s13 + $0x488] sm:$0xff] }
 0x4a6   :  { %12382 = vmatmul.mubr.f32.gmra.mrb[66].mxu1 %v10391_v16  ;;  %v10399_v16 = vld [vmem:[%s20023_s13 + $0x498] sm:$0xff] }
 0x4a7   :  { %14107 = vmatpush3.bf16.msra.mxu1 %v17376_v58  ;;  %v2148_v36 = vpop.f32.mrb[200].mxu0  ;;  %12384 = vmatprep.mubr.f32.mxu1 %v10392_v52 }
 0x4a8   :  { %14109 = vmatprep.subr.bf16.mxu1 %v17406_v24  ;;  %v2150_v22 = vpop.f32.mrb[201].mxu0  ;;  %10193 = vmatmul.mubr.msk.f32.gmra.mrb[50].mxu0 %vm83_vm0, %v15974_v37 }
 0x4a9   :  { %2665 = vmatprep.mubr.f32.mxu0 %v15366_v63 }
 0x4aa   :  { %12385 = vmatmul.mubr.f32.gmra.mrb[68].mxu1 %v10393_v19 }
 0x4ab   :  { %14111 = vmatpush3.bf16.msra.mxu1 %v17406_v24  ;;  %v2154_v58 = vpop.f32.mrb[202].mxu0  ;;  %12387 = vmatprep.mubr.f32.mxu1 %v10394_v14 }
 0x4ac   :  { %14113 = vmatprep.subr.bf16.mxu1 %v17436_v30  ;;  %v17687_v25 = vpack.c.bf16 %v2154_v58, %v2148_v36  ;;  %v2156_v33 = vpop.f32.mrb[203].mxu0  ;;  %10194 = vmatmul.mubr.msk.f32.gmra.mrb[52].mxu0 %vm83_vm0, %v15984_v56  ;;  %v10400_v36 = vld [vmem:[%s20023_s13 + $0x4a0] sm:$0xff]  ;;  %v10402_v58 = vld [vmem:[%s20023_s13 + $0x4b0] sm:$0xff] }
 0x4ad   :  { %v17694_v7 = vpack.c.bf16 %v2156_v33, %v2150_v22  ;;  %2671 = vmatprep.mubr.f32.mxu0 %v15366_v63  ;;  %v10401_v22 = vld [vmem:[%s20023_s13 + $0x4a8] sm:$0xff] }
 0x4ae   :  { %12388 = vmatmul.mubr.f32.gmra.mrb[70].mxu1 %v10395_v41  ;;  %v10403_v41 = vld [vmem:[%s20023_s13 + $0x4b8] sm:$0xff] }
 0x4af   :  { %14115 = vmatpush3.bf16.msra.mxu1 %v17436_v30  ;;  %v2160_v24 = vpop.f32.mrb[204].mxu0  ;;  %12422 = vmatprep.mubr.f32.mxu1 %v10396_v8 }
 0x4b0   :  { %14117 = vmatprep.subr.bf16.mxu1 %v17455_v10  ;;  %v2162_v48 = vpop.f32.mrb[205].mxu0  ;;  %10195 = vmatmul.mubr.msk.f32.gmra.mrb[54].mxu0 %vm83_vm0, %v15992_v32 }
 0x4b1   :  { %2677 = vmatprep.mubr.f32.mxu0 %v15366_v63 }
 0x4b2   :  { %12423 = vmatmul.mubr.f32.vlgmr.msra.gmra.mrb[56].mxu1 %v10397_v53 }
 0x4b3   :  { %14119 = vmatpush3.bf16.msra.mxu1 %v17455_v10  ;;  %v2166_v30 = vpop.f32.mrb[206].mxu0  ;;  %12425 = vmatprep.mubr.f32.mxu1 %v10398_v4 }
 0x4b4   :  { %14121 = vmatprep.subr.bf16.mxu1 %v17481_v43  ;;  %v17713_v20 = vpack.c.bf16 %v2166_v30, %v2160_v24  ;;  %v2168_v52 = vpop.f32.mrb[207].mxu0  ;;  %10196 = vmatmul.mubr.msk.f32.gmra.mrb[56].mxu0 %vm83_vm0, %v16002_v9  ;;  %v10404_v24 = vld [vmem:[%s20023_s13 + $0x4c0] sm:$0xff]  ;;  %v10406_v30 = vld [vmem:[%s20023_s13 + $0x4d0] sm:$0xff] }
 0x4b5   :  { %v17720_v19 = vpack.c.bf16 %v2168_v52, %v2162_v48  ;;  %2683 = vmatprep.mubr.f32.mxu0 %v15366_v63  ;;  %v10405_v48 = vld [vmem:[%s20023_s13 + $0x4c8] sm:$0xff] }
 0x4b6   :  { %12426 = vmatmul.mubr.f32.gmra.mrb[58].mxu1 %v10399_v16  ;;  %v10407_v16 = vld [vmem:[%s20023_s13 + $0x4d8] sm:$0xff] }
 0x4b7   :  { %14123 = vmatpush3.bf16.msra.mxu1 %v17481_v43  ;;  %v2172_v10 = vpop.f32.mrb[208].mxu0  ;;  %12428 = vmatprep.mubr.f32.mxu1 %v10400_v36 }
 0x4b8   :  { %14125 = vmatprep.subr.bf16.mxu1 %v17507_v0  ;;  %v2174_v14 = vpop.f32.mrb[209].mxu0  ;;  %10197 = vmatmul.mubr.msk.f32.gmra.mrb[58].mxu0 %vm83_vm0, %v16009_v40 }
 0x4b9   :  { %2689 = vmatprep.mubr.f32.mxu0 %v15366_v63 }
 0x4ba   :  { %12429 = vmatmul.mubr.f32.gmra.mrb[60].mxu1 %v10401_v22 }
 0x4bb   :  { %14127 = vmatpush3.bf16.msra.mxu1 %v17507_v0  ;;  %v2178_v43 = vpop.f32.mrb[210].mxu0  ;;  %12431 = vmatprep.mubr.f32.mxu1 %v10402_v58 }
 0x4bc   :  { %14129 = vmatprep.subr.bf16.mxu1 %v17533_v34  ;;  %v17739_v33 = vpack.c.bf16 %v2178_v43, %v2172_v10  ;;  %v2180_v8 = vpop.f32.mrb[211].mxu0  ;;  %10198 = vmatmul.mubr.msk.f32.gmra.mrb[60].mxu0 %vm83_vm0, %v16018_v31  ;;  %v10408_v10 = vld [vmem:[%s20023_s13 + $0x4e0] sm:$0xff]  ;;  %v10410_v43 = vld [vmem:[%s20023_s13 + $0x4f0] sm:$0xff] }
 0x4bd   :  { %v17746_v53 = vpack.c.bf16 %v2180_v8, %v2174_v14  ;;  %2695 = vmatprep.mubr.f32.mxu0 %v15366_v63  ;;  %v10409_v14 = vld [vmem:[%s20023_s13 + $0x4e8] sm:$0xff] }
 0x4be   :  { %12432 = vmatmul.mubr.f32.gmra.mrb[62].mxu1 %v10403_v41  ;;  %v10411_v41 = vld [vmem:[%s20023_s13 + $0x4f8] sm:$0xff] }
 0x4bf   :  { %14131 = vmatpush3.bf16.msra.mxu1 %v17533_v34  ;;  %v2184_v0 = vpop.f32.mrb[212].mxu0  ;;  %12434 = vmatprep.mubr.f32.mxu1 %v10404_v24 }
 0x4c0   :  { %14133 = vmatprep.subr.bf16.mxu1 %v17559_v55  ;;  %v2186_v4 = vpop.f32.mrb[213].mxu0  ;;  %10199 = vmatmul.mubr.msk.f32.gmra.mrb[62].mxu0 %vm83_vm0, %v16025_v35 }
 0x4c1   :  { %2701 = vmatprep.mubr.f32.mxu0 %v15366_v63 }
 0x4c2   :  { %12435 = vmatmul.mubr.f32.gmra.mrb[64].mxu1 %v10405_v48 }
 0x4c3   :  { %14135 = vmatpush3.bf16.msra.mxu1 %v17559_v55  ;;  %v2190_v34 = vpop.f32.mrb[214].mxu0  ;;  %12437 = vmatprep.mubr.f32.mxu1 %v10406_v30 }
 0x4c4   :  { %14137 = vmatprep.subr.bf16.mxu1 %v17609_v15  ;;  %v17765_v52 = vpack.c.bf16 %v2190_v34, %v2184_v0  ;;  %v2192_v36 = vpop.f32.mrb[215].mxu0  ;;  %10200 = vmatmul.mubr.msk.f32.gmra.mrb[64].mxu0 %vm83_vm0, %v16034_v28  ;;  %v10412_v0 = vld [vmem:[%s20023_s13 + $0x500] sm:$0xff]  ;;  %v10413_v34 = vld [vmem:[%s20023_s13 + $0x508] sm:$0xff] }
 0x4c5   :  { %v17772_v22 = vpack.c.bf16 %v2192_v36, %v2186_v4  ;;  %2707 = vmatprep.mubr.f32.mxu0 %v15366_v63  ;;  %v1011_v4 = vld [vmem:[%s20029_s19 + $0x198] sm:$0xff]  ;;  %v1066_v36 = vld [vmem:[%s20029_s19 + $0x350] sm:$0xff] }
 0x4c6   :  { %12438 = vmatmul.mubr.f32.gmra.mrb[66].mxu1 %v10407_v16  ;;  %v1039_v16 = vld [vmem:[%s20029_s19 + $0x278] sm:$0xff] }
 0x4c7   :  { %14139 = vmatpush3.bf16.msra.mxu1 %v17609_v15  ;;  %v2196_v55 = vpop.f32.mrb[216].mxu0  ;;  %12440 = vmatprep.mubr.f32.mxu1 %v10408_v10 }
 0x4c8   :  { %14141 = vmatprep.subr.bf16.mxu1 %v17635_v29  ;;  %v2198_v58 = vpop.f32.mrb[217].mxu0  ;;  %10201 = vmatmul.mubr.msk.f32.gmra.mrb[66].mxu0 %vm83_vm0, %v16041_v42 }
 0x4c9   :  { %2713 = vmatprep.mubr.f32.mxu0 %v15366_v63 }
 0x4ca   :  { %12441 = vmatmul.mubr.f32.gmra.mrb[68].mxu1 %v10409_v14  ;;  %v13784_v14 = vpack.c.bf16 %v1066_v36, %v1039_v16  ;;  %v10418_v36 = vld [vmem:[%s20023_s13 + $0x530] sm:$0xff] }
 0x4cb   :  { %14143 = vmatpush3.bf16.msra.mxu1 %v17635_v29  ;;  %v2202_v15 = vpop.f32.mrb[218].mxu0  ;;  %12443 = vmatprep.mubr.f32.mxu1 %v10410_v43  ;;  %v984_v29 = vld [vmem:[%s20029_s19 + $0xc0] sm:$0xff]  ;;  %v1065_v43 = vld [vmem:[%s20029_s19 + $0x348] sm:$0xff] }
 0x4cc   :  { %14145 = vmatprep.subr.bf16.mxu1 %v17661_v5  ;;  %v17791_v8 = vpack.c.bf16 %v2202_v15, %v2196_v55  ;;  %v2204_v24 = vpop.f32.mrb[219].mxu0  ;;  %10202 = vmatmul.mubr.msk.f32.gmra.mrb[68].mxu0 %vm83_vm0, %v16050_v59  ;;  %v13782_v55 = vpack.c.bf16 %v1011_v4, %v984_v29  ;;  %v10416_v29 = vld [vmem:[%s20023_s13 + $0x520] sm:$0xff] }
 0x4cd   :  { %v17798_v48 = vpack.c.bf16 %v2204_v24, %v2198_v58  ;;  %2719 = vmatprep.mubr.f32.mxu0 %v15366_v63  ;;  %v1038_v58 = vld [vmem:[%s20029_s19 + $0x270] sm:$0xff] }
 0x4ce   :  { %12444 = vmatmul.mubr.f32.gmra.mrb[70].mxu1 %v10411_v41  ;;  %v10415_v41 = vld [vmem:[%s20023_s13 + $0x518] sm:$0xff] }
 0x4cf   :  { %14147 = vmatpush3.bf16.msra.mxu1 %v17661_v5  ;;  %v2208_v30 = vpop.f32.mrb[220].mxu0  ;;  %12478 = vmatprep.mubr.f32.mxu1 %v10412_v0  ;;  %v10414_v5 = vld [vmem:[%s20023_s13 + $0x510] sm:$0xff] }
 0x4d0   :  { %14149 = vmatprep.subr.bf16.mxu1 %v17462_v60  ;;  %v2210_v10 = vpop.f32.mrb[221].mxu0  ;;  %10203 = vmatmul.mubr.msk.f32.gmra.mrb[70].mxu0 %vm83_vm0, %v16056_v38 }
 0x4d1   :  { %2790 = vmatprep.mubr.f32.mxu0 %v15366_v63 }
 0x4d2   :  { %12479 = vmatmul.mubr.f32.vlgmr.msra.gmra.mrb[56].mxu1 %v10413_v34  ;;  %v10417_v34 = vld [vmem:[%s20023_s13 + $0x528] sm:$0xff] }
 0x4d3   :  { %14151 = vmatpush3.bf16.msra.mxu1 %v17462_v60  ;;  %v2214_v15 = vpop.f32.mrb[222].mxu0  ;;  %12481 = vmatprep.mubr.f32.mxu1 %v10414_v5  ;;  %v13786_v60 = vpack.c.bf16 %v1065_v43, %v1038_v58  ;;  %v10419_v5 = vld [vmem:[%s20023_s13 + $0x538] sm:$0xff]  ;;  %v10420_v58 = vld [vmem:[%s20023_s13 + $0x540] sm:$0xff] }
 0x4d4   :  { %14153 = vmatprep.subr.bf16.mxu1 %v17488_v21  ;;  %v17835_v24 = vpack.c.bf16 %v2214_v15, %v2208_v30  ;;  %v2216_v0 = vpop.f32.mrb[223].mxu0  ;;  %10204 = vmatmul.mubr.msk.f32.vlgmr.msra.gmra.mrb[72].mxu0 %vm83_vm0, %v15918_v2  ;;  %v10421_v15 = vld [vmem:[%s20023_s13 + $0x548] sm:$0xff] }
 0x4d5   :  { %v17842_v4 = vpack.c.bf16 %v2216_v0, %v2210_v10  ;;  %2796 = vmatprep.mubr.f32.mxu0 %v15366_v63  ;;  %13783 = vmatpush1.bf16.msra.mxu0 %v13782_v55  ;;  %v10422_v0 = vld [vmem:[%s20023_s13 + $0x550] sm:$0xff] }
 0x4d6   :  { %12482 = vmatmul.mubr.f32.gmra.mrb[58].mxu1 %v10415_v41  ;;  %13785 = vmatprep.subr.bf16.mxu0 %v13784_v14 }
 0x4d7   :  { %14155 = vmatpush3.bf16.msra.mxu1 %v17488_v21  ;;  %v2220_v30 = vpop.f32.mrb[224].mxu0  ;;  %12484 = vmatprep.mubr.f32.mxu1 %v10416_v29  ;;  %v20095_v21 = vmov 0.0|0.0   ;;  %v10423_v29 = vld [vmem:[%s20023_s13 + $0x558] sm:$0xff] }
 0x4d8   :  { %14157 = vmatprep.subr.bf16.mxu1 %v17514_v47  ;;  %v2222_v16 = vpop.f32.mrb[225].mxu0  ;;  %10205 = vmatmul.mubr.msk.f32.gmra.mrb[74].mxu0 %vm83_vm0, %v15938_v11 }
 0x4d9   :  { %2802 = vmatprep.mubr.f32.mxu0 %v15366_v63  ;;  %13787 = vmatpush1.bf16.msra.mxu0 %v13786_v60 }
 0x4da   :  { %12485 = vmatmul.mubr.f32.gmra.mrb[60].mxu1 %v10417_v34  ;;  %14660 = vmatprep.subr.bf16.mxu0 %v20095_v21  ;;  %v10424_v34 = vld [vmem:[%s20023_s13 + $0x560] sm:$0xff] }
 0x4db   :  { %14159 = vmatpush3.bf16.msra.mxu1 %v17514_v47  ;;  %v2226_v10 = vpop.f32.mrb[226].mxu0  ;;  %12487 = vmatprep.mubr.f32.mxu1 %v10418_v36  ;;  %v10425_v36 = vld [vmem:[%s20023_s13 + $0x568] sm:$0xff] }
 0x4dc   :  { %14161 = vmatprep.subr.bf16.mxu1 %v17540_v12  ;;  %v17862_v55 = vpack.c.bf16 %v2226_v10, %v2220_v30  ;;  %v2228_v14 = vpop.f32.mrb[227].mxu0  ;;  %10206 = vmatmul.mubr.msk.f32.gmra.mrb[76].mxu0 %vm83_vm0, %v15948_v50 }
 0x4dd   :  { %v17869_v43 = vpack.c.bf16 %v2228_v14, %v2222_v16  ;;  %2808 = vmatprep.mubr.f32.mxu0 %v15366_v63  ;;  %v10427_v14 = vld [vmem:[%s20023_s13 + $0x578] sm:$0xff] }
 0x4de   :  { %12488 = vmatmul.mubr.f32.gmra.mrb[62].mxu1 %v10419_v5  ;;  %v10426_v5 = vld [vmem:[%s20023_s13 + $0x570] sm:$0xff] }
 0x4df   :  { %14163 = vmatpush3.bf16.msra.mxu1 %v17540_v12  ;;  %v2232_v47 = vpop.f32.mrb[228].mxu0  ;;  %12490 = vmatprep.mubr.f32.mxu1 %v10420_v58 }
 0x4e0   :  { %14165 = vmatprep.subr.bf16.mxu1 %v17566_v61  ;;  %v2234_v41 = vpop.f32.mrb[229].mxu0  ;;  %10207 = vmatmul.mubr.msk.f32.gmra.mrb[78].mxu0 %vm83_vm0, %v15956_v54 }
 0x4e1   :  { %2814 = vmatprep.mubr.f32.mxu0 %v15366_v63 }
 0x4e2   :  { %12491 = vmatmul.mubr.f32.gmra.mrb[64].mxu1 %v10421_v15  ;;  %v10428_v15 = vld [vmem:[%s20023_s13 + $0x580] sm:$0xff] }
 0x4e3   :  { %14167 = vmatpush3.bf16.msra.mxu1 %v17566_v61  ;;  %v2238_v12 = vpop.f32.mrb[230].mxu0  ;;  %12493 = vmatprep.mubr.f32.mxu1 %v10422_v0  ;;  %v10429_v0 = vld [vmem:[%s20023_s13 + $0x588] sm:$0xff] }
 0x4e4   :  { %14169 = vmatprep.subr.bf16.mxu1 %v17616_v46  ;;  %v17888_v60 = vpack.c.bf16 %v2238_v12, %v2232_v47  ;;  %v2240_v30 = vpop.f32.mrb[231].mxu0  ;;  %10208 = vmatmul.mubr.msk.f32.gmra.mrb[80].mxu0 %vm83_vm0, %v15966_v45 }
 0x4e5   :  { %v17895_v16 = vpack.c.bf16 %v2240_v30, %v2234_v41  ;;  %2820 = vmatprep.mubr.f32.mxu0 %v15366_v63  ;;  %v10431_v30 = vld [vmem:[%s20023_s13 + $0x598] sm:$0xff] }
 0x4e6   :  { %12494 = vmatmul.mubr.f32.gmra.mrb[66].mxu1 %v10423_v29  ;;  %v10430_v29 = vld [vmem:[%s20023_s13 + $0x590] sm:$0xff] }
 0x4e7   :  { %14171 = vmatpush3.bf16.msra.mxu1 %v17616_v46  ;;  %v2309_v61 = vpop.f32.mrb[232].mxu0  ;;  %12496 = vmatprep.mubr.f32.mxu1 %v10424_v34 }
 0x4e8   :  { %14173 = vmatprep.subr.bf16.mxu1 %v17642_v62  ;;  %v2311_v10 = vpop.f32.mrb[233].mxu0  ;;  %10209 = vmatmul.mubr.msk.f32.gmra.mrb[82].mxu0 %vm83_vm0, %v15974_v37 }
 0x4e9   :  { %2826 = vmatprep.mubr.f32.mxu0 %v15366_v63 }
 0x4ea   :  { %12497 = vmatmul.mubr.f32.gmra.mrb[68].mxu1 %v10425_v36  ;;  %v10432_v36 = vld [vmem:[%s20023_s13 + $0x5a0] sm:$0xff] }
 0x4eb   :  { %14175 = vmatpush3.bf16.msra.mxu1 %v17642_v62  ;;  %v2315_v46 = vpop.f32.mrb[234].mxu0  ;;  %12499 = vmatprep.mubr.f32.mxu1 %v10426_v5  ;;  %v10433_v5 = vld [vmem:[%s20023_s13 + $0x5a8] sm:$0xff] }
 0x4ec   :  { %14177 = vmatprep.subr.bf16.mxu1 %v17668_v6  ;;  %v17914_v58 = vpack.c.bf16 %v2315_v46, %v2309_v61  ;;  %v2317_v47 = vpop.f32.mrb[235].mxu0  ;;  %10210 = vmatmul.mubr.msk.f32.gmra.mrb[84].mxu0 %vm83_vm0, %v15984_v56 }
 0x4ed   :  { %v17921_v41 = vpack.c.bf16 %v2317_v47, %v2311_v10  ;;  %2832 = vmatprep.mubr.f32.mxu0 %v15366_v63  ;;  %v10435_v47 = vld [vmem:[%s20023_s13 + $0x5b8] sm:$0xff] }
 0x4ee   :  { %12500 = vmatmul.mubr.f32.gmra.mrb[70].mxu1 %v10427_v14  ;;  %v10434_v14 = vld [vmem:[%s20023_s13 + $0x5b0] sm:$0xff] }
 0x4ef   :  { %14179 = vmatpush3.bf16.msra.mxu1 %v17668_v6  ;;  %v2321_v62 = vpop.f32.mrb[236].mxu0  ;;  %12534 = vmatprep.mubr.f32.mxu1 %v10428_v15 }
 0x4f0   :  { %14181 = vmatprep.subr.bf16.mxu1 %v17687_v25  ;;  %v2323_v12 = vpop.f32.mrb[237].mxu0  ;;  %10211 = vmatmul.mubr.msk.f32.gmra.mrb[86].mxu0 %vm83_vm0, %v15992_v32 }
 0x4f1   :  { %2838 = vmatprep.mubr.f32.mxu0 %v15366_v63 }
 0x4f2   :  { %12535 = vmatmul.mubr.f32.vlgmr.msra.gmra.mrb[56].mxu1 %v10429_v0  ;;  %v10436_v0 = vld [vmem:[%s20023_s13 + $0x5c0] sm:$0xff] }
 0x4f3   :  { %14183 = vmatpush3.bf16.msra.mxu1 %v17687_v25  ;;  %v2327_v6 = vpop.f32.mrb[238].mxu0  ;;  %12537 = vmatprep.mubr.f32.mxu1 %v10430_v29  ;;  %v10437_v29 = vld [vmem:[%s20023_s13 + $0x5c8] sm:$0xff] }
 0x4f4   :  { %14185 = vmatprep.subr.bf16.mxu1 %v17713_v20  ;;  %v17940_v34 = vpack.c.bf16 %v2327_v6, %v2321_v62  ;;  %v2329_v61 = vpop.f32.mrb[239].mxu0  ;;  %10212 = vmatmul.mubr.msk.f32.gmra.mrb[88].mxu0 %vm83_vm0, %v16002_v9 }
 0x4f5   :  { %v17947_v10 = vpack.c.bf16 %v2329_v61, %v2323_v12  ;;  %2844 = vmatprep.mubr.f32.mxu0 %v15366_v63  ;;  %v10439_v61 = vld [vmem:[%s20023_s13 + $0x5d8] sm:$0xff] }
 0x4f6   :  { %12538 = vmatmul.mubr.f32.gmra.mrb[58].mxu1 %v10431_v30  ;;  %v10438_v30 = vld [vmem:[%s20023_s13 + $0x5d0] sm:$0xff] }
 0x4f7   :  { %14187 = vmatpush3.bf16.msra.mxu1 %v17713_v20  ;;  %v2333_v25 = vpop.f32.mrb[240].mxu0  ;;  %12540 = vmatprep.mubr.f32.mxu1 %v10432_v36 }
 0x4f8   :  { %14189 = vmatprep.subr.bf16.mxu1 %v17739_v33  ;;  %v2335_v46 = vpop.f32.mrb[241].mxu0  ;;  %10213 = vmatmul.mubr.msk.f32.gmra.mrb[90].mxu0 %vm83_vm0, %v16009_v40 }
 0x4f9   :  { %2850 = vmatprep.mubr.f32.mxu0 %v15366_v63 }
 0x4fa   :  { %12541 = vmatmul.mubr.f32.gmra.mrb[60].mxu1 %v10433_v5  ;;  %v10440_v5 = vld [vmem:[%s20023_s13 + $0x5e0] sm:$0xff] }
 0x4fb   :  { %14191 = vmatpush3.bf16.msra.mxu1 %v17739_v33  ;;  %v2339_v20 = vpop.f32.mrb[242].mxu0  ;;  %12543 = vmatprep.mubr.f32.mxu1 %v10434_v14  ;;  %v10441_v14 = vld [vmem:[%s20023_s13 + $0x5e8] sm:$0xff] }
 0x4fc   :  { %14193 = vmatprep.subr.bf16.mxu1 %v17765_v52  ;;  %v17966_v15 = vpack.c.bf16 %v2339_v20, %v2333_v25  ;;  %v2341_v62 = vpop.f32.mrb[243].mxu0  ;;  %10214 = vmatmul.mubr.msk.f32.gmra.mrb[92].mxu0 %vm83_vm0, %v16018_v31 }
 0x4fd   :  { %v17973_v12 = vpack.c.bf16 %v2341_v62, %v2335_v46  ;;  %2856 = vmatprep.mubr.f32.mxu0 %v15366_v63  ;;  %v10443_v62 = vld [vmem:[%s20023_s13 + $0x5f8] sm:$0xff] }
 0x4fe   :  { %12544 = vmatmul.mubr.f32.gmra.mrb[62].mxu1 %v10435_v47  ;;  %v10442_v47 = vld [vmem:[%s20023_s13 + $0x5f0] sm:$0xff] }
 0x4ff   :  { %14195 = vmatpush3.bf16.msra.mxu1 %v17765_v52  ;;  %v2345_v33 = vpop.f32.mrb[244].mxu0  ;;  %12546 = vmatprep.mubr.f32.mxu1 %v10436_v0 }
 0x500   :  { %14197 = vmatprep.subr.bf16.mxu1 %v17791_v8  ;;  %v2347_v6 = vpop.f32.mrb[245].mxu0  ;;  %10215 = vmatmul.mubr.msk.f32.gmra.mrb[94].mxu0 %vm83_vm0, %v16025_v35 }
 0x501   :  { %2862 = vmatprep.mubr.f32.mxu0 %v15366_v63 }
 0x502   :  { %12547 = vmatmul.mubr.f32.gmra.mrb[64].mxu1 %v10437_v29  ;;  %v10444_v29 = vld [vmem:[%s20023_s13 + $0x600] sm:$0xff] }
 0x503   :  { %14199 = vmatpush3.bf16.msra.mxu1 %v17791_v8  ;;  %v2351_v52 = vpop.f32.mrb[246].mxu0  ;;  %12549 = vmatprep.mubr.f32.mxu1 %v10438_v30  ;;  %v10445_v30 = vld [vmem:[%s20023_s13 + $0x608] sm:$0xff] }
 0x504   :  { %14201 = vmatprep.subr.bf16.mxu1 %v17835_v24  ;;  %v17992_v36 = vpack.c.bf16 %v2351_v52, %v2345_v33  ;;  %v2353_v25 = vpop.f32.mrb[247].mxu0  ;;  %10216 = vmatmul.mubr.msk.f32.gmra.mrb[96].mxu0 %vm83_vm0, %v16034_v28 }
 0x505   :  { %v17999_v46 = vpack.c.bf16 %v2353_v25, %v2347_v6  ;;  %2868 = vmatprep.mubr.f32.mxu0 %v15366_v63  ;;  %v10447_v25 = vld [vmem:[%s20023_s13 + $0x618] sm:$0xff] }
 0x506   :  { %12550 = vmatmul.mubr.f32.gmra.mrb[66].mxu1 %v10439_v61  ;;  %v10446_v61 = vld [vmem:[%s20023_s13 + $0x610] sm:$0xff] }
 0x507   :  { %14203 = vmatpush3.bf16.msra.mxu1 %v17835_v24  ;;  %v2357_v8 = vpop.f32.mrb[248].mxu0  ;;  %12552 = vmatprep.mubr.f32.mxu1 %v10440_v5 }
 0x508   :  { %14205 = vmatprep.subr.bf16.mxu1 %v17862_v55  ;;  %v2359_v20 = vpop.f32.mrb[249].mxu0  ;;  %10217 = vmatmul.mubr.msk.f32.gmra.mrb[98].mxu0 %vm83_vm0, %v16041_v42 }
 0x509   :  { %2874 = vmatprep.mubr.f32.mxu0 %v15366_v63 }
 0x50a   :  { %12553 = vmatmul.mubr.f32.gmra.mrb[68].mxu1 %v10441_v14  ;;  %v10448_v14 = vld [vmem:[%s20023_s13 + $0x620] sm:$0xff] }
 0x50b   :  { %14207 = vmatpush3.bf16.msra.mxu1 %v17862_v55  ;;  %v2363_v24 = vpop.f32.mrb[250].mxu0  ;;  %12555 = vmatprep.mubr.f32.mxu1 %v10442_v47 }
 0x50c   :  { %14209 = vmatprep.subr.bf16.mxu1 %v17888_v60  ;;  %v18018_v0 = vpack.c.bf16 %v2363_v24, %v2357_v8  ;;  %v2365_v33 = vpop.f32.mrb[251].mxu0  ;;  %10218 = vmatmul.mubr.msk.f32.gmra.mrb[100].mxu0 %vm83_vm0, %v16050_v59 }
 0x50d   :  { %v18025_v6 = vpack.c.bf16 %v2365_v33, %v2359_v20  ;;  %2880 = vmatprep.mubr.f32.mxu0 %v15366_v63  ;;  %v10452_v33 = vld [vmem:[%s20023_s13 + $0x640] sm:$0xff] }
 0x50e   :  { %12556 = vmatmul.mubr.f32.gmra.mrb[70].mxu1 %v10443_v62 }
 0x50f   :  { %14211 = vmatpush3.bf16.msra.mxu1 %v17888_v60  ;;  %v2369_v55 = vpop.f32.mrb[252].mxu0  ;;  %12590 = vmatprep.mubr.f32.mxu1 %v10444_v29 }
 0x510   :  { %14213 = vmatprep.subr.bf16.mxu1 %v17694_v7  ;;  %v2371_v52 = vpop.f32.mrb[253].mxu0  ;;  %10219 = vmatmul.mubr.msk.f32.gmra.mrb[102].mxu0 %vm83_vm0, %v16056_v38 }
 0x511   :  { %3112 = vmatprep.mubr.f32.mxu0 %v15366_v63 }
 0x512   :  { %12591 = vmatmul.mubr.f32.vlgmr.msra.gmra.mrb[56].mxu1 %v10445_v30  ;;  %v10454_v30 = vld [vmem:[%s20023_s13 + $0x650] sm:$0xff] }
 0x513   :  { %14215 = vmatpush3.bf16.msra.mxu1 %v17694_v7  ;;  %v2375_v60 = vpop.f32.mrb[254].mxu0  ;;  %12593 = vmatprep.mubr.f32.mxu1 %v10446_v61  ;;  %v20096_v7 = vpack.c.bf16 %v17115_v1, %v17120_v44  ;;  %v10450_v1 = vld [vmem:[%s20023_s13 + $0x630] sm:$0xff] }
 0x514   :  { %14217 = vmatprep.subr.bf16.mxu1 %v17720_v19  ;;  %v18044_v5 = vpack.c.bf16 %v2375_v60, %v2369_v55  ;;  %v2377_v8 = vpop.f32.mrb[255].mxu0  ;;  %10236 = vmatmul.mubr.msk.f32.vlgmr.msra.gmra.mrb[104].mxu0 %vm83_vm0, %v15918_v2  ;;  %v10449_v2 = vld [vmem:[%s20023_s13 + $0x628] sm:$0xff]  ;;  %v10456_v60 = vld [vmem:[%s20023_s13 + $0x660] sm:$0xff] }
 0x515   :  { %v18051_v20 = vpack.c.bf16 %v2377_v8, %v2371_v52  ;;  %14662 = vmatpush3.bf16.msra.mxu0 %v20096_v7  ;;  %3118 = vmatprep.mubr.f32.mxu0 %v15366_v63  ;;  %v10453_v55 = vld [vmem:[%s20023_s13 + $0x648] sm:$0xff]  ;;  %v10455_v52 = vld [vmem:[%s20023_s13 + $0x658] sm:$0xff] }
 0x516   :  { %12594 = vmatmul.mubr.f32.gmra.mrb[58].mxu1 %v10447_v25  ;;  %14663 = vmatprep.subr.bf16.mxu0 %v20095_v21  ;;  %v10457_v8 = vld [vmem:[%s20023_s13 + $0x668] sm:$0xff]  ;;  %v10459_v7 = vld [vmem:[%s20023_s13 + $0x678] sm:$0xff] }
 0x517   :  { %14219 = vmatpush3.bf16.msra.mxu1 %v17720_v19  ;;  %v2381_v47 = vpop.f32.mrb[0].mxu0  ;;  %12596 = vmatprep.mubr.f32.mxu1 %v10448_v14  ;;  %v10451_v19 = vld [vmem:[%s20023_s13 + $0x638] sm:$0xff]  ;;  %v10458_v14 = vld [vmem:[%s20023_s13 + $0x670] sm:$0xff] }
 0x518   :  { %14221 = vmatprep.subr.bf16.mxu1 %v17746_v53  ;;  %v2383_v24 = vpop.f32.mrb[1].mxu0  ;;  %10237 = vmatmul.mubr.msk.f32.gmra.mrb[106].mxu0 %vm83_vm0, %v15938_v11 }
 0x519   :  { %3124 = vmatprep.mubr.f32.mxu0 %v15366_v63 }
 0x51a   :  { %12597 = vmatmul.mubr.f32.gmra.mrb[60].mxu1 %v10449_v2  ;;  %v10460_v2 = vld [vmem:[%s20023_s13 + $0x680] sm:$0xff] }
 0x51b   :  { %14223 = vmatpush3.bf16.msra.mxu1 %v17746_v53  ;;  %v2387_v44 = vpop.f32.mrb[2].mxu0  ;;  %12599 = vmatprep.mubr.f32.mxu1 %v10450_v1  ;;  %v10461_v1 = vld [vmem:[%s20023_s13 + $0x688] sm:$0xff] }
 0x51c   :  { %14225 = vmatprep.subr.bf16.mxu1 %v17772_v22  ;;  %v18074_v62 = vpack.c.bf16 %v2387_v44, %v2381_v47  ;;  %v2389_v11 = vpop.f32.mrb[3].mxu0  ;;  %10238 = vmatmul.mubr.msk.f32.gmra.mrb[108].mxu0 %vm83_vm0, %v15948_v50  ;;  %v10462_v44 = vld [vmem:[%s20023_s13 + $0x690] sm:$0xff] }
 0x51d   :  { %v18081_v29 = vpack.c.bf16 %v2389_v11, %v2383_v24  ;;  %3130 = vmatprep.mubr.f32.mxu0 %v15366_v63 }
 0x51e   :  { %12600 = vmatmul.mubr.f32.gmra.mrb[62].mxu1 %v10451_v19  ;;  %v10463_v19 = vld [vmem:[%s20023_s13 + $0x698] sm:$0xff] }
 0x51f   :  { %14227 = vmatpush3.bf16.msra.mxu1 %v17772_v22  ;;  %v2393_v53 = vpop.f32.mrb[4].mxu0  ;;  %12602 = vmatprep.mubr.f32.mxu1 %v10452_v33  ;;  %v10464_v33 = vld [vmem:[%s20023_s13 + $0x6a0] sm:$0xff] }
 0x520   :  { %14229 = vmatprep.subr.bf16.mxu1 %v17798_v48  ;;  %v2395_v50 = vpop.f32.mrb[5].mxu0  ;;  %10239 = vmatmul.mubr.msk.f32.gmra.mrb[110].mxu0 %vm83_vm0, %v15956_v54 }
 0x521   :  { %3136 = vmatprep.mubr.f32.mxu0 %v15366_v63 }
 0x522   :  { %12603 = vmatmul.mubr.f32.gmra.mrb[64].mxu1 %v10453_v55  ;;  %v10465_v55 = vld [vmem:[%s20023_s13 + $0x6a8] sm:$0xff] }
 0x523   :  { %14231 = vmatpush3.bf16.msra.mxu1 %v17798_v48  ;;  %v2399_v22 = vpop.f32.mrb[6].mxu0  ;;  %12605 = vmatprep.mubr.f32.mxu1 %v10454_v30  ;;  %v10467_v30 = vld [vmem:[%s20023_s13 + $0x6b8] sm:$0xff] }
 0x524   :  { %14233 = vmatprep.subr.bf16.mxu1 %v17842_v4  ;;  %v18100_v61 = vpack.c.bf16 %v2399_v22, %v2393_v53  ;;  %v2401_v54 = vpop.f32.mrb[7].mxu0  ;;  %10240 = vmatmul.mubr.msk.f32.gmra.mrb[112].mxu0 %vm83_vm0, %v15966_v45 }
 0x525   :  { %v18107_v25 = vpack.c.bf16 %v2401_v54, %v2395_v50  ;;  %3142 = vmatprep.mubr.f32.mxu0 %v15366_v63  ;;  %v10466_v50 = vld [vmem:[%s20023_s13 + $0x6b0] sm:$0xff] }
 0x526   :  { %12606 = vmatmul.mubr.f32.gmra.mrb[66].mxu1 %v10455_v52  ;;  %v10468_v52 = vld [vmem:[%s20023_s13 + $0x6c0] sm:$0xff] }
 0x527   :  { %14235 = vmatpush3.bf16.msra.mxu1 %v17842_v4  ;;  %v2470_v48 = vpop.f32.mrb[8].mxu0  ;;  %12608 = vmatprep.mubr.f32.mxu1 %v10456_v60  ;;  %v10469_v60 = vld [vmem:[%s20023_s13 + $0x6c8] sm:$0xff] }
 0x528   :  { %14237 = vmatprep.subr.bf16.mxu1 %v17869_v43  ;;  %v2472_v45 = vpop.f32.mrb[9].mxu0  ;;  %10241 = vmatmul.mubr.msk.f32.gmra.mrb[114].mxu0 %vm83_vm0, %v15974_v37 }
 0x529   :  { %3148 = vmatprep.mubr.f32.mxu0 %v15366_v63 }
 0x52a   :  { %12609 = vmatmul.mubr.f32.gmra.mrb[68].mxu1 %v10457_v8  ;;  %v10471_v8 = vld [vmem:[%s20023_s13 + $0x6d8] sm:$0xff] }
 0x52b   :  { %14239 = vmatpush3.bf16.msra.mxu1 %v17869_v43  ;;  %v2476_v4 = vpop.f32.mrb[10].mxu0  ;;  %12611 = vmatprep.mubr.f32.mxu1 %v10458_v14  ;;  %v10472_v14 = vld [vmem:[%s20023_s13 + $0x6e0] sm:$0xff] }
 0x52c   :  { %14241 = vmatprep.subr.bf16.mxu1 %v17895_v16  ;;  %v18126_v47 = vpack.c.bf16 %v2476_v4, %v2470_v48  ;;  %v2478_v37 = vpop.f32.mrb[11].mxu0  ;;  %10242 = vmatmul.mubr.msk.f32.gmra.mrb[116].mxu0 %vm83_vm0, %v15984_v56  ;;  %v10470_v48 = vld [vmem:[%s20023_s13 + $0x6d0] sm:$0xff] }
 0x52d   :  { %v18133_v24 = vpack.c.bf16 %v2478_v37, %v2472_v45  ;;  %3154 = vmatprep.mubr.f32.mxu0 %v15366_v63  ;;  %v10474_v37 = vld [vmem:[%s20023_s13 + $0x6f0] sm:$0xff] }
 0x52e   :  { %12612 = vmatmul.mubr.f32.gmra.mrb[70].mxu1 %v10459_v7  ;;  %v10473_v7 = vld [vmem:[%s20023_s13 + $0x6e8] sm:$0xff] }
 0x52f   :  { %14243 = vmatpush3.bf16.msra.mxu1 %v17895_v16  ;;  %v2482_v43 = vpop.f32.mrb[12].mxu0  ;;  %12646 = vmatprep.mubr.f32.mxu1 %v10460_v2  ;;  %v10475_v2 = vld [vmem:[%s20023_s13 + $0x6f8] sm:$0xff] }
 0x530   :  { %14245 = vmatprep.subr.bf16.mxu1 %v17914_v58  ;;  %v2484_v56 = vpop.f32.mrb[13].mxu0  ;;  %10243 = vmatmul.mubr.msk.f32.gmra.mrb[118].mxu0 %vm83_vm0, %v15992_v32 }
 0x531   :  { %3160 = vmatprep.mubr.f32.mxu0 %v15366_v63 }
 0x532   :  { %12647 = vmatmul.mubr.f32.vlgmr.msra.gmra.mrb[56].mxu1 %v10461_v1  ;;  %v10476_v1 = vld [vmem:[%s20023_s13 + $0x700] sm:$0xff] }
 0x533   :  { %14247 = vmatpush3.bf16.msra.mxu1 %v17914_v58  ;;  %v2488_v16 = vpop.f32.mrb[14].mxu0  ;;  %12649 = vmatprep.mubr.f32.mxu1 %v10462_v44  ;;  %v10477_v44 = vld [vmem:[%s20023_s13 + $0x708] sm:$0xff] }
 0x534   :  { %14249 = vmatprep.subr.bf16.mxu1 %v17940_v34  ;;  %v18152_v11 = vpack.c.bf16 %v2488_v16, %v2482_v43  ;;  %v2490_v32 = vpop.f32.mrb[15].mxu0  ;;  %10244 = vmatmul.mubr.msk.f32.gmra.mrb[120].mxu0 %vm83_vm0, %v16002_v9  ;;  %v10478_v16 = vld [vmem:[%s20023_s13 + $0x710] sm:$0xff] }
 0x535   :  { %v18159_v53 = vpack.c.bf16 %v2490_v32, %v2484_v56  ;;  %3166 = vmatprep.mubr.f32.mxu0 %v15366_v63 }
 0x536   :  { %12650 = vmatmul.mubr.f32.gmra.mrb[58].mxu1 %v10463_v19 }
 0x537   :  { %14251 = vmatpush3.bf16.msra.mxu1 %v17940_v34  ;;  %v2494_v58 = vpop.f32.mrb[16].mxu0  ;;  %12652 = vmatprep.mubr.f32.mxu1 %v10464_v33 }
 0x538   :  { %14253 = vmatprep.subr.bf16.mxu1 %v17966_v15  ;;  %v2496_v9 = vpop.f32.mrb[17].mxu0  ;;  %10245 = vmatmul.mubr.msk.f32.gmra.mrb[122].mxu0 %vm83_vm0, %v16009_v40 }
 0x539   :  { %3172 = vmatprep.mubr.f32.mxu0 %v15366_v63 }
 0x53a   :  { %12653 = vmatmul.mubr.f32.gmra.mrb[60].mxu1 %v10465_v55 }
 0x53b   :  { %14255 = vmatpush3.bf16.msra.mxu1 %v17966_v15  ;;  %v2500_v34 = vpop.f32.mrb[18].mxu0  ;;  %12655 = vmatprep.mubr.f32.mxu1 %v10466_v50  ;;  %v10481_v50 = vld [vmem:[%s20023_s13 + $0x728] sm:$0xff] }
 0x53c   :  { %14257 = vmatprep.subr.bf16.mxu1 %v17992_v36  ;;  %v18178_v22 = vpack.c.bf16 %v2500_v34, %v2494_v58  ;;  %v2502_v40 = vpop.f32.mrb[19].mxu0  ;;  %10246 = vmatmul.mubr.msk.f32.gmra.mrb[124].mxu0 %vm83_vm0, %v16018_v31  ;;  %v10480_v58 = vld [vmem:[%s20023_s13 + $0x720] sm:$0xff] }
 0x53d   :  { %v18185_v54 = vpack.c.bf16 %v2502_v40, %v2496_v9  ;;  %3178 = vmatprep.mubr.f32.mxu0 %v15366_v63 }
 0x53e   :  { %12656 = vmatmul.mubr.f32.gmra.mrb[62].mxu1 %v10467_v30  ;;  %v10482_v30 = vld [vmem:[%s20023_s13 + $0x730] sm:$0xff] }
 0x53f   :  { %14259 = vmatpush3.bf16.msra.mxu1 %v17992_v36  ;;  %v2506_v15 = vpop.f32.mrb[20].mxu0  ;;  %12658 = vmatprep.mubr.f32.mxu1 %v10468_v52  ;;  %v10483_v52 = vld [vmem:[%s20023_s13 + $0x738] sm:$0xff] }
 0x540   :  { %14261 = vmatprep.subr.bf16.mxu1 %v18018_v0  ;;  %v2508_v31 = vpop.f32.mrb[21].mxu0  ;;  %10247 = vmatmul.mubr.msk.f32.gmra.mrb[126].mxu0 %vm83_vm0, %v16025_v35 }
 0x541   :  { %3184 = vmatprep.mubr.f32.mxu0 %v15366_v63 }
 0x542   :  { %12659 = vmatmul.mubr.f32.gmra.mrb[64].mxu1 %v10469_v60 }
 0x543   :  { %14263 = vmatpush3.bf16.msra.mxu1 %v18018_v0  ;;  %v2512_v36 = vpop.f32.mrb[22].mxu0  ;;  %12661 = vmatprep.mubr.f32.mxu1 %v10470_v48 }
 0x544   :  { %14265 = vmatprep.subr.bf16.mxu1 %v18044_v5  ;;  %v18204_v45 = vpack.c.bf16 %v2512_v36, %v2506_v15  ;;  %v2514_v35 = vpop.f32.mrb[23].mxu0  ;;  %10248 = vmatmul.mubr.msk.f32.gmra.mrb[128].mxu0 %vm83_vm0, %v16034_v28 }
 0x545   :  { %v18211_v4 = vpack.c.bf16 %v2514_v35, %v2508_v31  ;;  %3190 = vmatprep.mubr.f32.mxu0 %v15366_v63  ;;  %v10484_v31 = vld [vmem:[%s20023_s13 + $0x740] sm:$0xff] }
 0x546   :  { %12662 = vmatmul.mubr.f32.gmra.mrb[66].mxu1 %v10471_v8  ;;  %v10485_v8 = vld [vmem:[%s20023_s13 + $0x748] sm:$0xff] }
 0x547   :  { %14267 = vmatpush3.bf16.msra.mxu1 %v18044_v5  ;;  %v2518_v0 = vpop.f32.mrb[24].mxu0  ;;  %12664 = vmatprep.mubr.f32.mxu1 %v10472_v14  ;;  %v10486_v14 = vld [vmem:[%s20023_s13 + $0x750] sm:$0xff] }
 0x548   :  { %14269 = vmatprep.subr.bf16.mxu1 %v18074_v62  ;;  %v2520_v28 = vpop.f32.mrb[25].mxu0  ;;  %10249 = vmatmul.mubr.msk.f32.gmra.mrb[130].mxu0 %vm83_vm0, %v16041_v42 }
 0x549   :  { %3196 = vmatprep.mubr.f32.mxu0 %v15366_v63 }
 0x54a   :  { %12665 = vmatmul.mubr.f32.gmra.mrb[68].mxu1 %v10473_v7  ;;  %v10487_v7 = vld [vmem:[%s20023_s13 + $0x758] sm:$0xff] }
 0x54b   :  { %14271 = vmatpush3.bf16.msra.mxu1 %v18074_v62  ;;  %v2524_v5 = vpop.f32.mrb[26].mxu0  ;;  %12667 = vmatprep.mubr.f32.mxu1 %v10474_v37 }
 0x54c   :  { %14273 = vmatprep.subr.bf16.mxu1 %v18100_v61  ;;  %v18230_v43 = vpack.c.bf16 %v2524_v5, %v2518_v0  ;;  %v2526_v42 = vpop.f32.mrb[27].mxu0  ;;  %10250 = vmatmul.mubr.msk.f32.gmra.mrb[132].mxu0 %vm83_vm0, %v16050_v59  ;;  %v10488_v5 = vld [vmem:[%s20023_s13 + $0x760] sm:$0xff] }
 0x54d   :  { %v18237_v56 = vpack.c.bf16 %v2526_v42, %v2520_v28  ;;  %3202 = vmatprep.mubr.f32.mxu0 %v15366_v63  ;;  %v10489_v42 = vld [vmem:[%s20023_s13 + $0x768] sm:$0xff] }
 0x54e   :  { %12668 = vmatmul.mubr.f32.gmra.mrb[70].mxu1 %v10475_v2 }
 0x54f   :  { %14275 = vmatpush3.bf16.msra.mxu1 %v18100_v61  ;;  %v2530_v62 = vpop.f32.mrb[28].mxu0  ;;  %12702 = vmatprep.mubr.f32.mxu1 %v10476_v1  ;;  %v8151_v61 = vld [vmem:[%s20097_s17] sm:$0xff] }
 0x550   :  { %14277 = vmatprep.subr.bf16.mxu1 %v17921_v41  ;;  %v2532_v59 = vpop.f32.mrb[29].mxu0  ;;  %10251 = vmatmul.mubr.msk.f32.gmra.mrb[134].mxu0 %vm83_vm0, %v16056_v38  ;;  %v10479_v38 = vld [vmem:[%s20023_s13 + $0x718] sm:$0xff] }
 0x551   :  { %13402 = vmatprep.mubr.msk.f32.mxu0 %vm15365_vm1, %v15366_v63 }
 0x552   :  { %12703 = vmatmul.mubr.f32.vlgmr.msra.gmra.mrb[56].mxu1 %v10477_v44 }
 0x553   :  { %14279 = vmatpush3.bf16.msra.mxu1 %v17921_v41  ;;  %v2536_v19 = vpop.f32.mrb[30].mxu0  ;;  %12705 = vmatprep.mubr.f32.mxu1 %v10478_v16  ;;  %v8152_v41 = vld [vmem:[%s20097_s17 + $0x8] sm:$0xff] }
 0x554   :  { %14281 = vmatprep.subr.bf16.mxu1 %v17947_v10  ;;  %v18260_v32 = vpack.c.bf16 %v2536_v19, %v2530_v62  ;;  %v2538_v33 = vpop.f32.mrb[31].mxu0  ;;  %13403 = vmatmul.mubr.msk.f32.vlgmr.msra.gmra.mrb[136].mxu0 %vm200_vm2, %v8151_v61  ;;  %v10490_v62 = vld [vmem:[%s20023_s13 + $0x770] sm:$0xff]  ;;  %v10492_v61 = vld [vmem:[%s20023_s13 + $0x780] sm:$0xff] }
 0x555   :  { %v18266_v55 = vpack.c.bf16 %v2538_v33, %v2532_v59  ;;  %13405 = vmatprep.mubr.msk.f32.mxu0 %vm15365_vm1, %v15366_v63 }
 0x556   :  { %12706 = vmatmul.mubr.f32.gmra.mrb[58].mxu1 %v10479_v38  ;;  %v10493_v38 = vld [vmem:[%s20023_s13 + $0x788] sm:$0xff] }
 0x557   :  { %14283 = vmatpush3.bf16.msra.mxu1 %v17947_v10  ;;  %v2542_v9 = vpop.f32.mrb[32].mxu0  ;;  %12708 = vmatprep.mubr.f32.mxu1 %v10480_v58  ;;  %v8153_v10 = vld [vmem:[%s20097_s17 + $0x10] sm:$0xff] }
 0x558   :  { %14285 = vmatprep.subr.bf16.mxu1 %v17973_v12  ;;  %v2544_v34 = vpop.f32.mrb[33].mxu0  ;;  %13406 = vmatmul.mubr.msk.f32.gmra.mrb[138].mxu0 %vm200_vm2, %v8152_v41  ;;  %v10494_v58 = vld [vmem:[%s20023_s13 + $0x790] sm:$0xff] }
 0x559   :  { %13408 = vmatprep.mubr.msk.f32.mxu0 %vm15365_vm1, %v15366_v63 }
 0x55a   :  { %12709 = vmatmul.mubr.f32.gmra.mrb[60].mxu1 %v10481_v50 }
 0x55b   :  { %14287 = vmatpush3.bf16.msra.mxu1 %v17973_v12  ;;  %v2548_v40 = vpop.f32.mrb[34].mxu0  ;;  %12711 = vmatprep.mubr.f32.mxu1 %v10482_v30  ;;  %v8154_v12 = vld [vmem:[%s20097_s17 + $0x18] sm:$0xff] }
 0x55c   :  { %14289 = vmatprep.subr.bf16.mxu1 %v17999_v46  ;;  %v18292_v15 = vpack.c.bf16 %v2548_v40, %v2542_v9  ;;  %v2550_v60 = vpop.f32.mrb[35].mxu0  ;;  %13409 = vmatmul.mubr.msk.f32.gmra.mrb[140].mxu0 %vm200_vm2, %v8153_v10  ;;  %v10497_v10 = vld [vmem:[%s20023_s13 + $0x7a8] sm:$0xff] }
 0x55d   :  { %v18298_v48 = vpack.c.bf16 %v2550_v60, %v2544_v34  ;;  %13411 = vmatprep.mubr.msk.f32.mxu0 %vm15365_vm1, %v15366_v63  ;;  %v10496_v34 = vld [vmem:[%s20023_s13 + $0x7a0] sm:$0xff] }
 0x55e   :  { %12712 = vmatmul.mubr.f32.gmra.mrb[62].mxu1 %v10483_v52  ;;  %v10498_v52 = vld [vmem:[%s20023_s13 + $0x7b0] sm:$0xff] }
 0x55f   :  { %14291 = vmatpush3.bf16.msra.mxu1 %v17999_v46  ;;  %v2554_v36 = vpop.f32.mrb[36].mxu0  ;;  %12714 = vmatprep.mubr.f32.mxu1 %v10484_v31  ;;  %v8155_v46 = vld [vmem:[%s20097_s17 + $0x20] sm:$0xff] }
 0x560   :  { %14293 = vmatprep.subr.bf16.mxu1 %v18025_v6  ;;  %v2556_v35 = vpop.f32.mrb[37].mxu0  ;;  %13412 = vmatmul.mubr.msk.f32.gmra.mrb[142].mxu0 %vm200_vm2, %v8154_v12 }
 0x561   :  { %13414 = vmatprep.mubr.msk.f32.mxu0 %vm15365_vm1, %v15366_v63 }
 0x562   :  { %12715 = vmatmul.mubr.f32.gmra.mrb[64].mxu1 %v10485_v8 }
 0x563   :  { %14295 = vmatpush3.bf16.msra.mxu1 %v18025_v6  ;;  %v2560_v0 = vpop.f32.mrb[38].mxu0  ;;  %12717 = vmatprep.mubr.f32.mxu1 %v10486_v14 }
 0x564   :  { %14297 = vmatprep.subr.bf16.mxu1 %v18051_v20  ;;  %v18324_v28 = vpack.c.bf16 %v2560_v0, %v2554_v36  ;;  %v2562_v37 = vpop.f32.mrb[39].mxu0  ;;  %13415 = vmatmul.mubr.msk.f32.gmra.mrb[144].mxu0 %vm200_vm2, %v8155_v46  ;;  %v10500_v36 = vld [vmem:[%s20023_s13 + $0x7c0] sm:$0xff]  ;;  %v10502_v46 = vld [vmem:[%s20023_s13 + $0x7d0] sm:$0xff] }
 0x565   :  { %v18330_v2 = vpack.c.bf16 %v2562_v37, %v2556_v35  ;;  %13421 = vmatprep.mubr.msk.f32.mxu0 %vm15365_vm1, %v15366_v63  ;;  %v10501_v35 = vld [vmem:[%s20023_s13 + $0x7c8] sm:$0xff] }
 0x566   :  { %12718 = vmatmul.mubr.f32.gmra.mrb[66].mxu1 %v10487_v7 }
 0x567   :  { %14299 = vmatpush3.bf16.msra.mxu1 %v18051_v20  ;;  %v2631_v6 = vpop.f32.mrb[40].mxu0  ;;  %12720 = vmatprep.mubr.f32.mxu1 %v10488_v5  ;;  %v10491_v20 = vld [vmem:[%s20023_s13 + $0x778] sm:$0xff]  ;;  %v10504_v5 = vld [vmem:[%s20023_s13 + $0x7e0] sm:$0xff] }
 0x568   :  { %14301 = vmatprep.subr.bf16.mxu1 %v18081_v29  ;;  %v2633_v1 = vpop.f32.mrb[41].mxu0 }
 0x56a   :  { %12721 = vmatmul.mubr.f32.gmra.mrb[68].mxu1 %v10489_v42  ;;  %v10505_v42 = vld [vmem:[%s20023_s13 + $0x7e8] sm:$0xff] }
 0x56b   :  { %14303 = vmatpush3.bf16.msra.mxu1 %v18081_v29  ;;  %v2637_v44 = vpop.f32.mrb[42].mxu0  ;;  %12723 = vmatprep.mubr.f32.mxu1 %v10490_v62  ;;  %v10506_v62 = vld [vmem:[%s20023_s13 + $0x7f0] sm:$0xff] }
 0x56c   :  { %14305 = vmatprep.subr.bf16.mxu1 %v18107_v25  ;;  %v18347_v59 = vpack.c.bf16 %v2637_v44, %v2631_v6  ;;  %v2639_v16 = vpop.f32.mrb[43].mxu0 }
 0x56d   :  { %v18352_v19 = vpack.c.bf16 %v2639_v16, %v2633_v1 }
 0x56e   :  { %12724 = vmatmul.mubr.f32.gmra.mrb[70].mxu1 %v10491_v20 }
 0x56f   :  { %14307 = vmatpush3.bf16.msra.mxu1 %v18107_v25  ;;  %v2643_v29 = vpop.f32.mrb[44].mxu0  ;;  %12758 = vmatprep.mubr.f32.mxu1 %v10492_v61  ;;  %v10495_v25 = vld [vmem:[%s20023_s13 + $0x798] sm:$0xff]  ;;  %v10508_v61 = vld [vmem:[%s20023_s13 + $0x800] sm:$0xff] }
 0x570   :  { %14309 = vmatprep.subr.bf16.mxu1 %v18126_v47  ;;  %v2645_v33 = vpop.f32.mrb[45].mxu0 }
 0x572   :  { %12759 = vmatmul.mubr.f32.vlgmr.msra.gmra.mrb[56].mxu1 %v10493_v38  ;;  %v10509_v38 = vld [vmem:[%s20023_s13 + $0x808] sm:$0xff] }
 0x573   :  { %14311 = vmatpush3.bf16.msra.mxu1 %v18126_v47  ;;  %v2649_v41 = vpop.f32.mrb[46].mxu0  ;;  %12761 = vmatprep.mubr.f32.mxu1 %v10494_v58  ;;  %v10510_v58 = vld [vmem:[%s20023_s13 + $0x810] sm:$0xff] }
 0x574   :  { %14313 = vmatprep.subr.bf16.mxu1 %v18152_v11  ;;  %v18367_v9 = vpack.c.bf16 %v2649_v41, %v2643_v29  ;;  %v2651_v50 = vpop.f32.mrb[47].mxu0  ;;  %v8270_v41 = vld [vmem:[%s20030_s20 + $0x20] sm:$0xff] }
 0x575   :  { %v18372_v30 = vpack.c.bf16 %v2651_v50, %v2645_v33 }
 0x576   :  { %12762 = vmatmul.mubr.f32.gmra.mrb[58].mxu1 %v10495_v25 }
 0x577   :  { %14315 = vmatpush3.bf16.msra.mxu1 %v18152_v11  ;;  %v2655_v47 = vpop.f32.mrb[48].mxu0  ;;  %12764 = vmatprep.mubr.f32.mxu1 %v10496_v34  ;;  %v10499_v11 = vld [vmem:[%s20023_s13 + $0x7b8] sm:$0xff] }
 0x578   :  { %14317 = vmatprep.subr.bf16.mxu1 %v18178_v22  ;;  %v2657_v40 = vpop.f32.mrb[49].mxu0  ;;  %v10511_v34 = vld [vmem:[%s20023_s13 + $0x818] sm:$0xff] }
 0x57a   :  { %12765 = vmatmul.mubr.f32.gmra.mrb[60].mxu1 %v10497_v10 }
 0x57b   :  { %14319 = vmatpush3.bf16.msra.mxu1 %v18178_v22  ;;  %v2661_v60 = vpop.f32.mrb[50].mxu0  ;;  %12767 = vmatprep.mubr.f32.mxu1 %v10498_v52 }
 0x57c   :  { %14321 = vmatprep.subr.bf16.mxu1 %v18204_v45  ;;  %v18387_v31 = vpack.c.bf16 %v2661_v60, %v2655_v47  ;;  %v2663_v12 = vpop.f32.mrb[51].mxu0 }
 0x57d   :  { %v18392_v8 = vpack.c.bf16 %v2663_v12, %v2657_v40  ;;  %v10512_v40 = vld [vmem:[%s20023_s13 + $0x820] sm:$0xff] }
 0x57e   :  { %12768 = vmatmul.mubr.f32.gmra.mrb[62].mxu1 %v10499_v11  ;;  %v10513_v11 = vld [vmem:[%s20023_s13 + $0x828] sm:$0xff] }
 0x57f   :  { %14323 = vmatpush3.bf16.msra.mxu1 %v18204_v45  ;;  %v2667_v22 = vpop.f32.mrb[52].mxu0  ;;  %12770 = vmatprep.mubr.f32.mxu1 %v10500_v36  ;;  %v10503_v45 = vld [vmem:[%s20023_s13 + $0x7d8] sm:$0xff]  ;;  %v10514_v36 = vld [vmem:[%s20023_s13 + $0x830] sm:$0xff] }
 0x580   :  { %14325 = vmatprep.subr.bf16.mxu1 %v18230_v43  ;;  %v2669_v14 = vpop.f32.mrb[53].mxu0 }
 0x582   :  { %12771 = vmatmul.mubr.f32.gmra.mrb[64].mxu1 %v10501_v35  ;;  %v10515_v35 = vld [vmem:[%s20023_s13 + $0x838] sm:$0xff] }
 0x583   :  { %14327 = vmatpush3.bf16.msra.mxu1 %v18230_v43  ;;  %v2673_v0 = vpop.f32.mrb[54].mxu0  ;;  %12773 = vmatprep.mubr.f32.mxu1 %v10502_v46 }
 0x584   :  { %14329 = vmatprep.subr.bf16.mxu1 %v18260_v32  ;;  %v18407_v7 = vpack.c.bf16 %v2673_v0, %v2667_v22  ;;  %v2675_v37 = vpop.f32.mrb[55].mxu0  ;;  %v10516_v0 = vld [vmem:[%s20023_s13 + $0x840] sm:$0xff] }
 0x585   :  { %v18412_v6 = vpack.c.bf16 %v2675_v37, %v2669_v14 }
 0x586   :  { %12774 = vmatmul.mubr.f32.gmra.mrb[66].mxu1 %v10503_v45 }
 0x587   :  { %14331 = vmatpush3.bf16.msra.mxu1 %v18260_v32  ;;  %v2679_v43 = vpop.f32.mrb[56].mxu0  ;;  %12776 = vmatprep.mubr.f32.mxu1 %v10504_v5  ;;  %v10507_v32 = vld [vmem:[%s20023_s13 + $0x7f8] sm:$0xff]  ;;  %v10517_v5 = vld [vmem:[%s20023_s13 + $0x848] sm:$0xff] }
 0x588   :  { %14333 = vmatprep.subr.bf16.mxu1 %v18292_v15  ;;  %v2681_v1 = vpop.f32.mrb[57].mxu0 }
 0x58a   :  { %12777 = vmatmul.mubr.f32.gmra.mrb[68].mxu1 %v10505_v42  ;;  %v10518_v42 = vld [vmem:[%s20023_s13 + $0x850] sm:$0xff] }
 0x58b   :  { %14335 = vmatpush3.bf16.msra.mxu1 %v18292_v15  ;;  %v2685_v44 = vpop.f32.mrb[58].mxu0  ;;  %12779 = vmatprep.mubr.f32.mxu1 %v10506_v62  ;;  %v8262_v62 = vld [vmem:[%s20030_s20 + $0x8] sm:$0xff] }
 0x58c   :  { %14337 = vmatprep.subr.bf16.mxu1 %v18324_v28  ;;  %v18427_v20 = vpack.c.bf16 %v2685_v44, %v2679_v43  ;;  %v2687_v16 = vpop.f32.mrb[59].mxu0 }
 0x58d   :  { %v18432_v29 = vpack.c.bf16 %v2687_v16, %v2681_v1  ;;  %v8261_v1 = vld [vmem:[%s20030_s20] sm:$0xff]  ;;  %v10519_v16 = vld [vmem:[%s20023_s13 + $0x858] sm:$0xff] }
 0x58e   :  { %12780 = vmatmul.mubr.f32.gmra.mrb[70].mxu1 %v10507_v32  ;;  %v14667_v44 = vpack.c.bf16 %v8262_v62, %v8261_v1 }
 0x58f   :  { %14339 = vmatpush3.bf16.msra.mxu1 %v18324_v28  ;;  %v2691_v15 = vpop.f32.mrb[60].mxu0  ;;  %12814 = vmatprep.mubr.f32.mxu1 %v10508_v61  ;;  %v8271_v28 = vld [vmem:[%s20030_s20 + $0x28] sm:$0xff] }
 0x590   :  { %14341 = vmatprep.subr.bf16.mxu1 %v18133_v24  ;;  %v2693_v33 = vpop.f32.mrb[61].mxu0  ;;  %v14664_v25 = vpack.c.bf16 %v8271_v28, %v8270_v41  ;;  %v8269_v41 = vld [vmem:[%s20098_s8 + $0x20] sm:$0xff] }
 0x592   :  { %12815 = vmatmul.mubr.f32.vlgmr.msra.gmra.mrb[56].mxu1 %v10509_v38  ;;  %14665 = vmatpush3.bf16.msra.mxu0 %v14664_v25  ;;  %v10520_v38 = vld [vmem:[%s20023_s13 + $0x860] sm:$0xff] }
 0x593   :  { %14343 = vmatpush3.bf16.msra.mxu1 %v18133_v24  ;;  %v2697_v50 = vpop.f32.mrb[62].mxu0  ;;  %12817 = vmatprep.mubr.f32.mxu1 %v10510_v58  ;;  %v8265_v24 = vld [vmem:[%s20098_s8] sm:$0xff] }
 0x594   :  { %14345 = vmatprep.subr.bf16.mxu1 %v18159_v53  ;;  %v18453_v47 = vpack.c.bf16 %v2697_v50, %v2691_v15  ;;  %v2699_v10 = vpop.f32.mrb[63].mxu0  ;;  %14666 = vmatprep.subr.bf16.mxu0 %v20095_v21  ;;  %v10521_v50 = vld [vmem:[%s20023_s13 + $0x868] sm:$0xff] }
 0x595   :  { %v18458_v52 = vpack.c.bf16 %v2699_v10, %v2693_v33  ;;  %13422 = vmatmul.mubr.msk.f32.vlgmr.msra.gmra.mrb[146].mxu0 %vm200_vm2, %v8265_v24  ;;  %v8264_v33 = vld [vmem:[%s20030_s20 + $0x18] sm:$0xff]  ;;  %v10522_v10 = vld [vmem:[%s20023_s13 + $0x870] sm:$0xff] }
 0x596   :  { %12818 = vmatmul.mubr.f32.gmra.mrb[58].mxu1 %v10511_v34  ;;  %13424 = vmatprep.mubr.msk.f32.mxu0 %vm15365_vm1, %v15366_v63 }
 0x597   :  { %14347 = vmatpush3.bf16.msra.mxu1 %v18159_v53  ;;  %v2703_v60 = vpop.f32.mrb[64].mxu0  ;;  %12820 = vmatprep.mubr.f32.mxu1 %v10512_v40  ;;  %v8266_v53 = vld [vmem:[%s20098_s8 + $0x8] sm:$0xff]  ;;  %v10523_v40 = vld [vmem:[%s20023_s13 + $0x878] sm:$0xff] }
 0x598   :  { %14349 = vmatprep.subr.bf16.mxu1 %v18185_v54  ;;  %v2705_v12 = vpop.f32.mrb[65].mxu0  ;;  %14668 = vmatpush3.bf16.msra.mxu0 %v14667_v44  ;;  %v10532_v44 = vld [vmem:[%s20023_s13 + $0x8c0] sm:$0xff] }
 0x599   :  { %13425 = vmatmul.mubr.msk.f32.gmra.mrb[148].mxu0 %vm200_vm2, %v8266_v53  ;;  %14669 = vmatprep.subr.bf16.mxu0 %v20095_v21 }
 0x59a   :  { %12821 = vmatmul.mubr.f32.gmra.mrb[60].mxu1 %v10513_v11  ;;  %13427 = vmatprep.mubr.msk.f32.mxu0 %vm15365_vm1, %v15366_v63  ;;  %v10524_v11 = vld [vmem:[%s20023_s13 + $0x880] sm:$0xff] }
 0x59b   :  { %14351 = vmatpush3.bf16.msra.mxu1 %v18185_v54  ;;  %v2709_v22 = vpop.f32.mrb[66].mxu0  ;;  %12823 = vmatprep.mubr.f32.mxu1 %v10514_v36  ;;  %v8267_v54 = vld [vmem:[%s20098_s8 + $0x10] sm:$0xff]  ;;  %v10525_v36 = vld [vmem:[%s20023_s13 + $0x888] sm:$0xff] }
 0x59c   :  { %14353 = vmatprep.subr.bf16.mxu1 %v18211_v4  ;;  %v18483_v14 = vpack.c.bf16 %v2709_v22, %v2703_v60  ;;  %v2711_v46 = vpop.f32.mrb[67].mxu0  ;;  %v10526_v22 = vld [vmem:[%s20023_s13 + $0x890] sm:$0xff] }
 0x59d   :  { %v18489_v45 = vpack.c.bf16 %v2711_v46, %v2705_v12  ;;  %13428 = vmatmul.mubr.msk.f32.gmra.mrb[150].mxu0 %vm200_vm2, %v8267_v54  ;;  %v10528_v54 = vld [vmem:[%s20023_s13 + $0x8a0] sm:$0xff] }
 0x59e   :  { %12824 = vmatmul.mubr.f32.gmra.mrb[62].mxu1 %v10515_v35  ;;  %13430 = vmatprep.mubr.msk.f32.mxu0 %vm15365_vm1, %v15366_v63 }
 0x59f   :  { %14355 = vmatpush3.bf16.msra.mxu1 %v18211_v4  ;;  %v2715_v37 = vpop.f32.mrb[68].mxu0  ;;  %12826 = vmatprep.mubr.f32.mxu1 %v10516_v0  ;;  %v8268_v4 = vld [vmem:[%s20098_s8 + $0x18] sm:$0xff] }
 0x5a0   :  { %14357 = vmatprep.subr.bf16.mxu1 %v18237_v56  ;;  %v2717_v43 = vpop.f32.mrb[69].mxu0 }
 0x5a1   :  { %13431 = vmatmul.mubr.msk.f32.gmra.mrb[152].mxu0 %vm200_vm2, %v8268_v4 }
 0x5a2   :  { %12827 = vmatmul.mubr.f32.gmra.mrb[64].mxu1 %v10517_v5  ;;  %13433 = vmatprep.mubr.msk.f32.mxu0 %vm15365_vm1, %v15366_v63  ;;  %v10529_v5 = vld [vmem:[%s20023_s13 + $0x8a8] sm:$0xff] }
 0x5a3   :  { %14359 = vmatpush3.bf16.msra.mxu1 %v18237_v56  ;;  %v2721_v32 = vpop.f32.mrb[70].mxu0  ;;  %12829 = vmatprep.mubr.f32.mxu1 %v10518_v42  ;;  %v8263_v56 = vld [vmem:[%s20030_s20 + $0x10] sm:$0xff] }
 0x5a4   :  { %14361 = vmatprep.subr.bf16.mxu1 %v18266_v55  ;;  %v18521_v61 = vpack.c.bf16 %v2721_v32, %v2715_v37  ;;  %v2723_v15 = vpop.f32.mrb[71].mxu0  ;;  %v14670_v28 = vpack.c.bf16 %v8264_v33, %v8263_v56  ;;  %v10530_v42 = vld [vmem:[%s20023_s13 + $0x8b0] sm:$0xff] }
 0x5a5   :  { %v18533_v58 = vpack.c.bf16 %v2723_v15, %v2717_v43  ;;  %13434 = vmatmul.mubr.msk.f32.gmra.mrb[154].mxu0 %vm200_vm2, %v8269_v41 }
 0x5a6   :  { %12830 = vmatmul.mubr.f32.gmra.mrb[66].mxu1 %v10519_v16  ;;  %14671 = vmatpush3.bf16.msra.mxu0 %v14670_v28  ;;  %v10533_v16 = vld [vmem:[%s20023_s13 + $0x8c8] sm:$0xff]  ;;  %v10536_v28 = vld [vmem:[%s20023_s13 + $0x8e0] sm:$0xff] }
 0x5a7   :  { %14363 = vmatpush3.bf16.msra.mxu1 %v18266_v55  ;;  %v2792_v25 = vpop.f32.mrb[72].mxu0  ;;  %12832 = vmatprep.mubr.f32.mxu1 %v10520_v38  ;;  %v10534_v38 = vld [vmem:[%s20023_s13 + $0x8d0] sm:$0xff] }
 0x5a8   :  { %14365 = vmatprep.subr.bf16.mxu1 %v18298_v48  ;;  %v2794_v34 = vpop.f32.mrb[73].mxu0  ;;  %13444 = vmatprep.mubr.msk.f32.mxu0 %vm15365_vm1, %v15366_v63 }
 0x5aa   :  { %12833 = vmatmul.mubr.f32.gmra.mrb[68].mxu1 %v10521_v50  ;;  %v10537_v50 = vld [vmem:[%s20023_s13 + $0x8e8] sm:$0xff] }
 0x5ab   :  { %14367 = vmatpush3.bf16.msra.mxu1 %v18298_v48  ;;  %v2798_v55 = vpop.f32.mrb[74].mxu0  ;;  %12835 = vmatprep.mubr.f32.mxu1 %v10522_v10  ;;  %v10538_v10 = vld [vmem:[%s20023_s13 + $0x8f0] sm:$0xff] }
 0x5ac   :  { %14369 = vmatprep.subr.bf16.mxu1 %v18330_v2  ;;  %v18557_v24 = vpack.c.bf16 %v2798_v55, %v2792_v25  ;;  %v2800_v60 = vpop.f32.mrb[75].mxu0 }
 0x5ad   :  { %v18562_v12 = vpack.c.bf16 %v2800_v60, %v2794_v34 }
 0x5ae   :  { %12836 = vmatmul.mubr.f32.gmra.mrb[70].mxu1 %v10523_v40 }
 0x5af   :  { %14371 = vmatpush3.bf16.msra.mxu1 %v18330_v2  ;;  %v2804_v48 = vpop.f32.mrb[76].mxu0  ;;  %12870 = vmatprep.mubr.f32.mxu1 %v10524_v11  ;;  %v10527_v2 = vld [vmem:[%s20023_s13 + $0x898] sm:$0xff]  ;;  %v10540_v11 = vld [vmem:[%s20023_s13 + $0x900] sm:$0xff] }
 0x5b0   :  { %14373 = vmatprep.subr.bf16.mxu1 %v18347_v59  ;;  %v2806_v53 = vpop.f32.mrb[77].mxu0 }
 0x5b2   :  { %12871 = vmatmul.mubr.f32.vlgmr.msra.gmra.mrb[56].mxu1 %v10525_v36  ;;  %v10541_v36 = vld [vmem:[%s20023_s13 + $0x908] sm:$0xff] }
 0x5b3   :  { %14375 = vmatpush3.bf16.msra.mxu1 %v18347_v59  ;;  %v2810_v35 = vpop.f32.mrb[78].mxu0  ;;  %12873 = vmatprep.mubr.f32.mxu1 %v10526_v22  ;;  %v10542_v22 = vld [vmem:[%s20023_s13 + $0x910] sm:$0xff] }
 0x5b4   :  { %14377 = vmatprep.subr.bf16.mxu1 %v18367_v9  ;;  %v18577_v46 = vpack.c.bf16 %v2810_v35, %v2804_v48  ;;  %v2812_v0 = vpop.f32.mrb[79].mxu0 }
 0x5b5   :  { %v18582_v37 = vpack.c.bf16 %v2812_v0, %v2806_v53 }
 0x5b6   :  { %12874 = vmatmul.mubr.f32.gmra.mrb[58].mxu1 %v10527_v2 }
 0x5b7   :  { %14379 = vmatpush3.bf16.msra.mxu1 %v18367_v9  ;;  %v2816_v59 = vpop.f32.mrb[80].mxu0  ;;  %12876 = vmatprep.mubr.f32.mxu1 %v10528_v54  ;;  %v10531_v9 = vld [vmem:[%s20023_s13 + $0x8b8] sm:$0xff]  ;;  %v10544_v54 = vld [vmem:[%s20023_s13 + $0x920] sm:$0xff] }
 0x5b8   :  { %14381 = vmatprep.subr.bf16.mxu1 %v18387_v31  ;;  %v2818_v43 = vpop.f32.mrb[81].mxu0 }
 0x5ba   :  { %12877 = vmatmul.mubr.f32.gmra.mrb[60].mxu1 %v10529_v5  ;;  %v10545_v5 = vld [vmem:[%s20023_s13 + $0x928] sm:$0xff] }
 0x5bb   :  { %14383 = vmatpush3.bf16.msra.mxu1 %v18387_v31  ;;  %v2822_v4 = vpop.f32.mrb[82].mxu0  ;;  %12879 = vmatprep.mubr.f32.mxu1 %v10530_v42  ;;  %v10546_v42 = vld [vmem:[%s20023_s13 + $0x930] sm:$0xff] }
 0x5bc   :  { %14385 = vmatprep.subr.bf16.mxu1 %v18407_v7  ;;  %v18597_v1 = vpack.c.bf16 %v2822_v4, %v2816_v59  ;;  %v2824_v62 = vpop.f32.mrb[83].mxu0 }
 0x5bd   :  { %v18602_v32 = vpack.c.bf16 %v2824_v62, %v2818_v43 }
 0x5be   :  { %12880 = vmatmul.mubr.f32.gmra.mrb[62].mxu1 %v10531_v9 }
 0x5bf   :  { %14387 = vmatpush3.bf16.msra.mxu1 %v18407_v7  ;;  %v2828_v31 = vpop.f32.mrb[84].mxu0  ;;  %12882 = vmatprep.mubr.f32.mxu1 %v10532_v44  ;;  %v10535_v7 = vld [vmem:[%s20023_s13 + $0x8d8] sm:$0xff]  ;;  %v10548_v44 = vld [vmem:[%s20023_s13 + $0x940] sm:$0xff] }
 0x5c0   :  { %14389 = vmatprep.subr.bf16.mxu1 %v18427_v20  ;;  %v2830_v15 = vpop.f32.mrb[85].mxu0 }
 0x5c2   :  { %12883 = vmatmul.mubr.f32.gmra.mrb[64].mxu1 %v10533_v16  ;;  %v10549_v16 = vld [vmem:[%s20023_s13 + $0x948] sm:$0xff] }
 0x5c3   :  { %14391 = vmatpush3.bf16.msra.mxu1 %v18427_v20  ;;  %v2834_v56 = vpop.f32.mrb[86].mxu0  ;;  %12885 = vmatprep.mubr.f32.mxu1 %v10534_v38  ;;  %v10550_v38 = vld [vmem:[%s20023_s13 + $0x950] sm:$0xff] }
 0x5c4   :  { %14393 = vmatprep.subr.bf16.mxu1 %v18453_v47  ;;  %v18617_v33 = vpack.c.bf16 %v2834_v56, %v2828_v31  ;;  %v2836_v41 = vpop.f32.mrb[87].mxu0 }
 0x5c5   :  { %v18622_v25 = vpack.c.bf16 %v2836_v41, %v2830_v15 }
 0x5c6   :  { %12886 = vmatmul.mubr.f32.gmra.mrb[66].mxu1 %v10535_v7 }
 0x5c7   :  { %14395 = vmatpush3.bf16.msra.mxu1 %v18453_v47  ;;  %v2840_v20 = vpop.f32.mrb[88].mxu0  ;;  %12888 = vmatprep.mubr.f32.mxu1 %v10536_v28  ;;  %v10539_v47 = vld [vmem:[%s20023_s13 + $0x8f8] sm:$0xff]  ;;  %v10552_v28 = vld [vmem:[%s20023_s13 + $0x960] sm:$0xff] }
 0x5c8   :  { %14397 = vmatprep.subr.bf16.mxu1 %v18483_v14  ;;  %v2842_v34 = vpop.f32.mrb[89].mxu0 }
 0x5ca   :  { %12889 = vmatmul.mubr.f32.gmra.mrb[68].mxu1 %v10537_v50  ;;  %v10553_v50 = vld [vmem:[%s20023_s13 + $0x968] sm:$0xff] }
 0x5cb   :  { %14399 = vmatpush3.bf16.msra.mxu1 %v18483_v14  ;;  %v2846_v55 = vpop.f32.mrb[90].mxu0  ;;  %12891 = vmatprep.mubr.f32.mxu1 %v10538_v10  ;;  %v10554_v10 = vld [vmem:[%s20023_s13 + $0x970] sm:$0xff] }
 0x5cc   :  { %14401 = vmatprep.subr.bf16.mxu1 %v18521_v61  ;;  %v18637_v40 = vpack.c.bf16 %v2846_v55, %v2840_v20  ;;  %v2848_v60 = vpop.f32.mrb[91].mxu0 }
 0x5cd   :  { %v18642_v48 = vpack.c.bf16 %v2848_v60, %v2842_v34 }
 0x5ce   :  { %12892 = vmatmul.mubr.f32.gmra.mrb[70].mxu1 %v10539_v47 }
 0x5cf   :  { %14403 = vmatpush3.bf16.msra.mxu1 %v18521_v61  ;;  %v2852_v14 = vpop.f32.mrb[92].mxu0  ;;  %12926 = vmatprep.mubr.f32.mxu1 %v10540_v11  ;;  %v10543_v61 = vld [vmem:[%s20023_s13 + $0x918] sm:$0xff]  ;;  %v10556_v11 = vld [vmem:[%s20023_s13 + $0x980] sm:$0xff] }
 0x5d0   :  { %14405 = vmatprep.subr.bf16.mxu1 %v18352_v19  ;;  %v2854_v53 = vpop.f32.mrb[93].mxu0 }
 0x5d2   :  { %12927 = vmatmul.mubr.f32.vlgmr.msra.gmra.mrb[56].mxu1 %v10541_v36  ;;  %v10557_v36 = vld [vmem:[%s20023_s13 + $0x988] sm:$0xff] }
 0x5d3   :  { %14407 = vmatpush3.bf16.msra.mxu1 %v18352_v19  ;;  %v2858_v35 = vpop.f32.mrb[94].mxu0  ;;  %12929 = vmatprep.mubr.f32.mxu1 %v10542_v22  ;;  %v10558_v22 = vld [vmem:[%s20023_s13 + $0x990] sm:$0xff] }
 0x5d4   :  { %14409 = vmatprep.subr.bf16.mxu1 %v18372_v30  ;;  %v18657_v2 = vpack.c.bf16 %v2858_v35, %v2852_v14  ;;  %v2860_v0 = vpop.f32.mrb[95].mxu0 }
 0x5d5   :  { %v18662_v59 = vpack.c.bf16 %v2860_v0, %v2854_v53 }
 0x5d6   :  { %12930 = vmatmul.mubr.f32.gmra.mrb[58].mxu1 %v10543_v61 }
 0x5d7   :  { %14411 = vmatpush3.bf16.msra.mxu1 %v18372_v30  ;;  %v2864_v19 = vpop.f32.mrb[96].mxu0  ;;  %12932 = vmatprep.mubr.f32.mxu1 %v10544_v54  ;;  %v10547_v30 = vld [vmem:[%s20023_s13 + $0x938] sm:$0xff]  ;;  %v10560_v54 = vld [vmem:[%s20023_s13 + $0x9a0] sm:$0xff] }
 0x5d8   :  { %14413 = vmatprep.subr.bf16.mxu1 %v18392_v8  ;;  %v2866_v43 = vpop.f32.mrb[97].mxu0 }
 0x5da   :  { %12933 = vmatmul.mubr.f32.gmra.mrb[60].mxu1 %v10545_v5  ;;  %v10561_v5 = vld [vmem:[%s20023_s13 + $0x9a8] sm:$0xff] }
 0x5db   :  { %14415 = vmatpush3.bf16.msra.mxu1 %v18392_v8  ;;  %v2870_v4 = vpop.f32.mrb[98].mxu0  ;;  %12935 = vmatprep.mubr.f32.mxu1 %v10546_v42  ;;  %v10562_v42 = vld [vmem:[%s20023_s13 + $0x9b0] sm:$0xff] }
 0x5dc   :  { %14417 = vmatprep.subr.bf16.mxu1 %v18412_v6  ;;  %v18677_v9 = vpack.c.bf16 %v2870_v4, %v2864_v19  ;;  %v2872_v62 = vpop.f32.mrb[99].mxu0 }
 0x5dd   :  { %v18682_v31 = vpack.c.bf16 %v2872_v62, %v2866_v43 }
 0x5de   :  { %12936 = vmatmul.mubr.f32.gmra.mrb[62].mxu1 %v10547_v30 }
 0x5df   :  { %14419 = vmatpush3.bf16.msra.mxu1 %v18412_v6  ;;  %v2876_v8 = vpop.f32.mrb[100].mxu0  ;;  %12938 = vmatprep.mubr.f32.mxu1 %v10548_v44  ;;  %v10551_v6 = vld [vmem:[%s20023_s13 + $0x958] sm:$0xff]  ;;  %v10564_v44 = vld [vmem:[%s20023_s13 + $0x9c0] sm:$0xff] }
 0x5e0   :  { %14421 = vmatprep.subr.bf16.mxu1 %v18432_v29  ;;  %v2878_v15 = vpop.f32.mrb[101].mxu0 }
 0x5e2   :  { %12939 = vmatmul.mubr.f32.gmra.mrb[64].mxu1 %v10549_v16  ;;  %v10565_v16 = vld [vmem:[%s20023_s13 + $0x9c8] sm:$0xff] }
 0x5e3   :  { %14423 = vmatpush3.bf16.msra.mxu1 %v18432_v29  ;;  %v2882_v56 = vpop.f32.mrb[102].mxu0  ;;  %12941 = vmatprep.mubr.f32.mxu1 %v10550_v38  ;;  %v10566_v38 = vld [vmem:[%s20023_s13 + $0x9d0] sm:$0xff] }
 0x5e4   :  { %14425 = vmatprep.subr.bf16.mxu1 %v18458_v52  ;;  %v18697_v7 = vpack.c.bf16 %v2882_v56, %v2876_v8  ;;  %v2884_v41 = vpop.f32.mrb[103].mxu0 }
 0x5e5   :  { %v18702_v20 = vpack.c.bf16 %v2884_v41, %v2878_v15 }
 0x5e6   :  { %12942 = vmatmul.mubr.f32.gmra.mrb[66].mxu1 %v10551_v6 }
 0x5e7   :  { %14427 = vmatpush3.bf16.msra.mxu1 %v18458_v52  ;;  %v3114_v29 = vpop.f32.mrb[104].mxu0  ;;  %12944 = vmatprep.mubr.f32.mxu1 %v10552_v28  ;;  %v10555_v52 = vld [vmem:[%s20023_s13 + $0x978] sm:$0xff]  ;;  %v10568_v28 = vld [vmem:[%s20023_s13 + $0x9e0] sm:$0xff] }
 0x5e8   :  { %14429 = vmatprep.subr.bf16.mxu1 %v18489_v45  ;;  %v3116_v34 = vpop.f32.mrb[105].mxu0 }
 0x5ea   :  { %12945 = vmatmul.mubr.f32.gmra.mrb[68].mxu1 %v10553_v50  ;;  %v10569_v50 = vld [vmem:[%s20023_s13 + $0x9e8] sm:$0xff] }
 0x5eb   :  { %14431 = vmatpush3.bf16.msra.mxu1 %v18489_v45  ;;  %v3120_v55 = vpop.f32.mrb[106].mxu0  ;;  %12947 = vmatprep.mubr.f32.mxu1 %v10554_v10  ;;  %v10570_v10 = vld [vmem:[%s20023_s13 + $0x9f0] sm:$0xff] }
 0x5ec   :  { %14433 = vmatprep.subr.bf16.mxu1 %v18533_v58  ;;  %v18717_v47 = vpack.c.bf16 %v3120_v55, %v3114_v29  ;;  %v3122_v60 = vpop.f32.mrb[107].mxu0 }
 0x5ed   :  { %v18722_v14 = vpack.c.bf16 %v3122_v60, %v3116_v34 }
 0x5ee   :  { %12948 = vmatmul.mubr.f32.gmra.mrb[70].mxu1 %v10555_v52 }
 0x5ef   :  { %14435 = vmatpush3.bf16.msra.mxu1 %v18533_v58  ;;  %v3126_v45 = vpop.f32.mrb[108].mxu0  ;;  %12982 = vmatprep.mubr.f32.mxu1 %v10556_v11  ;;  %v10559_v58 = vld [vmem:[%s20023_s13 + $0x998] sm:$0xff]  ;;  %v10572_v11 = vld [vmem:[%s20023_s13 + $0xa00] sm:$0xff] }
 0x5f0   :  { %14437 = vmatprep.subr.bf16.mxu1 %v18557_v24  ;;  %v3128_v53 = vpop.f32.mrb[109].mxu0 }
 0x5f2   :  { %12983 = vmatmul.mubr.f32.vlgmr.msra.gmra.mrb[56].mxu1 %v10557_v36  ;;  %v10573_v36 = vld [vmem:[%s20023_s13 + $0xa08] sm:$0xff] }
 0x5f3   :  { %14439 = vmatpush3.bf16.msra.mxu1 %v18557_v24  ;;  %v3132_v35 = vpop.f32.mrb[110].mxu0  ;;  %12985 = vmatprep.mubr.f32.mxu1 %v10558_v22  ;;  %v10574_v22 = vld [vmem:[%s20023_s13 + $0xa10] sm:$0xff] }
 0x5f4   :  { %14441 = vmatprep.subr.bf16.mxu1 %v18577_v46  ;;  %v18737_v61 = vpack.c.bf16 %v3132_v35, %v3126_v45  ;;  %v3134_v0 = vpop.f32.mrb[111].mxu0 }
 0x5f5   :  { %v18742_v19 = vpack.c.bf16 %v3134_v0, %v3128_v53 }
 0x5f6   :  { %12986 = vmatmul.mubr.f32.gmra.mrb[58].mxu1 %v10559_v58 }
 0x5f7   :  { %14443 = vmatpush3.bf16.msra.mxu1 %v18577_v46  ;;  %v3138_v24 = vpop.f32.mrb[112].mxu0  ;;  %12988 = vmatprep.mubr.f32.mxu1 %v10560_v54  ;;  %v10563_v46 = vld [vmem:[%s20023_s13 + $0x9b8] sm:$0xff]  ;;  %v10576_v54 = vld [vmem:[%s20023_s13 + $0xa20] sm:$0xff] }
 0x5f8   :  { %14445 = vmatprep.subr.bf16.mxu1 %v18597_v1  ;;  %v3140_v43 = vpop.f32.mrb[113].mxu0 }
 0x5fa   :  { %12989 = vmatmul.mubr.f32.gmra.mrb[60].mxu1 %v10561_v5  ;;  %v10577_v5 = vld [vmem:[%s20023_s13 + $0xa28] sm:$0xff] }
 0x5fb   :  { %14447 = vmatpush3.bf16.msra.mxu1 %v18597_v1  ;;  %v3144_v4 = vpop.f32.mrb[114].mxu0  ;;  %12991 = vmatprep.mubr.f32.mxu1 %v10562_v42  ;;  %v10578_v42 = vld [vmem:[%s20023_s13 + $0xa30] sm:$0xff] }
 0x5fc   :  { %14449 = vmatprep.subr.bf16.mxu1 %v18617_v33  ;;  %v18757_v30 = vpack.c.bf16 %v3144_v4, %v3138_v24  ;;  %v3146_v62 = vpop.f32.mrb[115].mxu0 }
 0x5fd   :  { %v18762_v8 = vpack.c.bf16 %v3146_v62, %v3140_v43 }
 0x5fe   :  { %12992 = vmatmul.mubr.f32.gmra.mrb[62].mxu1 %v10563_v46 }
 0x5ff   :  { %14451 = vmatpush3.bf16.msra.mxu1 %v18617_v33  ;;  %v3150_v1 = vpop.f32.mrb[116].mxu0  ;;  %12994 = vmatprep.mubr.f32.mxu1 %v10564_v44  ;;  %v10567_v33 = vld [vmem:[%s20023_s13 + $0x9d8] sm:$0xff]  ;;  %v10580_v44 = vld [vmem:[%s20023_s13 + $0xa40] sm:$0xff] }
 0x600   :  { %14453 = vmatprep.subr.bf16.mxu1 %v18637_v40  ;;  %v3152_v15 = vpop.f32.mrb[117].mxu0 }
 0x602   :  { %12995 = vmatmul.mubr.f32.gmra.mrb[64].mxu1 %v10565_v16  ;;  %v10581_v16 = vld [vmem:[%s20023_s13 + $0xa48] sm:$0xff] }
 0x603   :  { %14455 = vmatpush3.bf16.msra.mxu1 %v18637_v40  ;;  %v3156_v56 = vpop.f32.mrb[118].mxu0  ;;  %12997 = vmatprep.mubr.f32.mxu1 %v10566_v38  ;;  %v10582_v38 = vld [vmem:[%s20023_s13 + $0xa50] sm:$0xff] }
 0x604   :  { %14457 = vmatprep.subr.bf16.mxu1 %v18657_v2  ;;  %v18777_v6 = vpack.c.bf16 %v3156_v56, %v3150_v1  ;;  %v3158_v41 = vpop.f32.mrb[119].mxu0 }
 0x605   :  { %v18782_v29 = vpack.c.bf16 %v3158_v41, %v3152_v15 }
 0x606   :  { %12998 = vmatmul.mubr.f32.gmra.mrb[66].mxu1 %v10567_v33 }
 0x607   :  { %14459 = vmatpush3.bf16.msra.mxu1 %v18657_v2  ;;  %v3162_v40 = vpop.f32.mrb[120].mxu0  ;;  %13000 = vmatprep.mubr.f32.mxu1 %v10568_v28  ;;  %v10571_v2 = vld [vmem:[%s20023_s13 + $0x9f8] sm:$0xff]  ;;  %v10584_v28 = vld [vmem:[%s20023_s13 + $0xa60] sm:$0xff] }
 0x608   :  { %14461 = vmatprep.subr.bf16.mxu1 %v18677_v9  ;;  %v3164_v34 = vpop.f32.mrb[121].mxu0 }
 0x60a   :  { %13001 = vmatmul.mubr.f32.gmra.mrb[68].mxu1 %v10569_v50  ;;  %v10585_v50 = vld [vmem:[%s20023_s13 + $0xa68] sm:$0xff] }
 0x60b   :  { %14463 = vmatpush3.bf16.msra.mxu1 %v18677_v9  ;;  %v3168_v55 = vpop.f32.mrb[122].mxu0  ;;  %13003 = vmatprep.mubr.f32.mxu1 %v10570_v10  ;;  %v10586_v10 = vld [vmem:[%s20023_s13 + $0xa70] sm:$0xff] }
 0x60c   :  { %14465 = vmatprep.subr.bf16.mxu1 %v18697_v7  ;;  %v18797_v52 = vpack.c.bf16 %v3168_v55, %v3162_v40  ;;  %v3170_v60 = vpop.f32.mrb[123].mxu0  ;;  %v10587_v55 = vld [vmem:[%s20023_s13 + $0xa78] sm:$0xff] }
 0x60d   :  { %v18802_v45 = vpack.c.bf16 %v3170_v60, %v3164_v34  ;;  %v10588_v60 = vld [vmem:[%s20023_s13 + $0xa80] sm:$0xff] }
 0x60e   :  { %13004 = vmatmul.mubr.f32.gmra.mrb[70].mxu1 %v10571_v2 }
 0x60f   :  { %14467 = vmatpush3.bf16.msra.mxu1 %v18697_v7  ;;  %v3174_v9 = vpop.f32.mrb[124].mxu0  ;;  %13038 = vmatprep.mubr.f32.mxu1 %v10572_v11  ;;  %v10575_v7 = vld [vmem:[%s20023_s13 + $0xa18] sm:$0xff]  ;;  %v10589_v11 = vld [vmem:[%s20023_s13 + $0xa88] sm:$0xff] }
 0x610   :  { %14469 = vmatprep.subr.bf16.mxu1 %v18562_v12  ;;  %v3176_v53 = vpop.f32.mrb[125].mxu0 }
 0x612   :  { %13039 = vmatmul.mubr.f32.vlgmr.msra.gmra.mrb[56].mxu1 %v10573_v36  ;;  %v10590_v36 = vld [vmem:[%s20023_s13 + $0xa90] sm:$0xff] }
 0x613   :  { %14471 = vmatpush3.bf16.msra.mxu1 %v18562_v12  ;;  %v3180_v35 = vpop.f32.mrb[126].mxu0  ;;  %13041 = vmatprep.mubr.f32.mxu1 %v10574_v22  ;;  %v10592_v22 = vld [vmem:[%s20023_s13 + $0xaa0] sm:$0xff] }
 0x614   :  { %14473 = vmatprep.subr.bf16.mxu1 %v18582_v37  ;;  %v18817_v58 = vpack.c.bf16 %v3180_v35, %v3174_v9  ;;  %v3182_v0 = vpop.f32.mrb[127].mxu0 }
 0x615   :  { %v18822_v24 = vpack.c.bf16 %v3182_v0, %v3176_v53  ;;  %v10591_v53 = vld [vmem:[%s20023_s13 + $0xa98] sm:$0xff]  ;;  %v10594_v0 = vld [vmem:[%s20023_s13 + $0xab0] sm:$0xff] }
 0x616   :  { %13042 = vmatmul.mubr.f32.gmra.mrb[58].mxu1 %v10575_v7 }
 0x617   :  { %14475 = vmatpush3.bf16.msra.mxu1 %v18582_v37  ;;  %v3186_v12 = vpop.f32.mrb[128].mxu0  ;;  %13044 = vmatprep.mubr.f32.mxu1 %v10576_v54  ;;  %v10579_v37 = vld [vmem:[%s20023_s13 + $0xa38] sm:$0xff] }
 0x618   :  { %14477 = vmatprep.subr.bf16.mxu1 %v18602_v32  ;;  %v3188_v43 = vpop.f32.mrb[129].mxu0 }
 0x61a   :  { %13045 = vmatmul.mubr.f32.gmra.mrb[60].mxu1 %v10577_v5  ;;  %v10597_v5 = vld [vmem:[%s20023_s13 + $0xac8] sm:$0xff] }
 0x61b   :  { %14479 = vmatpush3.bf16.msra.mxu1 %v18602_v32  ;;  %v3192_v4 = vpop.f32.mrb[130].mxu0  ;;  %13047 = vmatprep.mubr.f32.mxu1 %v10578_v42  ;;  %v10601_v42 = vld [vmem:[%s20023_s13 + $0xae8] sm:$0xff] }
 0x61c   :  { %14481 = vmatprep.subr.bf16.mxu1 %v18622_v25  ;;  %v18837_v46 = vpack.c.bf16 %v3192_v4, %v3186_v12  ;;  %v3194_v62 = vpop.f32.mrb[131].mxu0  ;;  %v10596_v12 = vld [vmem:[%s20023_s13 + $0xac0] sm:$0xff]  ;;  %v10603_v4 = vld [vmem:[%s20023_s13 + $0xaf8] sm:$0xff] }
 0x61d   :  { %v18842_v1 = vpack.c.bf16 %v3194_v62, %v3188_v43  ;;  %v10599_v43 = vld [vmem:[%s20023_s13 + $0xad8] sm:$0xff] }
 0x61e   :  { %13048 = vmatmul.mubr.f32.gmra.mrb[62].mxu1 %v10579_v37  ;;  %v10605_v37 = vld [vmem:[%s20023_s13 + $0xb08] sm:$0xff]  ;;  %v10607_v62 = vld [vmem:[%s20023_s13 + $0xb18] sm:$0xff] }
 0x61f   :  { %14483 = vmatpush3.bf16.msra.mxu1 %v18622_v25  ;;  %v3198_v32 = vpop.f32.mrb[132].mxu0  ;;  %13050 = vmatprep.mubr.f32.mxu1 %v10580_v44  ;;  %v10583_v25 = vld [vmem:[%s20023_s13 + $0xa58] sm:$0xff]  ;;  %v10609_v44 = vld [vmem:[%s20023_s13 + $0xb28] sm:$0xff] }
 0x620   :  { %14485 = vmatprep.subr.bf16.mxu1 %v18642_v48  ;;  %v3200_v15 = vpop.f32.mrb[133].mxu0 }
 0x622   :  { %13051 = vmatmul.mubr.f32.gmra.mrb[64].mxu1 %v10581_v16  ;;  %v10611_v16 = vld [vmem:[%s20023_s13 + $0xb38] sm:$0xff] }
 0x623   :  { %14487 = vmatpush3.bf16.msra.mxu1 %v18642_v48  ;;  %v3204_v56 = vpop.f32.mrb[134].mxu0  ;;  %13053 = vmatprep.mubr.f32.mxu1 %v10582_v38  ;;  %v10613_v38 = vld [vmem:[%s20023_s13 + $0xb48] sm:$0xff] }
 0x624   :  { %14489 = vmatprep.subr.bf16.mxu1 %v18662_v59  ;;  %v18857_v33 = vpack.c.bf16 %v3204_v56, %v3198_v32  ;;  %v3206_v41 = vpop.f32.mrb[135].mxu0  ;;  %v10610_v32 = vld [vmem:[%s20023_s13 + $0xb30] sm:$0xff] }
 0x625   :  { %v18862_v40 = vpack.c.bf16 %v3206_v41, %v3200_v15  ;;  %v10612_v15 = vld [vmem:[%s20023_s13 + $0xb40] sm:$0xff]  ;;  %v20101_v56 = vld [vmem:[#allocation13_spill] sm:$0xff]  ;;  %v10615_v41 = vld [vmem:[%s20023_s13 + $0xb58] sm:$0xff] }
 0x626   :  { %13054 = vmatmul.mubr.f32.gmra.mrb[66].mxu1 %v10583_v25  ;;  %v10614_v25 = vld [vmem:[%s20023_s13 + $0xb50] sm:$0xff] }
 0x627   :  { %14491 = vmatpush3.bf16.msra.mxu1 %v18662_v59  ;;  %v8237_v48 = vpop.f32.mrb[136].mxu0  ;;  %13056 = vmatprep.mubr.f32.mxu1 %v10584_v28  ;;  %v20102_v28 = vld [vmem:[#allocation14_spill] sm:$0xff] }
 0x628   :  { %14493 = vmatprep.subr.bf16.mxu1 %v18682_v31  ;;  %13445 = vmatmul.mubr.msk.f32.vlgmr.msra.gmra.mrb[156].mxu0 %vm83_vm0, %v8237_v48  ;;  %v13404_v34 = vpop.f32.mrb[137].mxu0  ;;  %v10616_v48 = vld [vmem:[%s20023_s13 + $0xb60] sm:$0xff] }
 0x629   :  { %13447 = vmatprep.mubr.msk.f32.mxu0 %vm15365_vm1, %v15366_v63  ;;  %v20103_v34 = vld [vmem:[#allocation15_spill] sm:$0xff] }
 0x62a   :  { %13057 = vmatmul.mubr.f32.gmra.mrb[68].mxu1 %v10585_v50  ;;  %v10617_v50 = vld [vmem:[%s20023_s13 + $0xb68] sm:$0xff] }
 0x62b   :  { %14495 = vmatpush3.bf16.msra.mxu1 %v18682_v31  ;;  %v8242_v59 = vpop.f32.mrb[138].mxu0  ;;  %13059 = vmatprep.mubr.f32.mxu1 %v10586_v10  ;;  %v10618_v10 = vld [vmem:[%s20023_s13 + $0xb70] sm:$0xff] }
 0x62c   :  { %14497 = vmatprep.subr.bf16.mxu1 %v18702_v20  ;;  %13448 = vmatmul.mubr.msk.f32.gmra.mrb[158].mxu0 %vm83_vm0, %v8242_v59  ;;  %v13407_v2 = vpop.f32.mrb[139].mxu0  ;;  %v10619_v59 = vld [vmem:[%s20023_s13 + $0xb78] sm:$0xff] }
 0x62d   :  { %13450 = vmatprep.mubr.msk.f32.mxu0 %vm15365_vm1, %v15366_v63  ;;  %v10620_v2 = vld [vmem:[%s20023_s13 + $0xb80] sm:$0xff] }
 0x62e   :  { %13060 = vmatmul.mubr.f32.gmra.mrb[70].mxu1 %v10587_v55  ;;  %v20104_v55 = vld [vmem:[#allocation16_spill] sm:$0xff] }
 0x62f   :  { %14499 = vmatpush3.bf16.msra.mxu1 %v18702_v20  ;;  %v8247_v31 = vpop.f32.mrb[140].mxu0  ;;  %13094 = vmatprep.mubr.f32.mxu1 %v10588_v60 }
 0x630   :  { %14501 = vmatprep.subr.bf16.mxu1 %v17030_v17  ;;  %13451 = vmatmul.mubr.msk.f32.gmra.mrb[160].mxu0 %vm83_vm0, %v8247_v31  ;;  %v13410_v9 = vpop.f32.mrb[141].mxu0  ;;  %v10621_v31 = vld [vmem:[%s20023_s13 + $0xb88] sm:$0xff] }
 0x631   :  { %13453 = vmatprep.mubr.msk.f32.mxu0 %vm15365_vm1, %v15366_v63  ;;  %v10622_v9 = vld [vmem:[%s20023_s13 + $0xb90] sm:$0xff] }
 0x632   :  { %13095 = vmatmul.mubr.f32.vlgmr.msra.gmra.mrb[56].mxu1 %v10589_v11 }
 0x633   :  { %14503 = vmatpush3.bf16.msra.mxu1 %v17030_v17  ;;  %v8252_v20 = vpop.f32.mrb[142].mxu0  ;;  %13097 = vmatprep.mubr.f32.mxu1 %v10590_v36  ;;  %v10593_v17 = vld [vmem:[%s20023_s13 + $0xaa8] sm:$0xff] }
 0x634   :  { %14505 = vmatprep.subr.bf16.mxu1 %v17072_v26  ;;  %13454 = vmatmul.mubr.msk.f32.gmra.mrb[162].mxu0 %vm83_vm0, %v8252_v20  ;;  %v13413_v35 = vpop.f32.mrb[143].mxu0 }
 0x635   :  { %13456 = vmatprep.mubr.msk.f32.mxu0 %vm15365_vm1, %v15366_v63  ;;  %v10624_v35 = vld [vmem:[%s20023_s13 + $0xba0] sm:$0xff] }
 0x636   :  { %13098 = vmatmul.mubr.f32.gmra.mrb[58].mxu1 %v10591_v53  ;;  %v10623_v53 = vld [vmem:[%s20023_s13 + $0xb98] sm:$0xff] }
 0x637   :  { %14507 = vmatpush3.bf16.msra.mxu1 %v17072_v26  ;;  %13100 = vmatprep.mubr.f32.mxu1 %v10592_v22  ;;  %v8257_v7 = vpop.f32.mrb[144].mxu0  ;;  %v10595_v26 = vld [vmem:[%s20023_s13 + $0xab8] sm:$0xff] }
 0x638   :  { %14509 = vmatprep.subr.bf16.mxu1 %v17117_v23  ;;  %13457 = vmatmul.mubr.msk.f32.gmra.mrb[164].mxu0 %vm83_vm0, %v8257_v7  ;;  %v13416_v54 = vpop.f32.mrb[145].mxu0 }
 0x63a   :  { %13101 = vmatmul.mubr.f32.gmra.mrb[60].mxu1 %v10593_v17 }
 0x63b   :  { %14511 = vmatpush3.bf16.msra.mxu1 %v17117_v23  ;;  %13103 = vmatprep.mubr.f32.mxu1 %v10594_v0  ;;  %v10598_v23 = vld [vmem:[%s20023_s13 + $0xad0] sm:$0xff] }
 0x63c   :  { %14513 = vmatprep.subr.bf16.mxu1 %v17156_v39  ;;  %v10626_v0 = vld [vmem:[%s20023_s13 + $0xbb0] sm:$0xff] }
 0x63e   :  { %13104 = vmatmul.mubr.f32.gmra.mrb[62].mxu1 %v10595_v26 }
 0x63f   :  { %14515 = vmatpush3.bf16.msra.mxu1 %v17156_v39  ;;  %13106 = vmatprep.mubr.f32.mxu1 %v10596_v12  ;;  %v10600_v39 = vld [vmem:[%s20023_s13 + $0xae0] sm:$0xff] }
 0x640   :  { %14517 = vmatprep.subr.bf16.mxu1 %v17186_v27  ;;  %v10628_v12 = vld [vmem:[%s20023_s13 + $0xbc0] sm:$0xff] }
 0x642   :  { %13107 = vmatmul.mubr.f32.gmra.mrb[64].mxu1 %v10597_v5 }
 0x643   :  { %14519 = vmatpush3.bf16.msra.mxu1 %v17186_v27  ;;  %13109 = vmatprep.mubr.f32.mxu1 %v10598_v23  ;;  %v10602_v27 = vld [vmem:[%s20023_s13 + $0xaf0] sm:$0xff] }
 0x644   :  { %14521 = vmatprep.subr.bf16.mxu1 %v17216_v57  ;;  %v10630_v23 = vld [vmem:[%s20023_s13 + $0xbd0] sm:$0xff] }
 0x646   :  { %13110 = vmatmul.mubr.f32.gmra.mrb[66].mxu1 %v10599_v43  ;;  %v10631_v43 = vld [vmem:[%s20023_s13 + $0xbd8] sm:$0xff] }
 0x647   :  { %14523 = vmatpush3.bf16.msra.mxu1 %v17216_v57  ;;  %13112 = vmatprep.mubr.f32.mxu1 %v10600_v39  ;;  %v10604_v57 = vld [vmem:[%s20023_s13 + $0xb00] sm:$0xff]  ;;  %v10633_v39 = vld [vmem:[%s20023_s13 + $0xbe8] sm:$0xff] }
 0x648   :  { %14525 = vmatprep.subr.bf16.mxu1 %v17246_v3 }
 0x64a   :  { %13113 = vmatmul.mubr.f32.gmra.mrb[68].mxu1 %v10601_v42  ;;  %v10635_v42 = vld [vmem:[%s20023_s13 + $0xbf8] sm:$0xff] }
 0x64b   :  { %14527 = vmatpush3.bf16.msra.mxu1 %v17246_v3  ;;  %13115 = vmatprep.mubr.f32.mxu1 %v10602_v27  ;;  %v10606_v3 = vld [vmem:[%s20023_s13 + $0xb10] sm:$0xff]  ;;  %v10637_v27 = vld [vmem:[%s20023_s13 + $0xc08] sm:$0xff] }
 0x64c   :  { %14529 = vmatprep.subr.bf16.mxu1 %v17276_v18 }
 0x64e   :  { %13116 = vmatmul.mubr.f32.gmra.mrb[70].mxu1 %v10603_v4  ;;  %v10639_v4 = vld [vmem:[%s20023_s13 + $0xc18] sm:$0xff] }
 0x64f   :  { %14531 = vmatpush3.bf16.msra.mxu1 %v17276_v18  ;;  %13150 = vmatprep.mubr.f32.mxu1 %v10604_v57  ;;  %v10608_v18 = vld [vmem:[%s20023_s13 + $0xb20] sm:$0xff]  ;;  %v10641_v57 = vld [vmem:[%s20023_s13 + $0xc28] sm:$0xff] }
 0x650   :  { %14533 = vmatprep.subr.bf16.mxu1 %v17032_v13 }
 0x652   :  { %13151 = vmatmul.mubr.f32.vlgmr.msra.gmra.mrb[56].mxu1 %v10605_v37  ;;  %v10643_v37 = vld [vmem:[%s20023_s13 + $0xc38] sm:$0xff] }
 0x653   :  { %14535 = vmatpush3.bf16.msra.mxu1 %v17032_v13  ;;  %13153 = vmatprep.mubr.f32.mxu1 %v10606_v3  ;;  %v20099_v13 = vld [vmem:[#allocation11_spill] sm:$0xff]  ;;  %v10645_v3 = vld [vmem:[%s20023_s13 + $0xc48] sm:$0xff] }
 0x654   :  { %14537 = vmatprep.subr.bf16.mxu1 %v17080_v49 }
 0x656   :  { %13154 = vmatmul.mubr.f32.gmra.mrb[58].mxu1 %v10607_v62  ;;  %v10647_v62 = vld [vmem:[%s20023_s13 + $0xc58] sm:$0xff] }
 0x657   :  { %14539 = vmatpush3.bf16.msra.mxu1 %v17080_v49  ;;  %13156 = vmatprep.mubr.f32.mxu1 %v10608_v18  ;;  %v20100_v49 = vld [vmem:[#allocation12_spill] sm:$0xff] }
 0x658   :  { %14541 = vmatprep.subr.bf16.mxu1 %v20099_v13  ;;  %v10649_v18 = vld [vmem:[%s20023_s13 + $0xc68] sm:$0xff] }
 0x65a   :  { %13157 = vmatmul.mubr.f32.gmra.mrb[60].mxu1 %v10609_v44  ;;  %v10651_v44 = vld [vmem:[%s20023_s13 + $0xc78] sm:$0xff] }
 0x65b   :  { %14543 = vmatpush3.bf16.msra.mxu1 %v20099_v13  ;;  %13159 = vmatprep.mubr.f32.mxu1 %v10610_v32  ;;  %v10653_v13 = vld [vmem:[%s20023_s13 + $0xc88] sm:$0xff]  ;;  %v20106_v32 = vld [vmem:[#allocation17_spill] sm:$0xff] }
 0x65c   :  { %14545 = vmatprep.subr.bf16.mxu1 %v20100_v49 }
 0x65e   :  { %13160 = vmatmul.mubr.f32.gmra.mrb[62].mxu1 %v10611_v16  ;;  %v10654_v16 = vld [vmem:[%s20023_s13 + $0xc90] sm:$0xff] }
 0x65f   :  { %14547 = vmatpush3.bf16.msra.mxu1 %v20100_v49  ;;  %13162 = vmatprep.mubr.f32.mxu1 %v10612_v15  ;;  %v20107_v49 = vld [vmem:[#allocation18_spill] sm:$0xff]  ;;  %v10656_v15 = vld [vmem:[%s20023_s13 + $0xca0] sm:$0xff] }
 0x660   :  { %14549 = vmatprep.subr.bf16.mxu1 %v20101_v56 }
 0x662   :  { %13163 = vmatmul.mubr.f32.gmra.mrb[64].mxu1 %v10613_v38  ;;  %v10657_v38 = vld [vmem:[%s20023_s13 + $0xca8] sm:$0xff] }
 0x663   :  { %14551 = vmatpush3.bf16.msra.mxu1 %v20101_v56  ;;  %13165 = vmatprep.mubr.f32.mxu1 %v10614_v25  ;;  %v20108_v56 = vld [vmem:[#allocation19_spill] sm:$0xff]  ;;  %v10658_v25 = vld [vmem:[%s20023_s13 + $0xcb0] sm:$0xff] }
 0x664   :  { %14553 = vmatprep.subr.bf16.mxu1 %v20102_v28 }
 0x666   :  { %13166 = vmatmul.mubr.f32.gmra.mrb[66].mxu1 %v10615_v41  ;;  %v10659_v41 = vld [vmem:[%s20023_s13 + $0xcb8] sm:$0xff] }
 0x667   :  { %14555 = vmatpush3.bf16.msra.mxu1 %v20102_v28  ;;  %13168 = vmatprep.mubr.f32.mxu1 %v10616_v48  ;;  %v20109_v28 = vld [vmem:[#allocation20_spill] sm:$0xff]  ;;  %v10660_v48 = vld [vmem:[%s20023_s13 + $0xcc0] sm:$0xff] }
 0x668   :  { %14557 = vmatprep.subr.bf16.mxu1 %v20103_v34  ;;  %v19021_v60 = vpop.f32.mrb[146].mxu0 }
 0x669   :  { %v13423_v11 = vpop.f32.mrb[147].mxu0 }
 0x66a   :  { %13169 = vmatmul.mubr.f32.gmra.mrb[68].mxu1 %v10617_v50  ;;  %v10661_v50 = vld [vmem:[%s20023_s13 + $0xcc8] sm:$0xff]  ;;  %v10667_v11 = vld [vmem:[%s20023_s13 + $0xcf8] sm:$0xff] }
 0x66b   :  { %14559 = vmatpush3.bf16.msra.mxu1 %v20103_v34  ;;  %13171 = vmatprep.mubr.f32.mxu1 %v10618_v10  ;;  %v10662_v34 = vld [vmem:[%s20023_s13 + $0xcd0] sm:$0xff]  ;;  %v10663_v10 = vld [vmem:[%s20023_s13 + $0xcd8] sm:$0xff] }
 0x66c   :  { %14561 = vmatprep.subr.bf16.mxu1 %v20104_v55  ;;  %v19031_v36 = vpop.f32.mrb[148].mxu0 }
 0x66d   :  { %v13426_v20 = vpop.f32.mrb[149].mxu0 }
 0x66e   :  { %13172 = vmatmul.mubr.f32.gmra.mrb[70].mxu1 %v10619_v59  ;;  %v20110_v59 = vld [vmem:[#allocation21_spill] sm:$0xff]  ;;  %v10668_v20 = vld [vmem:[%s20023_s13 + $0xd00] sm:$0xff] }
 0x66f   :  { %14563 = vmatpush3.bf16.msra.mxu1 %v20104_v55  ;;  %13206 = vmatprep.mubr.f32.mxu1 %v10620_v2  ;;  %v10664_v55 = vld [vmem:[%s20023_s13 + $0xce0] sm:$0xff]  ;;  %v10665_v2 = vld [vmem:[%s20023_s13 + $0xce8] sm:$0xff] }
 0x670   :  { %14565 = vmatprep.subr.bf16.mxu1 %v18717_v47  ;;  %v19037_v22 = vpop.f32.mrb[150].mxu0 }
 0x671   :  { %v13429_v17 = vpop.f32.mrb[151].mxu0 }
 0x672   :  { %13207 = vmatmul.mubr.f32.vlgmr.msra.gmra.mrb[56].mxu1 %v10621_v31  ;;  %v10666_v31 = vld [vmem:[%s20023_s13 + $0xcf0] sm:$0xff]  ;;  %v10671_v17 = vld [vmem:[%s20023_s13 + $0xd18] sm:$0xff] }
 0x673   :  { %14567 = vmatpush3.bf16.msra.mxu1 %v18717_v47  ;;  %13209 = vmatprep.mubr.f32.mxu1 %v10622_v9  ;;  %v10625_v47 = vld [vmem:[%s20023_s13 + $0xba8] sm:$0xff]  ;;  %v20112_v9 = vld [vmem:[#allocation23_spill] sm:$0xff] }
 0x674   :  { %14569 = vmatprep.subr.bf16.mxu1 %v18737_v61  ;;  %v19047_v7 = vpop.f32.mrb[152].mxu0 }
 0x675   :  { %v13432_v54 = vpop.f32.mrb[153].mxu0 }
 0x676   :  { %13210 = vmatmul.mubr.f32.gmra.mrb[58].mxu1 %v10623_v53  ;;  %v10669_v53 = vld [vmem:[%s20023_s13 + $0xd08] sm:$0xff]  ;;  %v10674_v54 = vld [vmem:[%s20023_s13 + $0xd30] sm:$0xff] }
 0x677   :  { %14571 = vmatpush3.bf16.msra.mxu1 %v18737_v61  ;;  %13212 = vmatprep.mubr.f32.mxu1 %v10624_v35  ;;  %v10627_v61 = vld [vmem:[%s20023_s13 + $0xbb8] sm:$0xff]  ;;  %v10670_v35 = vld [vmem:[%s20023_s13 + $0xd10] sm:$0xff] }
 0x678   :  { %14573 = vmatprep.subr.bf16.mxu1 %v18757_v30  ;;  %v19057_v26 = vpop.f32.mrb[154].mxu0 }
 0x679   :  { %v13435_v5 = vpop.f32.mrb[155].mxu0 }
 0x67a   :  { %13213 = vmatmul.mubr.f32.gmra.mrb[60].mxu1 %v10625_v47  ;;  %v10672_v47 = vld [vmem:[%s20023_s13 + $0xd20] sm:$0xff]  ;;  %v10677_v5 = vld [vmem:[%s20023_s13 + $0xd48] sm:$0xff] }
 0x67b   :  { %14575 = vmatpush3.bf16.msra.mxu1 %v18757_v30  ;;  %13215 = vmatprep.mubr.f32.mxu1 %v10626_v0  ;;  %v10629_v30 = vld [vmem:[%s20023_s13 + $0xbc8] sm:$0xff] }
 0x67c   :  { %14577 = vmatprep.subr.bf16.mxu1 %v18777_v6  ;;  %v10673_v0 = vld [vmem:[%s20023_s13 + $0xd28] sm:$0xff] }
 0x67e   :  { %13216 = vmatmul.mubr.f32.gmra.mrb[62].mxu1 %v10627_v61  ;;  %v10675_v61 = vld [vmem:[%s20023_s13 + $0xd38] sm:$0xff] }
 0x67f   :  { %14579 = vmatpush3.bf16.msra.mxu1 %v18777_v6  ;;  %13218 = vmatprep.mubr.f32.mxu1 %v10628_v12  ;;  %v10632_v6 = vld [vmem:[%s20023_s13 + $0xbe0] sm:$0xff] }
 0x680   :  { %14581 = vmatprep.subr.bf16.mxu1 %v18797_v52  ;;  %v10676_v12 = vld [vmem:[%s20023_s13 + $0xd40] sm:$0xff] }
 0x682   :  { %13219 = vmatmul.mubr.f32.gmra.mrb[64].mxu1 %v10629_v30  ;;  %v10678_v30 = vld [vmem:[%s20023_s13 + $0xd50] sm:$0xff] }
 0x683   :  { %14583 = vmatpush3.bf16.msra.mxu1 %v18797_v52  ;;  %13221 = vmatprep.mubr.f32.mxu1 %v10630_v23  ;;  %v10634_v52 = vld [vmem:[%s20023_s13 + $0xbf0] sm:$0xff]  ;;  %v10679_v23 = vld [vmem:[%s20023_s13 + $0xd58] sm:$0xff] }
 0x684   :  { %14585 = vmatprep.subr.bf16.mxu1 %v18817_v58 }
 0x686   :  { %13222 = vmatmul.mubr.f32.gmra.mrb[66].mxu1 %v10631_v43  ;;  %v10680_v43 = vld [vmem:[%s20023_s13 + $0xd60] sm:$0xff] }
 0x687   :  { %14587 = vmatpush3.bf16.msra.mxu1 %v18817_v58  ;;  %13224 = vmatprep.mubr.f32.mxu1 %v10632_v6  ;;  %v10636_v58 = vld [vmem:[%s20023_s13 + $0xc00] sm:$0xff]  ;;  %v10681_v6 = vld [vmem:[%s20023_s13 + $0xd68] sm:$0xff] }
 0x688   :  { %14589 = vmatprep.subr.bf16.mxu1 %v18837_v46 }
 0x68a   :  { %13225 = vmatmul.mubr.f32.gmra.mrb[68].mxu1 %v10633_v39  ;;  %v10682_v39 = vld [vmem:[%s20023_s13 + $0xd70] sm:$0xff] }
 0x68b   :  { %14591 = vmatpush3.bf16.msra.mxu1 %v18837_v46  ;;  %13227 = vmatprep.mubr.f32.mxu1 %v10634_v52  ;;  %v10638_v46 = vld [vmem:[%s20023_s13 + $0xc10] sm:$0xff]  ;;  %v10683_v52 = vld [vmem:[%s20023_s13 + $0xd78] sm:$0xff] }
 0x68c   :  { %14593 = vmatprep.subr.bf16.mxu1 %v18857_v33 }
 0x68e   :  { %13228 = vmatmul.mubr.f32.gmra.mrb[70].mxu1 %v10635_v42 }
 0x68f   :  { %14595 = vmatpush3.bf16.msra.mxu1 %v18857_v33  ;;  %13262 = vmatprep.mubr.f32.mxu1 %v10636_v58  ;;  %v10640_v33 = vld [vmem:[%s20023_s13 + $0xc20] sm:$0xff] }
 0x690   :  { %14597 = vmatprep.subr.bf16.mxu1 %v18722_v14  ;;  %v10702_v58 = vld [vmem:[%s20026_s16 + $0x3] ss:$0 sm:$0xff] }
 0x692   :  { %13263 = vmatmul.mubr.f32.vlgmr.msra.gmra.mrb[56].mxu1 %v10637_v27 }
 0x693   :  { %14599 = vmatpush3.bf16.msra.mxu1 %v18722_v14  ;;  %13265 = vmatprep.mubr.f32.mxu1 %v10638_v46  ;;  %v10642_v14 = vld [vmem:[%s20023_s13 + $0xc30] sm:$0xff] }
 0x694   :  { %14601 = vmatprep.subr.bf16.mxu1 %v18742_v19 }
 0x696   :  { %13266 = vmatmul.mubr.f32.gmra.mrb[58].mxu1 %v10639_v4 }
 0x697   :  { %14603 = vmatpush3.bf16.msra.mxu1 %v18742_v19  ;;  %13268 = vmatprep.mubr.f32.mxu1 %v10640_v33  ;;  %v10644_v19 = vld [vmem:[%s20023_s13 + $0xc40] sm:$0xff] }
 0x698   :  { %14605 = vmatprep.subr.bf16.mxu1 %v18762_v8 }
 0x69a   :  { %13269 = vmatmul.mubr.f32.gmra.mrb[60].mxu1 %v10641_v57 }
 0x69b   :  { %14607 = vmatpush3.bf16.msra.mxu1 %v18762_v8  ;;  %13271 = vmatprep.mubr.f32.mxu1 %v10642_v14  ;;  %v10646_v8 = vld [vmem:[%s20023_s13 + $0xc50] sm:$0xff] }
 0x69c   :  { %14609 = vmatprep.subr.bf16.mxu1 %v18782_v29 }
 0x69e   :  { %13272 = vmatmul.mubr.f32.gmra.mrb[62].mxu1 %v10643_v37 }
 0x69f   :  { %14611 = vmatpush3.bf16.msra.mxu1 %v18782_v29  ;;  %13274 = vmatprep.mubr.f32.mxu1 %v10644_v19  ;;  %v10648_v29 = vld [vmem:[%s20023_s13 + $0xc60] sm:$0xff] }
 0x6a0   :  { %14613 = vmatprep.subr.bf16.mxu1 %v18802_v45 }
 0x6a2   :  { %13275 = vmatmul.mubr.f32.gmra.mrb[64].mxu1 %v10645_v3 }
 0x6a3   :  { %14615 = vmatpush3.bf16.msra.mxu1 %v18802_v45  ;;  %13277 = vmatprep.mubr.f32.mxu1 %v10646_v8  ;;  %v10650_v45 = vld [vmem:[%s20023_s13 + $0xc70] sm:$0xff] }
 0x6a4   :  { %14617 = vmatprep.subr.bf16.mxu1 %v18822_v24 }
 0x6a6   :  { %13278 = vmatmul.mubr.f32.gmra.mrb[66].mxu1 %v10647_v62 }
 0x6a7   :  { %14619 = vmatpush3.bf16.msra.mxu1 %v18822_v24  ;;  %13280 = vmatprep.mubr.f32.mxu1 %v10648_v29  ;;  %v10652_v24 = vld [vmem:[%s20023_s13 + $0xc80] sm:$0xff] }
 0x6a8   :  { %14621 = vmatprep.subr.bf16.mxu1 %v18842_v1 }
 0x6aa   :  { %13281 = vmatmul.mubr.f32.gmra.mrb[68].mxu1 %v10649_v18 }
 0x6ab   :  { %14623 = vmatpush3.bf16.msra.mxu1 %v18842_v1  ;;  %13283 = vmatprep.mubr.f32.mxu1 %v10650_v45  ;;  %v8530_v1 = vld [vmem:[%s20105_s18] sm:$0xff] }
 0x6ac   :  { %14625 = vmatprep.subr.bf16.mxu1 %v18862_v40  ;;  %13469 = vmatprep.mubr.msk.f32.mxu0 %vm8546_vm4, %v8530_v1 }
 0x6ae   :  { %13284 = vmatmul.mubr.f32.gmra.mrb[70].mxu1 %v10651_v44 }
 0x6af   :  { %14627 = vmatpush3.bf16.msra.mxu1 %v18862_v40  ;;  %13318 = vmatprep.mubr.f32.mxu1 %v10652_v24  ;;  %v10655_v40 = vld [vmem:[%s20023_s13 + $0xc98] sm:$0xff] }
 0x6b0   :  { %14629 = vmatprep.subr.bf16.mxu1 %v20106_v32 }
 0x6b2   :  { %13319 = vmatmul.mubr.f32.vlgmr.msra.gmra.mrb[56].mxu1 %v10653_v13 }
 0x6b3   :  { %14631 = vmatpush3.bf16.msra.mxu1 %v20106_v32  ;;  %13321 = vmatprep.mubr.f32.mxu1 %v10654_v16 }
 0x6b4   :  { %14633 = vmatprep.subr.bf16.mxu1 %v20107_v49 }
 0x6b6   :  { %13322 = vmatmul.mubr.f32.gmra.mrb[58].mxu1 %v10655_v40 }
 0x6b7   :  { %14635 = vmatpush3.bf16.msra.mxu1 %v20107_v49  ;;  %13324 = vmatprep.mubr.f32.mxu1 %v10656_v15 }
 0x6b8   :  { %14637 = vmatprep.subr.bf16.mxu1 %v20108_v56 }
 0x6ba   :  { %13325 = vmatmul.mubr.f32.gmra.mrb[60].mxu1 %v10657_v38 }
 0x6bb   :  { %14639 = vmatpush3.bf16.msra.mxu1 %v20108_v56  ;;  %13327 = vmatprep.mubr.f32.mxu1 %v10658_v25 }
 0x6bc   :  { %14641 = vmatprep.subr.bf16.mxu1 %v20109_v28 }
 0x6be   :  { %13328 = vmatmul.mubr.f32.gmra.mrb[62].mxu1 %v10659_v41 }
 0x6bf   :  { %14643 = vmatpush3.bf16.msra.mxu1 %v20109_v28  ;;  %13330 = vmatprep.mubr.f32.mxu1 %v10660_v48 }
 0x6c0   :  { %14645 = vmatprep.subr.bf16.mxu1 %v17379_v51 }
 0x6c2   :  { %13331 = vmatmul.mubr.f32.gmra.mrb[64].mxu1 %v10661_v50 }
 0x6c3   :  { %14647 = vmatpush3.bf16.msra.mxu1 %v17379_v51  ;;  %13333 = vmatprep.mubr.f32.mxu1 %v10662_v34  ;;  %v20111_v51 = vld [vmem:[#allocation22_spill] sm:$0xff] }
 0x6c4   :  { %14649 = vmatprep.subr.bf16.mxu1 %v20110_v59 }
 0x6c6   :  { %13334 = vmatmul.mubr.f32.gmra.mrb[66].mxu1 %v10663_v10 }
 0x6c7   :  { %14651 = vmatpush3.bf16.msra.mxu1 %v20110_v59  ;;  %13336 = vmatprep.mubr.f32.mxu1 %v10664_v55 }
 0x6c8   :  { %14653 = vmatprep.subr.bf16.mxu1 %v20111_v51 }
 0x6ca   :  { %13337 = vmatmul.mubr.f32.gmra.mrb[68].mxu1 %v10665_v2 }
 0x6cb   :  { %14655 = vmatpush3.bf16.msra.mxu1 %v20111_v51  ;;  %13339 = vmatprep.mubr.f32.mxu1 %v10666_v31 }
 0x6cc   :  { %14657 = vmatprep.subr.bf16.mxu1 %v20112_v9 }
 0x6ce   :  { %13340 = vmatmul.mubr.f32.gmra.mrb[70].mxu1 %v10667_v11 }
 0x6cf   :  { %14659 = vmatpush3.bf16.msra.mxu1 %v20112_v9  ;;  %13374 = vmatprep.mubr.f32.mxu1 %v10668_v20 }
 0x6d2   :  { %13375 = vmatmul.mubr.f32.vlgmr.msra.gmra.mrb[56].mxu1 %v10669_v53 }
 0x6d3   :  { %13377 = vmatprep.mubr.f32.mxu1 %v10670_v35  ;;  %v8531_v35 = vld [vmem:[%s20105_s18 + $0x8] sm:$0xff] }
 0x6d6   :  { %13378 = vmatmul.mubr.f32.gmra.mrb[58].mxu1 %v10671_v17  ;;  %v8532_v17 = vld [vmem:[%s20105_s18 + $0x10] sm:$0xff] }
 0x6d7   :  { %13380 = vmatprep.mubr.f32.mxu1 %v10672_v47  ;;  %v8533_v47 = vld [vmem:[%s20105_s18 + $0x18] sm:$0xff] }
 0x6da   :  { %13381 = vmatmul.mubr.f32.gmra.mrb[60].mxu1 %v10673_v0  ;;  %v8534_v0 = vld [vmem:[%s20105_s18 + $0x20] sm:$0xff] }
 0x6db   :  { %13383 = vmatprep.mubr.f32.mxu1 %v10674_v54  ;;  %v8535_v54 = vld [vmem:[%s20105_s18 + $0x28] sm:$0xff] }
 0x6de   :  { %13384 = vmatmul.mubr.f32.gmra.mrb[62].mxu1 %v10675_v61  ;;  %v8536_v61 = vld [vmem:[%s20105_s18 + $0x30] sm:$0xff] }
 0x6df   :  { %13386 = vmatprep.mubr.f32.mxu1 %v10676_v12  ;;  %v8537_v12 = vld [vmem:[%s20105_s18 + $0x38] sm:$0xff] }
 0x6e2   :  { %13387 = vmatmul.mubr.f32.gmra.mrb[64].mxu1 %v10677_v5  ;;  %v8538_v5 = vld [vmem:[%s20105_s18 + $0x40] sm:$0xff] }
 0x6e3   :  { %13389 = vmatprep.mubr.f32.mxu1 %v10678_v30  ;;  %v8539_v30 = vld [vmem:[%s20105_s18 + $0x48] sm:$0xff] }
 0x6e6   :  { %13390 = vmatmul.mubr.f32.gmra.mrb[66].mxu1 %v10679_v23  ;;  %v8540_v23 = vld [vmem:[%s20105_s18 + $0x50] sm:$0xff] }
 0x6e7   :  { %13392 = vmatprep.mubr.f32.mxu1 %v10680_v43  ;;  %v8541_v43 = vld [vmem:[%s20105_s18 + $0x58] sm:$0xff] }
 0x6ea   :  { %13393 = vmatmul.mubr.f32.gmra.mrb[68].mxu1 %v10681_v6  ;;  %v8542_v6 = vld [vmem:[%s20105_s18 + $0x60] sm:$0xff] }
 0x6eb   :  { %13395 = vmatprep.mubr.f32.mxu1 %v10682_v39  ;;  %v8543_v39 = vld [vmem:[%s20105_s18 + $0x68] sm:$0xff] }
 0x6ee   :  { %13396 = vmatmul.mubr.f32.gmra.mrb[70].mxu1 %v10683_v52  ;;  %v8544_v52 = vld [vmem:[%s20105_s18 + $0x70] sm:$0xff] }
 0x6fb   :  { %v8458_v42 = vpop.f32.mrb[156].mxu0 }
 0x6fc   :  { %v8459_v27 = vadd.f32 %v8458_v42, %v19021_v60  ;;  %v13446_v46 = vpop.f32.mrb[157].mxu0  ;;  %v8545_v42 = vld [vmem:[%s20105_s18 + $0x78] sm:$0xff] }
 0x6fe   :  { %v8490_v4 = vadd.f32 %v10702_v58, %v8459_v27 }
 0x6ff   :  { %v8463_v33 = vpop.f32.mrb[158].mxu0 }
 0x700   :  { %v10703_v57 = vmul.f32 -1.442695, %v8490_v4  ;;  %v8464_v14 = vadd.f32 %v8463_v33, %v19031_v36  ;;  %v13449_v37 = vpop.f32.mrb[159].mxu0 }
 0x702   :  { %15226 = vpow2.f32 %v10703_v57  ;;  %v8491_v19 = vadd.f32 %v10702_v58, %v8464_v14 }
 0x703   :  { %v8468_v3 = vpop.f32.mrb[160].mxu0 }
 0x704   :  { %v10704_v8 = vmul.f32 -1.442695, %v8491_v19  ;;  %v8469_v62 = vadd.f32 %v8468_v3, %v19037_v22  ;;  %v13452_v29 = vpop.f32.mrb[161].mxu0 }
 0x706   :  { %15228 = vpow2.f32 %v10704_v8  ;;  %v8492_v18 = vadd.f32 %v10702_v58, %v8469_v62 }
 0x707   :  { %v8473_v45 = vpop.f32.mrb[162].mxu0 }
 0x708   :  { %v10705_v44 = vmul.f32 -1.442695, %v8492_v18  ;;  %v8474_v60 = vadd.f32 %v8473_v45, %v19047_v7  ;;  %v13455_v24 = vpop.f32.mrb[163].mxu0 }
 0x70a   :  { %15230 = vpow2.f32 %v10705_v44  ;;  %v8493_v13 = vadd.f32 %v10702_v58, %v8474_v60 }
 0x70b   :  { %v8478_v1 = vpop.f32.mrb[164].mxu0 }
 0x70c   :  { %v15227_v32 = vpop.eup %15226  ;;  %v10706_v36 = vmul.f32 -1.442695, %v8493_v13  ;;  %v8479_v16 = vadd.f32 %v8478_v1, %v19057_v26  ;;  %v13458_v40 = vpop.f32.mrb[165].mxu0 }
 0x70d   :  { %v8510_v49 = vadd.f32 1.0, %v15227_v32 }
 0x70e   :  { %15232 = vpow2.f32 %v10706_v36  ;;  %v8494_v15 = vadd.f32 %v10702_v58, %v8479_v16  ;;  %v10685_v58 = vld [vmem:[%s20026_s16 + $0x2] ss:$0 sm:$0xff] }
 0x70f   :  { %15234 = vrcp.f32 %v8510_v49 }
 0x710   :  { %v15229_v22 = vpop.eup %15228  ;;  %v10707_v38 = vmul.f32 -1.442695, %v8494_v15 }
 0x711   :  { %v8511_v56 = vadd.f32 1.0, %v15229_v22 }
 0x712   :  { %15236 = vpow2.f32 %v10707_v38 }
 0x713   :  { %15238 = vrcp.f32 %v8511_v56 }
 0x714   :  { %v15231_v25 = vpop.eup %15230 }
 0x715   :  { %v8512_v7 = vadd.f32 1.0, %v15231_v25 }
 0x717   :  { %15240 = vrcp.f32 %v8512_v7 }
 0x718   :  { %v15233_v41 = vpop.eup %15232 }
 0x719   :  { %v15235_v28 = vpop.eup %15234  ;;  %v8513_v48 = vadd.f32 1.0, %v15233_v41 }
 0x71a   :  { %v8525_v34 = vmul.f32 %v15235_v28, %v8490_v4 }
 0x71b   :  { %15242 = vrcp.f32 %v8513_v48 }
 0x71c   :  { %v15237_v50 = vpop.eup %15236 }
 0x71d   :  { %v15239_v26 = vpop.eup %15238  ;;  %v8514_v10 = vadd.f32 1.0, %v15237_v50 }
 0x71e   :  { %v8526_v59 = vmul.f32 %v15239_v26, %v8491_v19 }
 0x71f   :  { %15244 = vrcp.f32 %v8514_v10 }
 0x720   :  { %v14672_v55 = vpack.c.bf16 %v8526_v59, %v8525_v34 }
 0x721   :  { %v15241_v2 = vpop.eup %15240 }
 0x722   :  { %14673 = vmatprep.subr.bf16.mxu0 %v14672_v55  ;;  %v8527_v51 = vmul.f32 %v15241_v2, %v8492_v18  ;;  %v8844_v2 = vld [vmem:[%s20031_s21 + $0x20] sm:$0xff] }
 0x723   :  { %14675 = vmatpush3.bf16.msra.mxu0 %v14672_v55 }
 0x725   :  { %v15243_v31 = vpop.eup %15242 }
 0x726   :  { %v8528_v11 = vmul.f32 %v15243_v31, %v8493_v13 }
 0x728   :  { %v14676_v9 = vpack.c.bf16 %v8528_v11, %v8527_v51  ;;  %v8845_v51 = vld [vmem:[%s20031_s21 + $0x28] sm:$0xff]  ;;  %v8740_v11 = vld [vmem:[%s20113_s7] sm:$0xff] }
 0x729   :  { %v15245_v20 = vpop.eup %15244 }
 0x72a   :  { %14677 = vmatprep.subr.bf16.mxu0 %v14676_v9  ;;  %v8529_v53 = vmul.f32 %v15245_v20, %v8494_v15  ;;  %v8741_v20 = vld [vmem:[%s20113_s7 + $0x8] sm:$0xff] }
 0x72b   :  { %14679 = vmatpush3.bf16.msra.mxu0 %v14676_v9  ;;  %v14705_v9 = vpack.c.bf16 %v8845_v51, %v8844_v2 }
 0x72c   :  { %13467 = vmatprep.subr.mxu0 %v8529_v53 }
 0x72f   :  { %13468 = vmatpush3.msra.mxu0 %v8529_v53  ;;  %v8742_v53 = vld [vmem:[%s20113_s7 + $0x10] sm:$0xff] }
 0x730   :  { %13470 = vmatmul.mubr.msk.f32.vlgmr.msra.gmra.mrb[166].mxu0 %vm8546_vm4, %v8531_v35  ;;  %14680 = vmatprep.subr.bf16.mxu0 %v20095_v21  ;;  %v8743_v35 = vld [vmem:[%s20113_s7 + $0x18] sm:$0xff] }
 0x731   :  { %13472 = vmatprep.mubr.msk.f32.mxu0 %vm8546_vm4, %v8532_v17  ;;  %v8744_v17 = vld [vmem:[%s20113_s7 + $0x20] sm:$0xff] }
 0x734   :  { %13473 = vmatmul.mubr.msk.f32.gmra.mrb[168].mxu0 %vm8546_vm4, %v8533_v47  ;;  %v8835_v47 = vld [vmem:[%s20031_s21] sm:$0xff] }
 0x735   :  { %13475 = vmatprep.mubr.msk.f32.mxu0 %vm8546_vm4, %v8534_v0  ;;  %v8836_v0 = vld [vmem:[%s20031_s21 + $0x8] sm:$0xff] }
 0x738   :  { %13476 = vmatmul.mubr.msk.f32.gmra.mrb[170].mxu0 %vm8546_vm4, %v8535_v54  ;;  %v8839_v54 = vld [vmem:[%s20114_s2] sm:$0xff] }
 0x739   :  { %13478 = vmatprep.mubr.msk.f32.mxu0 %vm8546_vm4, %v8536_v61  ;;  %v14708_v61 = vpack.c.bf16 %v8836_v0, %v8835_v47 }
 0x73c   :  { %13479 = vmatmul.mubr.msk.f32.gmra.mrb[172].mxu0 %vm8546_vm4, %v8537_v12  ;;  %v8840_v12 = vld [vmem:[%s20114_s2 + $0x8] sm:$0xff] }
 0x73d   :  { %13481 = vmatprep.mubr.msk.f32.mxu0 %vm8546_vm4, %v8538_v5  ;;  %v8841_v5 = vld [vmem:[%s20114_s2 + $0x10] sm:$0xff] }
 0x740   :  { %13482 = vmatmul.mubr.msk.f32.gmra.mrb[174].mxu0 %vm8546_vm4, %v8539_v30 }
 0x741   :  { %13484 = vmatprep.mubr.msk.f32.mxu0 %vm8546_vm4, %v8540_v23 }
 0x744   :  { %13485 = vmatmul.mubr.msk.f32.gmra.mrb[176].mxu0 %vm8546_vm4, %v8541_v43 }
 0x745   :  { %13487 = vmatprep.mubr.msk.f32.mxu0 %vm8546_vm4, %v8542_v6 }
 0x748   :  { %13488 = vmatmul.mubr.msk.f32.gmra.mrb[178].mxu0 %vm8546_vm4, %v8543_v39 }
 0x749   :  { %13490 = vmatprep.mubr.msk.f32.mxu0 %vm8546_vm4, %v8544_v52 }
 0x74c   :  { %13491 = vmatmul.mubr.msk.f32.gmra.mrb[180].mxu0 %vm8546_vm4, %v8545_v42 }
 0x74d   :  { %13525 = vmatprep.mubr.msk.f32.mxu0 %vm15365_vm1, %v15366_v63 }
 0x7a5   :  { %v13376_v27 = vpop.f32.mrb[56].mxu1 }
 0x7a6   :  { %v19347_v46 = vadd.f32 %v13376_v27, %v10685_v58  ;;  %v8032_v4 = vpop.f32.mrb[57].mxu1 }
 0x7a7   :  { %v19349_v33 = vadd.f32 %v10685_v58, %v8032_v4 }
 0x7a9   :  { %v14681_v57 = vpack.c.bf16 %v19347_v46, %v19349_v33  ;;  %v13379_v14 = vpop.f32.mrb[58].mxu1 }
 0x7aa   :  { %v19353_v37 = vadd.f32 %v13379_v14, %v10685_v58  ;;  %v8042_v19 = vpop.f32.mrb[59].mxu1 }
 0x7ab   :  { %v19355_v3 = vadd.f32 %v10685_v58, %v8042_v19  ;;  %14682 = vmatpush3.bf16.msra.mxu0 %v14681_v57 }
 0x7ac   :  { %14683 = vmatprep.subr.bf16.mxu0 %v20095_v21 }
 0x7ad   :  { %v14684_v8 = vpack.c.bf16 %v19353_v37, %v19355_v3  ;;  %v13382_v62 = vpop.f32.mrb[60].mxu1 }
 0x7ae   :  { %v19360_v29 = vadd.f32 %v13382_v62, %v10685_v58  ;;  %v8052_v18 = vpop.f32.mrb[61].mxu1 }
 0x7af   :  { %v19362_v45 = vadd.f32 %v10685_v58, %v8052_v18  ;;  %14685 = vmatpush3.bf16.msra.mxu0 %v14684_v8 }
 0x7b0   :  { %14686 = vmatprep.subr.bf16.mxu0 %v20095_v21 }
 0x7b1   :  { %v14687_v44 = vpack.c.bf16 %v19360_v29, %v19362_v45  ;;  %v13385_v60 = vpop.f32.mrb[62].mxu1 }
 0x7b2   :  { %v19367_v24 = vadd.f32 %v13385_v60, %v10685_v58  ;;  %v8062_v13 = vpop.f32.mrb[63].mxu1 }
 0x7b3   :  { %v19369_v1 = vadd.f32 %v10685_v58, %v8062_v13  ;;  %14688 = vmatpush3.bf16.msra.mxu0 %v14687_v44 }
 0x7b4   :  { %14689 = vmatprep.subr.bf16.mxu0 %v20095_v21 }
 0x7b5   :  { %v14690_v32 = vpack.c.bf16 %v19367_v24, %v19369_v1  ;;  %v13388_v36 = vpop.f32.mrb[64].mxu1 }
 0x7b6   :  { %v19374_v16 = vadd.f32 %v13388_v36, %v10685_v58  ;;  %v8072_v40 = vpop.f32.mrb[65].mxu1  ;;  %v8842_v36 = vld [vmem:[%s20114_s2 + $0x18] sm:$0xff] }
 0x7b7   :  { %v19376_v49 = vadd.f32 %v10685_v58, %v8072_v40  ;;  %14691 = vmatpush3.bf16.msra.mxu0 %v14690_v32 }
 0x7b8   :  { %14692 = vmatprep.subr.bf16.mxu0 %v20095_v21 }
 0x7b9   :  { %v14693_v15 = vpack.c.bf16 %v19374_v16, %v19376_v49  ;;  %v13391_v22 = vpop.f32.mrb[66].mxu1 }
 0x7ba   :  { %v19381_v38 = vadd.f32 %v13391_v22, %v10685_v58  ;;  %v8082_v56 = vpop.f32.mrb[67].mxu1 }
 0x7bb   :  { %v19383_v25 = vadd.f32 %v10685_v58, %v8082_v56  ;;  %14694 = vmatpush3.bf16.msra.mxu0 %v14693_v15 }
 0x7bc   :  { %14695 = vmatprep.subr.bf16.mxu0 %v20095_v21 }
 0x7bd   :  { %v14696_v7 = vpack.c.bf16 %v19381_v38, %v19383_v25  ;;  %v13394_v41 = vpop.f32.mrb[68].mxu1 }
 0x7be   :  { %v19388_v28 = vadd.f32 %v13394_v41, %v10685_v58  ;;  %v8092_v48 = vpop.f32.mrb[69].mxu1  ;;  %v8837_v41 = vld [vmem:[%s20031_s21 + $0x10] sm:$0xff] }
 0x7bf   :  { %v19390_v50 = vadd.f32 %v10685_v58, %v8092_v48  ;;  %14697 = vmatpush3.bf16.msra.mxu0 %v14696_v7  ;;  %v8843_v7 = vld [vmem:[%s20114_s2 + $0x20] sm:$0xff]  ;;  %v8838_v48 = vld [vmem:[%s20031_s21 + $0x18] sm:$0xff]  ;;  %s15367_s21 = smov [#allocation2]  }
 0x7c0   :  { %14698 = vmatprep.subr.bf16.mxu0 %v20095_v21  ;;  %s9983_s28 = sshll.u32 %s15367_s21, 4  ;;  %s9984_s28 = int_to_ptr.vmem [resolvable:$true] %s9983_s28 }
 0x7c1   :  { %v14699_v34 = vpack.c.bf16 %v19388_v28, %v19390_v50  ;;  %v13397_v26 = vpop.f32.mrb[70].mxu1  ;;  %s15316_s2 = scalar_lea.vmem %s9984_s28, 256  ;;  %p15321_p1 = scmp.lt.s32.totalorder %s9984_s28, %s9984_s28 }
 0x7c2   :  { %v19395_v10 = vadd.f32 %v13397_v26, %v10685_v58  ;;  %v8102_v59 = vpop.f32.mrb[71].mxu1  ;;  %p15317_p0 = scmp.ne.s32.totalorder %s9984_s28, %s15316_s2  ;;  %p15322_p2 = scmp.lt.s32.totalorder %s15316_s2, %s15316_s2 }
 0x7c3   :  { %v19397_v55 = vadd.f32 %v10685_v58, %v8102_v59  ;;  %14700 = vmatpush3.bf16.msra.mxu0 %v14699_v34  ;;  %v14711_v34 = vpack.c.bf16 %v8838_v48, %v8837_v41 }
 0x7c4   :  { %14701 = vmatprep.subr.bf16.mxu0 %v20095_v21  ;;  %p15323_p3 = por %p15322_p2, %p15321_p1 }
 0x7c5   :  { %v14702_v31 = vpack.c.bf16 %v19395_v10, %v19397_v55 }
 0x7c6   :  { %p15324_p4 = pnand %p15323_p3, %p15317_p0 }
 0x7c7   :  { %14703 = vmatpush3.bf16.msra.mxu0 %v14702_v31 }
 0x7c8   :  { %14704 = vmatprep.subr.bf16.mxu0 %v20095_v21 }
 0x7ca   :  { %13526 = vmatmul.mubr.f32.vlgmr.msra.gmra.mrb[182].mxu0 %v8740_v11 }
 0x7cb   :  { %13528 = vmatprep.mubr.msk.f32.mxu0 %vm15365_vm1, %v15366_v63  ;;  %14706 = vmatpush3.bf16.msra.mxu0 %v14705_v9 }
 0x7cc   :  { %14707 = vmatprep.subr.bf16.mxu0 %v20095_v21 }
 0x7ce   :  { %13529 = vmatmul.mubr.f32.gmra.mrb[184].mxu0 %v8741_v20 }
 0x7cf   :  { %13531 = vmatprep.mubr.msk.f32.mxu0 %vm15365_vm1, %v15366_v63 }
 0x7d2   :  { %13532 = vmatmul.mubr.f32.gmra.mrb[186].mxu0 %v8742_v53 }
 0x7d3   :  { %13534 = vmatprep.mubr.msk.f32.mxu0 %vm15365_vm1, %v15366_v63 }
 0x7d6   :  { %13535 = vmatmul.mubr.f32.gmra.mrb[188].mxu0 %v8743_v35 }
 0x7d7   :  { %13537 = vmatprep.mubr.msk.f32.mxu0 %vm15365_vm1, %v15366_v63 }
 0x7da   :  { %13538 = vmatmul.mubr.f32.gmra.mrb[190].mxu0 %v8744_v17 }
 0x7db   :  { %13544 = vmatprep.mubr.msk.f32.mxu0 %vm15365_vm1, %v15366_v63 }
 0x7de   :  { %13545 = vmatmul.mubr.msk.f32.vlgmr.msra.gmra.mrb[192].mxu0 %vm200_vm2, %v8839_v54 }
 0x7df   :  { %13547 = vmatprep.mubr.msk.f32.mxu0 %vm15365_vm1, %v15366_v63  ;;  %14709 = vmatpush3.bf16.msra.mxu0 %v14708_v61 }
 0x7e0   :  { %14710 = vmatprep.subr.bf16.mxu0 %v20095_v21 }
 0x7e2   :  { %13548 = vmatmul.mubr.msk.f32.gmra.mrb[194].mxu0 %vm200_vm2, %v8840_v12 }
 0x7e3   :  { %13550 = vmatprep.mubr.msk.f32.mxu0 %vm15365_vm1, %v15366_v63  ;;  %14712 = vmatpush3.bf16.msra.mxu0 %v14711_v34 }
 0x7e6   :  { %13551 = vmatmul.mubr.msk.f32.gmra.mrb[196].mxu0 %vm200_vm2, %v8841_v5 }
 0x7e7   :  { %13553 = vmatprep.mubr.msk.f32.mxu0 %vm15365_vm1, %v15366_v63 }
 0x7ea   :  { %13554 = vmatmul.mubr.msk.f32.gmra.mrb[198].mxu0 %vm200_vm2, %v8842_v36 }
 0x7eb   :  { %13556 = vmatprep.mubr.msk.f32.mxu0 %vm15365_vm1, %v15366_v63 }
 0x7ee   :  { %13557 = vmatmul.mubr.msk.f32.gmra.mrb[200].mxu0 %vm200_vm2, %v8843_v7  ;;  %v10735_v7 = vld [vmem:[%s20026_s16 + $0x4] ss:$0 sm:$0xff] }
 0x7ef   :  { %13567 = vmatprep.mubr.msk.f32.mxu0 %vm15365_vm1, %v15366_v63 }
 0x803   :  { %v19460_v30 = vpop.f32.mrb[166].mxu0 }
 0x804   :  { %v19462_v23 = vpop.f32.mrb[167].mxu0  ;;  %v9598_v43 = vsel %vm83_vm0, %v19460_v30, 0.0 }
 0x805   :  { %9599 = vadd.xlane.f32.xlu1 %v9598_v43  ;;  %v9595_v6 = vsel %vm83_vm0, %v19462_v23, 0.0 }
 0x806   :  { %9596 = vadd.xlane.f32.xlu0 %v9595_v6 }
 0x807   :  { %v19468_v39 = vpop.f32.mrb[168].mxu0 }
 0x808   :  { %v19470_v52 = vpop.f32.mrb[169].mxu0  ;;  %v9604_v42 = vsel %vm83_vm0, %v19468_v39, 0.0 }
 0x809   :  { %9605 = vadd.xlane.f32.xlu1 %v9604_v42  ;;  %v9601_v58 = vsel %vm83_vm0, %v19470_v52, 0.0 }
 0x80a   :  { %9602 = vadd.xlane.f32.xlu0 %v9601_v58 }
 0x80b   :  { %v19476_v27 = vpop.f32.mrb[170].mxu0 }
 0x80c   :  { %v19478_v4 = vpop.f32.mrb[171].mxu0  ;;  %v9610_v57 = vsel %vm83_vm0, %v19476_v27, 0.0 }
 0x80d   :  { %9611 = vadd.xlane.f32.xlu1 %v9610_v57  ;;  %v9607_v14 = vsel %vm83_vm0, %v19478_v4, 0.0 }
 0x80e   :  { %9608 = vadd.xlane.f32.xlu0 %v9607_v14 }
 0x80f   :  { %v19484_v19 = vpop.f32.mrb[172].mxu0 }
 0x810   :  { %v19486_v8 = vpop.f32.mrb[173].mxu0  ;;  %v9616_v62 = vsel %vm83_vm0, %v19484_v19, 0.0 }
 0x811   :  { %9617 = vadd.xlane.f32.xlu1 %v9616_v62  ;;  %v9613_v18 = vsel %vm83_vm0, %v19486_v8, 0.0 }
 0x812   :  { %9614 = vadd.xlane.f32.xlu0 %v9613_v18 }
 0x813   :  { %v19492_v44 = vpop.f32.mrb[174].mxu0 }
 0x814   :  { %v19494_v60 = vpop.f32.mrb[175].mxu0  ;;  %v9622_v13 = vsel %vm83_vm0, %v19492_v44, 0.0 }
 0x815   :  { %9623 = vadd.xlane.f32.xlu1 %v9622_v13  ;;  %v9619_v32 = vsel %vm83_vm0, %v19494_v60, 0.0 }
 0x816   :  { %9620 = vadd.xlane.f32.xlu0 %v9619_v32 }
 0x817   :  { %v19504_v40 = vpop.f32.mrb[176].mxu0 }
 0x818   :  { %v19508_v15 = vpop.f32.mrb[177].mxu0  ;;  %v9628_v22 = vsel %vm83_vm0, %v19504_v40, 0.0 }
 0x819   :  { %9629 = vadd.xlane.f32.xlu1 %v9628_v22  ;;  %v9625_v56 = vsel %vm83_vm0, %v19508_v15, 0.0  ;;  %v9104_v22 = vld [vmem:[%s20020_s10] sm:$0xff] }
 0x81a   :  { %9626 = vadd.xlane.f32.xlu0 %v9625_v56 }
 0x81b   :  { %v19524_v26 = vpop.f32.mrb[178].mxu0 }
 0x81c   :  { %v19528_v59 = vpop.f32.mrb[179].mxu0  ;;  %v9634_v2 = vsel %vm83_vm0, %v19524_v26, 0.0 }
 0x81d   :  { %9635 = vadd.xlane.f32.xlu1 %v9634_v2  ;;  %v9631_v51 = vsel %vm83_vm0, %v19528_v59, 0.0 }
 0x81e   :  { %9632 = vadd.xlane.f32.xlu0 %v9631_v51 }
 0x81f   :  { %v19534_v31 = vpop.f32.mrb[180].mxu0 }
 0x820   :  { %v19536_v11 = vpop.f32.mrb[181].mxu0  ;;  %v9640_v9 = vsel %vm83_vm0, %v19534_v31, 0.0 }
 0x821   :  { %9641 = vadd.xlane.f32.xlu1 %v9640_v9  ;;  %v9637_v20 = vsel %vm83_vm0, %v19536_v11, 0.0 }
 0x822   :  { %9638 = vadd.xlane.f32.xlu0 %v9637_v20 }
 0x89d   :  { %v8811_v53 = vpop.f32.mrb[182].mxu0 }
 0x89e   :  { %v13527_v35 = vpop.f32.mrb[183].mxu0  ;;  %13568 = vmatmul.mubr.msk.f32.vlgmr.msra.gmra.mrb[202].mxu0 %vm83_vm0, %v8811_v53 }
 0x89f   :  { %13570 = vmatprep.mubr.msk.f32.mxu0 %vm15365_vm1, %v15366_v63 }
 0x8a1   :  { %v8816_v17 = vpop.f32.mrb[184].mxu0 }
 0x8a2   :  { %v13530_v47 = vpop.f32.mrb[185].mxu0  ;;  %13571 = vmatmul.mubr.msk.f32.gmra.mrb[204].mxu0 %vm83_vm0, %v8816_v17 }
 0x8a3   :  { %13573 = vmatprep.mubr.msk.f32.mxu0 %vm15365_vm1, %v15366_v63 }
 0x8a5   :  { %v8821_v0 = vpop.f32.mrb[186].mxu0 }
 0x8a6   :  { %v13533_v54 = vpop.f32.mrb[187].mxu0  ;;  %13574 = vmatmul.mubr.msk.f32.gmra.mrb[206].mxu0 %vm83_vm0, %v8821_v0 }
 0x8a7   :  { %13576 = vmatprep.mubr.msk.f32.mxu0 %vm15365_vm1, %v15366_v63 }
 0x8a9   :  { %v8826_v61 = vpop.f32.mrb[188].mxu0 }
 0x8aa   :  { %v13536_v12 = vpop.f32.mrb[189].mxu0  ;;  %13577 = vmatmul.mubr.msk.f32.gmra.mrb[208].mxu0 %vm83_vm0, %v8826_v61 }
 0x8ab   :  { %13579 = vmatprep.mubr.msk.f32.mxu0 %vm15365_vm1, %v15366_v63 }
 0x8ad   :  { %v8831_v5 = vpop.f32.mrb[190].mxu0 }
 0x8ae   :  { %13580 = vmatmul.mubr.msk.f32.gmra.mrb[210].mxu0 %vm83_vm0, %v8831_v5  ;;  %v13539_v43 = vpop.f32.mrb[191].mxu0 }
 0x8af   :  { %13592 = vmatprep.mubr.msk.f32.mxu0 %vm8546_vm4, %v9104_v22 }
 0x8b1   :  { %v8927_v6 = vpop.f32.mrb[192].mxu0 }
 0x8b2   :  { %v13546_v42 = vpop.f32.mrb[193].mxu0 }
 0x8b5   :  { %v8932_v58 = vpop.f32.mrb[194].mxu0 }
 0x8b6   :  { %v13549_v57 = vpop.f32.mrb[195].mxu0 }
 0x8b9   :  { %v8937_v14 = vpop.f32.mrb[196].mxu0 }
 0x8ba   :  { %v13552_v62 = vpop.f32.mrb[197].mxu0 }
 0x8bd   :  { %v8942_v18 = vpop.f32.mrb[198].mxu0 }
 0x8be   :  { %v13555_v13 = vpop.f32.mrb[199].mxu0 }
 0x8c1   :  { %v8947_v32 = vpop.f32.mrb[200].mxu0 }
 0x8c2   :  { %v13558_v36 = vpop.f32.mrb[201].mxu0 }
 0x971   :  { %v9032_v56 = vpop.f32.mrb[202].mxu0 }
 0x972   :  { %v9033_v41 = vadd.f32 %v9032_v56, %v8927_v6  ;;  %v13569_v48 = vpop.f32.mrb[203].mxu0 }
 0x974   :  { %v9064_v34 = vadd.f32 %v10735_v7, %v9033_v41 }
 0x975   :  { %v9037_v2 = vpop.f32.mrb[204].mxu0 }
 0x976   :  { %v10736_v51 = vmul.f32 -1.442695, %v9064_v34  ;;  %v9038_v9 = vadd.f32 %v9037_v2, %v8932_v58  ;;  %v13572_v20 = vpop.f32.mrb[205].mxu0 }
 0x978   :  { %15246 = vpow2.f32 %v10736_v51  ;;  %v9065_v53 = vadd.f32 %v10735_v7, %v9038_v9 }
 0x979   :  { %v9042_v35 = vpop.f32.mrb[206].mxu0 }
 0x97a   :  { %v10737_v17 = vmul.f32 -1.442695, %v9065_v53  ;;  %v9043_v47 = vadd.f32 %v9042_v35, %v8937_v14  ;;  %v13575_v0 = vpop.f32.mrb[207].mxu0 }
 0x97c   :  { %15248 = vpow2.f32 %v10737_v17  ;;  %v9066_v54 = vadd.f32 %v10735_v7, %v9043_v47 }
 0x97d   :  { %v9047_v61 = vpop.f32.mrb[208].mxu0 }
 0x97e   :  { %v10738_v12 = vmul.f32 -1.442695, %v9066_v54  ;;  %v9048_v5 = vadd.f32 %v9047_v61, %v8942_v18  ;;  %v13578_v43 = vpop.f32.mrb[209].mxu0 }
 0x980   :  { %15250 = vpow2.f32 %v10738_v12  ;;  %v9067_v6 = vadd.f32 %v10735_v7, %v9048_v5 }
 0x981   :  { %v9052_v42 = vpop.f32.mrb[210].mxu0 }
 0x982   :  { %v15247_v57 = vpop.eup %15246  ;;  %v10739_v62 = vmul.f32 -1.442695, %v9067_v6  ;;  %v9053_v13 = vadd.f32 %v9052_v42, %v8947_v32  ;;  %v13581_v58 = vpop.f32.mrb[211].mxu0 }
 0x983   :  { %v9084_v36 = vadd.f32 1.0, %v15247_v57  ;;  %v9189_v58 = vld [vmem:[%s20021_s11 + $0x10] sm:$0xff] }
 0x984   :  { %15252 = vpow2.f32 %v10739_v62  ;;  %v9068_v22 = vadd.f32 %v10735_v7, %v9053_v13  ;;  %v9105_v62 = vld [vmem:[%s20020_s10 + $0x8] sm:$0xff] }
 0x985   :  { %15254 = vrcp.f32 %v9084_v36  ;;  %v9188_v13 = vld [vmem:[%s20021_s11 + $0x8] sm:$0xff]  ;;  %v9279_v36 = vld [vmem:[%s20022_s12] sm:$0xff] }
 0x986   :  { %v15249_v56 = vpop.eup %15248  ;;  %v10740_v41 = vmul.f32 -1.442695, %v9068_v22 }
 0x987   :  { %v9085_v14 = vadd.f32 1.0, %v15249_v56  ;;  %v9281_v56 = vld [vmem:[%s20022_s12 + $0x10] sm:$0xff] }
 0x988   :  { %15256 = vpow2.f32 %v10740_v41  ;;  %v9375_v41 = vld [vmem:[%s20032_s22 + $0x20] sm:$0xff] }
 0x989   :  { %15258 = vrcp.f32 %v9085_v14  ;;  %v9376_v14 = vld [vmem:[%s20032_s22 + $0x28] sm:$0xff] }
 0x98a   :  { %v15251_v48 = vpop.eup %15250 }
 0x98b   :  { %v9086_v2 = vadd.f32 1.0, %v15251_v48  ;;  %v14728_v48 = vpack.c.bf16 %v9376_v14, %v9375_v41  ;;  %v10756_v41 = vld [vmem:[%s20026_s16 + $0x5] ss:$0 sm:$0xff] }
 0x98d   :  { %15260 = vrcp.f32 %v9086_v2  ;;  %v9377_v2 = vld [vmem:[%s20032_s22 + $0x30] sm:$0xff] }
 0x98e   :  { %v15253_v18 = vpop.eup %15252 }
 0x98f   :  { %v9087_v51 = vadd.f32 1.0, %v15253_v18  ;;  %v15255_v9 = vpop.eup %15254  ;;  %v9378_v18 = vld [vmem:[%s20032_s22 + $0x38] sm:$0xff] }
 0x990   :  { %v9099_v17 = vmul.f32 %v15255_v9, %v9064_v34 }
 0x991   :  { %15262 = vrcp.f32 %v9087_v51  ;;  %v14731_v51 = vpack.c.bf16 %v9378_v18, %v9377_v2 }
 0x992   :  { %v15257_v20 = vpop.eup %15256 }
 0x993   :  { %v15259_v35 = vpop.eup %15258  ;;  %v9088_v32 = vadd.f32 1.0, %v15257_v20 }
 0x994   :  { %v9100_v47 = vmul.f32 %v15259_v35, %v9065_v53 }
 0x995   :  { %15264 = vrcp.f32 %v9088_v32 }
 0x996   :  { %v14713_v7 = vpack.c.bf16 %v9100_v47, %v9099_v17  ;;  %v9371_v17 = vld [vmem:[%s20032_s22] sm:$0xff]  ;;  %v9372_v47 = vld [vmem:[%s20032_s22 + $0x8] sm:$0xff] }
 0x997   :  { %v15261_v0 = vpop.eup %15260 }
 0x998   :  { %14714 = vmatprep.subr.bf16.mxu0 %v14713_v7  ;;  %v9101_v12 = vmul.f32 %v15261_v0, %v9066_v54 }
 0x999   :  { %14716 = vmatpush3.bf16.msra.mxu0 %v14713_v7 }
 0x99b   :  { %v15263_v61 = vpop.eup %15262 }
 0x99c   :  { %v9102_v5 = vmul.f32 %v15263_v61, %v9067_v6  ;;  %v9187_v6 = vld [vmem:[%s20021_s11] sm:$0xff]  ;;  %v14734_v61 = vpack.c.bf16 %v9372_v47, %v9371_v17 }
 0x99e   :  { %v14717_v43 = vpack.c.bf16 %v9102_v5, %v9101_v12  ;;  %v9373_v12 = vld [vmem:[%s20032_s22 + $0x10] sm:$0xff]  ;;  %v9374_v5 = vld [vmem:[%s20032_s22 + $0x18] sm:$0xff] }
 0x99f   :  { %v15265_v42 = vpop.eup %15264 }
 0x9a0   :  { %14718 = vmatprep.subr.bf16.mxu0 %v14717_v43  ;;  %v9103_v57 = vmul.f32 %v15265_v42, %v9068_v22  ;;  %v9280_v22 = vld [vmem:[%s20022_s12 + $0x8] sm:$0xff] }
 0x9a1   :  { %14720 = vmatpush3.bf16.msra.mxu0 %v14717_v43 }
 0x9a2   :  { %13590 = vmatprep.subr.mxu0 %v9103_v57 }
 0x9a5   :  { %13591 = vmatpush3.msra.mxu0 %v9103_v57  ;;  %v14737_v57 = vpack.c.bf16 %v9374_v5, %v9373_v12  ;;  %v9600_v12 = vpop.xlane.xlu1 %9599 }
 0x9a6   :  { %13593 = vmatmul.mubr.msk.f32.vlgmr.msra.gmra.mrb[212].mxu0 %vm8546_vm4, %v9105_v62  ;;  %14721 = vmatprep.subr.bf16.mxu0 %v20095_v21 }
 0x9a7   :  { %13599 = vmatprep.mubr.msk.f32.mxu0 %vm15365_vm1, %v15366_v63 }
 0xa79   :  { %v13594_v34 = vpop.f32.mrb[212].mxu0 }
 0xa7a   :  { %v9178_v53 = vpop.f32.mrb[213].mxu0 }
 0xa7b   :  { %v14722_v54 = vpack.c.bf16 %v13594_v34, %v9178_v53 }
 0xa7d   :  { %14723 = vmatpush3.bf16.msra.mxu0 %v14722_v54 }
 0xa7e   :  { %14724 = vmatprep.subr.bf16.mxu0 %v20095_v21 }
 0xa80   :  { %13600 = vmatmul.mubr.msk.f32.vlgmr.msra.gmra.mrb[214].mxu0 %vm200_vm2, %v9187_v6 }
 0xa81   :  { %13602 = vmatprep.mubr.msk.f32.mxu0 %vm15365_vm1, %v15366_v63  ;;  %14726 = vmatpush3.bf16.msra.mxu0 %v14722_v54 }
 0xa82   :  { %14727 = vmatprep.subr.bf16.mxu0 %v20095_v21 }
 0xa84   :  { %13603 = vmatmul.mubr.msk.f32.gmra.mrb[216].mxu0 %vm200_vm2, %v9188_v13 }
 0xa85   :  { %13605 = vmatprep.mubr.msk.f32.mxu0 %vm15365_vm1, %v15366_v63 }
 0xa88   :  { %13606 = vmatmul.mubr.msk.f32.gmra.mrb[218].mxu0 %vm200_vm2, %v9189_v58 }
 0xa89   :  { %13612 = vmatprep.mubr.msk.f32.mxu0 %vm15365_vm1, %v15366_v63 }
 0xa8c   :  { %13613 = vmatmul.mubr.msk.f32.vlgmr.msra.gmra.mrb[220].mxu0 %vm200_vm2, %v9279_v36 }
 0xa8d   :  { %13615 = vmatprep.mubr.msk.f32.mxu0 %vm15365_vm1, %v15366_v63  ;;  %14729 = vmatpush3.bf16.msra.mxu0 %v14728_v48 }
 0xa8e   :  { %14730 = vmatprep.subr.bf16.mxu0 %v20095_v21 }
 0xa90   :  { %13616 = vmatmul.mubr.msk.f32.gmra.mrb[222].mxu0 %vm200_vm2, %v9280_v22 }
 0xa91   :  { %13618 = vmatprep.mubr.msk.f32.mxu0 %vm15365_vm1, %v15366_v63  ;;  %14732 = vmatpush3.bf16.msra.mxu0 %v14731_v51 }
 0xa92   :  { %14733 = vmatprep.subr.bf16.mxu0 %v20095_v21 }
 0xa94   :  { %13619 = vmatmul.mubr.msk.f32.gmra.mrb[224].mxu0 %vm200_vm2, %v9281_v56 }
 0xa95   :  { %13629 = vmatprep.mubr.msk.f32.mxu0 %vm15365_vm1, %v15366_v63 }
 0xb53   :  { %v9265_v9 = vpop.f32.mrb[214].mxu0 }
 0xb54   :  { %v13601_v20 = vpop.f32.mrb[215].mxu0 }
 0xb57   :  { %v9270_v35 = vpop.f32.mrb[216].mxu0 }
 0xb58   :  { %v13604_v32 = vpop.f32.mrb[217].mxu0 }
 0xb5b   :  { %v9275_v7 = vpop.f32.mrb[218].mxu0 }
 0xb5c   :  { %v13607_v0 = vpop.f32.mrb[219].mxu0 }
 0xb5d   :  { %v9597_v0 = vpop.xlane.xlu0 %9596 }
 0xb5f   :  { %v9357_v43 = vpop.f32.mrb[220].mxu0 }
 0xb60   :  { %13630 = vmatmul.mubr.msk.f32.vlgmr.msra.gmra.mrb[226].mxu0 %vm83_vm0, %v9357_v43  ;;  %v13614_v42 = vpop.f32.mrb[221].mxu0 }
 0xb61   :  { %13632 = vmatprep.mubr.msk.f32.mxu0 %vm15365_vm1, %v15366_v63  ;;  %14735 = vmatpush3.bf16.msra.mxu0 %v14734_v61  ;;  %v9603_v43 = vpop.xlane.xlu0 %9602 }
 0xb62   :  { %14736 = vmatprep.subr.bf16.mxu0 %v20095_v21 }
 0xb63   :  { %v9362_v62 = vpop.f32.mrb[222].mxu0 }
 0xb64   :  { %13633 = vmatmul.mubr.msk.f32.gmra.mrb[228].mxu0 %vm83_vm0, %v9362_v62  ;;  %v13617_v34 = vpop.f32.mrb[223].mxu0  ;;  %v9606_v62 = vpop.xlane.xlu1 %9605 }
 0xb65   :  { %13635 = vmatprep.mubr.msk.f32.mxu0 %vm15365_vm1, %v15366_v63  ;;  %14738 = vmatpush3.bf16.msra.mxu0 %v14737_v57 }
 0xb67   :  { %v9367_v53 = vpop.f32.mrb[224].mxu0 }
 0xb68   :  { %13636 = vmatmul.mubr.msk.f32.gmra.mrb[230].mxu0 %vm83_vm0, %v9367_v53  ;;  %v13620_v54 = vpop.f32.mrb[225].mxu0  ;;  %v9609_v53 = vpop.xlane.xlu0 %9608 }
 0xb69   :  { %13646 = vmatprep.mubr.msk.f32.mxu0 %vm15365_vm1, %v15366_v63 }
 0xb6c   :  { %13647 = vmatmul.mubr.msk.f32.vlgmr.msra.gmra.mrb[232].mxu0 %vm83_vm0, %v9265_v9 }
 0xb6d   :  { %13649 = vmatprep.mubr.msk.f32.mxu0 %vm15365_vm1, %v15366_v63 }
 0xb70   :  { %13650 = vmatmul.mubr.msk.f32.gmra.mrb[234].mxu0 %vm83_vm0, %v9270_v35 }
 0xb71   :  { %13652 = vmatprep.mubr.msk.f32.mxu0 %vm15365_vm1, %v15366_v63 }
 0xb74   :  { %13653 = vmatmul.mubr.msk.f32.gmra.mrb[236].mxu0 %vm83_vm0, %v9275_v7 }
 0xc33   :  { %v9454_v21 = vpop.f32.mrb[226].mxu0 }
 0xc34   :  { %v13631_v6 = vpop.f32.mrb[227].mxu0 }
 0xc35   :  { %v9643_v6 = vmul.f32 0.03125, %v9597_v0 }
 0xc37   :  { %v9459_v13 = vpop.f32.mrb[228].mxu0 }
 0xc38   :  { %v13634_v58 = vpop.f32.mrb[229].mxu0 }
 0xc3b   :  { %v9464_v36 = vpop.f32.mrb[230].mxu0 }
 0xc3c   :  { %v13637_v22 = vpop.f32.mrb[231].mxu0 }
 0xc3f   :  { %v9543_v56 = vpop.f32.mrb[232].mxu0 }
 0xc40   :  { %v9544_v14 = vadd.f32 %v9543_v56, %v9454_v21  ;;  %v13648_v48 = vpop.f32.mrb[233].mxu0  ;;  %v9644_v56 = vmul.f32 0.03125, %v9600_v12 }
 0xc42   :  { %v9565_v2 = vadd.f32 %v10756_v41, %v9544_v14  ;;  %v9645_v14 = vmul.f32 0.03125, %v9603_v43 }
 0xc43   :  { %v9548_v18 = vpop.f32.mrb[234].mxu0 }
 0xc44   :  { %v10757_v51 = vmul.f32 -1.442695, %v9565_v2  ;;  %v9549_v9 = vadd.f32 %v9548_v18, %v9459_v13  ;;  %v13651_v63 = vpop.f32.mrb[235].mxu0  ;;  %v9612_v13 = vpop.xlane.xlu1 %9611 }
 0xc45   :  { %v19663_v63 = vsub.f32 %v19460_v30, %v9644_v56  ;;  %v9648_v30 = vmul.f32 0.03125, %v9612_v13 }
 0xc46   :  { %15266 = vpow2.f32 %v10757_v51  ;;  %v9566_v20 = vadd.f32 %v10756_v41, %v9549_v9 }
 0xc47   :  { %v9553_v35 = vpop.f32.mrb[236].mxu0  ;;  %v9676_v43 = vmul.f32 %v19663_v63, %v19663_v63 }
 0xc48   :  { %v10758_v32 = vmul.f32 -1.442695, %v9566_v20  ;;  %v9554_v17 = vadd.f32 %v9553_v35, %v9464_v36  ;;  %v13654_v47 = vpop.f32.mrb[237].mxu0  ;;  %v9615_v36 = vpop.xlane.xlu0 %9614  ;;  %v9646_v35 = vmul.f32 0.03125, %v9606_v62 }
 0xc49   :  { %v9618_v51 = vpop.xlane.xlu1 %9617 }
 0xc4a   :  { %15268 = vpow2.f32 %v10758_v32  ;;  %v9567_v7 = vadd.f32 %v10756_v41, %v9554_v17  ;;  %v19656_v41 = vsub.f32 %v19462_v23, %v9643_v6  ;;  %v19668_v23 = vsub.f32 %v19470_v52, %v9645_v14 }
 0xc4b   :  { %v9647_v17 = vmul.f32 0.03125, %v9609_v53  ;;  %v9694_v53 = vsel %vm83_vm0, %v9676_v43, 0.0 }
 0xc4c   :  { %v10759_v61 = vmul.f32 -1.442695, %v9567_v7  ;;  %v9621_v32 = vpop.xlane.xlu0 %9620 }
 0xc4d   :  { %v9624_v12 = vpop.xlane.xlu1 %9623  ;;  %v19681_v52 = vsub.f32 %v19478_v4, %v9647_v17 }
 0xc4e   :  { %15270 = vpow2.f32 %v10759_v61 }
 0xc4f   :  { %v9679_v13 = vmul.f32 %v19681_v52, %v19681_v52 }
 0xc50   :  { %v15267_v5 = vpop.eup %15266  ;;  %v9627_v62 = vpop.xlane.xlu0 %9626 }
 0xc51   :  { %v9577_v42 = vadd.f32 1.0, %v15267_v5 }
 0xc53   :  { %15272 = vrcp.f32 %v9577_v42  ;;  %v9649_v42 = vmul.f32 0.03125, %v9615_v36  ;;  %v9652_v36 = vmul.f32 0.03125, %v9624_v12 }
 0xc54   :  { %v15269_v57 = vpop.eup %15268  ;;  %v9633_v56 = vpop.xlane.xlu0 %9632 }
 0xc55   :  { %v9578_v34 = vadd.f32 1.0, %v15269_v57 }
 0xc57   :  { %15274 = vrcp.f32 %v9578_v34  ;;  %v9650_v34 = vmul.f32 0.03125, %v9618_v51  ;;  %v9703_v51 = vsel %vm83_vm0, %v9679_v13, 0.0 }
 0xc58   :  { %v15271_v54 = vpop.eup %15270 }
 0xc59   :  { %v9579_v21 = vadd.f32 1.0, %v15271_v54  ;;  %v19694_v54 = vsub.f32 %v19486_v8, %v9649_v42 }
 0xc5b   :  { %15276 = vrcp.f32 %v9579_v21  ;;  %v9651_v21 = vmul.f32 0.03125, %v9621_v32 }
 0xc5d   :  { %v15273_v58 = vpop.eup %15272 }
 0xc5e   :  { %v19653_v22 = vmul.f32 %v15273_v58, %v9565_v2  ;;  %v9675_v2 = vmul.f32 %v19656_v41, %v19656_v41  ;;  %v9630_v58 = vpop.xlane.xlu1 %9629 }
 0xc5f   :  { %v9654_v32 = vmul.f32 0.03125, %v9630_v58 }
 0xc60   :  { %v9915_v48 = vsel %vm83_vm0, %v19653_v22, 0.0  ;;  %v9691_v5 = vsel %vm83_vm0, %v9675_v2, 0.0 }
 0xc61   :  { %v15275_v18 = vpop.eup %15274  ;;  %9916 = vadd.xlane.f32.xlu0 %v9915_v48  ;;  %v19706_v48 = vsub.f32 %v19494_v60, %v9651_v21 }
 0xc62   :  { %v19660_v9 = vmul.f32 %v15275_v18, %v9566_v20  ;;  %v19675_v20 = vsub.f32 %v19468_v39, %v9646_v35  ;;  %v19688_v39 = vsub.f32 %v19476_v27, %v9648_v30  ;;  %v19700_v27 = vsub.f32 %v19484_v19, %v9650_v34  ;;  %v9636_v2 = vpop.xlane.xlu1 %9635 }
 0xc63   :  { %v9653_v18 = vmul.f32 0.03125, %v9627_v62  ;;  %v9681_v35 = vmul.f32 %v19694_v54, %v19694_v54  ;;  %v19712_v19 = vsub.f32 %v19492_v44, %v9652_v36  ;;  %v9683_v12 = vmul.f32 %v19706_v48, %v19706_v48 }
 0xc64   :  { %v9918_v47 = vsel %vm83_vm0, %v19660_v9, 0.0  ;;  %v9678_v4 = vmul.f32 %v19675_v20, %v19675_v20  ;;  %v9680_v8 = vmul.f32 %v19688_v39, %v19688_v39  ;;  %v19724_v44 = vsub.f32 %v19504_v40, %v9654_v32 }
 0xc65   :  { %v15277_v0 = vpop.eup %15276  ;;  %9919 = vadd.xlane.f32.xlu1 %v9918_v47  ;;  %v9682_v47 = vmul.f32 %v19700_v27, %v19700_v27  ;;  %v19718_v60 = vsub.f32 %v19508_v15, %v9653_v18  ;;  %v9709_v30 = vsel %vm83_vm0, %v9681_v35, 0.0  ;;  %v9656_v43 = vmul.f32 0.03125, %v9636_v2 }
 0xc66   :  { %v19672_v61 = vmul.f32 %v15277_v0, %v9567_v7  ;;  %v9677_v7 = vmul.f32 %v19668_v23, %v19668_v23  ;;  %v9700_v14 = vsel %vm83_vm0, %v9678_v4, 0.0  ;;  %v9706_v17 = vsel %vm83_vm0, %v9680_v8, 0.0 }
 0xc67   :  { %v9655_v0 = vmul.f32 0.03125, %v9633_v56  ;;  %v9712_v42 = vsel %vm83_vm0, %v9682_v47, 0.0  ;;  %v9715_v62 = vsel %vm83_vm0, %v9683_v12, 0.0  ;;  %v9685_v34 = vmul.f32 %v19718_v60, %v19718_v60 }
 0xc68   :  { %v9921_v57 = vsel %vm83_vm0, %v19672_v61, 0.0  ;;  %v9697_v6 = vsel %vm83_vm0, %v9677_v7, 0.0  ;;  %v19736_v40 = vsub.f32 %v19524_v26, %v9656_v43  ;;  %v9686_v21 = vmul.f32 %v19724_v44, %v19724_v44 }
 0xc69   :  { %9692 = vadd.xlane.f32.xlu1 %v9691_v5  ;;  %9922 = vadd.xlane.f32.xlu0 %v9921_v57  ;;  %v9639_v5 = vpop.xlane.xlu0 %9638  ;;  %v9684_v57 = vmul.f32 %v19712_v19, %v19712_v19  ;;  %v19730_v15 = vsub.f32 %v19528_v59, %v9655_v0  ;;  %v9721_v13 = vsel %vm83_vm0, %v9685_v34, 0.0 }
 0xc6a   :  { %v9657_v7 = vmul.f32 0.03125, %v9639_v5  ;;  %v9724_v36 = vsel %vm83_vm0, %v9686_v21, 0.0 }
 0xc6b   :  { %v9718_v4 = vsel %vm83_vm0, %v9684_v57, 0.0  ;;  %v9687_v58 = vmul.f32 %v19730_v15, %v19730_v15 }
 0xc6c   :  { %v19742_v59 = vsub.f32 %v19536_v11, %v9657_v7  ;;  %v9688_v11 = vmul.f32 %v19736_v40, %v19736_v40 }
 0xc6d   :  { %9698 = vadd.xlane.f32.xlu1 %v9697_v6  ;;  %9695 = vadd.xlane.f32.xlu0 %v9694_v53  ;;  %v9642_v53 = vpop.xlane.xlu1 %9641  ;;  %v9727_v56 = vsel %vm83_vm0, %v9687_v58, 0.0 }
 0xc6e   :  { %v9658_v6 = vmul.f32 0.03125, %v9642_v53  ;;  %v9730_v18 = vsel %vm83_vm0, %v9688_v11, 0.0 }
 0xc70   :  { %v19749_v26 = vsub.f32 %v19534_v31, %v9658_v6 }
 0xc71   :  { %9704 = vadd.xlane.f32.xlu1 %v9703_v51  ;;  %9701 = vadd.xlane.f32.xlu0 %v9700_v14  ;;  %v9689_v14 = vmul.f32 %v19742_v59, %v19742_v59 }
 0xc72   :  { %v9690_v51 = vmul.f32 %v19749_v26, %v19749_v26 }
 0xc73   :  { %v9733_v8 = vsel %vm83_vm0, %v9689_v14, 0.0 }
 0xc74   :  { %v9736_v31 = vsel %vm83_vm0, %v9690_v51, 0.0 }
 0xc75   :  { %9710 = vadd.xlane.f32.xlu1 %v9709_v30  ;;  %9707 = vadd.xlane.f32.xlu0 %v9706_v17 }
 0xc79   :  { %9716 = vadd.xlane.f32.xlu1 %v9715_v62  ;;  %9713 = vadd.xlane.f32.xlu0 %v9712_v42 }
 0xc7d   :  { %9722 = vadd.xlane.f32.xlu1 %v9721_v13  ;;  %9719 = vadd.xlane.f32.xlu0 %v9718_v4 }
 0xc81   :  { %9728 = vadd.xlane.f32.xlu1 %v9727_v56  ;;  %9725 = vadd.xlane.f32.xlu0 %v9724_v36 }
 0xc85   :  { %9734 = vadd.xlane.f32.xlu1 %v9733_v8  ;;  %9731 = vadd.xlane.f32.xlu0 %v9730_v18 }
 0xc89   :  { %9737 = vadd.xlane.f32.xlu0 %v9736_v31 }
 0xcee   :  { %v9917_v35 = vpop.xlane.xlu0 %9916 }
 0xcef   :  { %v9924_v32 = vmul.f32 0.03125, %v9917_v35 }
 0xcf1   :  { %v19762_v2 = vsub.f32 %v19653_v22, %v9924_v32 }
 0xcf2   :  { %v9920_v17 = vpop.xlane.xlu1 %9919 }
 0xcf3   :  { %v9925_v47 = vmul.f32 0.03125, %v9920_v17  ;;  %v9930_v0 = vmul.f32 %v19762_v2, %v19762_v2 }
 0xcf5   :  { %v19767_v30 = vsub.f32 %v19660_v9, %v9925_v47  ;;  %v9933_v12 = vsel %vm83_vm0, %v9930_v0, 0.0  ;;  %v19782_v47 = vld [vmem:[%s20024_s14 + $0x3] ss:$0 sm:$0xff] }
 0xcf6   :  { %9934 = vadd.xlane.f32.xlu1 %v9933_v12  ;;  %v9693_v5 = vpop.xlane.xlu1 %9692  ;;  %v9923_v43 = vpop.xlane.xlu0 %9922 }
 0xcf7   :  { %v9739_v42 = vmul.f32 0.03125, %v9693_v5  ;;  %v9926_v57 = vmul.f32 0.03125, %v9923_v43  ;;  %v9931_v7 = vmul.f32 %v19767_v30, %v19767_v30 }
 0xcf9   :  { %v9755_v22 = vadd.f32 1e-05, %v9739_v42  ;;  %v19773_v62 = vsub.f32 %v19672_v61, %v9926_v57  ;;  %v9936_v34 = vsel %vm83_vm0, %v9931_v7, 0.0  ;;  %v19788_v57 = vld [vmem:[%s20025_s15 + $0x3] ss:$0 sm:$0xff] }
 0xcfa   :  { %v9699_v53 = vpop.xlane.xlu1 %9698  ;;  %9937 = vadd.xlane.f32.xlu0 %v9936_v34  ;;  %v9696_v9 = vpop.xlane.xlu0 %9695 }
 0xcfb   :  { %15278 = vrsqrt.f32 %v9755_v22  ;;  %v9741_v4 = vmul.f32 0.03125, %v9699_v53  ;;  %v9740_v21 = vmul.f32 0.03125, %v9696_v9  ;;  %v9932_v6 = vmul.f32 %v19773_v62, %v19773_v62 }
 0xcfd   :  { %v9757_v13 = vadd.f32 1e-05, %v9741_v4  ;;  %v9756_v58 = vadd.f32 1e-05, %v9740_v21  ;;  %v9939_v36 = vsel %vm83_vm0, %v9932_v6, 0.0 }
 0xcfe   :  { %v9705_v56 = vpop.xlane.xlu1 %9704  ;;  %9940 = vadd.xlane.f32.xlu1 %v9939_v36  ;;  %v9702_v14 = vpop.xlane.xlu0 %9701  ;;  %v9863_v36 = vld [vmem:[%s20075_s27] sm:$0xff] }
 0xcff   :  { %15280 = vrsqrt.f32 %v9757_v13  ;;  %v9743_v61 = vmul.f32 0.03125, %v9705_v56  ;;  %v9742_v11 = vmul.f32 0.03125, %v9702_v14 }
 0xd00   :  { %15282 = vrsqrt.f32 %v9756_v58 }
 0xd01   :  { %v9759_v8 = vadd.f32 1e-05, %v9743_v61  ;;  %v9758_v18 = vadd.f32 1e-05, %v9742_v11 }
 0xd02   :  { %v9711_v51 = vpop.xlane.xlu1 %9710  ;;  %v9708_v31 = vpop.xlane.xlu0 %9707 }
 0xd03   :  { %15284 = vrsqrt.f32 %v9759_v8  ;;  %v9745_v35 = vmul.f32 0.03125, %v9711_v51  ;;  %v9744_v32 = vmul.f32 0.03125, %v9708_v31 }
 0xd04   :  { %15286 = vrsqrt.f32 %v9758_v18 }
 0xd05   :  { %v15279_v17 = vpop.eup %15278  ;;  %v9761_v0 = vadd.f32 1e-05, %v9745_v35  ;;  %v9760_v12 = vadd.f32 1e-05, %v9744_v32 }
 0xd06   :  { %v9787_v5 = vmul.f32 %v15279_v17, %v19656_v41  ;;  %v9717_v43 = vpop.xlane.xlu1 %9716  ;;  %v9714_v42 = vpop.xlane.xlu0 %9713 }
 0xd07   :  { %15288 = vrsqrt.f32 %v9761_v0  ;;  %v9747_v7 = vmul.f32 0.03125, %v9717_v43  ;;  %v9746_v22 = vmul.f32 0.03125, %v9714_v42 }
 0xd08   :  { %v9809_v34 = vmul.f32 %v19782_v47, %v9787_v5  ;;  %15290 = vrsqrt.f32 %v9760_v12 }
 0xd09   :  { %v15281_v53 = vpop.eup %15280  ;;  %v9763_v9 = vadd.f32 1e-05, %v9747_v7  ;;  %v9762_v4 = vadd.f32 1e-05, %v9746_v22 }
 0xd0a   :  { %v15283_v21 = vpop.eup %15282  ;;  %v9831_v6 = vadd.f32 %v19788_v57, %v9809_v34  ;;  %v9789_v41 = vmul.f32 %v15281_v53, %v19668_v23  ;;  %v9723_v13 = vpop.xlane.xlu1 %9722 }
 0xd0b   :  { %v9720_v58 = vpop.xlane.xlu0 %9719  ;;  %v9788_v56 = vmul.f32 %v15283_v21, %v19663_v63  ;;  %15292 = vrsqrt.f32 %v9763_v9  ;;  %v9749_v14 = vmul.f32 0.03125, %v9723_v13 }
 0xd0c   :  { %v9748_v61 = vmul.f32 0.03125, %v9720_v58  ;;  %v9847_v11 = vadd.f32 %v9831_v6, %v19349_v33  ;;  %v9811_v8 = vmul.f32 %v19782_v47, %v9789_v41  ;;  %15294 = vrsqrt.f32 %v9762_v4  ;;  %v9865_v33 = vld [vmem:[%s20075_s27 + $0x10] sm:$0xff] }
 0xd0d   :  { %v15285_v18 = vpop.eup %15284  ;;  %v9810_v51 = vmul.f32 %v19782_v47, %v9788_v56  ;;  %v9765_v23 = vadd.f32 1e-05, %v9749_v14  ;;  %v9867_v14 = vld [vmem:[%s20075_s27 + $0x20] sm:$0xff] }
 0xd0e   :  { %v9764_v31 = vadd.f32 1e-05, %v9748_v61  ;;  %v15287_v35 = vpop.eup %15286  ;;  %v9879_v32 = vadd.f32 %v9863_v36, %v9847_v11  ;;  %v9833_v17 = vadd.f32 %v19788_v57, %v9811_v8  ;;  %v9791_v0 = vmul.f32 %v15285_v18, %v19681_v52  ;;  %v9729_v63 = vpop.xlane.xlu1 %9728  ;;  %v9864_v52 = vld [vmem:[%s20075_s27 + $0x8] sm:$0xff]  ;;  %v9866_v11 = vld [vmem:[%s20075_s27 + $0x18] sm:$0xff] }
 0xd0f   :  { %v9726_v12 = vpop.xlane.xlu0 %9725  ;;  %v9832_v5 = vadd.f32 %v19788_v57, %v9810_v51  ;;  %v9790_v43 = vmul.f32 %v15287_v35, %v19675_v20  ;;  %15296 = vrsqrt.f32 %v9765_v23  ;;  %v9751_v42 = vmul.f32 0.03125, %v9729_v63 }
 0xd10   :  { %9895 = vst.msk [vmem:[%s20034_s24] sm:$0xff] %vm83_vm0, %v9879_v32  ;;  %v9849_v7 = vadd.f32 %v9833_v17, %v19355_v3  ;;  %v9813_v22 = vmul.f32 %v19782_v47, %v9791_v0  ;;  %15298 = vrsqrt.f32 %v9764_v31  ;;  %v9750_v34 = vmul.f32 0.03125, %v9726_v12 }
 0xd11   :  { %v15289_v53 = vpop.eup %15288  ;;  %v9848_v20 = vadd.f32 %v9832_v5, %v19347_v46  ;;  %v9812_v9 = vmul.f32 %v19782_v47, %v9790_v43  ;;  %v9767_v4 = vadd.f32 1e-05, %v9751_v42 }
 0xd12   :  { %v15291_v21 = vpop.eup %15290  ;;  %v9881_v6 = vadd.f32 %v9865_v33, %v9849_v7  ;;  %v9835_v41 = vadd.f32 %v19788_v57, %v9813_v22  ;;  %v9793_v3 = vmul.f32 %v15289_v53, %v19694_v54  ;;  %v9766_v13 = vadd.f32 1e-05, %v9750_v34  ;;  %v9735_v58 = vpop.xlane.xlu1 %9734  ;;  %v9869_v33 = vld [vmem:[%s20075_s27 + $0x30] sm:$0xff] }
 0xd13   :  { %v9732_v36 = vpop.xlane.xlu0 %9731  ;;  %v9880_v56 = vadd.f32 %v9864_v52, %v9848_v20  ;;  %v9834_v61 = vadd.f32 %v19788_v57, %v9812_v9  ;;  %v9792_v46 = vmul.f32 %v15291_v21, %v19688_v39  ;;  %15300 = vrsqrt.f32 %v9767_v4 }
 0xd14   :  { %9897 = vst.msk [vmem:[%s20034_s24 + $0x10] sm:$0xff] %vm83_vm0, %v9881_v6  ;;  %v9851_v54 = vadd.f32 %v9835_v41, %v19362_v45  ;;  %v9815_v8 = vmul.f32 %v19782_v47, %v9793_v3  ;;  %15302 = vrsqrt.f32 %v9766_v13  ;;  %v9753_v18 = vmul.f32 0.03125, %v9735_v58  ;;  %v9871_v6 = vld [vmem:[%s20075_s27 + $0x40] sm:$0xff] }
 0xd15   :  { %v15293_v51 = vpop.eup %15292  ;;  %9896 = vst.msk [vmem:[%s20034_s24 + $0x8] sm:$0xff] %vm83_vm0, %v9880_v56  ;;  %v9850_v39 = vadd.f32 %v9834_v61, %v19353_v37  ;;  %v9814_v23 = vmul.f32 %v19782_v47, %v9792_v46  ;;  %v9752_v31 = vmul.f32 0.03125, %v9732_v36 }
 0xd16   :  { %v15295_v45 = vpop.eup %15294  ;;  %v9883_v35 = vadd.f32 %v9867_v14, %v9851_v54  ;;  %v9837_v32 = vadd.f32 %v19788_v57, %v9815_v8  ;;  %v9795_v17 = vmul.f32 %v15293_v51, %v19706_v48  ;;  %v9769_v0 = vadd.f32 1e-05, %v9753_v18  ;;  %v9868_v48 = vld [vmem:[%s20075_s27 + $0x28] sm:$0xff]  ;;  %v9873_v54 = vld [vmem:[%s20075_s27 + $0x50] sm:$0xff] }
 0xd17   :  { %v9738_v63 = vpop.xlane.xlu0 %9737  ;;  %v9882_v12 = vadd.f32 %v9866_v11, %v9850_v39  ;;  %v9836_v5 = vadd.f32 %v19788_v57, %v9814_v23  ;;  %v9794_v37 = vmul.f32 %v15295_v45, %v19700_v27  ;;  %v9768_v43 = vadd.f32 1e-05, %v9752_v31  ;;  %v9872_v11 = vld [vmem:[%s20075_s27 + $0x48] sm:$0xff] }
 0xd18   :  { %9899 = vst.msk [vmem:[%s20034_s24 + $0x20] sm:$0xff] %vm83_vm0, %v9883_v35  ;;  %v9853_v42 = vadd.f32 %v9837_v32, %v19369_v1  ;;  %v9817_v7 = vmul.f32 %v19782_v47, %v9795_v17  ;;  %15304 = vrsqrt.f32 %v9769_v0  ;;  %v9754_v52 = vmul.f32 0.03125, %v9738_v63 }
 0xd19   :  { %v15297_v22 = vpop.eup %15296  ;;  %9898 = vst.msk [vmem:[%s20034_s24 + $0x18] sm:$0xff] %vm83_vm0, %v9882_v12  ;;  %v9852_v27 = vadd.f32 %v9836_v5, %v19360_v29  ;;  %v9816_v34 = vmul.f32 %v19782_v47, %v9794_v37  ;;  %15306 = vrsqrt.f32 %v9768_v43 }
 0xd1a   :  { %v15299_v1 = vpop.eup %15298  ;;  %v9885_v53 = vadd.f32 %v9869_v33, %v9853_v42  ;;  %v9839_v20 = vadd.f32 %v19788_v57, %v9817_v7  ;;  %v9797_v9 = vmul.f32 %v15297_v22, %v19718_v60  ;;  %v9770_v4 = vadd.f32 1e-05, %v9754_v52  ;;  %v9870_v60 = vld [vmem:[%s20075_s27 + $0x38] sm:$0xff] }
 0xd1b   :  { %v9884_v21 = vadd.f32 %v9868_v48, %v9852_v27  ;;  %v9838_v41 = vadd.f32 %v19788_v57, %v9816_v34  ;;  %v9796_v3 = vmul.f32 %v15299_v1, %v19712_v19 }
 0xd1c   :  { %9901 = vst.msk [vmem:[%s20034_s24 + $0x30] sm:$0xff] %vm83_vm0, %v9885_v53  ;;  %v9855_v29 = vadd.f32 %v9839_v20, %v19376_v49  ;;  %v9819_v13 = vmul.f32 %v19782_v47, %v9797_v9  ;;  %15308 = vrsqrt.f32 %v9770_v4 }
 0xd1d   :  { %v15301_v58 = vpop.eup %15300  ;;  %9900 = vst.msk [vmem:[%s20034_s24 + $0x28] sm:$0xff] %vm83_vm0, %v9884_v21  ;;  %v9854_v19 = vadd.f32 %v9838_v41, %v19367_v24  ;;  %v9818_v36 = vmul.f32 %v19782_v47, %v9796_v3 }
 0xd1e   :  { %v15303_v56 = vpop.eup %15302  ;;  %v9887_v14 = vadd.f32 %v9871_v6, %v9855_v29  ;;  %v9841_v49 = vadd.f32 %v19788_v57, %v9819_v13  ;;  %v9799_v61 = vmul.f32 %v15301_v58, %v19730_v15 }
 0xd1f   :  { %v9886_v46 = vadd.f32 %v9870_v60, %v9854_v19  ;;  %v9840_v24 = vadd.f32 %v19788_v57, %v9818_v36  ;;  %v9798_v8 = vmul.f32 %v15303_v56, %v19724_v44 }
 0xd20   :  { %9903 = vst.msk [vmem:[%s20034_s24 + $0x40] sm:$0xff] %vm83_vm0, %v9887_v14  ;;  %v9857_v15 = vadd.f32 %v9841_v49, %v19383_v25  ;;  %v9821_v18 = vmul.f32 %v19782_v47, %v9799_v61 }
 0xd21   :  { %15327 = shalt.err (!%p15324_p4)
}
 0xd22   :  { %s15328_s30 = scalar_lea.hbm %s20033_s23, 256 }
 0xd23   :  { %p15329_p5 = scmp.ne.s32.totalorder %s20033_s23, %s15328_s30  ;;  %p15332_p6 = scmp.lt.u32.totalorder %s15328_s30, %s20033_s23 }
 0xd25   :  { %p15334_p7 = pnand %p15332_p6, %p15329_p5 }
 0xd27   :  { %15337 = shalt.err (!%p15334_p7)
}
 0xd28   :  { %s15368_s3 = smov 128   ;;  %s15369_s19 = smov 8   ;;  %9902 = vst.msk [vmem:[%s20034_s24 + $0x38] sm:$0xff] %vm83_vm0, %v9886_v46  ;;  %v9856_v25 = vadd.f32 %v9840_v24, %v19374_v16  ;;  %v9820_v44 = vmul.f32 %v19782_v47, %v9798_v8  ;;  %v15305_v51 = vpop.eup %15304  ;;  %v9889_v39 = vadd.f32 %v9873_v54, %v9857_v15  ;;  %v9843_v23 = vadd.f32 %v19788_v57, %v9821_v18  ;;  %v9875_v35 = vld [vmem:[%s20075_s27 + $0x60] sm:$0xff]  ;;  %v9874_v0 = vld [vmem:[%s20075_s27 + $0x58] sm:$0xff]  ;;  %v20115_v14 = vld [vmem:[#allocation8_spill] sm:$0xff] }
 0xd29   :  { %9989 = dma.vmem_to_hbm [thread:$0]  %s9984_s28, 256, %s20033_s23, [#allocation3], %s15368_s3, %s15368_s3, %s15369_s19   ;;  %v15307_v31 = vpop.eup %15306  ;;  %v9801_v17 = vmul.f32 %v15305_v51, %v19742_v59  ;;  %v20117_v15 = vld [vmem:[#allocation10_spill] sm:$0xff] }
 0xd2a   :  { %v9888_v45 = vadd.f32 %v9872_v11, %v9856_v25  ;;  %v9842_v32 = vadd.f32 %v19788_v57, %v9820_v44  ;;  %9905 = vst.msk [vmem:[%s20034_s24 + $0x50] sm:$0xff] %vm83_vm0, %v9889_v39  ;;  %v9859_v16 = vadd.f32 %v9843_v23, %v19390_v50  ;;  %v9800_v63 = vmul.f32 %v15307_v31, %v19736_v40  ;;  %v15309_v33 = vpop.eup %15308  ;;  %v9878_v1 = vld [vmem:[%s20075_s27 + $0x78] sm:$0xff]  ;;  %v10766_v3 = vld [vmem:[%s20024_s14 + $0x4] ss:$0 sm:$0xff]  ;;  %s15370_s14 = smov [#allocation4]  }
 0xd2b   :  { %v9823_v12 = vmul.f32 %v19782_v47, %v9801_v17  ;;  %v9802_v42 = vmul.f32 %v15309_v33, %v19749_v26  ;;  %v9876_v26 = vld [vmem:[%s20075_s27 + $0x68] sm:$0xff]  ;;  %v10767_v60 = vld [vmem:[%s20025_s15 + $0x4] ss:$0 sm:$0xff]  ;;  %s9997_s23 = sshll.u32 %s15370_s14, 4  ;;  %s9998_s23 = int_to_ptr.vmem [resolvable:$true] %s9997_s23 }
 0xd2c   :  { %9904 = vst.msk [vmem:[%s20034_s24 + $0x48] sm:$0xff] %vm83_vm0, %v9888_v45  ;;  %v9858_v59 = vadd.f32 %v9842_v32, %v19381_v38  ;;  %v9891_v5 = vadd.f32 %v9875_v35, %v9859_v16  ;;  %v9822_v37 = vmul.f32 %v19782_v47, %v9800_v63  ;;  %v9877_v38 = vld [vmem:[%s20075_s27 + $0x70] sm:$0xff]  ;;  %s15338_s15 = scalar_lea.vmem %s9998_s23, 384  ;;  %p15343_p9 = scmp.lt.s32.totalorder %s9998_s23, %s9998_s23 }
 0xd2d   :  { %v9845_v43 = vadd.f32 %v19788_v57, %v9823_v12  ;;  %v9824_v7 = vmul.f32 %v19782_v47, %v9802_v42  ;;  %p15339_p8 = scmp.ne.s32.totalorder %s9998_s23, %s15338_s15  ;;  %p15344_p10 = scmp.lt.s32.totalorder %s15338_s15, %s15338_s15 }
 0xd2e   :  { %v9890_v50 = vadd.f32 %v9874_v0, %v9858_v59  ;;  %9907 = vst.msk [vmem:[%s20034_s24 + $0x60] sm:$0xff] %vm83_vm0, %v9891_v5  ;;  %v9844_v40 = vadd.f32 %v19788_v57, %v9822_v37 }
 0xd2f   :  { %v9861_v48 = vadd.f32 %v9845_v43, %v19397_v55  ;;  %v9846_v27 = vadd.f32 %v19788_v57, %v9824_v7  ;;  %p15345_p11 = por %p15344_p10, %p15343_p9 }
 0xd30   :  { %9906 = vst.msk [vmem:[%s20034_s24 + $0x58] sm:$0xff] %vm83_vm0, %v9890_v50  ;;  %v9860_v52 = vadd.f32 %v9844_v40, %v19388_v28 }
 0xd31   :  { %v9893_v22 = vadd.f32 %v9877_v38, %v9861_v48  ;;  %v9862_v55 = vadd.f32 %v9846_v27, %v19395_v10  ;;  %p15346_p12 = pnand %p15345_p11, %p15339_p8 }
 0xd32   :  { %v9892_v34 = vadd.f32 %v9876_v26, %v9860_v52 }
 0xd33   :  { %9909 = vst.msk [vmem:[%s20034_s24 + $0x70] sm:$0xff] %vm83_vm0, %v9893_v22  ;;  %v9894_v28 = vadd.f32 %v9878_v1, %v9862_v55 }
 0xd34   :  { %9908 = vst.msk [vmem:[%s20034_s24 + $0x68] sm:$0xff] %vm83_vm0, %v9892_v34 }
 0xd35   :  { %9910 = vst.msk [vmem:[%s20034_s24 + $0x78] sm:$0xff] %vm83_vm0, %v9894_v28 }
 0xd83   :  { %v9935_v47 = vpop.xlane.xlu1 %9934 }
 0xd84   :  { %v9942_v57 = vmul.f32 0.03125, %v9935_v47 }
 0xd86   :  { %v9945_v53 = vadd.f32 1e-05, %v9942_v57 }
 0xd87   :  { %v9938_v20 = vpop.xlane.xlu0 %9937 }
 0xd88   :  { %15310 = vrsqrt.f32 %v9945_v53  ;;  %v9943_v9 = vmul.f32 0.03125, %v9938_v20 }
 0xd8a   :  { %v9946_v4 = vadd.f32 1e-05, %v9943_v9 }
 0xd8b   :  { %v9941_v21 = vpop.xlane.xlu1 %9940 }
 0xd8c   :  { %15312 = vrsqrt.f32 %v9946_v4  ;;  %v9944_v10 = vmul.f32 0.03125, %v9941_v21 }
 0xd8e   :  { %v9947_v6 = vadd.f32 1e-05, %v9944_v10 }
 0xd90   :  { %15314 = vrsqrt.f32 %v9947_v6 }
 0xd92   :  { %v15311_v41 = vpop.eup %15310 }
 0xd93   :  { %v9951_v29 = vmul.f32 %v15311_v41, %v19762_v2  ;;  %v20116_v2 = vld [vmem:[#allocation9_spill] sm:$0xff] }
 0xd95   :  { %v9960_v13 = vmul.f32 %v10766_v3, %v9951_v29 }
 0xd96   :  { %v15313_v58 = vpop.eup %15312 }
 0xd97   :  { %v9952_v19 = vmul.f32 %v15313_v58, %v19767_v30  ;;  %v9969_v36 = vadd.f32 %v10767_v60, %v9960_v13 }
 0xd99   :  { %v9961_v56 = vmul.f32 %v10766_v3, %v9952_v19  ;;  %v9972_v49 = vadd.f32 %v9969_v36, %v20115_v14 }
 0xd9a   :  { %v15315_v61 = vpop.eup %15314 }
 0xd9b   :  { %v9953_v46 = vmul.f32 %v15315_v61, %v19773_v62  ;;  %v9970_v54 = vadd.f32 %v10767_v60, %v9961_v56  ;;  %9975 = vst.msk [vmem:[#allocation4] sm:$0xff] %vm83_vm0, %v9972_v49 }
 0xd9d   :  { %v9962_v11 = vmul.f32 %v10766_v3, %v9953_v46  ;;  %v9973_v24 = vadd.f32 %v9970_v54, %v20116_v2 }
 0xd9f   :  { %v9971_v8 = vadd.f32 %v10767_v60, %v9962_v11  ;;  %9976 = vst.msk [vmem:[#allocation4 + $0x8] sm:$0xff] %vm83_vm0, %v9973_v24 }
 0xda1   :  { %v9974_v30 = vadd.f32 %v9971_v8, %v20117_v15 }
 0xda3   :  { %9977 = vst.msk [vmem:[#allocation4 + $0x10] sm:$0xff] %vm83_vm0, %v9974_v30 }
 0xda4   :  { %15349 = shalt.err (!%p15346_p12)
}
 0xda5   :  { %s15350_s28 = scalar_lea.hbm %s20035_s25, 384 }
 0xda6   :  { %p15351_p13 = scmp.ne.s32.totalorder %s20035_s25, %s15350_s28  ;;  %p15354_p0 = scmp.lt.u32.totalorder %s15350_s28, %s20035_s25 }
 0xda8   :  { %p15356_p1 = pnand %p15354_p0, %p15351_p13 }
 0xdaa   :  { %15359 = shalt.err (!%p15356_p1)
}
 0xdab   :  { %10003 = dma.vmem_to_hbm [thread:$0]  %s9998_s23, 384, %s20035_s25, [#allocation5], %s15368_s3, %s15368_s3, %s15369_s19  }
 0xdac   :  { %15360 = dma.done.wait [#allocation3], 256  }
 0xdad   :  { %15361 = vsyncadd [#allocation3], 4294967040 }
 0xdae   :  { %15362 = dma.done.wait [#allocation5], 384  }
 0xdaf   :  { %15363 = vsyncadd [#allocation5], 4294966912 }
 0xdb0   :  { %10012 = vsyncpa [#allocation3], 1 }
 0xdb1   :  { %10013 = vsyncpa [#allocation5], 1 }

</bundles_post_ra>
